<compile_context>
chip_gen: v7x
topology: tpu7x:2x2x1
jax: 0.10.0
libtpu: 0.0.40
codegen_flags: <defaults>
</compile_context>

<pallas_src>
import numpy as np
import jax
import jax.numpy as jnp
from jax.experimental import pallas as pl
from jax.experimental.pallas import tpu as pltpu


# ----------------------------------------------------------------------------
# In-kernel building blocks
# ----------------------------------------------------------------------------
def _conv_block(x, w_ref, b_ref, *, pool):
    """Batched conv(+bias+ReLU)(+2x2 max-pool) on a lane-dense slab.

    x      : [nb, H, K]            f32 activations (K = W_in*C_in, lane-padded)
    w_ref  : [kh, npar, K, ncols]  bf16 block-Toeplitz weights; npar==2 when the
                                   width half of the pool is folded into the
                                   weight layout (even/odd output columns)
    b_ref  : [1, ncols]            f32 bias tiled over output columns
    returns: [nb, H_out, ncols]    f32 (H_out = (H-kh+1)//2 if pool else H-kh+1)
    """
    nb, h, k = x.shape
    kh, npar, _, ncols = w_ref.shape
    ho = h - kh + 1

    # Row-banded shift-and-accumulate with the batch folded into the matmul M:
    # one MXU issue per (band, parity) over all nb images at once.
    accs = [None] * npar
    for i in range(kh):
        xs = x[:, i:i + ho, :].reshape(nb * ho, k).astype(jnp.bfloat16)
        for p in range(npar):
            t = jnp.dot(xs, w_ref[i, p], preferred_element_type=jnp.float32)
            accs[p] = t if accs[p] is None else accs[p] + t

    # Width-direction pool = parity max (no-op when npar == 1).
    y = accs[0]
    for a in accs[1:]:
        y = jnp.maximum(y, a)

    # Bias + ReLU in f32 (max/ReLU commute with the per-column bias).
    y = jnp.maximum(y + b_ref[...], 0.0)                  # [nb*ho, ncols]

    if pool:
        # Height-direction pool: pair-of-rows max. ho is even, so pooling pairs
        # never straddle an image boundary in the nb*ho flattening.
        y = y.reshape(nb * ho // 2, 2, ncols)
        y = jnp.maximum(y[:, 0, :], y[:, 1, :])           # [nb*(ho//2), ncols]
        ho //= 2

    return y.reshape(nb, ho, ncols)


def _cnn_fused_kernel(x_ref, c1w, c1b, c2w, c2b, c3w, c3b,
                      f1w, f1b, f2w, f2b, o_ref):
    """One grid step = one block of `nb` images; whole network stays in VMEM."""
    a1 = _conv_block(x_ref[...], c1w, c1b, pool=True)     # [nb, 14, 512]
    a2 = _conv_block(a1, c2w, c2b, pool=True)             # [nb,  6, 384]
    a3 = _conv_block(a2, c3w, c3b, pool=False)            # [nb,  4, 256]

    # fc1 fused into the conv3 epilogue: h = sum_r a3[:, r, :] @ W1[r]
    h = None
    for r in range(4):
        t = jnp.dot(a3[:, r, :].astype(jnp.bfloat16), f1w[r],
                    preferred_element_type=jnp.float32)
        h = t if h is None else h + t
    h = jnp.maximum(h + f1b[...], 0.0)                    # [nb, 64] f32

    # fc2 as a VPU multiply + lane reduction (a [nb,64]x[64,1] matmul would use
    # a single MXU column); exact f32 sigmoid.
    y = jnp.sum(h * f2w[...], axis=-1, keepdims=True) + f2b[...]   # [nb, 1]
    o_ref[...] = (1.0 / (1.0 + jnp.exp(-y))).astype(o_ref.dtype)


# ----------------------------------------------------------------------------
# pallas_call wrapper
# ----------------------------------------------------------------------------
def _pick_batch_block(n, images_per_step):
    ips = max(8, (images_per_step // 8) * 8)     # keep blocks 8-aligned
    if n > ips:
        return ips                               # grid has >= 2 steps
    if n >= 16:
        # Small batches: split into two 8-aligned blocks so both v7x
        # TensorCores get a grid step under dimension_semantics=("parallel",).
        return ((n + 15) // 16) * 8
    return n                                     # tiny batch: one full block


def _const_spec(arr):
    zeros = (0,) * arr.ndim
    return pl.BlockSpec(arr.shape, lambda g, _z=zeros: _z)


def cnn_forward(x_nchw, p, *, images_per_step=32):
    n = x_nchw.shape[0]
    # NCHW -> lane-dense [N, H, W*C] rows, lane-padded 90 -> 128.
    x = jnp.transpose(x_nchw, (0, 2, 3, 1)).reshape(n, 30, 30 * 3)
    x = jnp.pad(x, ((0, 0), (0, 0), (0, 128 - 90)))

    nb = _pick_batch_block(n, images_per_step)
    grid = (pl.cdiv(n, nb),)

    weights = (p["c1_w"], p["c1_b"], p["c2_w"], p["c2_b"], p["c3_w"], p["c3_b"],
               p["fc1_w"], p["fc1_b"], p["fc2_w"], p["fc2_b"])

    return pl.pallas_call(
        _cnn_fused_kernel,
        out_shape=jax.ShapeDtypeStruct((n, 1), jnp.float32),
        grid=grid,
        in_specs=[pl.BlockSpec((nb, 30, 128), lambda g: (g, 0, 0))]
                 + [_const_spec(w) for w in weights],
        out_specs=pl.BlockSpec((nb, 1), lambda g: (g, 0)),
        compiler_params=pltpu.CompilerParams(
            dimension_semantics=("parallel",),
            vmem_limit_bytes=40 * 1024 * 1024,
        ),
    )(x, *weights)


# ----------------------------------------------------------------------------
# One-time parameter preparation (all reshapes/transposes hoisted out of forward)
# ----------------------------------------------------------------------------
def _prep_conv(w_oihw, b, *, w_in, pool, pad_k_to=None, pad_n_to=None):
    """Block-Toeplitz weights so the conv becomes kh row-banded matmuls.

    wrow[i, (t+j)*cin + c, t*cout + f] = w[f, c, i, j]
    pool=True splits output columns into even/odd width positions so the width
    half of the 2x2 max-pool becomes an elementwise max of two matmul results.
    K / ncols are optionally zero-padded to lane-aligned sizes.
    """
    w = np.asarray(w_oihw, np.float32)
    b = np.asarray(b, np.float32)
    cout, cin, kh, kw = w.shape
    wo = w_in - kw + 1
    k_dim = w_in * cin

    wrow = np.zeros((kh, k_dim, wo * cout), np.float32)
    for i in range(kh):
        for j in range(kw):
            blk = w[:, :, i, j].T                               # [cin, cout]
            for t in range(wo):
                wrow[i, (t + j) * cin:(t + j + 1) * cin,
                        t * cout:(t + 1) * cout] = blk

    if pool:
        wo_out = wo // 2
        wrow = wrow.reshape(kh, k_dim, wo_out, 2, cout)
        wrow = wrow.transpose(0, 3, 1, 2, 4).reshape(kh, 2, k_dim, wo_out * cout)
    else:
        wo_out = wo
        wrow = wrow.reshape(kh, 1, k_dim, wo * cout)

    brow = np.tile(b, wo_out)
    ncols = wo_out * cout

    if pad_k_to is not None and pad_k_to > k_dim:
        wrow = np.pad(wrow, ((0, 0), (0, 0), (0, pad_k_to - k_dim), (0, 0)))
    if pad_n_to is not None and pad_n_to > ncols:
        wrow = np.pad(wrow, ((0, 0), (0, 0), (0, 0), (0, pad_n_to - ncols)))
        brow = np.pad(brow, (0, pad_n_to - ncols))

    return (jnp.asarray(wrow, jnp.bfloat16),
            jnp.asarray(brow.reshape(1, -1), jnp.float32))


def prep_params(params):
    # conv1: K 90 -> 128 and ncols 448 -> 512 (zero-padded); conv2's Toeplitz K
    # is padded to 512 with zero rows so it consumes conv1's padded output.
    c1_w, c1_b = _prep_conv(params["conv1_w"], params["conv1_b"],
                            w_in=30, pool=True, pad_k_to=128, pad_n_to=512)
    c2_w, c2_b = _prep_conv(params["conv2_w"], params["conv2_b"],
                            w_in=14, pool=True, pad_k_to=512)
    c3_w, c3_b = _prep_conv(params["conv3_w"], params["conv3_b"],
                            w_in=6, pool=False)

    # fc1: permute the input dim from PyTorch NCHW-flatten order (c*16+h*4+w)
    # to per-row NHWC order and split into 4 [256, 64] row blocks so fc1 fuses
    # into the conv3 epilogue without any flatten transpose.
    fc1_w = np.asarray(params["fc1_w"], np.float32).reshape(64, 64, 4, 4)  # [out,C,H,W]
    fc1_w = fc1_w.transpose(2, 3, 1, 0).reshape(4, 4 * 64, 64)             # [H, W*C, out]

    return {
        "c1_w": c1_w, "c1_b": c1_b,
        "c2_w": c2_w, "c2_b": c2_b,
        "c3_w": c3_w, "c3_b": c3_b,
        "fc1_w": jnp.asarray(fc1_w, jnp.bfloat16),
        "fc1_b": jnp.asarray(np.asarray(params["fc1_b"], np.float32).reshape(1, 64)),
        "fc2_w": jnp.asarray(np.asarray(params["fc2_w"], np.float32).reshape(1, 64)),
        "fc2_b": jnp.asarray(np.asarray(params["fc2_b"], np.float32).reshape(1, 1)),
    }


# ----------------------------------------------------------------------------
# Pure-JAX reference (correctness check) and parameter init
# ----------------------------------------------------------------------------
def cnn_forward_reference(x, p):
    dn = ("NCHW", "OIHW", "NCHW")
    hp = jax.lax.Precision.HIGHEST

    def conv(x, w, b):
        y = jax.lax.conv_general_dilated(x, w, (1, 1), "VALID",
                                         dimension_numbers=dn, precision=hp)
        return jnp.maximum(y + b[None, :, None, None], 0.0)

    def pool(x):
        return jax.lax.reduce_window(x, -jnp.inf, jax.lax.max,
                                     (1, 1, 2, 2), (1, 1, 2, 2), "VALID")

    x = pool(conv(x, p["conv1_w"], p["conv1_b"]))
    x = pool(conv(x, p["conv2_w"], p["conv2_b"]))
    x = conv(x, p["conv3_w"], p["conv3_b"])
    x = x.reshape(x.shape[0], -1)                            # NCHW flatten (PyTorch)
    x = jnp.maximum(jnp.dot(x, p["fc1_w"].T, precision=hp) + p["fc1_b"], 0.0)
    y = jnp.dot(x, p["fc2_w"].T, precision=hp) + p["fc2_b"]
    return 1.0 / (1.0 + jnp.exp(-y))


def init_params(key):
    ks = jax.random.split(key, 10)
    scale = 0.05
    return {
        "conv1_w": scale * jax.random.normal(ks[0], (32, 3, 3, 3), jnp.float32),
        "conv1_b": scale * jax.random.normal(ks[1], (32,), jnp.float32),
        "conv2_w": scale * jax.random.normal(ks[2], (64, 32, 3, 3), jnp.float32),
        "conv2_b": scale * jax.random.normal(ks[3], (64,), jnp.float32),
        "conv3_w": scale * jax.random.normal(ks[4], (64, 64, 3, 3), jnp.float32),
        "conv3_b": scale * jax.random.normal(ks[5], (64,), jnp.float32),
        "fc1_w": scale * jax.random.normal(ks[6], (64, 64 * 4 * 4), jnp.float32),
        "fc1_b": scale * jax.random.normal(ks[7], (64,), jnp.float32),
        "fc2_w": scale * jax.random.normal(ks[8], (1, 64), jnp.float32),
        "fc2_b": scale * jax.random.normal(ks[9], (1,), jnp.float32),
    }


if __name__ == "__main__":
    key = jax.random.PRNGKey(0)
    k_x, k_p = jax.random.split(key)

    # fc1's 64*4*4 input forces a 30x30 spatial input: 30->28->14->12->6->4.
    x = jax.random.normal(k_x, (2, 3, 30, 30), jnp.float32)   # NCHW like PyTorch
    params = init_params(k_p)
    prepped = prep_params(params)                             # one-time weight prep

    out = jax.block_until_ready(jax.jit(cnn_forward)(x, prepped))
    ref = jax.block_until_ready(cnn_forward_reference(x, params))

    assert out.shape == (2, 1), out.shape
    assert bool(jnp.all(jnp.isfinite(out)))
    assert bool(jnp.allclose(out, ref, atol=2e-3, rtol=2e-3)), (out, ref)
    print("KERNEL_OK")
</pallas_src>

<mosaic_0001>
module attributes {stable_mosaic.version = 11 : i64} {
  func.func @_cnn_fused_kernel(%arg0: i32, %arg1: memref<2x30x128xf32, #tpu.memory_space<vmem>>, %arg2: memref<3x2x128x512xbf16, #tpu.memory_space<vmem>>, %arg3: memref<1x512xf32, #tpu.memory_space<vmem>>, %arg4: memref<3x2x512x384xbf16, #tpu.memory_space<vmem>>, %arg5: memref<1x384xf32, #tpu.memory_space<vmem>>, %arg6: memref<3x1x384x256xbf16, #tpu.memory_space<vmem>>, %arg7: memref<1x256xf32, #tpu.memory_space<vmem>>, %arg8: memref<4x256x64xbf16, #tpu.memory_space<vmem>>, %arg9: memref<1x64xf32, #tpu.memory_space<vmem>>, %arg10: memref<1x64xf32, #tpu.memory_space<vmem>>, %arg11: memref<1x1xf32, #tpu.memory_space<vmem>>, %arg12: memref<2x1xf32, #tpu.memory_space<vmem>>) attributes {dimension_semantics = [#tpu.dimension_semantics<parallel>], iteration_bounds = array<i64: 1>, scalar_prefetch = 0 : i64, scratch_operands = 0 : i64, tpu.core_type = #tpu.core_type<tc>, window_params = [{transform_indices = @transform_0, window_bounds = array<i64: 2, 30, 128>}, {pipeline_mode = #tpu.pipeline_mode<synchronous>, transform_indices = @transform_1, window_bounds = array<i64: 3, 2, 128, 512>}, {pipeline_mode = #tpu.pipeline_mode<synchronous>, transform_indices = @transform_2, window_bounds = array<i64: 1, 512>}, {pipeline_mode = #tpu.pipeline_mode<synchronous>, transform_indices = @transform_3, window_bounds = array<i64: 3, 2, 512, 384>}, {pipeline_mode = #tpu.pipeline_mode<synchronous>, transform_indices = @transform_4, window_bounds = array<i64: 1, 384>}, {pipeline_mode = #tpu.pipeline_mode<synchronous>, transform_indices = @transform_5, window_bounds = array<i64: 3, 1, 384, 256>}, {pipeline_mode = #tpu.pipeline_mode<synchronous>, transform_indices = @transform_6, window_bounds = array<i64: 1, 256>}, {pipeline_mode = #tpu.pipeline_mode<synchronous>, transform_indices = @transform_7, window_bounds = array<i64: 4, 256, 64>}, {pipeline_mode = #tpu.pipeline_mode<synchronous>, transform_indices = @transform_8, window_bounds = array<i64: 1, 64>}, {pipeline_mode = #tpu.pipeline_mode<synchronous>, transform_indices = @transform_9, window_bounds = array<i64: 1, 64>}, {pipeline_mode = #tpu.pipeline_mode<synchronous>, transform_indices = @transform_10, window_bounds = array<i64: 1, 1>}, {transform_indices = @transform_11, window_bounds = array<i64: 2, 1>}]} {
    %c0 = arith.constant 0 : index
    %c0_0 = arith.constant 0 : index
    %c0_1 = arith.constant 0 : index
    %0 = vector.load %arg1[%c0, %c0_0, %c0_1] : memref<2x30x128xf32, #tpu.memory_space<vmem>>, vector<2x30x128xf32>
    %1 = vector.extract_strided_slice %0 {offsets = [0, 0, 0], sizes = [2, 28, 128], strides = [1, 1, 1]} : vector<2x30x128xf32> to vector<2x28x128xf32>
    %2 = vector.shape_cast %1 : vector<2x28x128xf32> to vector<56x128xf32>
    %3 = arith.truncf %2 : vector<56x128xf32> to vector<56x128xbf16>
    %c0_2 = arith.constant 0 : index
    %c0_3 = arith.constant 0 : index
    %c0_4 = arith.constant 0 : index
    %c0_5 = arith.constant 0 : index
    %4 = vector.load %arg2[%c0_2, %c0_3, %c0_4, %c0_5] : memref<3x2x128x512xbf16, #tpu.memory_space<vmem>>, vector<1x1x128x512xbf16>
    %5 = vector.shape_cast %4 : vector<1x1x128x512xbf16> to vector<128x512xbf16>
    %cst = arith.constant dense<0.000000e+00> : vector<56x512xf32>
    %6 = tpu.matmul %3, %5, %cst {dimension_numbers = #tpu.dot_dimension_numbers<[1], [0], [0], [1], [0, 0, 1, 1], [], []>} : vector<56x128xbf16>, vector<128x512xbf16>, vector<56x512xf32> -> vector<56x512xf32>
    %c0_6 = arith.constant 0 : index
    %c1 = arith.constant 1 : index
    %c0_7 = arith.constant 0 : index
    %c0_8 = arith.constant 0 : index
    %7 = vector.load %arg2[%c0_6, %c1, %c0_7, %c0_8] : memref<3x2x128x512xbf16, #tpu.memory_space<vmem>>, vector<1x1x128x512xbf16>
    %8 = vector.shape_cast %7 : vector<1x1x128x512xbf16> to vector<128x512xbf16>
    %cst_9 = arith.constant dense<0.000000e+00> : vector<56x512xf32>
    %9 = tpu.matmul %3, %8, %cst_9 {dimension_numbers = #tpu.dot_dimension_numbers<[1], [0], [0], [1], [0, 0, 1, 1], [], []>} : vector<56x128xbf16>, vector<128x512xbf16>, vector<56x512xf32> -> vector<56x512xf32>
    %10 = vector.extract_strided_slice %0 {offsets = [0, 1, 0], sizes = [2, 28, 128], strides = [1, 1, 1]} : vector<2x30x128xf32> to vector<2x28x128xf32>
    %11 = vector.shape_cast %10 : vector<2x28x128xf32> to vector<56x128xf32>
    %12 = arith.truncf %11 : vector<56x128xf32> to vector<56x128xbf16>
    %c1_10 = arith.constant 1 : index
    %c0_11 = arith.constant 0 : index
    %c0_12 = arith.constant 0 : index
    %c0_13 = arith.constant 0 : index
    %13 = vector.load %arg2[%c1_10, %c0_11, %c0_12, %c0_13] : memref<3x2x128x512xbf16, #tpu.memory_space<vmem>>, vector<1x1x128x512xbf16>
    %14 = vector.shape_cast %13 : vector<1x1x128x512xbf16> to vector<128x512xbf16>
    %cst_14 = arith.constant dense<0.000000e+00> : vector<56x512xf32>
    %15 = tpu.matmul %12, %14, %cst_14 {dimension_numbers = #tpu.dot_dimension_numbers<[1], [0], [0], [1], [0, 0, 1, 1], [], []>} : vector<56x128xbf16>, vector<128x512xbf16>, vector<56x512xf32> -> vector<56x512xf32>
    %16 = arith.addf %6, %15 : vector<56x512xf32>
    %c1_15 = arith.constant 1 : index
    %c1_16 = arith.constant 1 : index
    %c0_17 = arith.constant 0 : index
    %c0_18 = arith.constant 0 : index
    %17 = vector.load %arg2[%c1_15, %c1_16, %c0_17, %c0_18] : memref<3x2x128x512xbf16, #tpu.memory_space<vmem>>, vector<1x1x128x512xbf16>
    %18 = vector.shape_cast %17 : vector<1x1x128x512xbf16> to vector<128x512xbf16>
    %cst_19 = arith.constant dense<0.000000e+00> : vector<56x512xf32>
    %19 = tpu.matmul %12, %18, %cst_19 {dimension_numbers = #tpu.dot_dimension_numbers<[1], [0], [0], [1], [0, 0, 1, 1], [], []>} : vector<56x128xbf16>, vector<128x512xbf16>, vector<56x512xf32> -> vector<56x512xf32>
    %20 = arith.addf %9, %19 : vector<56x512xf32>
    %21 = vector.extract_strided_slice %0 {offsets = [0, 2, 0], sizes = [2, 28, 128], strides = [1, 1, 1]} : vector<2x30x128xf32> to vector<2x28x128xf32>
    %22 = vector.shape_cast %21 : vector<2x28x128xf32> to vector<56x128xf32>
    %23 = arith.truncf %22 : vector<56x128xf32> to vector<56x128xbf16>
    %c2 = arith.constant 2 : index
    %c0_20 = arith.constant 0 : index
    %c0_21 = arith.constant 0 : index
    %c0_22 = arith.constant 0 : index
    %24 = vector.load %arg2[%c2, %c0_20, %c0_21, %c0_22] : memref<3x2x128x512xbf16, #tpu.memory_space<vmem>>, vector<1x1x128x512xbf16>
    %25 = vector.shape_cast %24 : vector<1x1x128x512xbf16> to vector<128x512xbf16>
    %cst_23 = arith.constant dense<0.000000e+00> : vector<56x512xf32>
    %26 = tpu.matmul %23, %25, %cst_23 {dimension_numbers = #tpu.dot_dimension_numbers<[1], [0], [0], [1], [0, 0, 1, 1], [], []>} : vector<56x128xbf16>, vector<128x512xbf16>, vector<56x512xf32> -> vector<56x512xf32>
    %27 = arith.addf %16, %26 : vector<56x512xf32>
    %c2_24 = arith.constant 2 : index
    %c1_25 = arith.constant 1 : index
    %c0_26 = arith.constant 0 : index
    %c0_27 = arith.constant 0 : index
    %28 = vector.load %arg2[%c2_24, %c1_25, %c0_26, %c0_27] : memref<3x2x128x512xbf16, #tpu.memory_space<vmem>>, vector<1x1x128x512xbf16>
    %29 = vector.shape_cast %28 : vector<1x1x128x512xbf16> to vector<128x512xbf16>
    %cst_28 = arith.constant dense<0.000000e+00> : vector<56x512xf32>
    %30 = tpu.matmul %23, %29, %cst_28 {dimension_numbers = #tpu.dot_dimension_numbers<[1], [0], [0], [1], [0, 0, 1, 1], [], []>} : vector<56x128xbf16>, vector<128x512xbf16>, vector<56x512xf32> -> vector<56x512xf32>
    %31 = arith.addf %20, %30 : vector<56x512xf32>
    %32 = arith.maximumf %27, %31 : vector<56x512xf32>
    %c0_29 = arith.constant 0 : index
    %c0_30 = arith.constant 0 : index
    %33 = vector.load %arg3[%c0_29, %c0_30] : memref<1x512xf32, #tpu.memory_space<vmem>>, vector<1x512xf32>
    %34 = vector.broadcast %33 : vector<1x512xf32> to vector<56x512xf32>
    %35 = arith.addf %32, %34 : vector<56x512xf32>
    %cst_31 = arith.constant 0.000000e+00 : f32
    %36 = vector.broadcast %cst_31 : f32 to vector<56x512xf32>
    %37 = arith.maximumf %35, %36 : vector<56x512xf32>
    %38 = vector.shape_cast %37 : vector<56x512xf32> to vector<28x2x512xf32>
    %39 = vector.extract_strided_slice %38 {offsets = [0, 0, 0], sizes = [28, 1, 512], strides = [1, 1, 1]} : vector<28x2x512xf32> to vector<28x1x512xf32>
    %40 = vector.shape_cast %39 : vector<28x1x512xf32> to vector<28x512xf32>
    %41 = vector.extract_strided_slice %38 {offsets = [0, 1, 0], sizes = [28, 1, 512], strides = [1, 1, 1]} : vector<28x2x512xf32> to vector<28x1x512xf32>
    %42 = vector.shape_cast %41 : vector<28x1x512xf32> to vector<28x512xf32>
    %43 = arith.maximumf %40, %42 : vector<28x512xf32>
    %44 = vector.shape_cast %43 : vector<28x512xf32> to vector<2x14x512xf32>
    %45 = vector.extract_strided_slice %44 {offsets = [0, 0, 0], sizes = [2, 12, 512], strides = [1, 1, 1]} : vector<2x14x512xf32> to vector<2x12x512xf32>
    %46 = vector.shape_cast %45 : vector<2x12x512xf32> to vector<24x512xf32>
    %47 = arith.truncf %46 : vector<24x512xf32> to vector<24x512xbf16>
    %c0_32 = arith.constant 0 : index
    %c0_33 = arith.constant 0 : index
    %c0_34 = arith.constant 0 : index
    %c0_35 = arith.constant 0 : index
    %48 = vector.load %arg4[%c0_32, %c0_33, %c0_34, %c0_35] : memref<3x2x512x384xbf16, #tpu.memory_space<vmem>>, vector<1x1x512x384xbf16>
    %49 = vector.shape_cast %48 : vector<1x1x512x384xbf16> to vector<512x384xbf16>
    %cst_36 = arith.constant dense<0.000000e+00> : vector<24x384xf32>
    %50 = tpu.matmul %47, %49, %cst_36 {dimension_numbers = #tpu.dot_dimension_numbers<[1], [0], [0], [1], [0, 0, 1, 1], [], []>} : vector<24x512xbf16>, vector<512x384xbf16>, vector<24x384xf32> -> vector<24x384xf32>
    %c0_37 = arith.constant 0 : index
    %c1_38 = arith.constant 1 : index
    %c0_39 = arith.constant 0 : index
    %c0_40 = arith.constant 0 : index
    %51 = vector.load %arg4[%c0_37, %c1_38, %c0_39, %c0_40] : memref<3x2x512x384xbf16, #tpu.memory_space<vmem>>, vector<1x1x512x384xbf16>
    %52 = vector.shape_cast %51 : vector<1x1x512x384xbf16> to vector<512x384xbf16>
    %cst_41 = arith.constant dense<0.000000e+00> : vector<24x384xf32>
    %53 = tpu.matmul %47, %52, %cst_41 {dimension_numbers = #tpu.dot_dimension_numbers<[1], [0], [0], [1], [0, 0, 1, 1], [], []>} : vector<24x512xbf16>, vector<512x384xbf16>, vector<24x384xf32> -> vector<24x384xf32>
    %54 = vector.extract_strided_slice %44 {offsets = [0, 1, 0], sizes = [2, 12, 512], strides = [1, 1, 1]} : vector<2x14x512xf32> to vector<2x12x512xf32>
    %55 = vector.shape_cast %54 : vector<2x12x512xf32> to vector<24x512xf32>
    %56 = arith.truncf %55 : vector<24x512xf32> to vector<24x512xbf16>
    %c1_42 = arith.constant 1 : index
    %c0_43 = arith.constant 0 : index
    %c0_44 = arith.constant 0 : index
    %c0_45 = arith.constant 0 : index
    %57 = vector.load %arg4[%c1_42, %c0_43, %c0_44, %c0_45] : memref<3x2x512x384xbf16, #tpu.memory_space<vmem>>, vector<1x1x512x384xbf16>
    %58 = vector.shape_cast %57 : vector<1x1x512x384xbf16> to vector<512x384xbf16>
    %cst_46 = arith.constant dense<0.000000e+00> : vector<24x384xf32>
    %59 = tpu.matmul %56, %58, %cst_46 {dimension_numbers = #tpu.dot_dimension_numbers<[1], [0], [0], [1], [0, 0, 1, 1], [], []>} : vector<24x512xbf16>, vector<512x384xbf16>, vector<24x384xf32> -> vector<24x384xf32>
    %60 = arith.addf %50, %59 : vector<24x384xf32>
    %c1_47 = arith.constant 1 : index
    %c1_48 = arith.constant 1 : index
    %c0_49 = arith.constant 0 : index
    %c0_50 = arith.constant 0 : index
    %61 = vector.load %arg4[%c1_47, %c1_48, %c0_49, %c0_50] : memref<3x2x512x384xbf16, #tpu.memory_space<vmem>>, vector<1x1x512x384xbf16>
    %62 = vector.shape_cast %61 : vector<1x1x512x384xbf16> to vector<512x384xbf16>
    %cst_51 = arith.constant dense<0.000000e+00> : vector<24x384xf32>
    %63 = tpu.matmul %56, %62, %cst_51 {dimension_numbers = #tpu.dot_dimension_numbers<[1], [0], [0], [1], [0, 0, 1, 1], [], []>} : vector<24x512xbf16>, vector<512x384xbf16>, vector<24x384xf32> -> vector<24x384xf32>
    %64 = arith.addf %53, %63 : vector<24x384xf32>
    %65 = vector.extract_strided_slice %44 {offsets = [0, 2, 0], sizes = [2, 12, 512], strides = [1, 1, 1]} : vector<2x14x512xf32> to vector<2x12x512xf32>
    %66 = vector.shape_cast %65 : vector<2x12x512xf32> to vector<24x512xf32>
    %67 = arith.truncf %66 : vector<24x512xf32> to vector<24x512xbf16>
    %c2_52 = arith.constant 2 : index
    %c0_53 = arith.constant 0 : index
    %c0_54 = arith.constant 0 : index
    %c0_55 = arith.constant 0 : index
    %68 = vector.load %arg4[%c2_52, %c0_53, %c0_54, %c0_55] : memref<3x2x512x384xbf16, #tpu.memory_space<vmem>>, vector<1x1x512x384xbf16>
    %69 = vector.shape_cast %68 : vector<1x1x512x384xbf16> to vector<512x384xbf16>
    %cst_56 = arith.constant dense<0.000000e+00> : vector<24x384xf32>
    %70 = tpu.matmul %67, %69, %cst_56 {dimension_numbers = #tpu.dot_dimension_numbers<[1], [0], [0], [1], [0, 0, 1, 1], [], []>} : vector<24x512xbf16>, vector<512x384xbf16>, vector<24x384xf32> -> vector<24x384xf32>
    %71 = arith.addf %60, %70 : vector<24x384xf32>
    %c2_57 = arith.constant 2 : index
    %c1_58 = arith.constant 1 : index
    %c0_59 = arith.constant 0 : index
    %c0_60 = arith.constant 0 : index
    %72 = vector.load %arg4[%c2_57, %c1_58, %c0_59, %c0_60] : memref<3x2x512x384xbf16, #tpu.memory_space<vmem>>, vector<1x1x512x384xbf16>
    %73 = vector.shape_cast %72 : vector<1x1x512x384xbf16> to vector<512x384xbf16>
    %cst_61 = arith.constant dense<0.000000e+00> : vector<24x384xf32>
    %74 = tpu.matmul %67, %73, %cst_61 {dimension_numbers = #tpu.dot_dimension_numbers<[1], [0], [0], [1], [0, 0, 1, 1], [], []>} : vector<24x512xbf16>, vector<512x384xbf16>, vector<24x384xf32> -> vector<24x384xf32>
    %75 = arith.addf %64, %74 : vector<24x384xf32>
    %76 = arith.maximumf %71, %75 : vector<24x384xf32>
    %c0_62 = arith.constant 0 : index
    %c0_63 = arith.constant 0 : index
    %77 = vector.load %arg5[%c0_62, %c0_63] : memref<1x384xf32, #tpu.memory_space<vmem>>, vector<1x384xf32>
    %78 = vector.broadcast %77 : vector<1x384xf32> to vector<24x384xf32>
    %79 = arith.addf %76, %78 : vector<24x384xf32>
    %cst_64 = arith.constant 0.000000e+00 : f32
    %80 = vector.broadcast %cst_64 : f32 to vector<24x384xf32>
    %81 = arith.maximumf %79, %80 : vector<24x384xf32>
    %82 = vector.shape_cast %81 : vector<24x384xf32> to vector<12x2x384xf32>
    %83 = vector.extract_strided_slice %82 {offsets = [0, 0, 0], sizes = [12, 1, 384], strides = [1, 1, 1]} : vector<12x2x384xf32> to vector<12x1x384xf32>
    %84 = vector.shape_cast %83 : vector<12x1x384xf32> to vector<12x384xf32>
    %85 = vector.extract_strided_slice %82 {offsets = [0, 1, 0], sizes = [12, 1, 384], strides = [1, 1, 1]} : vector<12x2x384xf32> to vector<12x1x384xf32>
    %86 = vector.shape_cast %85 : vector<12x1x384xf32> to vector<12x384xf32>
    %87 = arith.maximumf %84, %86 : vector<12x384xf32>
    %88 = vector.shape_cast %87 : vector<12x384xf32> to vector<2x6x384xf32>
    %89 = vector.extract_strided_slice %88 {offsets = [0, 0, 0], sizes = [2, 4, 384], strides = [1, 1, 1]} : vector<2x6x384xf32> to vector<2x4x384xf32>
    %90 = vector.shape_cast %89 : vector<2x4x384xf32> to vector<8x384xf32>
    %91 = arith.truncf %90 : vector<8x384xf32> to vector<8x384xbf16>
    %c0_65 = arith.constant 0 : index
    %c0_66 = arith.constant 0 : index
    %c0_67 = arith.constant 0 : index
    %c0_68 = arith.constant 0 : index
    %92 = vector.load %arg6[%c0_65, %c0_66, %c0_67, %c0_68] : memref<3x1x384x256xbf16, #tpu.memory_space<vmem>>, vector<1x1x384x256xbf16>
    %93 = vector.shape_cast %92 : vector<1x1x384x256xbf16> to vector<384x256xbf16>
    %cst_69 = arith.constant dense<0.000000e+00> : vector<8x256xf32>
    %94 = tpu.matmul %91, %93, %cst_69 {dimension_numbers = #tpu.dot_dimension_numbers<[1], [0], [0], [1], [0, 0, 1, 1], [], []>} : vector<8x384xbf16>, vector<384x256xbf16>, vector<8x256xf32> -> vector<8x256xf32>
    %95 = vector.extract_strided_slice %88 {offsets = [0, 1, 0], sizes = [2, 4, 384], strides = [1, 1, 1]} : vector<2x6x384xf32> to vector<2x4x384xf32>
    %96 = vector.shape_cast %95 : vector<2x4x384xf32> to vector<8x384xf32>
    %97 = arith.truncf %96 : vector<8x384xf32> to vector<8x384xbf16>
    %c1_70 = arith.constant 1 : index
    %c0_71 = arith.constant 0 : index
    %c0_72 = arith.constant 0 : index
    %c0_73 = arith.constant 0 : index
    %98 = vector.load %arg6[%c1_70, %c0_71, %c0_72, %c0_73] : memref<3x1x384x256xbf16, #tpu.memory_space<vmem>>, vector<1x1x384x256xbf16>
    %99 = vector.shape_cast %98 : vector<1x1x384x256xbf16> to vector<384x256xbf16>
    %cst_74 = arith.constant dense<0.000000e+00> : vector<8x256xf32>
    %100 = tpu.matmul %97, %99, %cst_74 {dimension_numbers = #tpu.dot_dimension_numbers<[1], [0], [0], [1], [0, 0, 1, 1], [], []>} : vector<8x384xbf16>, vector<384x256xbf16>, vector<8x256xf32> -> vector<8x256xf32>
    %101 = arith.addf %94, %100 : vector<8x256xf32>
    %102 = vector.extract_strided_slice %88 {offsets = [0, 2, 0], sizes = [2, 4, 384], strides = [1, 1, 1]} : vector<2x6x384xf32> to vector<2x4x384xf32>
    %103 = vector.shape_cast %102 : vector<2x4x384xf32> to vector<8x384xf32>
    %104 = arith.truncf %103 : vector<8x384xf32> to vector<8x384xbf16>
    %c2_75 = arith.constant 2 : index
    %c0_76 = arith.constant 0 : index
    %c0_77 = arith.constant 0 : index
    %c0_78 = arith.constant 0 : index
    %105 = vector.load %arg6[%c2_75, %c0_76, %c0_77, %c0_78] : memref<3x1x384x256xbf16, #tpu.memory_space<vmem>>, vector<1x1x384x256xbf16>
    %106 = vector.shape_cast %105 : vector<1x1x384x256xbf16> to vector<384x256xbf16>
    %cst_79 = arith.constant dense<0.000000e+00> : vector<8x256xf32>
    %107 = tpu.matmul %104, %106, %cst_79 {dimension_numbers = #tpu.dot_dimension_numbers<[1], [0], [0], [1], [0, 0, 1, 1], [], []>} : vector<8x384xbf16>, vector<384x256xbf16>, vector<8x256xf32> -> vector<8x256xf32>
    %108 = arith.addf %101, %107 : vector<8x256xf32>
    %c0_80 = arith.constant 0 : index
    %c0_81 = arith.constant 0 : index
    %109 = vector.load %arg7[%c0_80, %c0_81] : memref<1x256xf32, #tpu.memory_space<vmem>>, vector<1x256xf32>
    %110 = vector.broadcast %109 : vector<1x256xf32> to vector<8x256xf32>
    %111 = arith.addf %108, %110 : vector<8x256xf32>
    %cst_82 = arith.constant 0.000000e+00 : f32
    %112 = vector.broadcast %cst_82 : f32 to vector<8x256xf32>
    %113 = arith.maximumf %111, %112 : vector<8x256xf32>
    %114 = vector.shape_cast %113 : vector<8x256xf32> to vector<2x4x256xf32>
    %115 = vector.extract_strided_slice %114 {offsets = [0, 0, 0], sizes = [2, 1, 256], strides = [1, 1, 1]} : vector<2x4x256xf32> to vector<2x1x256xf32>
    %116 = vector.shape_cast %115 : vector<2x1x256xf32> to vector<2x256xf32>
    %117 = arith.truncf %116 : vector<2x256xf32> to vector<2x256xbf16>
    %c0_83 = arith.constant 0 : index
    %c0_84 = arith.constant 0 : index
    %c0_85 = arith.constant 0 : index
    %118 = vector.load %arg8[%c0_83, %c0_84, %c0_85] : memref<4x256x64xbf16, #tpu.memory_space<vmem>>, vector<1x256x64xbf16>
    %119 = vector.shape_cast %118 : vector<1x256x64xbf16> to vector<256x64xbf16>
    %cst_86 = arith.constant dense<0.000000e+00> : vector<2x64xf32>
    %120 = tpu.matmul %117, %119, %cst_86 {dimension_numbers = #tpu.dot_dimension_numbers<[1], [0], [0], [1], [0, 0, 1, 1], [], []>} : vector<2x256xbf16>, vector<256x64xbf16>, vector<2x64xf32> -> vector<2x64xf32>
    %121 = vector.extract_strided_slice %114 {offsets = [0, 1, 0], sizes = [2, 1, 256], strides = [1, 1, 1]} : vector<2x4x256xf32> to vector<2x1x256xf32>
    %122 = vector.shape_cast %121 : vector<2x1x256xf32> to vector<2x256xf32>
    %123 = arith.truncf %122 : vector<2x256xf32> to vector<2x256xbf16>
    %c1_87 = arith.constant 1 : index
    %c0_88 = arith.constant 0 : index
    %c0_89 = arith.constant 0 : index
    %124 = vector.load %arg8[%c1_87, %c0_88, %c0_89] : memref<4x256x64xbf16, #tpu.memory_space<vmem>>, vector<1x256x64xbf16>
    %125 = vector.shape_cast %124 : vector<1x256x64xbf16> to vector<256x64xbf16>
    %cst_90 = arith.constant dense<0.000000e+00> : vector<2x64xf32>
    %126 = tpu.matmul %123, %125, %cst_90 {dimension_numbers = #tpu.dot_dimension_numbers<[1], [0], [0], [1], [0, 0, 1, 1], [], []>} : vector<2x256xbf16>, vector<256x64xbf16>, vector<2x64xf32> -> vector<2x64xf32>
    %127 = arith.addf %120, %126 : vector<2x64xf32>
    %128 = vector.extract_strided_slice %114 {offsets = [0, 2, 0], sizes = [2, 1, 256], strides = [1, 1, 1]} : vector<2x4x256xf32> to vector<2x1x256xf32>
    %129 = vector.shape_cast %128 : vector<2x1x256xf32> to vector<2x256xf32>
    %130 = arith.truncf %129 : vector<2x256xf32> to vector<2x256xbf16>
    %c2_91 = arith.constant 2 : index
    %c0_92 = arith.constant 0 : index
    %c0_93 = arith.constant 0 : index
    %131 = vector.load %arg8[%c2_91, %c0_92, %c0_93] : memref<4x256x64xbf16, #tpu.memory_space<vmem>>, vector<1x256x64xbf16>
    %132 = vector.shape_cast %131 : vector<1x256x64xbf16> to vector<256x64xbf16>
    %cst_94 = arith.constant dense<0.000000e+00> : vector<2x64xf32>
    %133 = tpu.matmul %130, %132, %cst_94 {dimension_numbers = #tpu.dot_dimension_numbers<[1], [0], [0], [1], [0, 0, 1, 1], [], []>} : vector<2x256xbf16>, vector<256x64xbf16>, vector<2x64xf32> -> vector<2x64xf32>
    %134 = arith.addf %127, %133 : vector<2x64xf32>
    %135 = vector.extract_strided_slice %114 {offsets = [0, 3, 0], sizes = [2, 1, 256], strides = [1, 1, 1]} : vector<2x4x256xf32> to vector<2x1x256xf32>
    %136 = vector.shape_cast %135 : vector<2x1x256xf32> to vector<2x256xf32>
    %137 = arith.truncf %136 : vector<2x256xf32> to vector<2x256xbf16>
    %c3 = arith.constant 3 : index
    %c0_95 = arith.constant 0 : index
    %c0_96 = arith.constant 0 : index
    %138 = vector.load %arg8[%c3, %c0_95, %c0_96] : memref<4x256x64xbf16, #tpu.memory_space<vmem>>, vector<1x256x64xbf16>
    %139 = vector.shape_cast %138 : vector<1x256x64xbf16> to vector<256x64xbf16>
    %cst_97 = arith.constant dense<0.000000e+00> : vector<2x64xf32>
    %140 = tpu.matmul %137, %139, %cst_97 {dimension_numbers = #tpu.dot_dimension_numbers<[1], [0], [0], [1], [0, 0, 1, 1], [], []>} : vector<2x256xbf16>, vector<256x64xbf16>, vector<2x64xf32> -> vector<2x64xf32>
    %141 = arith.addf %134, %140 : vector<2x64xf32>
    %c0_98 = arith.constant 0 : index
    %c0_99 = arith.constant 0 : index
    %142 = vector.load %arg9[%c0_98, %c0_99] : memref<1x64xf32, #tpu.memory_space<vmem>>, vector<1x64xf32>
    %143 = vector.broadcast %142 : vector<1x64xf32> to vector<2x64xf32>
    %144 = arith.addf %141, %143 : vector<2x64xf32>
    %cst_100 = arith.constant 0.000000e+00 : f32
    %145 = vector.broadcast %cst_100 : f32 to vector<2x64xf32>
    %146 = arith.maximumf %144, %145 : vector<2x64xf32>
    %c0_101 = arith.constant 0 : index
    %c0_102 = arith.constant 0 : index
    %147 = vector.load %arg10[%c0_101, %c0_102] : memref<1x64xf32, #tpu.memory_space<vmem>>, vector<1x64xf32>
    %148 = vector.broadcast %147 : vector<1x64xf32> to vector<2x64xf32>
    %149 = arith.mulf %146, %148 : vector<2x64xf32>
    %cst_103 = arith.constant dense<0.000000e+00> : vector<2xf32>
    %150 = vector.multi_reduction <add>, %149, %cst_103 [1] : vector<2x64xf32> to vector<2xf32>
    %151 = vector.shape_cast %150 : vector<2xf32> to vector<2x1xf32>
    %c0_104 = arith.constant 0 : index
    %c0_105 = arith.constant 0 : index
    %152 = vector.load %arg11[%c0_104, %c0_105] : memref<1x1xf32, #tpu.memory_space<vmem>>, vector<1x1xf32>
    %153 = vector.broadcast %152 : vector<1x1xf32> to vector<2x1xf32>
    %154 = arith.addf %151, %153 : vector<2x1xf32>
    %cst_106 = arith.constant 0.000000e+00 : f32
    %155 = vector.broadcast %cst_106 : f32 to vector<2x1xf32>
    %156 = arith.subf %155, %154 : vector<2x1xf32>
    %157 = math.exp %156 : vector<2x1xf32>
    %cst_107 = arith.constant 1.000000e+00 : f32
    %158 = vector.broadcast %cst_107 : f32 to vector<2x1xf32>
    %159 = arith.addf %158, %157 : vector<2x1xf32>
    %cst_108 = arith.constant 1.000000e+00 : f32
    %160 = vector.broadcast %cst_108 : f32 to vector<2x1xf32>
    %161 = arith.divf %160, %159 : vector<2x1xf32>
    %c0_109 = arith.constant 0 : index
    %c0_110 = arith.constant 0 : index
    %162 = vector.load %arg12[%c0_109, %c0_110] : memref<2x1xf32, #tpu.memory_space<vmem>>, vector<2x1xf32>
    tpu.vector_store %arg12[%c0_109, %c0_110], %161 {strides = array<i32>} : memref<2x1xf32, #tpu.memory_space<vmem>>, vector<2x1xf32>,
    return
  }
  func.func @transform_0(%arg0: i32) -> (i32, i32, i32) {
    %c0_i32 = arith.constant 0 : i32
    %c0_i32_0 = arith.constant 0 : i32
    %c0_i32_1 = arith.constant 0 : i32
    return %arg0, %c0_i32, %c0_i32_0 : i32, i32, i32
  }
  func.func @transform_1(%arg0: i32) -> (i32, i32, i32, i32) {
    %c0_i32 = arith.constant 0 : i32
    %c0_i32_0 = arith.constant 0 : i32
    %c0_i32_1 = arith.constant 0 : i32
    %c0_i32_2 = arith.constant 0 : i32
    %c0_i32_3 = arith.constant 0 : i32
    return %c0_i32, %c0_i32_0, %c0_i32_1, %c0_i32_2 : i32, i32, i32, i32
  }
  func.func @transform_2(%arg0: i32) -> (i32, i32) {
    %c0_i32 = arith.constant 0 : i32
    %c0_i32_0 = arith.constant 0 : i32
    %c0_i32_1 = arith.constant 0 : i32
    return %c0_i32, %c0_i32_0 : i32, i32
  }
  func.func @transform_3(%arg0: i32) -> (i32, i32, i32, i32) {
    %c0_i32 = arith.constant 0 : i32
    %c0_i32_0 = arith.constant 0 : i32
    %c0_i32_1 = arith.constant 0 : i32
    %c0_i32_2 = arith.constant 0 : i32
    %c0_i32_3 = arith.constant 0 : i32
    return %c0_i32, %c0_i32_0, %c0_i32_1, %c0_i32_2 : i32, i32, i32, i32
  }
  func.func @transform_4(%arg0: i32) -> (i32, i32) {
    %c0_i32 = arith.constant 0 : i32
    %c0_i32_0 = arith.constant 0 : i32
    %c0_i32_1 = arith.constant 0 : i32
    return %c0_i32, %c0_i32_0 : i32, i32
  }
  func.func @transform_5(%arg0: i32) -> (i32, i32, i32, i32) {
    %c0_i32 = arith.constant 0 : i32
    %c0_i32_0 = arith.constant 0 : i32
    %c0_i32_1 = arith.constant 0 : i32
    %c0_i32_2 = arith.constant 0 : i32
    %c0_i32_3 = arith.constant 0 : i32
    return %c0_i32, %c0_i32_0, %c0_i32_1, %c0_i32_2 : i32, i32, i32, i32
  }
  func.func @transform_6(%arg0: i32) -> (i32, i32) {
    %c0_i32 = arith.constant 0 : i32
    %c0_i32_0 = arith.constant 0 : i32
    %c0_i32_1 = arith.constant 0 : i32
    return %c0_i32, %c0_i32_0 : i32, i32
  }
  func.func @transform_7(%arg0: i32) -> (i32, i32, i32) {
    %c0_i32 = arith.constant 0 : i32
    %c0_i32_0 = arith.constant 0 : i32
    %c0_i32_1 = arith.constant 0 : i32
    %c0_i32_2 = arith.constant 0 : i32
    return %c0_i32, %c0_i32_0, %c0_i32_1 : i32, i32, i32
  }
  func.func @transform_8(%arg0: i32) -> (i32, i32) {
    %c0_i32 = arith.constant 0 : i32
    %c0_i32_0 = arith.constant 0 : i32
    %c0_i32_1 = arith.constant 0 : i32
    return %c0_i32, %c0_i32_0 : i32, i32
  }
  func.func @transform_9(%arg0: i32) -> (i32, i32) {
    %c0_i32 = arith.constant 0 : i32
    %c0_i32_0 = arith.constant 0 : i32
    %c0_i32_1 = arith.constant 0 : i32
    return %c0_i32, %c0_i32_0 : i32, i32
  }
  func.func @transform_10(%arg0: i32) -> (i32, i32) {
    %c0_i32 = arith.constant 0 : i32
    %c0_i32_0 = arith.constant 0 : i32
    %c0_i32_1 = arith.constant 0 : i32
    return %c0_i32, %c0_i32_0 : i32, i32
  }
  func.func @transform_11(%arg0: i32) -> (i32, i32) {
    %c0_i32 = arith.constant 0 : i32
    %c0_i32_0 = arith.constant 0 : i32
    return %arg0, %c0_i32 : i32, i32
  }
}

</mosaic_0001>

<bundles_post_ra>
// kernel: cnn_forward.1
= control target key start
LH: loop header
LB: loop body
LE: loop exit
PB: predicated region body
PF: predicated region fallthrough
CT: control target
= control target key end

     0   :  { %s18159_s0 = inlined_call_operand.vmem [shape: f32[2,30,128], index: 0, kind: input, shape index: {}]   ;;  %s18160_s1 = inlined_call_operand.hbm [shape: bf16[3,2,128,512], index: 1, kind: input, shape index: {}]   ;;  %s18161_s2 = inlined_call_operand.hbm [shape: f32[1,512], index: 2, kind: input, shape index: {}]   ;;  %s18162_s3 = inlined_call_operand.hbm [shape: bf16[3,2,512,384], index: 3, kind: input, shape index: {}]   ;;  %s18163_s4 = inlined_call_operand.hbm [shape: f32[1,384], index: 4, kind: input, shape index: {}]   ;;  %s18164_s5 = inlined_call_operand.hbm [shape: bf16[3,1,384,256], index: 5, kind: input, shape index: {}]   ;;  %s18165_s6 = inlined_call_operand.hbm [shape: f32[1,256], index: 6, kind: input, shape index: {}]   ;;  %s18166_s7 = inlined_call_operand.vmem [shape: bf16[4,256,64], index: 7, kind: input, shape index: {}]   ;;  %s18167_s8 = inlined_call_operand.hbm [shape: f32[1,64], index: 8, kind: input, shape index: {}]   ;;  %s18168_s9 = inlined_call_operand.hbm [shape: f32[1,64], index: 9, kind: input, shape index: {}]   ;;  %s18169_s10 = inlined_call_operand.<no memory space> [shape: f32[1,1], index: 10, kind: input, shape index: {}]   ;;  %s18170_s11 = inlined_call_operand.vmem [shape: f32[2,1], index: 11, kind: output, shape index: {}]  }
   0x1   :  { %v16_v0 = vstv %s18169_s10 }
   0x2   :  { %17 = vst [vmem:[#allocation2] sm:$0x1] %v16_v0 }
   0x3   :  { %18 = vsyncpa [#allocation4], 0 }
   0x4   :  { %19 = vsyncpa [#allocation6], 0 }
   0x5   :  { %20 = vsyncpa [#allocation9], 0 }
   0x6   :  { %21 = vsyncpa [#allocation12], 0 }
   0x7   :  { %22 = vsyncpa [#allocation15], 0  ;;  %s15422_s19 = smov [#allocation5]   ;;  %s15423_s21 = smov [#allocation8]  }
   0x8   :  { %s43_s20 = sshll.u32 %s15422_s19, 4  ;;  %s65_s22 = sshll.u32 %s15423_s21, 4  ;;  %s44_s20 = int_to_ptr.vmem [resolvable:$true] %s43_s20  ;;  %s66_s22 = int_to_ptr.vmem [resolvable:$true] %s65_s22 }
   0x9   :  { %s15236_s25 = scalar_lea.hbm %s18161_s2, 64 }
   0xa   :  { %p15237_p0 = scmp.ne.s32.totalorder %s18161_s2, %s15236_s25  ;;  %p15240_p1 = scmp.lt.u32.totalorder %s15236_s25, %s18161_s2 }
   0xc   :  { %p15242_p2 = pnand %p15240_p1, %p15237_p0 }
   0xe   :  { %15245 = shalt.err (!%p15242_p2)
}
   0xf   :  { %s15246_s29 = scalar_lea.vmem %s44_s20, 64  ;;  %p15251_p4 = scmp.lt.s32.totalorder %s44_s20, %s44_s20 }
  0x10   :  { %p15247_p3 = scmp.ne.s32.totalorder %s44_s20, %s15246_s29  ;;  %p15252_p5 = scmp.lt.s32.totalorder %s15246_s29, %s15246_s29 }
  0x12   :  { %p15253_p6 = por %p15252_p5, %p15251_p4 }
  0x14   :  { %p15254_p7 = pnand %p15253_p6, %p15247_p3 }
  0x16   :  { %15257 = shalt.err (!%p15254_p7)
}
  0x17   :  { %46 = dma.hbm_to_vmem [thread:$0]  %s18161_s2, 64, %s44_s20, [#allocation6]  }
  0x18   :  { %s15258_s15 = scalar_lea.hbm %s18163_s4, 48 }
  0x19   :  { %p15259_p8 = scmp.ne.s32.totalorder %s18163_s4, %s15258_s15  ;;  %p15262_p9 = scmp.lt.u32.totalorder %s15258_s15, %s18163_s4 }
  0x1b   :  { %p15264_p10 = pnand %p15262_p9, %p15259_p8 }
  0x1d   :  { %15267 = shalt.err (!%p15264_p10)
}
  0x1e   :  { %s15268_s21 = scalar_lea.vmem %s66_s22, 48  ;;  %s15272_s23 = scalar_lea.vmem %s66_s22, 64 }
  0x1f   :  { %p15269_p11 = scmp.ne.s32.totalorder %s66_s22, %s15268_s21  ;;  %p15273_p12 = scmp.lt.s32.totalorder %s66_s22, %s66_s22 }
  0x20   :  { %p15274_p13 = scmp.lt.s32.totalorder %s15272_s23, %s15268_s21 }
  0x22   :  { %p15275_p0 = por %p15274_p13, %p15273_p12 }
  0x24   :  { %p15276_p1 = pnand %p15275_p0, %p15269_p11 }
  0x26   :  { %15279 = shalt.err (!%p15276_p1)
}
  0x27   :  { %68 = dma.hbm_to_vmem [thread:$0]  %s18163_s4, 48, %s66_s22, [#allocation9]  }
  0x28   :  { %s15424_s24 = smov [#allocation11]   ;;  %s15425_s26 = smov [#allocation3]  }
  0x29   :  { %s87_s25 = sshll.u32 %s15424_s24, 4  ;;  %s30_s27 = sshll.u32 %s15425_s26, 4  ;;  %s88_s25 = int_to_ptr.vmem [resolvable:$true] %s87_s25  ;;  %s15525_s27 = int_to_ptr.vmem [resolvable:$true] %s30_s27 }
  0x2a   :  { %s15280_s29 = scalar_lea.hbm %s18165_s6, 32 }
  0x2b   :  { %p15281_p2 = scmp.ne.s32.totalorder %s18165_s6, %s15280_s29  ;;  %p15284_p3 = scmp.lt.u32.totalorder %s15280_s29, %s18165_s6 }
  0x2d   :  { %p15286_p4 = pnand %p15284_p3, %p15281_p2 }
  0x2f   :  { %15289 = shalt.err (!%p15286_p4)
}
  0x30   :  { %s15290_s4 = scalar_lea.vmem %s88_s25, 32  ;;  %p15295_p6 = scmp.lt.s32.totalorder %s88_s25, %s88_s25 }
  0x31   :  { %p15291_p5 = scmp.ne.s32.totalorder %s88_s25, %s15290_s4  ;;  %p15296_p7 = scmp.lt.s32.totalorder %s15290_s4, %s15290_s4 }
  0x33   :  { %p15297_p8 = por %p15296_p7, %p15295_p6 }
  0x35   :  { %p15298_p9 = pnand %p15297_p8, %p15291_p5 }
  0x37   :  { %15301 = shalt.err (!%p15298_p9)
}
  0x38   :  { %90 = dma.hbm_to_vmem [thread:$0]  %s18165_s6, 32, %s88_s25, [#allocation12]  }
  0x39   :  { %s15302_s18 = scalar_lea.hbm %s18160_s1, 24576 }
  0x3a   :  { %p15303_p10 = scmp.ne.s32.totalorder %s18160_s1, %s15302_s18  ;;  %p15306_p11 = scmp.lt.u32.totalorder %s15302_s18, %s18160_s1 }
  0x3c   :  { %p15308_p12 = pnand %p15306_p11, %p15303_p10 }
  0x3e   :  { %15311 = shalt.err (!%p15308_p12)
}
  0x3f   :  { %s15312_s20 = scalar_lea.vmem %s15525_s27, 24576  ;;  %p15317_p0 = scmp.lt.s32.totalorder %s15525_s27, %s15525_s27 }
  0x40   :  { %p15313_p13 = scmp.ne.s32.totalorder %s15525_s27, %s15312_s20  ;;  %p15318_p1 = scmp.lt.s32.totalorder %s15312_s20, %s15312_s20 }
  0x42   :  { %p15319_p2 = por %p15318_p1, %p15317_p0 }
  0x44   :  { %p15320_p3 = pnand %p15319_p2, %p15313_p13 }
  0x46   :  { %15323 = shalt.err (!%p15320_p3)
}
  0x47   :  { %s15426_s6 = smov 256   ;;  %s15427_s24 = smov 16  }
  0x48   :  { %36 = dma.hbm_to_vmem [thread:$0]  %s18160_s1, 24576, %s15525_s27, [#allocation4], %s15426_s6, %s15426_s6, %s15427_s24  }
  0x49   :  { %s15428_s10 = smov [#allocation7]   ;;  %s15324_s12 = scalar_lea.hbm %s18162_s3, 73728 }
  0x4a   :  { %s52_s28 = sshll.u32 %s15428_s10, 4  ;;  %p15325_p4 = scmp.ne.s32.totalorder %s18162_s3, %s15324_s12  ;;  %s53_s28 = int_to_ptr.vmem [resolvable:$true] %s52_s28 }
  0x4b   :  { %p15328_p5 = scmp.lt.u32.totalorder %s15324_s12, %s18162_s3 }
  0x4d   :  { %p15330_p6 = pnand %p15328_p5, %p15325_p4 }
  0x4f   :  { %15333 = shalt.err (!%p15330_p6)
}
  0x50   :  { %s15334_s15 = scalar_lea.vmem %s53_s28, 73728  ;;  %p15339_p8 = scmp.lt.s32.totalorder %s53_s28, %s53_s28 }
  0x51   :  { %p15335_p7 = scmp.ne.s32.totalorder %s53_s28, %s15334_s15  ;;  %p15340_p9 = scmp.lt.s32.totalorder %s15334_s15, %s15334_s15 }
  0x53   :  { %p15341_p10 = por %p15340_p9, %p15339_p8 }
  0x55   :  { %p15342_p11 = pnand %p15341_p10, %p15335_p7 }
  0x57   :  { %15345 = shalt.err (!%p15342_p11)
}
  0x58   :  { %s15429_s1 = smov 192   ;;  %s15430_s27 = smov 12  }
  0x59   :  { %58 = dma.hbm_to_vmem [thread:$0]  %s18162_s3, 73728, %s53_s28, [#allocation6], %s15429_s1, %s15429_s1, %s15430_s27  }
  0x5a   :  { %s15431_s18 = smov [#allocation10]   ;;  %s15346_s2 = scalar_lea.hbm %s18164_s5, 18432 }
  0x5b   :  { %s74_s19 = sshll.u32 %s15431_s18, 4  ;;  %p15347_p12 = scmp.ne.s32.totalorder %s18164_s5, %s15346_s2  ;;  %s75_s19 = int_to_ptr.vmem [resolvable:$true] %s74_s19 }
  0x5c   :  { %p15350_p13 = scmp.lt.u32.totalorder %s15346_s2, %s18164_s5 }
  0x5e   :  { %p15352_p0 = pnand %p15350_p13, %p15347_p12 }
  0x60   :  { %15355 = shalt.err (!%p15352_p0)
}
  0x61   :  { %s15356_s26 = scalar_lea.vmem %s75_s19, 18432  ;;  %p15361_p2 = scmp.lt.s32.totalorder %s75_s19, %s75_s19 }
  0x62   :  { %p15357_p1 = scmp.ne.s32.totalorder %s75_s19, %s15356_s26  ;;  %p15362_p3 = scmp.lt.s32.totalorder %s15356_s26, %s15356_s26 }
  0x64   :  { %p15363_p4 = por %p15362_p3, %p15361_p2 }
  0x66   :  { %p15364_p5 = pnand %p15363_p4, %p15357_p1 }
  0x68   :  { %15367 = shalt.err (!%p15364_p5)
}
  0x69   :  { %s15432_s3 = smov 128   ;;  %s15433_s10 = smov 8  }
  0x6a   :  { %80 = dma.hbm_to_vmem [thread:$0]  %s18164_s5, 18432, %s75_s19, [#allocation9], %s15432_s3, %s15432_s3, %s15433_s10  }
  0x6b   :  { %s15434_s30 = smov [#allocation13]   ;;  %s15435_s13 = smov [#allocation14]  }
  0x6c   :  { %s99_s12 = sshll.u32 %s15434_s30, 4  ;;  %s109_s14 = sshll.u32 %s15435_s13, 4  ;;  %s100_s12 = int_to_ptr.vmem [resolvable:$true] %s99_s12  ;;  %s110_s14 = int_to_ptr.vmem [resolvable:$true] %s109_s14 }
  0x6d   :  { %s15368_s15 = scalar_lea.hbm %s18167_s8, 16 }
  0x6e   :  { %p15369_p6 = scmp.ne.s32.totalorder %s18167_s8, %s15368_s15  ;;  %p15372_p7 = scmp.lt.u32.totalorder %s15368_s15, %s18167_s8 }
  0x70   :  { %p15374_p8 = pnand %p15372_p7, %p15369_p6 }
  0x72   :  { %15377 = shalt.err (!%p15374_p8)
}
  0x73   :  { %s15378_s5 = scalar_lea.vmem %s100_s12, 16  ;;  %s15382_s18 = scalar_lea.vmem %s100_s12, 32 }
  0x74   :  { %p15379_p9 = scmp.ne.s32.totalorder %s100_s12, %s15378_s5  ;;  %p15383_p10 = scmp.lt.s32.totalorder %s100_s12, %s100_s12 }
  0x75   :  { %p15384_p11 = scmp.lt.s32.totalorder %s15382_s18, %s15378_s5 }
  0x77   :  { %p15385_p12 = por %p15384_p11, %p15383_p10 }
  0x79   :  { %p15386_p13 = pnand %p15385_p12, %p15379_p9 }
  0x7b   :  { %15389 = shalt.err (!%p15386_p13)
}
  0x7c   :  { %102 = dma.hbm_to_vmem [thread:$0]  %s18167_s8, 16, %s100_s12, [#allocation12]  }
  0x7d   :  { %s15390_s20 = scalar_lea.hbm %s18168_s9, 16 }
  0x7e   :  { %p15391_p0 = scmp.ne.s32.totalorder %s18168_s9, %s15390_s20  ;;  %p15394_p1 = scmp.lt.u32.totalorder %s15390_s20, %s18168_s9 }
  0x80   :  { %p15396_p2 = pnand %p15394_p1, %p15391_p0 }
  0x82   :  { %15399 = shalt.err (!%p15396_p2)
}
  0x83   :  { %s15400_s3 = scalar_lea.vmem %s110_s14, 16  ;;  %s15404_s10 = scalar_lea.vmem %s110_s14, 32 }
  0x84   :  { %p15401_p3 = scmp.ne.s32.totalorder %s110_s14, %s15400_s3  ;;  %p15405_p4 = scmp.lt.s32.totalorder %s110_s14, %s110_s14 }
  0x85   :  { %p15406_p5 = scmp.lt.s32.totalorder %s15404_s10, %s15400_s3 }
  0x87   :  { %p15407_p6 = por %p15406_p5, %p15405_p4 }
  0x89   :  { %p15408_p7 = pnand %p15407_p6, %p15401_p3 }
  0x8b   :  { %15411 = shalt.err (!%p15408_p7)
}
  0x8c   :  { %112 = dma.hbm_to_vmem [thread:$0]  %s18168_s9, 16, %s110_s14, [#allocation15]  }
  0x8d   :  { %15412 = dma.done.wait [#allocation4], 24576  }
  0x8e   :  { %15413 = vsyncadd [#allocation4], 4294942720 }
  0x8f   :  { %15414 = dma.done.wait [#allocation6], 73792  }
  0x90   :  { %15415 = vsyncadd [#allocation6], 4294893504 }
  0x91   :  { %15416 = dma.done.wait [#allocation9], 18480  }
  0x92   :  { %15417 = vsyncadd [#allocation9], 4294948816 }
  0x93   :  { %15418 = dma.done.wait [#allocation12], 48  }
  0x94   :  { %15419 = vsyncadd [#allocation12], 4294967248 }
  0x95   :  { %15420 = dma.done.wait [#allocation15], 16  }
  0x96   :  { %15421 = vsyncadd [#allocation15], 4294967280  ;;  %v18171_v1 = vmov 0   ;;  %v13887_v2 = vld [vmem:[#allocation3 + $0x204] ss:$16 sps:$4 sm:$0xff]   ;;  %vm247_vm0 = vcmask 1042432  }
  0x97   :  { %537 = vmatprep.mubr.bf16.mxu0 %v18171_v1  ;;  %608 = vmatprep.mubr.bf16.mxu1 %v18171_v1  ;;  %v13889_v3 = vld [vmem:[#allocation3 + $0x20c] ss:$16 sps:$4 sm:$0xff]   ;;  %v13891_v4 = vld [vmem:[#allocation3 + $0x200] ss:$16 sps:$4 sm:$0xff]   ;;  %v13892_v5 = vld [vmem:[#allocation3 + $0x208] ss:$16 sps:$4 sm:$0xff]  }
  0x98   :  { %505 = vmatprep.subr.bf16.mxu0 %v13887_v2  ;;  %576 = vmatprep.subr.bf16.mxu1 %v13889_v3  ;;  %v13893_v6 = vld [vmem:[#allocation3 + $0x224] ss:$16 sps:$4 sm:$0xff]   ;;  %v13895_v7 = vld [vmem:[#allocation3 + $0x22c] ss:$16 sps:$4 sm:$0xff]   ;;  %v13897_v8 = vld [vmem:[#allocation3 + $0x220] ss:$16 sps:$4 sm:$0xff]  }
  0x99   :  { %506 = vmatpush1.bf16.msra.mxu0 %v13891_v4  ;;  %577 = vmatpush1.bf16.msra.mxu1 %v13892_v5  ;;  %v13898_v9 = vld [vmem:[#allocation3 + $0x228] ss:$16 sps:$4 sm:$0xff]   ;;  %v13899_v10 = vld [vmem:[#allocation3 + $0x244] ss:$16 sps:$4 sm:$0xff]   ;;  %v13901_v11 = vld [vmem:[#allocation3 + $0x24c] ss:$16 sps:$4 sm:$0xff]  }
  0x9a   :  { %507 = vmatprep.subr.bf16.mxu0 %v13893_v6  ;;  %578 = vmatprep.subr.bf16.mxu1 %v13895_v7  ;;  %v13903_v12 = vld [vmem:[#allocation3 + $0x240] ss:$16 sps:$4 sm:$0xff]   ;;  %v13904_v13 = vld [vmem:[#allocation3 + $0x248] ss:$16 sps:$4 sm:$0xff]   ;;  %v13905_v14 = vld [vmem:[#allocation3 + $0x264] ss:$16 sps:$4 sm:$0xff]  }
  0x9b   :  { %v13907_v15 = vld [vmem:[#allocation3 + $0x26c] ss:$16 sps:$4 sm:$0xff]   ;;  %v13909_v16 = vld [vmem:[#allocation3 + $0x260] ss:$16 sps:$4 sm:$0xff]   ;;  %v13910_v17 = vld [vmem:[#allocation3 + $0x268] ss:$16 sps:$4 sm:$0xff]  }
  0x9c   :  { %v13911_v18 = vld [vmem:[#allocation3 + $0x284] ss:$16 sps:$4 sm:$0xff]   ;;  %v13913_v19 = vld [vmem:[#allocation3 + $0x28c] ss:$16 sps:$4 sm:$0xff]   ;;  %v13915_v20 = vld [vmem:[#allocation3 + $0x280] ss:$16 sps:$4 sm:$0xff]  }
  0x9d   :  { %508 = vmatpush1.bf16.msra.mxu0 %v13897_v8  ;;  %579 = vmatpush1.bf16.msra.mxu1 %v13898_v9  ;;  %v13916_v21 = vld [vmem:[#allocation3 + $0x288] ss:$16 sps:$4 sm:$0xff]   ;;  %vm248_vm1 = vcmask 1046532   ;;  %v13917_v22 = vld [vmem:[#allocation3 + $0x2a4] ss:$16 sps:$4 sm:$0xff]   ;;  %vm1586_vm3 = vcmask 1041408  }
  0x9e   :  { %509 = vmatprep.subr.bf16.mxu0 %v13899_v10  ;;  %580 = vmatprep.subr.bf16.mxu1 %v13901_v11  ;;  %v13919_v23 = vld [vmem:[#allocation3 + $0x2ac] ss:$16 sps:$4 sm:$0xff]   ;;  %vm15606_vm2 = vmor %vm247_vm0, %vm248_vm1  ;;  %v13921_v25 = vld [vmem:[#allocation3 + $0x2a0] ss:$16 sps:$4 sm:$0xff]   ;;  %vm1587_vm4 = vcmask 1045508   ;;  %vm4132_vm6 = vcmask 1041409  }
  0x9f   :  { %v13922_v26 = vld [vmem:[#allocation3 + $0x2a8] ss:$16 sps:$4 sm:$0xff]   ;;  %v13923_v27 = vld [vmem:[#allocation3 + $0x2c4] ss:$16 sps:$4 sm:$0xff]   ;;  %v13925_v28 = vld [vmem:[#allocation3 + $0x2cc] ss:$16 sps:$4 sm:$0xff]  }
  0xa0   :  { %v15613_v29 = vld [vmem:[%s18159_s0] sm:$0xff]  ;;  %v15618_v30 = vld [vmem:[%s18159_s0 + $0x8] sm:$0xff]  ;;  %v15623_v32 = vld [vmem:[%s18159_s0 + $0x10] sm:$0xff]  ;;  %vm4135_vm7 = vcmask 1042434   ;;  %vm4138_vm8 = vcmask 1043459   ;;  %vm4141_vm9 = vcmask 1044484  }
  0xa1   :  { %510 = vmatpush1.bf16.msra.mxu0 %v13903_v12  ;;  %581 = vmatpush1.bf16.msra.mxu1 %v13904_v13  ;;  %v13927_v31 = vld [vmem:[#allocation3 + $0x2c0] ss:$16 sps:$4 sm:$0xff]   ;;  %v15627_v33 = vcombine.high %v15613_v29, %v15613_v29  ;;  %v15631_v34 = vcombine.high %v15618_v30, %v15618_v30  ;;  %v12120_v35 = vrot.slane %v15613_v29, 9  ;;  %v255_v36 = vrot.slane %v15618_v30, 5  ;;  %v13928_v37 = vld [vmem:[#allocation3 + $0x2c8] ss:$16 sps:$4 sm:$0xff]   ;;  %vm15676_vm5 = vmor %vm1586_vm3, %vm1587_vm4 }
  0xa2   :  { %511 = vmatprep.subr.bf16.mxu0 %v13905_v14  ;;  %582 = vmatprep.subr.bf16.mxu1 %v13907_v15  ;;  %v13929_v38 = vld [vmem:[#allocation3 + $0x2e4] ss:$16 sps:$4 sm:$0xff]   ;;  %v15637_v39 = vcombine.high %v15623_v32, %v15623_v32  ;;  %v261_v43 = vrot.slane %v15623_v32, 5  ;;  %v13931_v44 = vld [vmem:[#allocation3 + $0x2ec] ss:$16 sps:$4 sm:$0xff]   ;;  %v12250_v14 = vrot.slane %v15613_v29, 10 }
  0xa3   :  { %v252_v40 = vrot.slane %v15627_v33, 5  ;;  %v257_v41 = vrot.slane %v255_v36, 4  ;;  %v258_v42 = vrot.slane %v15631_v34, 5  ;;  %v13933_v46 = vld [vmem:[#allocation3 + $0x2e0] ss:$16 sps:$4 sm:$0xff]   ;;  %v1591_v59 = vrot.slane %v15627_v33, 6 }
  0xa4   :  { %v264_v45 = vrot.slane %v15637_v39, 5  ;;  %v13934_v47 = vld [vmem:[#allocation3 + $0x2e8] ss:$16 sps:$4 sm:$0xff]   ;;  %v13939_v52 = vld [vmem:[#allocation3 + $0x4] ss:$16 sps:$4 sm:$0xff]   ;;  %v263_v53 = vrot.slane %v261_v43, 4 }
  0xa5   :  { %512 = vmatpush1.bf16.msra.mxu0 %v13909_v16  ;;  %583 = vmatpush1.bf16.msra.mxu1 %v13910_v17  ;;  %v253_v48 = vsel %vm15606_vm2, %v12120_v35, %v252_v40  ;;  %v254_v49 = vrot.slane %v252_v40, 4  ;;  %v259_v50 = vsel %vm15606_vm2, %v257_v41, %v258_v42  ;;  %v260_v51 = vrot.slane %v258_v42, 4  ;;  %v15654_v57 = vld [vmem:[%s18159_s0 + $0x18] sm:$0x3f]  ;;  %v15659_v58 = vld [vmem:[%s18159_s0 + $0x20] sm:$0xff] }
  0xa6   :  { %513 = vmatprep.subr.bf16.mxu0 %v13911_v18  ;;  %584 = vmatprep.subr.bf16.mxu1 %v13913_v19  ;;  %v266_v54 = vrot.slane %v264_v45, 4  ;;  %v13942_v62 = vld [vmem:[#allocation3 + $0xc] ss:$16 sps:$4 sm:$0xff]   ;;  %v15664_v63 = vcombine.high %v15659_v58, %v15659_v58  ;;  %v267_v0 = vrot.slane %v15654_v57, 5  ;;  %v15669_v2 = vcombine.high %v15654_v57, %v15654_v57  ;;  %v13937_v5 = vld [vmem:[#allocation3] ss:$16 sps:$4 sm:$0xff]  }
  0xa7   :  { %v256_v55 = vsel %vm15606_vm2, %v254_v49, %v255_v36  ;;  %v262_v56 = vsel %vm15606_vm2, %v260_v51, %v261_v43  ;;  %v12121_v3 = vrot.slane %v15659_v58, 9  ;;  %v13940_v6 = vld [vmem:[#allocation3 + $0x8] ss:$16 sps:$4 sm:$0xff]   ;;  %v13945_v10 = vld [vmem:[#allocation3 + $0x24] ss:$16 sps:$4 sm:$0xff]   ;;  %v265_v11 = vsel %vm15606_vm2, %v263_v53, %v264_v45 }
  0xa8   :  { %v294_v60 = vcombine.low %v253_v48, %v256_v55  ;;  %v295_v61 = vcombine.low %v259_v50, %v262_v56  ;;  %v269_v7 = vrot.slane %v267_v0, 4  ;;  %v274_v8 = vrot.slane %v15664_v63, 5  ;;  %v13948_v15 = vld [vmem:[#allocation3 + $0x2c] ss:$16 sps:$4 sm:$0xff]   ;;  %v13943_v18 = vld [vmem:[#allocation3 + $0x20] ss:$16 sps:$4 sm:$0xff]  }
  0xa9   :  { %514 = vmatpush1.bf16.msra.mxu0 %v13915_v20  ;;  %585 = vmatpush1.bf16.msra.mxu1 %v13916_v21  ;;  %v268_v12 = vsel %vm15606_vm2, %v266_v54, %v267_v0  ;;  %v270_v13 = vrot.slane %v15669_v2, 5  ;;  %v1593_v17 = vrot.slane %v1591_v59, 4  ;;  %v13946_v19 = vld [vmem:[#allocation3 + $0x28] ss:$16 sps:$4 sm:$0xff]   ;;  %v13954_v35 = vld [vmem:[#allocation3 + $0x44] ss:$16 sps:$4 sm:$0xff]  }
  0xaa   :  { %515 = vmatprep.subr.bf16.mxu0 %v13917_v22  ;;  %586 = vmatprep.subr.bf16.mxu1 %v13919_v23  ;;  %v15672_v4 = vpack.c.bf16 %v295_v61, %v294_v60  ;;  %v275_v16 = vsel %vm15606_vm2, %v12121_v3, %v274_v8  ;;  %v15693_v21 = vld [vmem:[%s18159_s0 + $0x28] sm:$0xff]  ;;  %v15697_v22 = vsel %vm15676_vm5, %v12250_v14, %v1591_v59  ;;  %v1594_v23 = vrot.slane %v15618_v30, 6  ;;  %v13952_v48 = vld [vmem:[#allocation3 + $0x40] ss:$16 sps:$4 sm:$0xff]   ;;  %v15738_v55 = vld [vmem:[%s18159_s0 + $0x38] sm:$0x3f] }
  0xab   :  { %v271_v20 = vsel %vm15606_vm2, %v269_v7, %v270_v13  ;;  %v13957_v41 = vld [vmem:[#allocation3 + $0x4c] ss:$16 sps:$4 sm:$0xff]   ;;  %v13955_v50 = vld [vmem:[#allocation3 + $0x48] ss:$16 sps:$4 sm:$0xff]   ;;  %v13960_v51 = vld [vmem:[#allocation3 + $0x64] ss:$16 sps:$4 sm:$0xff]   ;;  %v15744_v60 = vcombine.high %v15738_v55, %v15738_v55 }
  0xac   :  { %v15719_v40 = vsel %vm15676_vm5, %v1593_v17, %v1594_v23  ;;  %v13963_v56 = vld [vmem:[#allocation3 + $0x6c] ss:$16 sps:$4 sm:$0xff]   ;;  %v289_v61 = vrot.slane %v15738_v55, 5  ;;  %v1596_v0 = vrot.slane %v1594_v23, 4  ;;  %v1597_v3 = vrot.slane %v15631_v34, 6 }
  0xad   :  { %516 = vmatpush1.bf16.msra.mxu0 %v13921_v25  ;;  %587 = vmatpush1.bf16.msra.mxu1 %v13922_v26  ;;  %v296_v25 = vcombine.low %v265_v11, %v268_v12  ;;  %v297_v26 = vcombine.low %v271_v20, %v275_v16  ;;  %v292_v12 = vrot.slane %v15744_v60, 5  ;;  %v1600_v16 = vrot.slane %v15623_v32, 6  ;;  %v13966_v20 = vld [vmem:[#allocation3 + $0x80] ss:$16 sps:$4 sm:$0xff]  }
  0xae   :  { %517 = vmatprep.subr.bf16.mxu0 %v13923_v27  ;;  %588 = vmatprep.subr.bf16.mxu1 %v13925_v28  ;;  %v15705_v27 = vld [vmem:[%s18159_s0 + $0x30] sm:$0xff]  ;;  %v15709_v28 = vcombine.high %v15693_v21, %v15693_v21  ;;  %v291_v11 = vrot.slane %v289_v61, 4  ;;  %v1598_v13 = vsel %vm15676_vm5, %v1596_v0, %v1597_v3  ;;  %v1599_v14 = vrot.slane %v1597_v3, 4 }
  0xaf   :  { %v15714_v36 = vcombine.high %v15705_v27, %v15705_v27  ;;  %v1603_v17 = vrot.slane %v15637_v39, 6  ;;  %v1613_v24 = vrot.slane %v15664_v63, 6  ;;  %v1622_v3 = vrot.slane %v15705_v27, 6  ;;  %v13997_v9 = vld [vmem:[#allocation3 + $0x320] ss:$16 sps:$4 sm:$0xff]  }
  0xb0   :  { %v280_v43 = vrot.slane %v15709_v28, 5  ;;  %vm4144_vm10 = vcmask 1045509   ;;  %vm4147_vm11 = vcmask 1046534   ;;  %vm4150_vm12 = vcmask 1047559  }
  0xb1   :  { %518 = vmatpush1.bf16.msra.mxu0 %v13927_v31  ;;  %589 = vmatpush1.bf16.msra.mxu1 %v13928_v37  ;;  %v277_v31 = vrot.slane %v15693_v21, 5  ;;  %v276_v37 = vrot.slane %v274_v8, 4  ;;  %v286_v45 = vrot.slane %v15714_v36, 5  ;;  %v13968_v8 = vld [vmem:[#allocation3 + $0x84] ss:$16 sps:$4 sm:$0xff]   ;;  %vm12091_vm13 = vcmask 517120  }
  0xb2   :  { %519 = vmatprep.subr.bf16.mxu0 %v13929_v38  ;;  %590 = vmatprep.subr.bf16.mxu1 %v13931_v44  ;;  %v283_v38 = vrot.slane %v15705_v27, 5  ;;  %v282_v49 = vrot.slane %v280_v43, 4  ;;  %vm12109_vm14 = vcmask 1024  }
  0xb3   :  { %v279_v42 = vrot.slane %v277_v31, 4 }
  0xb4   :  { %v285_v44 = vrot.slane %v283_v38, 4  ;;  %v284_v59 = vsel %vm15606_vm2, %v282_v49, %v283_v38  ;;  %v1605_v38 = vrot.slane %v1603_v17, 4  ;;  %v13972_v49 = vld [vmem:[#allocation3 + $0xa0] ss:$16 sps:$4 sm:$0xff]  }
  0xb5   :  { %520 = vmatpush1.bf16.msra.mxu0 %v13933_v46  ;;  %591 = vmatpush1.bf16.msra.mxu1 %v13934_v47  ;;  %v1633_v46 = vcombine.low %v15697_v22, %v15719_v40  ;;  %v15727_v47 = vpack.c.bf16 %v297_v26, %v296_v25  ;;  %v281_v53 = vsel %vm15606_vm2, %v279_v42, %v280_v43  ;;  %v13969_v22 = vld [vmem:[#allocation3 + $0x88] ss:$16 sps:$4 sm:$0xff]   ;;  %v1602_v26 = vrot.slane %v1600_v16, 4 }
  0xb6   :  { %807 = vmatprep.subr.bf16.mxu0 %v13939_v52  ;;  %878 = vmatprep.subr.bf16.mxu1 %v13942_v62  ;;  %v278_v52 = vsel %vm15606_vm2, %v276_v37, %v277_v31  ;;  %v287_v54 = vsel %vm15606_vm2, %v285_v44, %v286_v45  ;;  %v13958_v62 = vld [vmem:[#allocation3 + $0x60] ss:$16 sps:$4 sm:$0xff]   ;;  %v1601_v25 = vsel %vm15676_vm5, %v1599_v14, %v1600_v16  ;;  %v13974_v31 = vld [vmem:[#allocation3 + $0xa4] ss:$16 sps:$4 sm:$0xff]   ;;  %v1609_v43 = vrot.slane %v15669_v2, 6 }
  0xb7   :  { %v299_v7 = vcombine.low %v284_v59, %v287_v54  ;;  %v1634_v37 = vcombine.low %v1598_v13, %v1601_v25  ;;  %v1604_v42 = vsel %vm15676_vm5, %v1602_v26, %v1603_v17  ;;  %v12251_v44 = vrot.slane %v15659_v58, 10  ;;  %v13987_v14 = vld [vmem:[#allocation3 + $0xe4] ss:$16 sps:$4 sm:$0xff]   ;;  %v13985_v26 = vld [vmem:[#allocation3 + $0xe0] ss:$16 sps:$4 sm:$0xff]  }
  0xb8   :  { %538 = vmatmul.mubr.bf16.vlgmr.msra.gmra.mrb[0].mxu0 %v15672_v4  ;;  %609 = vmatmul.mubr.bf16.vlgmr.msra.gmra.mrb[0].mxu1 %v15672_v4  ;;  %v1619_v59 = vrot.slane %v15709_v28, 6  ;;  %v1624_v13 = vrot.slane %v1622_v3, 4  ;;  %v1625_v16 = vrot.slane %v15714_v36, 6 }
  0xb9   :  { %808 = vmatpush1.bf16.msra.mxu0 %v13937_v5  ;;  %879 = vmatpush1.bf16.msra.mxu1 %v13940_v6  ;;  %v13961_v5 = vld [vmem:[#allocation3 + $0x68] ss:$16 sps:$4 sm:$0xff]   ;;  %v298_v6 = vcombine.low %v278_v52, %v281_v53  ;;  %v1616_v53 = vrot.slane %v15693_v21, 6  ;;  %v1614_v54 = vsel %vm15676_vm5, %v12251_v44, %v1613_v24 }
  0xba   :  { %809 = vmatprep.subr.bf16.mxu0 %v13945_v10  ;;  %880 = vmatprep.subr.bf16.mxu1 %v13948_v15  ;;  %v288_v10 = vrot.slane %v286_v45, 4  ;;  %v13971_v15 = vld [vmem:[#allocation3 + $0x8c] ss:$16 sps:$4 sm:$0xff]   ;;  %v15770_v45 = vpack.c.bf16 %v1634_v37, %v1633_v46  ;;  %v13981_v46 = vld [vmem:[#allocation3 + $0xc4] ss:$16 sps:$4 sm:$0xff]   ;;  %v1627_v25 = vrot.slane %v1625_v16, 4  ;;  %v163_v37 = vcombine.low %v15618_v30, %v15631_v34 }
  0xbb   :  { %547 = vmatprep.mubr.bf16.mxu0 %v18171_v1  ;;  %618 = vmatprep.mubr.bf16.mxu1 %v18171_v1  ;;  %v1618_v0 = vrot.slane %v1616_v53, 4  ;;  %v13994_v34 = vld [vmem:[#allocation3 + $0x308] ss:$16 sps:$4 sm:$0xff]  }
  0xbc   :  { %v290_v23 = vsel %vm15606_vm2, %v288_v10, %v289_v61  ;;  %v13984_v61 = vld [vmem:[#allocation3 + $0xcc] ss:$16 sps:$4 sm:$0xff]   ;;  %v13982_v10 = vld [vmem:[#allocation3 + $0xc8] ss:$16 sps:$4 sm:$0xff]  }
  0xbd   :  { %810 = vmatpush1.bf16.msra.mxu0 %v13943_v18  ;;  %881 = vmatpush1.bf16.msra.mxu1 %v13946_v19  ;;  %v1606_v18 = vrot.slane %v15654_v57, 6  ;;  %v15758_v19 = vpack.c.bf16 %v299_v7, %v298_v6  ;;  %v1621_v6 = vrot.slane %v1619_v59, 4 }
  0xbe   :  { %811 = vmatprep.subr.bf16.mxu0 %v13954_v35  ;;  %882 = vmatprep.subr.bf16.mxu1 %v13957_v41  ;;  %v293_v35 = vsel %vm15606_vm2, %v291_v11, %v292_v12  ;;  %v13977_v41 = vld [vmem:[#allocation3 + $0xac] ss:$16 sps:$4 sm:$0xff]   ;;  %v1620_v12 = vsel %vm15676_vm5, %v1618_v0, %v1619_v59  ;;  %v167_v59 = vcombine.low %v15709_v28, %v15705_v27  ;;  %v14022_v27 = vld [vmem:[#allocation3 + $0x3a0] ss:$16 sps:$4 sm:$0xff]   ;;  %v14025_v28 = vld [vmem:[#allocation3 + $0x3a8] ss:$16 sps:$4 sm:$0xff]  }
  0xbf   :  { %v1608_v40 = vrot.slane %v1606_v18, 4 }
  0xc0   :  { %548 = vmatmul.mubr.bf16.gmra.mrb[4].mxu0 %v15727_v47  ;;  %619 = vmatmul.mubr.bf16.gmra.mrb[4].mxu1 %v15727_v47 }
  0xc1   :  { %812 = vmatpush1.bf16.msra.mxu0 %v13952_v48  ;;  %883 = vmatpush1.bf16.msra.mxu1 %v13955_v50  ;;  %v1607_v48 = vsel %vm15676_vm5, %v1605_v38, %v1606_v18  ;;  %v13975_v50 = vld [vmem:[#allocation3 + $0xa8] ss:$16 sps:$4 sm:$0xff]   ;;  %v1610_v52 = vsel %vm15676_vm5, %v1608_v40, %v1609_v43  ;;  %v1628_v18 = vrot.slane %v15738_v55, 6 }
  0xc2   :  { %813 = vmatprep.subr.bf16.mxu0 %v13960_v51  ;;  %884 = vmatprep.subr.bf16.mxu1 %v13963_v56  ;;  %v300_v51 = vcombine.low %v290_v23, %v293_v35  ;;  %v1635_v2 = vcombine.low %v1604_v42, %v1607_v48  ;;  %v1615_v56 = vrot.slane %v1613_v24, 4  ;;  %v1626_v23 = vsel %vm15676_vm5, %v1624_v13, %v1625_v16  ;;  %v13996_v42 = vld [vmem:[#allocation3 + $0x30c] ss:$16 sps:$4 sm:$0xff]   ;;  %v13999_v48 = vld [vmem:[#allocation3 + $0x324] ss:$16 sps:$4 sm:$0xff]  }
  0xc3   :  { %557 = vmatprep.mubr.bf16.mxu0 %v18171_v1  ;;  %628 = vmatprep.mubr.bf16.mxu1 %v18171_v1  ;;  %v162_v35 = vcombine.low %v15613_v29, %v15627_v33  ;;  %v1630_v40 = vrot.slane %v1628_v18, 4  ;;  %v13991_v33 = vld [vmem:[#allocation3 + $0x300] ss:$16 sps:$4 sm:$0xff]   ;;  %v14002_v24 = vld [vmem:[#allocation3 + $0x32c] ss:$16 sps:$4 sm:$0xff]  }
  0xc4   :  { %v15788_v7 = vpack.c.bf16 %v300_v51, %v300_v51  ;;  %v165_v51 = vcombine.low %v15654_v57, %v15659_v58  ;;  %v14010_v57 = vld [vmem:[#allocation3 + $0x360] ss:$16 sps:$4 sm:$0xff]   ;;  %v14013_v58 = vld [vmem:[#allocation3 + $0x368] ss:$16 sps:$4 sm:$0xff]  }
  0xc5   :  { %814 = vmatpush1.bf16.msra.mxu0 %v13958_v62  ;;  %885 = vmatpush1.bf16.msra.mxu1 %v13961_v5  ;;  %v1636_v62 = vcombine.low %v1610_v52, %v1614_v54  ;;  %v1617_v5 = vsel %vm15676_vm5, %v1615_v56, %v1616_v53  ;;  %v15817_v30 = vpack.c.bf16 %v163_v37, %v162_v35  ;;  %v14006_v52 = vld [vmem:[#allocation3 + $0x344] ss:$16 sps:$4 sm:$0xff]   ;;  %v14007_v54 = vld [vmem:[#allocation3 + $0x348] ss:$16 sps:$4 sm:$0xff]   ;;  %v14028_v13 = vld [vmem:[#allocation3 + $0x3c0] ss:$16 sps:$4 sm:$0xff]  }
  0xc6   :  { %815 = vmatprep.subr.bf16.mxu0 %v13968_v8  ;;  %886 = vmatprep.subr.bf16.mxu1 %v13971_v15  ;;  %v13979_v8 = vld [vmem:[#allocation3 + $0xc0] ss:$16 sps:$4 sm:$0xff]   ;;  %v1623_v15 = vsel %vm15676_vm5, %v1621_v6, %v1622_v3  ;;  %v1637_v17 = vcombine.low %v1617_v5, %v1620_v12  ;;  %v166_v56 = vcombine.low %v15664_v63, %v15693_v21  ;;  %v14019_v5 = vld [vmem:[#allocation3 + $0x388] ss:$16 sps:$4 sm:$0xff]   ;;  %v14024_v63 = vld [vmem:[#allocation3 + $0x3a4] ss:$16 sps:$4 sm:$0xff]  }
  0xc7   :  { %v15790_v11 = vpack.c.bf16 %v1636_v62, %v1635_v2  ;;  %v1638_v38 = vcombine.low %v1623_v15, %v1626_v23  ;;  %v14009_v2 = vld [vmem:[#allocation3 + $0x34c] ss:$16 sps:$4 sm:$0xff]   ;;  %v14016_v3 = vld [vmem:[#allocation3 + $0x380] ss:$16 sps:$4 sm:$0xff]   ;;  %v168_v6 = vcombine.low %v15714_v36, %v15738_v55  ;;  %v14036_v15 = vld [vmem:[#allocation3 + $0x3e4] ss:$16 sps:$4 sm:$0xff]  }
  0xc8   :  { %558 = vmatmul.mubr.bf16.gmra.mrb[8].mxu0 %v15758_v19  ;;  %629 = vmatmul.mubr.bf16.gmra.mrb[8].mxu1 %v15758_v19  ;;  %v14021_v62 = vld [vmem:[#allocation3 + $0x38c] ss:$16 sps:$4 sm:$0xff]   ;;  %v15837_v0 = vpack.c.bf16 %v167_v59, %v166_v56  ;;  %v14034_v55 = vld [vmem:[#allocation3 + $0x3e0] ss:$16 sps:$4 sm:$0xff]   ;;  %v14037_v16 = vld [vmem:[#allocation3 + $0x3e8] ss:$16 sps:$4 sm:$0xff]  }
  0xc9   :  { %816 = vmatpush1.bf16.msra.mxu0 %v13966_v20  ;;  %887 = vmatpush1.bf16.msra.mxu1 %v13969_v22  ;;  %v13990_v20 = vld [vmem:[#allocation3 + $0xec] ss:$16 sps:$4 sm:$0xff]   ;;  %v1631_v22 = vrot.slane %v15744_v60, 6  ;;  %v13993_v60 = vld [vmem:[#allocation3 + $0x304] ss:$16 sps:$4 sm:$0xff]   ;;  %v15809_v43 = vpack.c.bf16 %v1638_v38, %v1637_v17  ;;  %v15845_v12 = vpack.c.bf16 %v168_v6, %v168_v6 }
  0xca   :  { %817 = vmatprep.subr.bf16.mxu0 %v13974_v31  ;;  %888 = vmatprep.subr.bf16.mxu1 %v13977_v41  ;;  %v13988_v31 = vld [vmem:[#allocation3 + $0xe8] ss:$16 sps:$4 sm:$0xff]   ;;  %v1629_v41 = vsel %vm15676_vm5, %v1627_v25, %v1628_v18  ;;  %v14027_v21 = vld [vmem:[#allocation3 + $0x3ac] ss:$16 sps:$4 sm:$0xff]   ;;  %v14042_v17 = vld [vmem:[#allocation3 + $0x104] ss:$16 sps:$4 sm:$0xff]  }
  0xcb   :  { %567 = vmatprep.mubr.bf16.mxu0 %v18171_v1  ;;  %638 = vmatprep.mubr.bf16.mxu1 %v18171_v1  ;;  %v1632_v44 = vsel %vm15676_vm5, %v1630_v40, %v1631_v22  ;;  %v14039_v36 = vld [vmem:[#allocation3 + $0x3ec] ss:$16 sps:$4 sm:$0xff]   ;;  %v14043_v22 = vld [vmem:[#allocation3 + $0x108] ss:$16 sps:$4 sm:$0xff]   ;;  %v14048_v23 = vld [vmem:[#allocation3 + $0x124] ss:$16 sps:$4 sm:$0xff]  }
  0xcc   :  { %v15815_v29 = vcombine.low %v1629_v41, %v1632_v44  ;;  %v14045_v18 = vld [vmem:[#allocation3 + $0x10c] ss:$16 sps:$4 sm:$0xff]   ;;  %v14054_v35 = vld [vmem:[#allocation3 + $0x144] ss:$16 sps:$4 sm:$0xff]   ;;  %v14052_v38 = vld [vmem:[#allocation3 + $0x140] ss:$16 sps:$4 sm:$0xff]  }
  0xcd   :  { %818 = vmatpush1.bf16.msra.mxu0 %v13972_v49  ;;  %889 = vmatpush1.bf16.msra.mxu1 %v13975_v50  ;;  %v14000_v49 = vld [vmem:[#allocation3 + $0x328] ss:$16 sps:$4 sm:$0xff]   ;;  %v164_v50 = vcombine.low %v15623_v32, %v15637_v39  ;;  %v14012_v32 = vld [vmem:[#allocation3 + $0x364] ss:$16 sps:$4 sm:$0xff]   ;;  %v14015_v39 = vld [vmem:[#allocation3 + $0x36c] ss:$16 sps:$4 sm:$0xff]  }
  0xce   :  { %819 = vmatprep.subr.bf16.mxu0 %v13981_v46  ;;  %890 = vmatprep.subr.bf16.mxu1 %v13984_v61  ;;  %v14004_v46 = vld [vmem:[#allocation3 + $0x340] ss:$16 sps:$4 sm:$0xff]   ;;  %v14018_v61 = vld [vmem:[#allocation3 + $0x384] ss:$16 sps:$4 sm:$0xff]   ;;  %v14051_v25 = vld [vmem:[#allocation3 + $0x12c] ss:$16 sps:$4 sm:$0xff]  }
  0xcf   :  { %v15827_v53 = vpack.c.bf16 %v165_v51, %v164_v50  ;;  %v14057_v37 = vld [vmem:[#allocation3 + $0x14c] ss:$16 sps:$4 sm:$0xff]   ;;  %v14055_v40 = vld [vmem:[#allocation3 + $0x148] ss:$16 sps:$4 sm:$0xff]   ;;  %v14058_v41 = vld [vmem:[#allocation3 + $0x160] ss:$16 sps:$4 sm:$0xff]  }
  0xd0   :  { %568 = vmatmul.mubr.bf16.gmra.mrb[12].mxu0 %v15788_v7  ;;  %639 = vmatmul.mubr.bf16.gmra.mrb[12].mxu1 %v15788_v7  ;;  %v14066_v44 = vld [vmem:[#allocation3 + $0x184] ss:$16 sps:$4 sm:$0xff]   ;;  %v14081_v51 = vld [vmem:[#allocation3 + $0x1cc] ss:$16 sps:$4 sm:$0xff]   ;;  %v14091_v56 = vld [vmem:[#allocation3 + $0x408] ss:$16 sps:$4 sm:$0xff]  }
  0xd1   :  { %820 = vmatpush1.bf16.msra.mxu0 %v13979_v8  ;;  %891 = vmatpush1.bf16.msra.mxu1 %v13982_v10  ;;  %v14030_v8 = vld [vmem:[#allocation3 + $0x3c4] ss:$16 sps:$4 sm:$0xff]   ;;  %v14033_v10 = vld [vmem:[#allocation3 + $0x3cc] ss:$16 sps:$4 sm:$0xff]   ;;  %v14106_v6 = vld [vmem:[#allocation3 + $0x460] ss:$16 sps:$4 sm:$0xff]  }
  0xd2   :  { %821 = vmatprep.subr.bf16.mxu0 %v13987_v14  ;;  %892 = vmatprep.subr.bf16.mxu1 %v13990_v20  ;;  %v14031_v14 = vld [vmem:[#allocation3 + $0x3c8] ss:$16 sps:$4 sm:$0xff]   ;;  %v14040_v20 = vld [vmem:[#allocation3 + $0x100] ss:$16 sps:$4 sm:$0xff]   ;;  %v14078_v50 = vld [vmem:[#allocation3 + $0x1c4] ss:$16 sps:$4 sm:$0xff]  }
  0xd3   :  { %839 = vmatprep.mubr.bf16.mxu0 %v18171_v1  ;;  %910 = vmatprep.mubr.bf16.mxu1 %v18171_v1  ;;  %v14096_v59 = vld [vmem:[#allocation3 + $0x424] ss:$16 sps:$4 sm:$0xff]  }
  0xd5   :  { %822 = vmatpush1.bf16.msra.mxu0 %v13985_v26  ;;  %893 = vmatpush1.bf16.msra.mxu1 %v13988_v31  ;;  %v14046_v26 = vld [vmem:[#allocation3 + $0x120] ss:$16 sps:$4 sm:$0xff]   ;;  %v14049_v31 = vld [vmem:[#allocation3 + $0x128] ss:$16 sps:$4 sm:$0xff]  }
  0xd6   :  { %1142 = vmatprep.subr.bf16.mxu0 %v13993_v60  ;;  %1213 = vmatprep.subr.bf16.mxu1 %v13996_v42  ;;  %v14060_v60 = vld [vmem:[#allocation3 + $0x164] ss:$16 sps:$4 sm:$0xff]   ;;  %v14061_v42 = vld [vmem:[#allocation3 + $0x168] ss:$16 sps:$4 sm:$0xff]  }
  0xd8   :  { %840 = vmatmul.mubr.bf16.vlgmr.msra.gmra.mrb[0].mxu0 %v15817_v30  ;;  %911 = vmatmul.mubr.bf16.vlgmr.msra.gmra.mrb[0].mxu1 %v15817_v30 }
  0xd9   :  { %1143 = vmatpush1.bf16.msra.mxu0 %v13991_v33  ;;  %1214 = vmatpush1.bf16.msra.mxu1 %v13994_v34  ;;  %v14069_v33 = vld [vmem:[#allocation3 + $0x18c] ss:$16 sps:$4 sm:$0xff]   ;;  %v14064_v34 = vld [vmem:[#allocation3 + $0x180] ss:$16 sps:$4 sm:$0xff]  }
  0xda   :  { %1144 = vmatprep.subr.bf16.mxu0 %v13999_v48  ;;  %1215 = vmatprep.subr.bf16.mxu1 %v14002_v24  ;;  %v14067_v48 = vld [vmem:[#allocation3 + $0x188] ss:$16 sps:$4 sm:$0xff]   ;;  %v14072_v24 = vld [vmem:[#allocation3 + $0x1a4] ss:$16 sps:$4 sm:$0xff]  }
  0xdb   :  { %849 = vmatprep.mubr.bf16.mxu0 %v18171_v1  ;;  %920 = vmatprep.mubr.bf16.mxu1 %v18171_v1 }
  0xdd   :  { %1145 = vmatpush1.bf16.msra.mxu0 %v13997_v9  ;;  %1216 = vmatpush1.bf16.msra.mxu1 %v14000_v49  ;;  %v14070_v9 = vld [vmem:[#allocation3 + $0x1a0] ss:$16 sps:$4 sm:$0xff]   ;;  %v14073_v49 = vld [vmem:[#allocation3 + $0x1a8] ss:$16 sps:$4 sm:$0xff]  }
  0xde   :  { %1146 = vmatprep.subr.bf16.mxu0 %v14006_v52  ;;  %1217 = vmatprep.subr.bf16.mxu1 %v14009_v2  ;;  %v14076_v52 = vld [vmem:[#allocation3 + $0x1c0] ss:$16 sps:$4 sm:$0xff]   ;;  %v14079_v2 = vld [vmem:[#allocation3 + $0x1c8] ss:$16 sps:$4 sm:$0xff]  }
  0xe0   :  { %850 = vmatmul.mubr.bf16.gmra.mrb[4].mxu0 %v15827_v53  ;;  %921 = vmatmul.mubr.bf16.gmra.mrb[4].mxu1 %v15827_v53 }
  0xe1   :  { %1147 = vmatpush1.bf16.msra.mxu0 %v14004_v46  ;;  %1218 = vmatpush1.bf16.msra.mxu1 %v14007_v54  ;;  %v14084_v46 = vld [vmem:[#allocation3 + $0x1e4] ss:$16 sps:$4 sm:$0xff]   ;;  %v14082_v54 = vld [vmem:[#allocation3 + $0x1e0] ss:$16 sps:$4 sm:$0xff]  }
  0xe2   :  { %1148 = vmatprep.subr.bf16.mxu0 %v14012_v32  ;;  %1219 = vmatprep.subr.bf16.mxu1 %v14015_v39  ;;  %v14085_v32 = vld [vmem:[#allocation3 + $0x1e8] ss:$16 sps:$4 sm:$0xff]   ;;  %v14090_v39 = vld [vmem:[#allocation3 + $0x404] ss:$16 sps:$4 sm:$0xff]  }
  0xe3   :  { %859 = vmatprep.mubr.bf16.mxu0 %v18171_v1  ;;  %930 = vmatprep.mubr.bf16.mxu1 %v18171_v1 }
  0xe5   :  { %1149 = vmatpush1.bf16.msra.mxu0 %v14010_v57  ;;  %1220 = vmatpush1.bf16.msra.mxu1 %v14013_v58  ;;  %v14093_v57 = vld [vmem:[#allocation3 + $0x40c] ss:$16 sps:$4 sm:$0xff]   ;;  %v14088_v58 = vld [vmem:[#allocation3 + $0x400] ss:$16 sps:$4 sm:$0xff]  }
  0xe6   :  { %1150 = vmatprep.subr.bf16.mxu0 %v14018_v61  ;;  %1221 = vmatprep.subr.bf16.mxu1 %v14021_v62  ;;  %v14094_v61 = vld [vmem:[#allocation3 + $0x420] ss:$16 sps:$4 sm:$0xff]   ;;  %v14097_v62 = vld [vmem:[#allocation3 + $0x428] ss:$16 sps:$4 sm:$0xff]  }
  0xe8   :  { %860 = vmatmul.mubr.bf16.gmra.mrb[8].mxu0 %v15837_v0  ;;  %931 = vmatmul.mubr.bf16.gmra.mrb[8].mxu1 %v15837_v0 }
  0xe9   :  { %1151 = vmatpush1.bf16.msra.mxu0 %v14016_v3  ;;  %1222 = vmatpush1.bf16.msra.mxu1 %v14019_v5  ;;  %v14102_v3 = vld [vmem:[#allocation3 + $0x444] ss:$16 sps:$4 sm:$0xff]   ;;  %v14105_v5 = vld [vmem:[#allocation3 + $0x44c] ss:$16 sps:$4 sm:$0xff]  }
  0xea   :  { %1152 = vmatprep.subr.bf16.mxu0 %v14024_v63  ;;  %1223 = vmatprep.subr.bf16.mxu1 %v14027_v21  ;;  %v14100_v63 = vld [vmem:[#allocation3 + $0x440] ss:$16 sps:$4 sm:$0xff]   ;;  %v14103_v21 = vld [vmem:[#allocation3 + $0x448] ss:$16 sps:$4 sm:$0xff]  }
  0xeb   :  { %869 = vmatprep.mubr.bf16.mxu0 %v18171_v1  ;;  %940 = vmatprep.mubr.bf16.mxu1 %v18171_v1 }
  0xed   :  { %1153 = vmatpush1.bf16.msra.mxu0 %v14022_v27  ;;  %1224 = vmatpush1.bf16.msra.mxu1 %v14025_v28  ;;  %v14108_v27 = vld [vmem:[#allocation3 + $0x464] ss:$16 sps:$4 sm:$0xff]   ;;  %v14111_v28 = vld [vmem:[#allocation3 + $0x46c] ss:$16 sps:$4 sm:$0xff]  }
  0xee   :  { %1154 = vmatprep.subr.bf16.mxu0 %v14030_v8  ;;  %1225 = vmatprep.subr.bf16.mxu1 %v14033_v10  ;;  %v14114_v8 = vld [vmem:[#allocation3 + $0x484] ss:$16 sps:$4 sm:$0xff]   ;;  %v14117_v10 = vld [vmem:[#allocation3 + $0x48c] ss:$16 sps:$4 sm:$0xff]  }
  0xf0   :  { %870 = vmatmul.mubr.bf16.gmra.mrb[12].mxu0 %v15845_v12  ;;  %941 = vmatmul.mubr.bf16.gmra.mrb[12].mxu1 %v15845_v12 }
  0xf1   :  { %1155 = vmatpush1.bf16.msra.mxu0 %v14028_v13  ;;  %1226 = vmatpush1.bf16.msra.mxu1 %v14031_v14  ;;  %v14112_v13 = vld [vmem:[#allocation3 + $0x480] ss:$16 sps:$4 sm:$0xff]   ;;  %v14115_v14 = vld [vmem:[#allocation3 + $0x488] ss:$16 sps:$4 sm:$0xff]  }
  0xf2   :  { %1156 = vmatprep.subr.bf16.mxu0 %v14036_v15  ;;  %1227 = vmatprep.subr.bf16.mxu1 %v14039_v36  ;;  %v14120_v15 = vld [vmem:[#allocation3 + $0x4a4] ss:$16 sps:$4 sm:$0xff]   ;;  %v14123_v36 = vld [vmem:[#allocation3 + $0x4ac] ss:$16 sps:$4 sm:$0xff]  }
  0xf3   :  { %1174 = vmatprep.mubr.bf16.mxu0 %v18171_v1  ;;  %1245 = vmatprep.mubr.bf16.mxu1 %v18171_v1 }
  0xf5   :  { %1157 = vmatpush1.bf16.msra.mxu0 %v14034_v55  ;;  %1228 = vmatpush1.bf16.msra.mxu1 %v14037_v16  ;;  %v14118_v55 = vld [vmem:[#allocation3 + $0x4a0] ss:$16 sps:$4 sm:$0xff]   ;;  %v14126_v16 = vld [vmem:[#allocation3 + $0x4c4] ss:$16 sps:$4 sm:$0xff]  }
  0xf6   :  { %1444 = vmatprep.subr.bf16.mxu0 %v14042_v17  ;;  %1515 = vmatprep.subr.bf16.mxu1 %v14045_v18  ;;  %v14129_v17 = vld [vmem:[#allocation3 + $0x4cc] ss:$16 sps:$4 sm:$0xff]   ;;  %v14124_v18 = vld [vmem:[#allocation3 + $0x4c0] ss:$16 sps:$4 sm:$0xff]  }
  0xf8   :  { %1175 = vmatmul.mubr.bf16.vlgmr.msra.gmra.mrb[16].mxu0 %v15672_v4  ;;  %1246 = vmatmul.mubr.bf16.vlgmr.msra.gmra.mrb[16].mxu1 %v15672_v4  ;;  %v14063_v4 = vld [vmem:[#allocation3 + $0x16c] ss:$16 sps:$4 sm:$0xff]  }
  0xf9   :  { %1445 = vmatpush1.bf16.msra.mxu0 %v14040_v20  ;;  %1516 = vmatpush1.bf16.msra.mxu1 %v14043_v22  ;;  %v14127_v20 = vld [vmem:[#allocation3 + $0x4c8] ss:$16 sps:$4 sm:$0xff]   ;;  %v14132_v22 = vld [vmem:[#allocation3 + $0x4e4] ss:$16 sps:$4 sm:$0xff]  }
  0xfa   :  { %1446 = vmatprep.subr.bf16.mxu0 %v14048_v23  ;;  %1517 = vmatprep.subr.bf16.mxu1 %v14051_v25  ;;  %v14135_v23 = vld [vmem:[#allocation3 + $0x4ec] ss:$16 sps:$4 sm:$0xff]   ;;  %v14130_v25 = vld [vmem:[#allocation3 + $0x4e0] ss:$16 sps:$4 sm:$0xff]  }
  0xfb   :  { %1184 = vmatprep.mubr.bf16.mxu0 %v18171_v1  ;;  %1255 = vmatprep.mubr.bf16.mxu1 %v18171_v1 }
  0xfd   :  { %1447 = vmatpush1.bf16.msra.mxu0 %v14046_v26  ;;  %1518 = vmatpush1.bf16.msra.mxu1 %v14049_v31  ;;  %v14138_v26 = vld [vmem:[#allocation3 + $0x504] ss:$16 sps:$4 sm:$0xff]   ;;  %v14141_v31 = vld [vmem:[#allocation3 + $0x50c] ss:$16 sps:$4 sm:$0xff]  }
  0xfe   :  { %1448 = vmatprep.subr.bf16.mxu0 %v14054_v35  ;;  %1519 = vmatprep.subr.bf16.mxu1 %v14057_v37  ;;  %v14136_v35 = vld [vmem:[#allocation3 + $0x500] ss:$16 sps:$4 sm:$0xff]   ;;  %v14139_v37 = vld [vmem:[#allocation3 + $0x508] ss:$16 sps:$4 sm:$0xff]  }
 0x100   :  { %1185 = vmatmul.mubr.bf16.gmra.mrb[20].mxu0 %v15727_v47  ;;  %1256 = vmatmul.mubr.bf16.gmra.mrb[20].mxu1 %v15727_v47  ;;  %v14075_v47 = vld [vmem:[#allocation3 + $0x1ac] ss:$16 sps:$4 sm:$0xff]  }
 0x101   :  { %1449 = vmatpush1.bf16.msra.mxu0 %v14052_v38  ;;  %1520 = vmatpush1.bf16.msra.mxu1 %v14055_v40  ;;  %v14144_v38 = vld [vmem:[#allocation3 + $0x524] ss:$16 sps:$4 sm:$0xff]   ;;  %v14147_v40 = vld [vmem:[#allocation3 + $0x52c] ss:$16 sps:$4 sm:$0xff]  }
 0x102   :  { %1450 = vmatprep.subr.bf16.mxu0 %v14060_v60  ;;  %1521 = vmatprep.subr.bf16.mxu1 %v14063_v4  ;;  %v14142_v60 = vld [vmem:[#allocation3 + $0x520] ss:$16 sps:$4 sm:$0xff]   ;;  %v14150_v4 = vld [vmem:[#allocation3 + $0x544] ss:$16 sps:$4 sm:$0xff]  }
 0x103   :  { %1194 = vmatprep.mubr.bf16.mxu0 %v18171_v1  ;;  %1265 = vmatprep.mubr.bf16.mxu1 %v18171_v1 }
 0x105   :  { %1451 = vmatpush1.bf16.msra.mxu0 %v14058_v41  ;;  %1522 = vmatpush1.bf16.msra.mxu1 %v14061_v42  ;;  %v14153_v41 = vld [vmem:[#allocation3 + $0x54c] ss:$16 sps:$4 sm:$0xff]   ;;  %v14148_v42 = vld [vmem:[#allocation3 + $0x540] ss:$16 sps:$4 sm:$0xff]  }
 0x106   :  { %1452 = vmatprep.subr.bf16.mxu0 %v14066_v44  ;;  %1523 = vmatprep.subr.bf16.mxu1 %v14069_v33  ;;  %v14151_v44 = vld [vmem:[#allocation3 + $0x548] ss:$16 sps:$4 sm:$0xff]   ;;  %v14156_v33 = vld [vmem:[#allocation3 + $0x564] ss:$16 sps:$4 sm:$0xff]  }
 0x108   :  { %1195 = vmatmul.mubr.bf16.gmra.mrb[24].mxu0 %v15758_v19  ;;  %1266 = vmatmul.mubr.bf16.gmra.mrb[24].mxu1 %v15758_v19  ;;  %v14087_v19 = vld [vmem:[#allocation3 + $0x1ec] ss:$16 sps:$4 sm:$0xff]  }
 0x109   :  { %1453 = vmatpush1.bf16.msra.mxu0 %v14064_v34  ;;  %1524 = vmatpush1.bf16.msra.mxu1 %v14067_v48  ;;  %v14159_v34 = vld [vmem:[#allocation3 + $0x56c] ss:$16 sps:$4 sm:$0xff]   ;;  %v14154_v48 = vld [vmem:[#allocation3 + $0x560] ss:$16 sps:$4 sm:$0xff]  }
 0x10a   :  { %1454 = vmatprep.subr.bf16.mxu0 %v14072_v24  ;;  %1525 = vmatprep.subr.bf16.mxu1 %v14075_v47  ;;  %v14157_v24 = vld [vmem:[#allocation3 + $0x568] ss:$16 sps:$4 sm:$0xff]   ;;  %v14162_v47 = vld [vmem:[#allocation3 + $0x584] ss:$16 sps:$4 sm:$0xff]  }
 0x10b   :  { %1204 = vmatprep.mubr.bf16.mxu0 %v18171_v1  ;;  %1275 = vmatprep.mubr.bf16.mxu1 %v18171_v1 }
 0x10d   :  { %1455 = vmatpush1.bf16.msra.mxu0 %v14070_v9  ;;  %1526 = vmatpush1.bf16.msra.mxu1 %v14073_v49  ;;  %v14165_v9 = vld [vmem:[#allocation3 + $0x58c] ss:$16 sps:$4 sm:$0xff]   ;;  %v14160_v49 = vld [vmem:[#allocation3 + $0x580] ss:$16 sps:$4 sm:$0xff]  }
 0x10e   :  { %1456 = vmatprep.subr.bf16.mxu0 %v14078_v50  ;;  %1527 = vmatprep.subr.bf16.mxu1 %v14081_v51  ;;  %v14163_v50 = vld [vmem:[#allocation3 + $0x588] ss:$16 sps:$4 sm:$0xff]   ;;  %v14168_v51 = vld [vmem:[#allocation3 + $0x5a4] ss:$16 sps:$4 sm:$0xff]  }
 0x110   :  { %1205 = vmatmul.mubr.bf16.gmra.mrb[28].mxu0 %v15788_v7  ;;  %1276 = vmatmul.mubr.bf16.gmra.mrb[28].mxu1 %v15788_v7  ;;  %v14099_v7 = vld [vmem:[#allocation3 + $0x42c] ss:$16 sps:$4 sm:$0xff]  }
 0x111   :  { %1457 = vmatpush1.bf16.msra.mxu0 %v14076_v52  ;;  %1528 = vmatpush1.bf16.msra.mxu1 %v14079_v2  ;;  %v14171_v52 = vld [vmem:[#allocation3 + $0x5ac] ss:$16 sps:$4 sm:$0xff]   ;;  %v14166_v2 = vld [vmem:[#allocation3 + $0x5a0] ss:$16 sps:$4 sm:$0xff]  }
 0x112   :  { %1458 = vmatprep.subr.bf16.mxu0 %v14084_v46  ;;  %1529 = vmatprep.subr.bf16.mxu1 %v14087_v19  ;;  %v14169_v46 = vld [vmem:[#allocation3 + $0x5a8] ss:$16 sps:$4 sm:$0xff]   ;;  %v14174_v19 = vld [vmem:[#allocation3 + $0x5c4] ss:$16 sps:$4 sm:$0xff]  }
 0x113   :  { %1476 = vmatprep.mubr.bf16.mxu0 %v18171_v1  ;;  %1547 = vmatprep.mubr.bf16.mxu1 %v18171_v1 }
 0x115   :  { %1459 = vmatpush1.bf16.msra.mxu0 %v14082_v54  ;;  %1530 = vmatpush1.bf16.msra.mxu1 %v14085_v32  ;;  %v14177_v54 = vld [vmem:[#allocation3 + $0x5cc] ss:$16 sps:$4 sm:$0xff]   ;;  %v14172_v32 = vld [vmem:[#allocation3 + $0x5c0] ss:$16 sps:$4 sm:$0xff]  }
 0x116   :  { %1844 = vmatprep.subr.bf16.mxu0 %v14090_v39  ;;  %1915 = vmatprep.subr.bf16.mxu1 %v14093_v57  ;;  %v14175_v39 = vld [vmem:[#allocation3 + $0x5c8] ss:$16 sps:$4 sm:$0xff]   ;;  %v1650_v57 = vpack.c.bf16 %v15815_v29, %v15815_v29 }
 0x117   :  { %v14186_v29 = vld [vmem:[#allocation7 + $0x604] ss:$12 sps:$4 sm:$0xff]  }
 0x118   :  { %1477 = vmatmul.mubr.bf16.vlgmr.msra.gmra.mrb[16].mxu0 %v15817_v30  ;;  %1548 = vmatmul.mubr.bf16.vlgmr.msra.gmra.mrb[16].mxu1 %v15817_v30  ;;  %v14109_v30 = vld [vmem:[#allocation3 + $0x468] ss:$16 sps:$4 sm:$0xff]  }
 0x119   :  { %1845 = vmatpush1.bf16.msra.mxu0 %v14088_v58  ;;  %1916 = vmatpush1.bf16.msra.mxu1 %v14091_v56  ;;  %v14180_v58 = vld [vmem:[#allocation3 + $0x5e4] ss:$16 sps:$4 sm:$0xff]   ;;  %v14183_v56 = vld [vmem:[#allocation3 + $0x5ec] ss:$16 sps:$4 sm:$0xff]  }
 0x11a   :  { %1846 = vmatprep.subr.bf16.mxu0 %v14096_v59  ;;  %1917 = vmatprep.subr.bf16.mxu1 %v14099_v7  ;;  %v14178_v59 = vld [vmem:[#allocation3 + $0x5e0] ss:$16 sps:$4 sm:$0xff]   ;;  %v14181_v7 = vld [vmem:[#allocation3 + $0x5e8] ss:$16 sps:$4 sm:$0xff]  }
 0x11b   :  { %1486 = vmatprep.mubr.bf16.mxu0 %v18171_v1  ;;  %1557 = vmatprep.mubr.bf16.mxu1 %v18171_v1 }
 0x11d   :  { %1847 = vmatpush1.bf16.msra.mxu0 %v14094_v61  ;;  %1918 = vmatpush1.bf16.msra.mxu1 %v14097_v62  ;;  %v14189_v61 = vld [vmem:[#allocation7 + $0x61c] ss:$12 sps:$4 sm:$0xff]  }
 0x11e   :  { %1848 = vmatprep.subr.bf16.mxu0 %v14102_v3  ;;  %1919 = vmatprep.subr.bf16.mxu1 %v14105_v5  ;;  %v14190_v62 = vld [vmem:[#allocation7 + $0x630] ss:$12 sps:$4 sm:$0xff]   ;;  %v14192_v3 = vld [vmem:[#allocation7 + $0x634] ss:$12 sps:$4 sm:$0xff]   ;;  %v14195_v5 = vld [vmem:[#allocation7 + $0x64c] ss:$12 sps:$4 sm:$0xff]  }
 0x120   :  { %1487 = vmatmul.mubr.bf16.gmra.mrb[20].mxu0 %v15827_v53  ;;  %1558 = vmatmul.mubr.bf16.gmra.mrb[20].mxu1 %v15827_v53  ;;  %v14121_v53 = vld [vmem:[#allocation3 + $0x4a8] ss:$16 sps:$4 sm:$0xff]  }
 0x121   :  { %1849 = vmatpush1.bf16.msra.mxu0 %v14100_v63  ;;  %1920 = vmatpush1.bf16.msra.mxu1 %v14103_v21  ;;  %v14196_v63 = vld [vmem:[#allocation7 + $0x660] ss:$12 sps:$4 sm:$0xff]   ;;  %v14198_v21 = vld [vmem:[#allocation7 + $0x664] ss:$12 sps:$4 sm:$0xff]  }
 0x122   :  { %1850 = vmatprep.subr.bf16.mxu0 %v14108_v27  ;;  %1921 = vmatprep.subr.bf16.mxu1 %v14111_v28  ;;  %v14201_v27 = vld [vmem:[#allocation7 + $0x67c] ss:$12 sps:$4 sm:$0xff]   ;;  %v14199_v28 = vld [vmem:[#allocation7 + $0x678] ss:$12 sps:$4 sm:$0xff]  }
 0x123   :  { %1496 = vmatprep.mubr.bf16.mxu0 %v18171_v1  ;;  %1567 = vmatprep.mubr.bf16.mxu1 %v18171_v1 }
 0x125   :  { %1851 = vmatpush1.bf16.msra.mxu0 %v14106_v6  ;;  %1922 = vmatpush1.bf16.msra.mxu1 %v14109_v30  ;;  %v14204_v6 = vld [vmem:[#allocation7 + $0x694] ss:$12 sps:$4 sm:$0xff]   ;;  %v14202_v30 = vld [vmem:[#allocation7 + $0x690] ss:$12 sps:$4 sm:$0xff]  }
 0x126   :  { %1852 = vmatprep.subr.bf16.mxu0 %v14114_v8  ;;  %1923 = vmatprep.subr.bf16.mxu1 %v14117_v10  ;;  %v14207_v8 = vld [vmem:[#allocation7 + $0x6ac] ss:$12 sps:$4 sm:$0xff]   ;;  %v14205_v10 = vld [vmem:[#allocation7 + $0x6a8] ss:$12 sps:$4 sm:$0xff]  }
 0x128   :  { %1497 = vmatmul.mubr.bf16.gmra.mrb[24].mxu0 %v15837_v0  ;;  %1568 = vmatmul.mubr.bf16.gmra.mrb[24].mxu1 %v15837_v0  ;;  %v14133_v0 = vld [vmem:[#allocation3 + $0x4e8] ss:$16 sps:$4 sm:$0xff]  }
 0x129   :  { %1853 = vmatpush1.bf16.msra.mxu0 %v14112_v13  ;;  %1924 = vmatpush1.bf16.msra.mxu1 %v14115_v14  ;;  %v14210_v13 = vld [vmem:[#allocation7 + $0x6c4] ss:$12 sps:$4 sm:$0xff]   ;;  %v14211_v14 = vld [vmem:[#allocation7 + $0x6c8] ss:$12 sps:$4 sm:$0xff]  }
 0x12a   :  { %1854 = vmatprep.subr.bf16.mxu0 %v14120_v15  ;;  %1925 = vmatprep.subr.bf16.mxu1 %v14123_v36  ;;  %v14208_v15 = vld [vmem:[#allocation7 + $0x6c0] ss:$12 sps:$4 sm:$0xff]   ;;  %v14212_v36 = vld [vmem:[#allocation7 + $0x608] ss:$12 sps:$4 sm:$0xff]  }
 0x12b   :  { %1506 = vmatprep.mubr.bf16.mxu0 %v18171_v1  ;;  %1577 = vmatprep.mubr.bf16.mxu1 %v18171_v1 }
 0x12d   :  { %1855 = vmatpush1.bf16.msra.mxu0 %v14118_v55  ;;  %1926 = vmatpush1.bf16.msra.mxu1 %v14121_v53 }
 0x12e   :  { %1856 = vmatprep.subr.bf16.mxu0 %v14126_v16  ;;  %1927 = vmatprep.subr.bf16.mxu1 %v14129_v17 }
 0x130   :  { %1507 = vmatmul.mubr.bf16.gmra.mrb[28].mxu0 %v15845_v12  ;;  %1578 = vmatmul.mubr.bf16.gmra.mrb[28].mxu1 %v15845_v12  ;;  %v14145_v12 = vld [vmem:[#allocation3 + $0x528] ss:$16 sps:$4 sm:$0xff]  }
 0x131   :  { %1857 = vmatpush1.bf16.msra.mxu0 %v14124_v18  ;;  %1928 = vmatpush1.bf16.msra.mxu1 %v14127_v20 }
 0x132   :  { %1858 = vmatprep.subr.bf16.mxu0 %v14132_v22  ;;  %1929 = vmatprep.subr.bf16.mxu1 %v14135_v23 }
 0x133   :  { %1876 = vmatprep.mubr.bf16.mxu0 %v18171_v1  ;;  %1947 = vmatprep.mubr.bf16.mxu1 %v18171_v1 }
 0x135   :  { %1859 = vmatpush1.bf16.msra.mxu0 %v14130_v25  ;;  %1930 = vmatpush1.bf16.msra.mxu1 %v14133_v0 }
 0x136   :  { %2207 = vmatprep.subr.bf16.mxu0 %v14138_v26  ;;  %2278 = vmatprep.subr.bf16.mxu1 %v14141_v31 }
 0x138   :  { %1877 = vmatmul.mubr.bf16.vlgmr.msra.gmra.mrb[0].mxu0 %v15770_v45  ;;  %1948 = vmatmul.mubr.bf16.vlgmr.msra.gmra.mrb[0].mxu1 %v15770_v45 }
 0x139   :  { %2208 = vmatpush1.bf16.msra.mxu0 %v14136_v35  ;;  %2279 = vmatpush1.bf16.msra.mxu1 %v14139_v37 }
 0x13a   :  { %2209 = vmatprep.subr.bf16.mxu0 %v14144_v38  ;;  %2280 = vmatprep.subr.bf16.mxu1 %v14147_v40 }
 0x13b   :  { %1886 = vmatprep.mubr.bf16.mxu0 %v18171_v1  ;;  %1957 = vmatprep.mubr.bf16.mxu1 %v18171_v1 }
 0x13d   :  { %2210 = vmatpush1.bf16.msra.mxu0 %v14142_v60  ;;  %2281 = vmatpush1.bf16.msra.mxu1 %v14145_v12 }
 0x13e   :  { %2211 = vmatprep.subr.bf16.mxu0 %v14150_v4  ;;  %2282 = vmatprep.subr.bf16.mxu1 %v14153_v41 }
 0x140   :  { %1887 = vmatmul.mubr.bf16.gmra.mrb[4].mxu0 %v15790_v11  ;;  %1958 = vmatmul.mubr.bf16.gmra.mrb[4].mxu1 %v15790_v11 }
 0x141   :  { %2212 = vmatpush1.bf16.msra.mxu0 %v14148_v42  ;;  %2283 = vmatpush1.bf16.msra.mxu1 %v14151_v44  ;;  %v14215_v42 = vld [vmem:[#allocation7 + $0x6dc] ss:$12 sps:$4 sm:$0xff]   ;;  %v14216_v44 = vld [vmem:[#allocation7 + $0x6e0] ss:$12 sps:$4 sm:$0xff]  }
 0x142   :  { %2213 = vmatprep.subr.bf16.mxu0 %v14156_v33  ;;  %2284 = vmatprep.subr.bf16.mxu1 %v14159_v34 }
 0x143   :  { %1896 = vmatprep.mubr.bf16.mxu0 %v18171_v1  ;;  %1967 = vmatprep.mubr.bf16.mxu1 %v18171_v1 }
 0x145   :  { %2214 = vmatpush1.bf16.msra.mxu0 %v14154_v48  ;;  %2285 = vmatpush1.bf16.msra.mxu1 %v14157_v24  ;;  %v2407_v48 = vlaneseq  ;;  %v14213_v24 = vld [vmem:[#allocation7 + $0x6d8] ss:$12 sps:$4 sm:$0xff]  }
 0x146   :  { %2215 = vmatprep.subr.bf16.mxu0 %v14162_v47  ;;  %2286 = vmatprep.subr.bf16.mxu1 %v14165_v9  ;;  %v14217_v47 = vld [vmem:[#allocation7 + $0x620] ss:$12 sps:$4 sm:$0xff]  }
 0x148   :  { %1897 = vmatmul.mubr.bf16.gmra.mrb[8].mxu0 %v15809_v43  ;;  %1968 = vmatmul.mubr.bf16.gmra.mrb[8].mxu1 %v15809_v43 }
 0x149   :  { %2216 = vmatpush1.bf16.msra.mxu0 %v14160_v49  ;;  %2287 = vmatpush1.bf16.msra.mxu1 %v14163_v50  ;;  %v14220_v50 = vld [vmem:[#allocation7 + $0x6f4] ss:$12 sps:$4 sm:$0xff]  }
 0x14a   :  { %2217 = vmatprep.subr.bf16.mxu0 %v14168_v51  ;;  %2288 = vmatprep.subr.bf16.mxu1 %v14171_v52  ;;  %v14221_v51 = vld [vmem:[#allocation7 + $0x6f8] ss:$12 sps:$4 sm:$0xff]   ;;  %v15959_v52 = vshrl.u32 %v2407_v48, 7 }
 0x14b   :  { %1906 = vmatprep.mubr.bf16.mxu0 %v18171_v1  ;;  %1977 = vmatprep.mubr.bf16.mxu1 %v18171_v1 }
 0x14c   :  { %18352 = vst [vmem:[#allocation26_spill] sm:$0xff] %v15959_v52 }
 0x14d   :  { %2218 = vmatpush1.bf16.msra.mxu0 %v14166_v2  ;;  %2289 = vmatpush1.bf16.msra.mxu1 %v14169_v46  ;;  %v14218_v2 = vld [vmem:[#allocation7 + $0x6f0] ss:$12 sps:$4 sm:$0xff]  }
 0x14e   :  { %2219 = vmatprep.subr.bf16.mxu0 %v14174_v19  ;;  %2290 = vmatprep.subr.bf16.mxu1 %v14177_v54 }
 0x150   :  { %1907 = vmatmul.mubr.bf16.gmra.mrb[12].mxu0 %v1650_v57  ;;  %1978 = vmatmul.mubr.bf16.gmra.mrb[12].mxu1 %v1650_v57 }
 0x151   :  { %2220 = vmatpush1.bf16.msra.mxu0 %v14172_v32  ;;  %2291 = vmatpush1.bf16.msra.mxu1 %v14175_v39 }
 0x152   :  { %2221 = vmatprep.subr.bf16.mxu0 %v14180_v58  ;;  %2292 = vmatprep.subr.bf16.mxu1 %v14183_v56  ;;  %v2405_v58 = vld [vmem:[#allocation5] sm:$0xf]  ;;  %v15970_v56 = vsub.s32 0, %v15959_v52 }
 0x153   :  { %2239 = vmatprep.mubr.bf16.mxu0 %v18171_v1  ;;  %2310 = vmatprep.mubr.bf16.mxu1 %v18171_v1 }
 0x154   :  { %18357 = vst [vmem:[#allocation31_spill] sm:$0xff] %v15970_v56 }
 0x155   :  { %2222 = vmatpush1.bf16.msra.mxu0 %v14178_v59  ;;  %2293 = vmatpush1.bf16.msra.mxu1 %v14181_v7  ;;  %v15437_v59 = vmov 1983009808  }
 0x156   :  { %4834 = vmatprep.subr.bf16.mxu0 %v14186_v29  ;;  %13239 = vmatprep.subr.bf16.mxu1 %v14211_v14  ;;  %v2516_v7 = vunpack.c.l.s4 %v15437_v59 }
 0x158   :  { %2240 = vmatmul.mubr.bf16.vlgmr.msra.gmra.mrb[16].mxu0 %v15770_v45  ;;  %2311 = vmatmul.mubr.bf16.vlgmr.msra.gmra.mrb[16].mxu1 %v15770_v45  ;;  %v14184_v45 = vld [vmem:[#allocation7 + $0x600] ss:$12 sps:$4 sm:$0xff]  }
 0x159   :  { %2249 = vmatprep.mubr.bf16.mxu0 %v18171_v1  ;;  %2320 = vmatprep.mubr.bf16.mxu1 %v18171_v1 }
 0x15a   :  { %4835 = vmatpush1.bf16.msra.mxu0 %v14184_v45  ;;  %13240 = vmatpush3.bf16.msra.mxu1 %v14212_v36 }
 0x15b   :  { %4836 = vmatprep.subr.bf16.mxu0 %v14189_v61  ;;  %13241 = vmatprep.subr.bf16.mxu1 %v14216_v44  ;;  %v15973_v61 = vsub.s32 2, %v15959_v52 }
 0x15d   :  { %18358 = vst [vmem:[#allocation32_spill] sm:$0xff] %v15973_v61 }
 0x15e   :  { %13242 = vmatpush3.bf16.msra.mxu1 %v14217_v47 }
 0x15f   :  { %13243 = vmatprep.subr.bf16.mxu1 %v14221_v51 }
 0x160   :  { %2250 = vmatmul.mubr.bf16.gmra.mrb[20].mxu0 %v15790_v11  ;;  %2321 = vmatmul.mubr.bf16.gmra.mrb[20].mxu1 %v15790_v11  ;;  %v14187_v11 = vld [vmem:[#allocation7 + $0x618] ss:$12 sps:$4 sm:$0xff]  }
 0x161   :  { %2259 = vmatprep.mubr.bf16.mxu0 %v18171_v1  ;;  %2330 = vmatprep.mubr.bf16.mxu1 %v18171_v1 }
 0x162   :  { %4837 = vmatpush1.bf16.msra.mxu0 %v14187_v11  ;;  %v15976_v11 = vsub.s32 1, %v15959_v52 }
 0x163   :  { %4838 = vmatprep.subr.bf16.mxu0 %v14192_v3  ;;  %v2517_v3 = vunpack.c.0.s8 %v2516_v7 }
 0x164   :  { %18359 = vst [vmem:[#allocation33_spill] sm:$0xff] %v15976_v11 }
 0x165   :  { %v15997_v14 = vsub.s32 %v2517_v3, %v15959_v52 }
 0x166   :  { %4839 = vmatpush1.bf16.msra.mxu0 %v14190_v62  ;;  %v15979_v62 = vsub.s32 3, %v15959_v52 }
 0x167   :  { %4840 = vmatprep.subr.bf16.mxu0 %v14195_v5  ;;  %v15982_v5 = vrot.slane %v2405_v58, %v15970_v56  ;;  %18361 = vst [vmem:[#allocation35_spill] sm:$0xff] %v15997_v14 }
 0x168   :  { %2260 = vmatmul.mubr.bf16.gmra.mrb[24].mxu0 %v15809_v43  ;;  %2331 = vmatmul.mubr.bf16.gmra.mrb[24].mxu1 %v15809_v43  ;;  %v14193_v43 = vld [vmem:[#allocation7 + $0x648] ss:$12 sps:$4 sm:$0xff]   ;;  %18360 = vst [vmem:[#allocation34_spill] sm:$0xff] %v15979_v62 }
 0x169   :  { %2269 = vmatprep.mubr.bf16.mxu0 %v18171_v1  ;;  %2340 = vmatprep.mubr.bf16.mxu1 %v18171_v1 }
 0x16a   :  { %4841 = vmatpush1.bf16.msra.mxu0 %v14193_v43  ;;  %v15985_v43 = vrot.slane %v2405_v58, %v15973_v61 }
 0x16b   :  { %4842 = vmatprep.subr.bf16.mxu0 %v14198_v21 }
 0x16e   :  { %4843 = vmatpush1.bf16.msra.mxu0 %v14196_v63 }
 0x16f   :  { %4844 = vmatprep.subr.bf16.mxu0 %v14201_v27  ;;  %v15988_v27 = vrot.slane %v2405_v58, %v15976_v11 }
 0x170   :  { %2270 = vmatmul.mubr.bf16.gmra.mrb[28].mxu0 %v1650_v57  ;;  %2341 = vmatmul.mubr.bf16.gmra.mrb[28].mxu1 %v1650_v57 }
 0x172   :  { %4845 = vmatpush1.bf16.msra.mxu0 %v14199_v28  ;;  %v15991_v28 = vrot.slane %v2405_v58, %v15979_v62 }
 0x173   :  { %4846 = vmatprep.subr.bf16.mxu0 %v14204_v6 }
 0x176   :  { %4847 = vmatpush1.bf16.msra.mxu0 %v14202_v30 }
 0x177   :  { %4848 = vmatprep.subr.bf16.mxu0 %v14207_v8 }
 0x17a   :  { %4849 = vmatpush1.bf16.msra.mxu0 %v14205_v10 }
 0x17b   :  { %4850 = vmatprep.subr.bf16.mxu0 %v14210_v13 }
 0x17e   :  { %4851 = vmatpush1.bf16.msra.mxu0 %v14208_v15 }
 0x17f   :  { %4852 = vmatprep.subr.bf16.mxu0 %v14215_v42 }
 0x182   :  { %4853 = vmatpush1.bf16.msra.mxu0 %v14213_v24 }
 0x183   :  { %4854 = vmatprep.subr.bf16.mxu0 %v14220_v50 }
 0x186   :  { %4855 = vmatpush1.bf16.msra.mxu0 %v14218_v2 }
 0x20b   :  { %v15911_v55 = vpop.f32.mrb[0].mxu0  ;;  %v15913_v53 = vpop.f32.mrb[0].mxu1 }
 0x20c   :  { %v15915_v16 = vpop.f32.mrb[1].mxu0  ;;  %v15917_v17 = vpop.f32.mrb[1].mxu1 }
 0x20d   :  { %v15919_v18 = vpop.f32.mrb[2].mxu0  ;;  %v15921_v20 = vpop.f32.mrb[2].mxu1 }
 0x20e   :  { %v15923_v22 = vpop.f32.mrb[3].mxu0  ;;  %v15925_v23 = vpop.f32.mrb[3].mxu1 }
 0x213   :  { %v15927_v25 = vpop.f32.mrb[4].mxu0  ;;  %v15929_v0 = vpop.f32.mrb[4].mxu1 }
 0x214   :  { %v15931_v26 = vpop.f32.mrb[5].mxu0  ;;  %v15933_v31 = vpop.f32.mrb[5].mxu1 }
 0x215   :  { %v15935_v35 = vpop.f32.mrb[6].mxu0  ;;  %v15937_v37 = vpop.f32.mrb[6].mxu1 }
 0x216   :  { %v15939_v38 = vpop.f32.mrb[7].mxu0  ;;  %v15941_v40 = vpop.f32.mrb[7].mxu1 }
 0x21b   :  { %v15943_v60 = vpop.f32.mrb[8].mxu0  ;;  %v15945_v12 = vpop.f32.mrb[8].mxu1 }
 0x21c   :  { %v15947_v4 = vpop.f32.mrb[9].mxu0  ;;  %v15949_v41 = vpop.f32.mrb[9].mxu1 }
 0x21d   :  { %18347 = vst [vmem:[#allocation21_spill] sm:$0xff] %v15949_v41  ;;  %v15951_v33 = vpop.f32.mrb[10].mxu0  ;;  %v15953_v34 = vpop.f32.mrb[10].mxu1 }
 0x21e   :  { %18348 = vst [vmem:[#allocation22_spill] sm:$0xff] %v15951_v33  ;;  %18349 = vst [vmem:[#allocation23_spill] sm:$0xff] %v15953_v34  ;;  %v15955_v9 = vpop.f32.mrb[11].mxu0  ;;  %v15957_v49 = vpop.f32.mrb[11].mxu1 }
 0x21f   :  { %18350 = vst [vmem:[#allocation24_spill] sm:$0xff] %v15955_v9  ;;  %18351 = vst [vmem:[#allocation25_spill] sm:$0xff] %v15957_v49 }
 0x223   :  { %v15961_v46 = vpop.f32.mrb[12].mxu0  ;;  %v15963_v19 = vpop.f32.mrb[12].mxu1 }
 0x224   :  { %18353 = vst [vmem:[#allocation27_spill] sm:$0xff] %v15961_v46  ;;  %18354 = vst [vmem:[#allocation28_spill] sm:$0xff] %v15963_v19  ;;  %v15965_v54 = vpop.f32.mrb[13].mxu0  ;;  %v15967_v32 = vpop.f32.mrb[13].mxu1 }
 0x225   :  { %18355 = vst [vmem:[#allocation29_spill] sm:$0xff] %v15965_v54  ;;  %18356 = vst [vmem:[#allocation30_spill] sm:$0xff] %v15967_v32  ;;  %v1912_v39 = vpop.f32.mrb[14].mxu0  ;;  %v1983_v57 = vpop.f32.mrb[14].mxu1  ;;  %v14241_v32 = vld [vmem:[#allocation7 + $0x758] ss:$12 sps:$4 sm:$0xff]  }
 0x226   :  { %v1913_v45 = vpop.f32.mrb[15].mxu0  ;;  %v1984_v29 = vpop.f32.mrb[15].mxu1 }
 0x227   :  { %v14222_v45 = vld [vmem:[#allocation7 + $0x638] ss:$12 sps:$4 sm:$0xff]   ;;  %v16013_v29 = vsub.s32 4, %v15959_v52 }
 0x228   :  { %13244 = vmatpush3.bf16.msra.mxu1 %v14222_v45 }
 0x22b   :  { %v2241_v63 = vpop.f32.mrb[16].mxu0  ;;  %v2312_v21 = vpop.f32.mrb[16].mxu1 }
 0x22c   :  { %v2377_v6 = vmax.f32 %v15911_v55, %v2241_v63  ;;  %v2379_v30 = vmax.f32 %v15913_v53, %v2312_v21  ;;  %v2243_v8 = vpop.f32.mrb[17].mxu0  ;;  %v2314_v10 = vpop.f32.mrb[17].mxu1 }
 0x22d   :  { %v2378_v13 = vmax.f32 %v15915_v16, %v2243_v8  ;;  %v2380_v15 = vmax.f32 %v15917_v17, %v2314_v10  ;;  %v2245_v36 = vpop.f32.mrb[18].mxu0  ;;  %v2316_v42 = vpop.f32.mrb[18].mxu1 }
 0x22e   :  { %v2427_v44 = vadd.f32 %v15982_v5, %v2377_v6  ;;  %v2429_v48 = vadd.f32 %v15985_v43, %v2379_v30  ;;  %v2381_v24 = vmax.f32 %v15919_v18, %v2245_v36  ;;  %v2383_v55 = vmax.f32 %v15921_v20, %v2316_v42  ;;  %v2247_v53 = vpop.f32.mrb[19].mxu0  ;;  %v2318_v47 = vpop.f32.mrb[19].mxu1 }
 0x22f   :  { %v2428_v50 = vadd.f32 %v15988_v27, %v2378_v13  ;;  %v2430_v16 = vadd.f32 %v15991_v28, %v2380_v15  ;;  %v2382_v51 = vmax.f32 %v15923_v22, %v2247_v53  ;;  %v2384_v17 = vmax.f32 %v15925_v23, %v2318_v47 }
 0x230   :  { %v2455_v2 = vmax.f32 %v2427_v44, 0.0  ;;  %v2457_v39 = vmax.f32 %v2429_v48, 0.0  ;;  %v2431_v57 = vadd.f32 %v15982_v5, %v2381_v24  ;;  %v2433_v58 = vadd.f32 %v15985_v43, %v2383_v55 }
 0x231   :  { %v2456_v59 = vmax.f32 %v2428_v50, 0.0  ;;  %v2458_v18 = vmax.f32 %v2430_v16, 0.0  ;;  %v2432_v20 = vadd.f32 %v15988_v27, %v2382_v51  ;;  %v2434_v7 = vadd.f32 %v15991_v28, %v2384_v17 }
 0x232   :  { %v2459_v3 = vmax.f32 %v2431_v57, 0.0  ;;  %v2461_v22 = vmax.f32 %v2433_v58, 0.0  ;;  %v14225_v58 = vld [vmem:[#allocation7 + $0x70c] ss:$12 sps:$4 sm:$0xff]  }
 0x233   :  { %v2511_v63 = vcombine.low %v2455_v2, %v2456_v59  ;;  %v2512_v23 = vcombine.high %v2455_v2, %v2456_v59  ;;  %v2513_v21 = vcombine.low %v2457_v39, %v2458_v18  ;;  %v2514_v6 = vcombine.high %v2457_v39, %v2458_v18  ;;  %v16015_v30 = vpop.f32.mrb[20].mxu0  ;;  %v16017_v8 = vpop.f32.mrb[20].mxu1  ;;  %v14226_v59 = vld [vmem:[#allocation7 + $0x710] ss:$12 sps:$4 sm:$0xff]   ;;  %4856 = vmatprep.subr.bf16.mxu0 %v14225_v58 }
 0x234   :  { %v2460_v10 = vmax.f32 %v2432_v20, 0.0  ;;  %v2462_v13 = vmax.f32 %v2434_v7, 0.0  ;;  %v16023_v42 = vpop.f32.mrb[21].mxu0  ;;  %v16025_v44 = vpop.f32.mrb[21].mxu1  ;;  %13245 = vmatprep.subr.bf16.mxu1 %v14226_v59  ;;  %v14228_v59 = vld [vmem:[#allocation7 + $0x720] ss:$12 sps:$4 sm:$0xff]  }
 0x235   :  { %v2521_v48 = vrot.slane %v2511_v63, %v15997_v14  ;;  %v2528_v24 = vrot.slane %v2512_v23, %v15997_v14  ;;  %v2535_v55 = vrot.slane %v2513_v21, %v15997_v14  ;;  %v2542_v53 = vrot.slane %v2514_v6, %v15997_v14  ;;  %v16031_v47 = vpop.f32.mrb[22].mxu0  ;;  %v16033_v50 = vpop.f32.mrb[22].mxu1  ;;  %v14223_v63 = vld [vmem:[#allocation7 + $0x708] ss:$12 sps:$4 sm:$0xff]   ;;  %v14227_v23 = vld [vmem:[#allocation7 + $0x650] ss:$12 sps:$4 sm:$0xff]  }
 0x236   :  { %v2547_v16 = vcombine.low %v2459_v3, %v2460_v10  ;;  %v2548_v51 = vcombine.high %v2459_v3, %v2460_v10  ;;  %v2549_v17 = vcombine.low %v2461_v22, %v2462_v13  ;;  %v2550_v2 = vcombine.high %v2461_v22, %v2462_v13  ;;  %v16035_v39 = vpop.f32.mrb[23].mxu0  ;;  %v16037_v57 = vpop.f32.mrb[23].mxu1  ;;  %4857 = vmatpush1.bf16.msra.mxu0 %v14223_v63  ;;  %v14232_v63 = vld [vmem:[#allocation7 + $0x668] ss:$12 sps:$4 sm:$0xff]  }
 0x237   :  { %v2543_v18 = vcombine.low %v2521_v48, %v2535_v55  ;;  %v2544_v20 = vcombine.high %v2521_v48, %v2535_v55  ;;  %v2545_v7 = vcombine.low %v2528_v24, %v2542_v53  ;;  %v2546_v45 = vcombine.high %v2528_v24, %v2542_v53  ;;  %13246 = vmatpush3.bf16.msra.mxu1 %v14227_v23 }
 0x238   :  { %v2557_v21 = vrot.slane %v2547_v16, %v15997_v14  ;;  %v2564_v6 = vrot.slane %v2548_v51, %v15997_v14  ;;  %v2571_v3 = vrot.slane %v2549_v17, %v15997_v14  ;;  %v2578_v22 = vrot.slane %v2550_v2, %v15997_v14  ;;  %v14230_v16 = vld [vmem:[#allocation7 + $0x724] ss:$12 sps:$4 sm:$0xff]   ;;  %v14231_v51 = vld [vmem:[#allocation7 + $0x728] ss:$12 sps:$4 sm:$0xff]  }
 0x239   :  { %v12316_v10 = vrot.slane %v2543_v18, 9  ;;  %v12317_v13 = vrot.slane %v2544_v20, 9  ;;  %v12318_v1 = vrot.slane %v2545_v7, 9  ;;  %v12319_v36 = vrot.slane %v2546_v45, 9  ;;  %4858 = vmatprep.subr.bf16.mxu0 %v14230_v16  ;;  %13247 = vmatprep.subr.bf16.mxu1 %v14231_v51  ;;  %v14233_v51 = vld [vmem:[#allocation7 + $0x738] ss:$12 sps:$4 sm:$0xff]  }
 0x23a   :  { %v16043_v48 = vcombine.low %v2557_v21, %v2571_v3  ;;  %v16045_v24 = vcombine.high %v2557_v21, %v2571_v3  ;;  %v16047_v55 = vcombine.low %v2564_v6, %v2578_v22  ;;  %v16049_v53 = vcombine.high %v2564_v6, %v2578_v22  ;;  %4859 = vmatpush1.bf16.msra.mxu0 %v14228_v59  ;;  %v14235_v3 = vld [vmem:[#allocation7 + $0x73c] ss:$12 sps:$4 sm:$0xff]   ;;  %v14236_v22 = vld [vmem:[#allocation7 + $0x740] ss:$12 sps:$4 sm:$0xff]  }
 0x23b   :  { %v16051_v17 = vmax.f32 %v2544_v20, %v12317_v13  ;;  %v16053_v2 = vmax.f32 %v2545_v7, %v12318_v1  ;;  %v16055_v58 = vpop.f32.mrb[24].mxu0  ;;  %v16057_v15 = vpop.f32.mrb[24].mxu1  ;;  %v16063_v6 = vmax.f32 %v2546_v45, %v12319_v36  ;;  %13248 = vmatpush3.bf16.msra.mxu1 %v14232_v63  ;;  %v16073_v13 = vmax.f32 %v2543_v18, %v12316_v10  ;;  %v14237_v59 = vld [vmem:[#allocation7 + $0x680] ss:$12 sps:$4 sm:$0xff]  }
 0x23c   :  { %v16059_v62 = vpop.f32.mrb[25].mxu0  ;;  %v16061_v21 = vpop.f32.mrb[25].mxu1  ;;  %4860 = vmatprep.subr.bf16.mxu0 %v14235_v3  ;;  %13249 = vmatprep.subr.bf16.mxu1 %v14236_v22  ;;  %v14240_v10 = vld [vmem:[#allocation7 + $0x754] ss:$12 sps:$4 sm:$0xff]   ;;  %v14238_v3 = vld [vmem:[#allocation7 + $0x750] ss:$12 sps:$4 sm:$0xff]  }
 0x23d   :  { %18362 = vst [vmem:[#allocation36_spill] sm:$0xff] %v16061_v21  ;;  %v16065_v23 = vpop.f32.mrb[26].mxu0  ;;  %v16067_v20 = vpop.f32.mrb[26].mxu1  ;;  %v2946_v16 = vrot.slane %v16051_v17, %v15970_v56  ;;  %v2962_v36 = vrot.slane %v16053_v2, %v15970_v56  ;;  %v2970_v45 = vrot.slane %v16053_v2, %v16013_v29  ;;  %v2954_v11 = vrot.slane %v16051_v17, %v16013_v29 }
 0x23e   :  { %18363 = vst [vmem:[#allocation37_spill] sm:$0xff] %v16065_v23  ;;  %18364 = vst [vmem:[#allocation38_spill] sm:$0xff] %v16067_v20  ;;  %v16069_v1 = vpop.f32.mrb[27].mxu0  ;;  %v16071_v7 = vpop.f32.mrb[27].mxu1  ;;  %v2978_v63 = vrot.slane %v16063_v6, %v15970_v56  ;;  %v2986_v18 = vrot.slane %v16063_v6, %v16013_v29  ;;  %4861 = vmatpush1.bf16.msra.mxu0 %v14233_v51  ;;  %v2930_v54 = vrot.slane %v16073_v13, %v15970_v56 }
 0x23f   :  { %18365 = vst [vmem:[#allocation39_spill] sm:$0xff] %v16069_v1  ;;  %18366 = vst [vmem:[#allocation40_spill] sm:$0xff] %v16071_v7  ;;  %v3411_v19 = vpack.c.bf16 %v2946_v16, %v2946_v16  ;;  %v3415_v46 = vpack.c.bf16 %v2962_v36, %v2962_v36  ;;  %v3417_v49 = vpack.c.bf16 %v2970_v45, %v2970_v45  ;;  %13250 = vmatpush3.bf16.msra.mxu1 %v14237_v59  ;;  %v14242_v1 = vld [vmem:[#allocation7 + $0x698] ss:$12 sps:$4 sm:$0xff]  }
 0x240   :  { %v2938_v34 = vrot.slane %v16073_v13, %v16013_v29  ;;  %v3413_v22 = vpack.c.bf16 %v2954_v11, %v2954_v11  ;;  %4862 = vmatprep.subr.bf16.mxu0 %v14240_v10  ;;  %v16100_v16 = vsub.s32 6, %v15959_v52  ;;  %v3419_v36 = vpack.c.bf16 %v2978_v63, %v2978_v63  ;;  %13251 = vmatprep.subr.bf16.mxu1 %v14241_v32  ;;  %v14245_v11 = vld [vmem:[#allocation7 + $0x76c] ss:$12 sps:$4 sm:$0xff]   ;;  %v14243_v10 = vld [vmem:[#allocation7 + $0x768] ss:$12 sps:$4 sm:$0xff]  }
 0x241   :  { %v3421_v45 = vpack.c.bf16 %v2986_v18, %v2986_v18  ;;  %v16102_v59 = vunpack.c.l.b16 %v3415_v46  ;;  %v3407_v21 = vpack.c.bf16 %v2930_v54, %v2930_v54  ;;  %v14247_v52 = vld [vmem:[#allocation7 + $0x6b0] ss:$12 sps:$4 sm:$0xff]  }
 0x242   :  { %18371 = vst [vmem:[#allocation45_spill] sm:$0xff] %v16100_v16  ;;  %4863 = vmatpush1.bf16.msra.mxu0 %v14238_v3  ;;  %v3409_v63 = vpack.c.bf16 %v2938_v34, %v2938_v34  ;;  %v4037_v18 = vunpack.c.l.b16 %v3413_v22  ;;  %v2966_v34 = vrot.slane %v16053_v2, %v15973_v61 }
 0x243   :  { %v16089_v7 = vpop.f32.mrb[28].mxu0  ;;  %v16091_v9 = vpop.f32.mrb[28].mxu1  ;;  %18372 = vst [vmem:[#allocation46_spill] sm:$0xff] %v16102_v59  ;;  %13252 = vmatpush3.bf16.msra.mxu1 %v14242_v1  ;;  %4864 = vmatprep.subr.bf16.mxu0 %v14245_v11  ;;  %v5040_v54 = vunpack.c.l.b16 %v3407_v21  ;;  %v2974_v1 = vrot.slane %v16053_v2, %v16100_v16  ;;  %v2958_v21 = vrot.slane %v16051_v17, %v16100_v16 }
 0x244   :  { %18367 = vst [vmem:[#allocation41_spill] sm:$0xff] %v16089_v7  ;;  %18368 = vst [vmem:[#allocation42_spill] sm:$0xff] %v16091_v9  ;;  %v16095_v51 = vpop.f32.mrb[29].mxu0  ;;  %v16097_v20 = vpop.f32.mrb[29].mxu1  ;;  %v16104_v9 = vunpack.c.l.b16 %v3417_v49  ;;  %v16108_v49 = vunpack.c.l.b16 %v3419_v36  ;;  %v5076_v3 = vrot.slane %v4037_v18, 7  ;;  %v3416_v11 = vpack.c.bf16 %v2966_v34, %v2966_v34 }
 0x245   :  { %18369 = vst [vmem:[#allocation43_spill] sm:$0xff] %v16095_v51  ;;  %18370 = vst [vmem:[#allocation44_spill] sm:$0xff] %v16097_v20  ;;  %v2275_v7 = vpop.f32.mrb[30].mxu0  ;;  %v2346_v33 = vpop.f32.mrb[30].mxu1  ;;  %v14246_v51 = vld [vmem:[#allocation7 + $0x770] ss:$12 sps:$4 sm:$0xff]   ;;  %v4035_v20 = vunpack.c.l.b16 %v3411_v19 }
 0x246   :  { %18373 = vst [vmem:[#allocation47_spill] sm:$0xff] %v16104_v9  ;;  %v2276_v23 = vpop.f32.mrb[31].mxu0  ;;  %v2347_v41 = vpop.f32.mrb[31].mxu1  ;;  %v4131_v33 = vrot.slane %v16102_v59, 7  ;;  %v4166_v46 = vrot.slane %v16104_v9, 7  ;;  %13253 = vmatprep.subr.bf16.mxu1 %v14246_v51  ;;  %18374 = vst [vmem:[#allocation48_spill] sm:$0xff] %v16108_v49  ;;  %4865 = vmatpush1.bf16.msra.mxu0 %v14243_v10  ;;  %v5042_v7 = vunpack.c.l.b16 %v3409_v63 }
 0x247   :  { %v16110_v41 = vunpack.c.l.b16 %v3421_v45  ;;  %v5048_v23 = vrot.slane %v4035_v20, 7  ;;  %13254 = vmatpush3.bf16.msra.mxu1 %v14247_v52  ;;  %v7686_v51 = vrot.slane %v16108_v49, 7  ;;  %v2950_v45 = vrot.slane %v16051_v17, %v15973_v61  ;;  %v14250_v17 = vld [vmem:[#allocation7 + $0x784] ss:$12 sps:$4 sm:$0xff]  }
 0x248   :  { %v16113_v32 = vsel %vm4132_vm6, %v4131_v33, %v4035_v20  ;;  %v16116_v19 = vsel %vm4132_vm6, %v4166_v46, %v4037_v18  ;;  %v2982_v52 = vrot.slane %v16063_v6, %v15973_v61  ;;  %v16134_v2 = vsel %vm4132_vm6, %v5076_v3, %v5042_v7  ;;  %v14251_v33 = vld [vmem:[#allocation7 + $0x848] ss:$12 sps:$4 sm:$0xff]   ;;  %4885 = vmatprep.subr.bf16.mxu0 %v14250_v17 }
 0x249   :  { %18375 = vst [vmem:[#allocation49_spill] sm:$0xff] %v16110_v41  ;;  %18376 = vst [vmem:[#allocation50_spill] sm:$0xff] %v16113_v32  ;;  %v16123_v22 = vsel %vm4132_vm6, %v5048_v23, %v5040_v54  ;;  %v7714_v36 = vrot.slane %v16110_v41, 7  ;;  %v2990_v20 = vrot.slane %v16063_v6, %v16100_v16  ;;  %v16140_v10 = vsel %vm4132_vm6, %v7686_v51, %v16102_v59 }
 0x24a   :  { %18377 = vst [vmem:[#allocation51_spill] sm:$0xff] %v16116_v19  ;;  %18378 = vst [vmem:[#allocation52_spill] sm:$0xff] %v16123_v22  ;;  %v3418_v18 = vpack.c.bf16 %v2974_v1, %v2974_v1  ;;  %v2934_v46 = vrot.slane %v16073_v13, %v15973_v61  ;;  %v2942_v54 = vrot.slane %v16073_v13, %v16100_v16  ;;  %v16150_v3 = vunpack.c.l.b16 %v3416_v11 }
 0x24b   :  { %18379 = vst [vmem:[#allocation53_spill] sm:$0xff] %v16134_v2  ;;  %18380 = vst [vmem:[#allocation54_spill] sm:$0xff] %v16140_v10  ;;  %v16144_v63 = vsel %vm4132_vm6, %v7714_v36, %v16104_v9  ;;  %v3412_v23 = vpack.c.bf16 %v2950_v45, %v2950_v45  ;;  %v3414_v6 = vpack.c.bf16 %v2958_v21, %v2958_v21  ;;  %v12320_v51 = vrot.slane %v16043_v48, 9 }
 0x24c   :  { %18381 = vst [vmem:[#allocation55_spill] sm:$0xff] %v16144_v63  ;;  %v3420_v34 = vpack.c.bf16 %v2982_v52, %v2982_v52  ;;  %v3422_v7 = vpack.c.bf16 %v2990_v20, %v2990_v20  ;;  %18382 = vst [vmem:[#allocation56_spill] sm:$0xff] %v16150_v3  ;;  %13267 = vmatprep.subr.bf16.mxu1 %v14251_v33  ;;  %v16153_v36 = vunpack.c.l.b16 %v3418_v18  ;;  %v12321_v1 = vrot.slane %v16045_v24, 9 }
 0x24d   :  { %v3408_v63 = vpack.c.bf16 %v2934_v46, %v2934_v46  ;;  %v3410_v10 = vpack.c.bf16 %v2942_v54, %v2942_v54  ;;  %v16156_v2 = vunpack.c.l.b16 %v3412_v23  ;;  %v16158_v22 = vunpack.c.l.b16 %v3414_v6 }
 0x24e   :  { %18383 = vst [vmem:[#allocation57_spill] sm:$0xff] %v16153_v36  ;;  %v12322_v13 = vrot.slane %v16047_v55, 9  ;;  %v12323_v45 = vrot.slane %v16049_v53, 9  ;;  %v16162_v21 = vunpack.c.l.b16 %v3420_v34  ;;  %v16164_v52 = vunpack.c.l.b16 %v3422_v7 }
 0x24f   :  { %18384 = vst [vmem:[#allocation58_spill] sm:$0xff] %v16158_v22  ;;  %v2879_v11 = vmax.f32 %v16043_v48, %v12320_v51  ;;  %v16172_v46 = vmax.f32 %v16045_v24, %v12321_v1  ;;  %v16174_v54 = vunpack.c.l.b16 %v3408_v63  ;;  %v16176_v23 = vunpack.c.l.b16 %v3410_v10 }
 0x250   :  { %18385 = vst [vmem:[#allocation59_spill] sm:$0xff] %v16162_v21  ;;  %18386 = vst [vmem:[#allocation60_spill] sm:$0xff] %v16164_v52  ;;  %v2881_v17 = vmax.f32 %v16047_v55, %v12322_v13  ;;  %v16185_v33 = vmax.f32 %v16049_v53, %v12323_v45  ;;  %v18389_v13 = vmax.f32 %v15927_v25, %v16015_v30 }
 0x251   :  { %18387 = vst [vmem:[#allocation61_spill] sm:$0xff] %v16174_v54  ;;  %18388 = vst [vmem:[#allocation62_spill] sm:$0xff] %v16176_v23  ;;  %v16188_v24 = vrot.slane %v2879_v11, %v15970_v56  ;;  %v16191_v10 = vrot.slane %v2879_v11, %v15973_v61  ;;  %v16194_v63 = vrot.slane %v2879_v11, %v16013_v29 }
 0x252   :  { %v16197_v1 = vrot.slane %v2879_v11, %v16100_v16  ;;  %v16201_v48 = vrot.slane %v16172_v46, %v15970_v56  ;;  %v16205_v55 = vrot.slane %v16172_v46, %v15973_v61  ;;  %v16209_v53 = vrot.slane %v16172_v46, %v16013_v29 }
 0x253   :  { %v2435_v45 = vadd.f32 %v15982_v5, %v18389_v13  ;;  %v18390_v11 = vmax.f32 %v15929_v0, %v16017_v8  ;;  %v2386_v34 = vmax.f32 %v15931_v26, %v16023_v42  ;;  %v2388_v6 = vmax.f32 %v15933_v31, %v16025_v44 }
 0x254   :  { %v2389_v7 = vmax.f32 %v15935_v35, %v16031_v47  ;;  %v2391_v18 = vmax.f32 %v15937_v37, %v16033_v50  ;;  %v2390_v25 = vmax.f32 %v15939_v38, %v16035_v39  ;;  %v2392_v0 = vmax.f32 %v15941_v40, %v16037_v57 }
 0x255   :  { %v2437_v51 = vadd.f32 %v15985_v43, %v18390_v11  ;;  %v2463_v30 = vmax.f32 %v2435_v45, 0.0  ;;  %v2436_v13 = vadd.f32 %v15988_v27, %v2386_v34  ;;  %v2438_v26 = vadd.f32 %v15991_v28, %v2388_v6 }
 0x256   :  { %v2439_v31 = vadd.f32 %v15982_v5, %v2389_v7  ;;  %v2441_v42 = vadd.f32 %v15985_v43, %v2391_v18  ;;  %v2440_v35 = vadd.f32 %v15988_v27, %v2390_v25  ;;  %v2442_v37 = vadd.f32 %v15991_v28, %v2392_v0 }
 0x257   :  { %v2465_v8 = vmax.f32 %v2437_v51, 0.0  ;;  %v2464_v44 = vmax.f32 %v2436_v13, 0.0  ;;  %v2466_v47 = vmax.f32 %v2438_v26, 0.0 }
 0x258   :  { %v2467_v50 = vmax.f32 %v2439_v31, 0.0  ;;  %v2469_v39 = vmax.f32 %v2441_v42, 0.0  ;;  %v2468_v57 = vmax.f32 %v2440_v35, 0.0  ;;  %v2470_v6 = vmax.f32 %v2442_v37, 0.0 }
 0x259   :  { %v2583_v34 = vcombine.low %v2463_v30, %v2464_v44  ;;  %v2584_v7 = vcombine.high %v2463_v30, %v2464_v44  ;;  %v2585_v51 = vcombine.low %v2465_v8, %v2466_v47  ;;  %v2586_v18 = vcombine.high %v2465_v8, %v2466_v47 }
 0x25a   :  { %v2619_v45 = vcombine.low %v2467_v50, %v2468_v57  ;;  %v2620_v11 = vcombine.high %v2467_v50, %v2468_v57  ;;  %v2621_v25 = vcombine.low %v2469_v39, %v2470_v6  ;;  %v2622_v0 = vcombine.high %v2469_v39, %v2470_v6 }
 0x25b   :  { %v2593_v13 = vrot.slane %v2583_v34, %v15997_v14  ;;  %v2600_v26 = vrot.slane %v2584_v7, %v15997_v14  ;;  %v2607_v20 = vrot.slane %v2585_v51, %v15997_v14  ;;  %v2614_v40 = vrot.slane %v2586_v18, %v15997_v14 }
 0x25c   :  { %v2629_v31 = vrot.slane %v2619_v45, %v15997_v14  ;;  %v2636_v42 = vrot.slane %v2620_v11, %v15997_v14  ;;  %v2643_v30 = vrot.slane %v2621_v25, %v15997_v14  ;;  %v2650_v8 = vrot.slane %v2622_v0, %v15997_v14 }
 0x25d   :  { %v2615_v35 = vcombine.low %v2593_v13, %v2607_v20  ;;  %v2616_v37 = vcombine.high %v2593_v13, %v2607_v20  ;;  %v2617_v44 = vcombine.low %v2600_v26, %v2614_v40  ;;  %v2618_v47 = vcombine.high %v2600_v26, %v2614_v40 }
 0x25e   :  { %v16249_v50 = vcombine.low %v2629_v31, %v2643_v30  ;;  %v16251_v39 = vcombine.high %v2629_v31, %v2643_v30  ;;  %v16253_v57 = vcombine.low %v2636_v42, %v2650_v8  ;;  %v16255_v6 = vcombine.high %v2636_v42, %v2650_v8 }
 0x25f   :  { %v3022_v34 = vrot.slane %v16172_v46, %v16100_v16  ;;  %v3026_v7 = vrot.slane %v2881_v17, %v15970_v56  ;;  %v3030_v51 = vrot.slane %v2881_v17, %v15973_v61  ;;  %v12327_v18 = vrot.slane %v2618_v47, 9 }
 0x260   :  { %v3034_v20 = vrot.slane %v2881_v17, %v16013_v29  ;;  %v3038_v40 = vrot.slane %v2881_v17, %v16100_v16  ;;  %v3042_v45 = vrot.slane %v16185_v33, %v15970_v56  ;;  %v16267_v11 = vrot.slane %v16185_v33, %v15973_v61 }
 0x261   :  { %v16271_v25 = vrot.slane %v16185_v33, %v16013_v29  ;;  %v16275_v46 = vrot.slane %v16185_v33, %v16100_v16  ;;  %v12326_v0 = vrot.slane %v2617_v44, 9  ;;  %v2886_v13 = vmax.f32 %v2618_v47, %v12327_v18 }
 0x262   :  { %v3423_v17 = vpack.c.bf16 %v16188_v24, %v16188_v24  ;;  %v3424_v26 = vpack.c.bf16 %v16191_v10, %v16191_v10  ;;  %v3425_v31 = vpack.c.bf16 %v16194_v63, %v16194_v63  ;;  %v3426_v42 = vpack.c.bf16 %v16197_v1, %v16197_v1 }
 0x263   :  { %18391 = vst [vmem:[#allocation63_spill] sm:$0xff] %v16275_v46  ;;  %v3427_v30 = vpack.c.bf16 %v16201_v48, %v16201_v48  ;;  %v3428_v33 = vpack.c.bf16 %v16205_v55, %v16205_v55  ;;  %v3429_v8 = vpack.c.bf16 %v16209_v53, %v16209_v53  ;;  %v3430_v47 = vpack.c.bf16 %v3022_v34, %v3022_v34 }
 0x264   :  { %v3431_v24 = vpack.c.bf16 %v3026_v7, %v3026_v7  ;;  %v3432_v18 = vpack.c.bf16 %v3030_v51, %v3030_v51  ;;  %v3433_v38 = vpack.c.bf16 %v3034_v20, %v3034_v20  ;;  %v3434_v10 = vpack.c.bf16 %v3038_v40, %v3038_v40 }
 0x265   :  { %v12324_v9 = vrot.slane %v2615_v35, 9  ;;  %v12325_v23 = vrot.slane %v2616_v37, 9  ;;  %v2885_v63 = vmax.f32 %v2617_v44, %v12326_v0  ;;  %v3106_v59 = vrot.slane %v2886_v13, %v15970_v56 }
 0x266   :  { %v3435_v1 = vpack.c.bf16 %v3042_v45, %v3042_v45  ;;  %v3437_v55 = vpack.c.bf16 %v16271_v25, %v16271_v25  ;;  %v3114_v54 = vrot.slane %v2886_v13, %v16013_v29  ;;  %v16299_v34 = vunpack.c.l.b16 %v3423_v17 }
 0x267   :  { %v16301_v7 = vunpack.c.l.b16 %v3424_v26  ;;  %v16303_v51 = vunpack.c.l.b16 %v3425_v31  ;;  %v16305_v44 = vunpack.c.l.b16 %v3426_v42  ;;  %v16307_v20 = vunpack.c.l.b16 %v3427_v30 }
 0x268   :  { %18392 = vst [vmem:[#allocation64_spill] sm:$0xff] %v16299_v34  ;;  %v16309_v40 = vunpack.c.l.b16 %v3428_v33  ;;  %v16311_v45 = vunpack.c.l.b16 %v3429_v8  ;;  %v16313_v25 = vunpack.c.l.b16 %v3430_v47  ;;  %v2884_v0 = vmax.f32 %v2616_v37, %v12325_v23 }
 0x269   :  { %18393 = vst [vmem:[#allocation65_spill] sm:$0xff] %v16301_v7  ;;  %18394 = vst [vmem:[#allocation66_spill] sm:$0xff] %v16303_v51  ;;  %v3090_v48 = vrot.slane %v2885_v63, %v15970_v56  ;;  %v3451_v53 = vpack.c.bf16 %v3106_v59, %v3106_v59  ;;  %v16316_v17 = vunpack.c.l.b16 %v3431_v24  ;;  %v16318_v26 = vunpack.c.l.b16 %v3432_v18 }
 0x26a   :  { %18395 = vst [vmem:[#allocation67_spill] sm:$0xff] %v16305_v44  ;;  %18396 = vst [vmem:[#allocation68_spill] sm:$0xff] %v16307_v20  ;;  %v3098_v31 = vrot.slane %v2885_v63, %v16013_v29  ;;  %v3453_v42 = vpack.c.bf16 %v3114_v54, %v3114_v54  ;;  %v16321_v41 = vunpack.c.l.b16 %v3433_v38  ;;  %v16325_v8 = vmax.f32 %v2615_v35, %v12324_v9 }
 0x26b   :  { %18397 = vst [vmem:[#allocation69_spill] sm:$0xff] %v16309_v40  ;;  %18398 = vst [vmem:[#allocation70_spill] sm:$0xff] %v16311_v45  ;;  %v16327_v47 = vunpack.c.l.b16 %v3434_v10  ;;  %v16329_v23 = vunpack.c.l.b16 %v3435_v1  ;;  %v12328_v59 = vrot.slane %v16249_v50, 9  ;;  %v12329_v37 = vrot.slane %v16251_v39, 9 }
 0x26c   :  { %18399 = vst [vmem:[#allocation71_spill] sm:$0xff] %v16313_v25  ;;  %18400 = vst [vmem:[#allocation72_spill] sm:$0xff] %v16316_v17  ;;  %v3074_v24 = vrot.slane %v2884_v0, %v15970_v56  ;;  %v3094_v54 = vrot.slane %v2885_v63, %v15973_v61  ;;  %v3447_v38 = vpack.c.bf16 %v3090_v48, %v3090_v48  ;;  %v16335_v18 = vunpack.c.l.b16 %v3451_v53 }
 0x26d   :  { %18401 = vst [vmem:[#allocation73_spill] sm:$0xff] %v16318_v26  ;;  %18402 = vst [vmem:[#allocation74_spill] sm:$0xff] %v16321_v41  ;;  %v3102_v30 = vrot.slane %v2885_v63, %v16100_v16  ;;  %v3449_v33 = vpack.c.bf16 %v3098_v31, %v3098_v31  ;;  %v16338_v9 = vunpack.c.l.b16 %v3453_v42  ;;  %v12331_v35 = vrot.slane %v16255_v6, 9 }
 0x26e   :  { %18403 = vst [vmem:[#allocation75_spill] sm:$0xff] %v16327_v47  ;;  %18404 = vst [vmem:[#allocation76_spill] sm:$0xff] %v16329_v23  ;;  %v3058_v10 = vrot.slane %v16325_v8, %v15970_v56  ;;  %v3066_v1 = vrot.slane %v16325_v8, %v16013_v29  ;;  %v3078_v41 = vrot.slane %v2884_v0, %v15973_v61  ;;  %v12330_v51 = vrot.slane %v16253_v57, 9 }
 0x26f   :  { %18405 = vst [vmem:[#allocation77_spill] sm:$0xff] %v16335_v18  ;;  %18406 = vst [vmem:[#allocation78_spill] sm:$0xff] %v16338_v9  ;;  %v3082_v48 = vrot.slane %v2884_v0, %v16013_v29  ;;  %v3086_v53 = vrot.slane %v2884_v0, %v16100_v16  ;;  %v3110_v63 = vrot.slane %v2886_v13, %v15973_v61  ;;  %v16351_v19 = vunpack.c.l.b16 %v3447_v38 }
 0x270   :  { %v3118_v31 = vrot.slane %v2886_v13, %v16100_v16  ;;  %v3443_v42 = vpack.c.bf16 %v3074_v24, %v3074_v24  ;;  %v3448_v45 = vpack.c.bf16 %v3094_v54, %v3094_v54  ;;  %v7742_v47 = vrot.slane %v16335_v18, 7 }
 0x271   :  { %18407 = vst [vmem:[#allocation79_spill] sm:$0xff] %v16351_v19  ;;  %v3450_v25 = vpack.c.bf16 %v3102_v30, %v3102_v30  ;;  %v16354_v44 = vunpack.c.l.b16 %v3449_v33  ;;  %v7770_v52 = vrot.slane %v16338_v9, 7  ;;  %v2890_v36 = vmax.f32 %v16255_v6, %v12331_v35  ;;  %v18443_v9 = vld [vmem:[#allocation40_spill] sm:$0xff] }
 0x272   :  { %v3439_v22 = vpack.c.bf16 %v3058_v10, %v3058_v10  ;;  %v3441_v46 = vpack.c.bf16 %v3066_v1, %v3066_v1  ;;  %v3444_v0 = vpack.c.bf16 %v3078_v41, %v3078_v41  ;;  %v16360_v23 = vsel %vm4132_vm6, %v7742_v47, %v16351_v19 }
 0x273   :  { %18408 = vst [vmem:[#allocation80_spill] sm:$0xff] %v16354_v44  ;;  %18409 = vst [vmem:[#allocation81_spill] sm:$0xff] %v16360_v23  ;;  %v3445_v13 = vpack.c.bf16 %v3082_v48, %v3082_v48  ;;  %v3446_v24 = vpack.c.bf16 %v3086_v53, %v3086_v53  ;;  %v3452_v54 = vpack.c.bf16 %v3110_v63, %v3110_v63  ;;  %v16366_v33 = vunpack.c.l.b16 %v3443_v42 }
 0x274   :  { %v16364_v38 = vsel %vm4132_vm6, %v7770_v52, %v16354_v44  ;;  %v3454_v30 = vpack.c.bf16 %v3118_v31, %v3118_v31  ;;  %v16368_v17 = vunpack.c.l.b16 %v3448_v45  ;;  %v4194_v6 = vrot.slane %v16351_v19, 7  ;;  %v18438_v19 = vld [vmem:[#allocation22_spill] sm:$0xff] }
 0x275   :  { %18410 = vst [vmem:[#allocation82_spill] sm:$0xff] %v16364_v38  ;;  %18411 = vst [vmem:[#allocation83_spill] sm:$0xff] %v16366_v33  ;;  %v16371_v35 = vunpack.c.l.b16 %v3437_v55  ;;  %v16373_v41 = vunpack.c.l.b16 %v3450_v25  ;;  %v2887_v47 = vmax.f32 %v16249_v50, %v12328_v59  ;;  %v16377_v10 = vmax.f32 %v16251_v39, %v12329_v37 }
 0x276   :  { %18412 = vst [vmem:[#allocation84_spill] sm:$0xff] %v16368_v17  ;;  %v16379_v1 = vunpack.c.l.b16 %v3439_v22  ;;  %v16381_v52 = vunpack.c.l.b16 %v3441_v46  ;;  %v2889_v48 = vmax.f32 %v16253_v57, %v12330_v51  ;;  %v3138_v45 = vrot.slane %v2890_v36, %v15970_v56 }
 0x277   :  { %18413 = vst [vmem:[#allocation85_spill] sm:$0xff] %v16371_v35  ;;  %18414 = vst [vmem:[#allocation86_spill] sm:$0xff] %v16373_v41  ;;  %v16385_v53 = vunpack.c.l.b16 %v3444_v0  ;;  %v16387_v63 = vunpack.c.l.b16 %v3445_v13  ;;  %v16389_v55 = vunpack.c.l.b16 %v3446_v24  ;;  %v16391_v25 = vunpack.c.l.b16 %v3452_v54  ;;  %v18437_v54 = vld [vmem:[#allocation37_spill] sm:$0xff] }
 0x278   :  { %18415 = vst [vmem:[#allocation87_spill] sm:$0xff] %v16377_v10  ;;  %18416 = vst [vmem:[#allocation88_spill] sm:$0xff] %v16379_v1  ;;  %v16393_v50 = vunpack.c.l.b16 %v3454_v30  ;;  %v4222_v22 = vrot.slane %v16354_v44, 7  ;;  %v5104_v46 = vrot.slane %v16366_v33, 7  ;;  %v16400_v57 = vsel %vm4132_vm6, %v4194_v6, %v16366_v33 }
 0x279   :  { %18417 = vst [vmem:[#allocation89_spill] sm:$0xff] %v16381_v52  ;;  %18418 = vst [vmem:[#allocation90_spill] sm:$0xff] %v16385_v53  ;;  %v3146_v37 = vrot.slane %v2890_v36, %v16013_v29  ;;  %v3122_v31 = vrot.slane %v2889_v48, %v15970_v56  ;;  %v3459_v42 = vpack.c.bf16 %v3138_v45, %v3138_v45 }
 0x27a   :  { %18419 = vst [vmem:[#allocation91_spill] sm:$0xff] %v16387_v63  ;;  %18420 = vst [vmem:[#allocation92_spill] sm:$0xff] %v16389_v55  ;;  %v3765_v0 = vrot.slane %v2887_v47, %v15970_v56  ;;  %v3773_v13 = vrot.slane %v2887_v47, %v16013_v29  ;;  %v16411_v30 = vrot.slane %v2889_v48, %v15973_v61 }
 0x27b   :  { %18421 = vst [vmem:[#allocation93_spill] sm:$0xff] %v16391_v25  ;;  %18422 = vst [vmem:[#allocation94_spill] sm:$0xff] %v16393_v50  ;;  %v16414_v6 = vrot.slane %v2890_v36, %v15973_v61  ;;  %v16418_v59 = vsel %vm4132_vm6, %v4222_v22, %v16387_v63  ;;  %v16422_v45 = vsel %vm4132_vm6, %v5104_v46, %v16379_v1  ;;  %v16433_v10 = vunpack.c.l.b16 %v3459_v42  ;;  %v18448_v50 = vld [vmem:[#allocation28_spill] sm:$0xff] }
 0x27c   :  { %18423 = vst [vmem:[#allocation95_spill] sm:$0xff] %v16400_v57  ;;  %18424 = vst [vmem:[#allocation96_spill] sm:$0xff] %v16418_v59  ;;  %v16426_v24 = vrot.slane %v2890_v36, %v16100_v16  ;;  %v3461_v38 = vpack.c.bf16 %v3146_v37, %v3146_v37  ;;  %v16431_v33 = vrot.slane %v2887_v47, %v15973_v61  ;;  %v18433_v36 = vld [vmem:[#allocation21_spill] sm:$0xff] }
 0x27d   :  { %18425 = vst [vmem:[#allocation97_spill] sm:$0xff] %v16422_v45  ;;  %v3455_v23 = vpack.c.bf16 %v3122_v31, %v3122_v31  ;;  %v3802_v22 = vpack.c.bf16 %v3765_v0, %v3765_v0  ;;  %v3804_v44 = vpack.c.bf16 %v3773_v13, %v3773_v13  ;;  %18426 = vst [vmem:[#allocation98_spill] sm:$0xff] %v16433_v10  ;;  %v18440_v45 = vld [vmem:[#allocation23_spill] sm:$0xff]  ;;  %v18444_v59 = vld [vmem:[#allocation25_spill] sm:$0xff] }
 0x27e   :  { %v16436_v46 = vrot.slane %v2889_v48, %v16013_v29  ;;  %v16439_v51 = vrot.slane %v2889_v48, %v16100_v16  ;;  %v3460_v37 = vpack.c.bf16 %v16414_v6, %v16414_v6  ;;  %v3462_v39 = vpack.c.bf16 %v16426_v24, %v16426_v24 }
 0x27f   :  { %v16448_v31 = vrot.slane %v2887_v47, %v16100_v16  ;;  %v18429_v42 = vmax.f32 %v15943_v60, %v16055_v58  ;;  %v18430_v48 = vmax.f32 %v15945_v12, %v16057_v15  ;;  %v16460_v6 = vunpack.c.l.b16 %v3461_v38  ;;  %v18432_v47 = vld [vmem:[#allocation36_spill] sm:$0xff] }
 0x280   :  { %18427 = vst [vmem:[#allocation99_spill] sm:$0xff] %v16436_v46  ;;  %18428 = vst [vmem:[#allocation100_spill] sm:$0xff] %v16439_v51  ;;  %v2394_v24 = vmax.f32 %v15947_v4, %v16059_v62  ;;  %v2396_v63 = vmax.f32 %v18433_v36, %v18432_v47  ;;  %v16466_v51 = vunpack.c.l.b16 %v3802_v22  ;;  %v16468_v60 = vunpack.c.l.b16 %v3804_v44  ;;  %v18439_v62 = vld [vmem:[#allocation38_spill] sm:$0xff]  ;;  %v18441_v22 = vld [vmem:[#allocation39_spill] sm:$0xff] }
 0x281   :  { %v2443_v0 = vadd.f32 %v15982_v5, %v18429_v42  ;;  %v2445_v13 = vadd.f32 %v15985_v43, %v18430_v48  ;;  %18431 = vst [vmem:[#allocation101_spill] sm:$0xff] %v16460_v6  ;;  %v16471_v12 = vunpack.c.l.b16 %v3455_v23  ;;  %v2397_v4 = vmax.f32 %v18438_v19, %v18437_v54  ;;  %v18442_v47 = vld [vmem:[#allocation24_spill] sm:$0xff] }
 0x282   :  { %18434 = vst [vmem:[#allocation36_spill] sm:$0xff] %v16466_v51  ;;  %18435 = vst [vmem:[#allocation21_spill] sm:$0xff] %v16468_v60  ;;  %v2444_v48 = vadd.f32 %v15988_v27, %v2394_v24  ;;  %v2446_v38 = vadd.f32 %v15991_v28, %v2396_v63  ;;  %v2399_v36 = vmax.f32 %v18440_v45, %v18439_v62  ;;  %v18447_v24 = vld [vmem:[#allocation42_spill] sm:$0xff] }
 0x283   :  { %18436 = vst [vmem:[#allocation102_spill] sm:$0xff] %v16471_v12  ;;  %v2471_v15 = vmax.f32 %v2443_v0, 0.0  ;;  %v2473_v42 = vmax.f32 %v2445_v13, 0.0  ;;  %v2398_v44 = vmax.f32 %v18442_v47, %v18441_v22  ;;  %v2400_v58 = vmax.f32 %v18444_v59, %v18443_v9  ;;  %v18445_v0 = vld [vmem:[#allocation41_spill] sm:$0xff]  ;;  %v18446_v13 = vld [vmem:[#allocation27_spill] sm:$0xff] }
 0x284   :  { %v2472_v23 = vmax.f32 %v2444_v48, 0.0  ;;  %v2474_v52 = vmax.f32 %v2446_v38, 0.0  ;;  %v2447_v41 = vadd.f32 %v15982_v5, %v2397_v4  ;;  %v2449_v19 = vadd.f32 %v15985_v43, %v2399_v36 }
 0x285   :  { %v2448_v54 = vadd.f32 %v15988_v27, %v2398_v44  ;;  %v2450_v45 = vadd.f32 %v15991_v28, %v2400_v58 }
 0x286   :  { %v2655_v62 = vcombine.low %v2471_v15, %v2472_v23  ;;  %v2656_v22 = vcombine.high %v2471_v15, %v2472_v23  ;;  %v2657_v47 = vcombine.low %v2473_v42, %v2474_v52  ;;  %v2658_v9 = vcombine.high %v2473_v42, %v2474_v52 }
 0x287   :  { %v2475_v59 = vmax.f32 %v2447_v41, 0.0  ;;  %v2477_v48 = vmax.f32 %v2449_v19, 0.0  ;;  %v2476_v38 = vmax.f32 %v2448_v54, 0.0  ;;  %v2478_v55 = vmax.f32 %v2450_v45, 0.0 }
 0x288   :  { %v2665_v35 = vrot.slane %v2655_v62, %v15997_v14  ;;  %v2672_v63 = vrot.slane %v2656_v22, %v15997_v14  ;;  %v2679_v4 = vrot.slane %v2657_v47, %v15997_v14  ;;  %v2686_v36 = vrot.slane %v2658_v9, %v15997_v14 }
 0x289   :  { %v2691_v10 = vcombine.low %v2475_v59, %v2476_v38  ;;  %v2692_v44 = vcombine.high %v2475_v59, %v2476_v38  ;;  %v2693_v18 = vcombine.low %v2477_v48, %v2478_v55  ;;  %v2694_v58 = vcombine.high %v2477_v48, %v2478_v55 }
 0x28a   :  { %v2687_v57 = vcombine.low %v2665_v35, %v2679_v4  ;;  %v2688_v15 = vcombine.high %v2665_v35, %v2679_v4  ;;  %v2689_v23 = vcombine.low %v2672_v63, %v2686_v36  ;;  %v2690_v52 = vcombine.high %v2672_v63, %v2686_v36 }
 0x28b   :  { %v2701_v41 = vrot.slane %v2691_v10, %v15997_v14  ;;  %v2708_v42 = vrot.slane %v2692_v44, %v15997_v14  ;;  %v2715_v19 = vrot.slane %v2693_v18, %v15997_v14  ;;  %v2722_v54 = vrot.slane %v2694_v58, %v15997_v14 }
 0x28c   :  { %v12332_v45 = vrot.slane %v2687_v57, 9  ;;  %v12333_v62 = vrot.slane %v2688_v15, 9  ;;  %v12334_v22 = vrot.slane %v2689_v23, 9  ;;  %v12335_v47 = vrot.slane %v2690_v52, 9 }
 0x28d   :  { %v2723_v9 = vcombine.low %v2701_v41, %v2715_v19  ;;  %v2724_v59 = vcombine.high %v2701_v41, %v2715_v19  ;;  %v2725_v38 = vcombine.low %v2708_v42, %v2722_v54  ;;  %v2726_v55 = vcombine.high %v2708_v42, %v2722_v54 }
 0x28e   :  { %v16501_v63 = vunpack.c.l.b16 %v3460_v37  ;;  %v16503_v10 = vunpack.c.l.b16 %v3462_v39  ;;  %v2891_v48 = vmax.f32 %v2687_v57, %v12332_v45  ;;  %v2892_v44 = vmax.f32 %v2688_v15, %v12333_v62 }
 0x28f   :  { %v3805_v58 = vpack.c.bf16 %v16448_v31, %v16448_v31  ;;  %v18451_v41 = vpack.c.bf16 %v16431_v33, %v16431_v33  ;;  %v16515_v37 = vmax.f32 %v2689_v23, %v12334_v22  ;;  %v2894_v39 = vmax.f32 %v2690_v52, %v12335_v47 }
 0x290   :  { %18449 = vst [vmem:[#allocation37_spill] sm:$0xff] %v16501_v63  ;;  %18450 = vst [vmem:[#allocation22_spill] sm:$0xff] %v16503_v10  ;;  %v3154_v19 = vrot.slane %v2891_v48, %v15970_v56  ;;  %v12336_v54 = vrot.slane %v2723_v9, 9  ;;  %v12337_v45 = vrot.slane %v2724_v59, 9  ;;  %v3158_v35 = vrot.slane %v2891_v48, %v15973_v61 }
 0x291   :  { %v16513_v42 = vunpack.c.l.b16 %v18451_v41  ;;  %v3162_v15 = vrot.slane %v2891_v48, %v16013_v29  ;;  %v12338_v62 = vrot.slane %v2725_v38, 9  ;;  %v12339_v31 = vrot.slane %v2726_v55, 9 }
 0x292   :  { %v3166_v36 = vrot.slane %v2891_v48, %v16100_v16  ;;  %v3170_v33 = vrot.slane %v2892_v44, %v15970_v56  ;;  %v16524_v23 = vrot.slane %v2892_v44, %v15973_v61  ;;  %v3178_v52 = vrot.slane %v2892_v44, %v16013_v29 }
 0x293   :  { %18452 = vst [vmem:[#allocation38_spill] sm:$0xff] %v16513_v42  ;;  %v16528_v22 = vrot.slane %v2892_v44, %v16100_v16  ;;  %v3186_v47 = vrot.slane %v16515_v37, %v15970_v56  ;;  %v3194_v41 = vrot.slane %v16515_v37, %v16013_v29  ;;  %v3202_v4 = vrot.slane %v2894_v39, %v15970_v56 }
 0x294   :  { %v3206_v48 = vrot.slane %v2894_v39, %v15973_v61  ;;  %v3210_v57 = vrot.slane %v2894_v39, %v16013_v29  ;;  %v3214_v18 = vrot.slane %v2894_v39, %v16100_v16  ;;  %v3463_v46 = vpack.c.bf16 %v3154_v19, %v3154_v19 }
 0x295   :  { %18453 = vst [vmem:[#allocation23_spill] sm:$0xff] %v16528_v22  ;;  %v16538_v12 = vunpack.c.l.b16 %v3805_v58  ;;  %v18455_v44 = vpack.c.bf16 %v16411_v30, %v16411_v30  ;;  %v3464_v60 = vpack.c.bf16 %v3158_v35, %v3158_v35  ;;  %v3465_v10 = vpack.c.bf16 %v3162_v15, %v3162_v15 }
 0x296   :  { %v3466_v51 = vpack.c.bf16 %v3166_v36, %v3166_v36  ;;  %v3467_v1 = vpack.c.bf16 %v3170_v33, %v3170_v33  ;;  %v3469_v20 = vpack.c.bf16 %v3178_v52, %v3178_v52  ;;  %v3471_v39 = vpack.c.bf16 %v3186_v47, %v3186_v47 }
 0x297   :  { %18454 = vst [vmem:[#allocation39_spill] sm:$0xff] %v16538_v12  ;;  %v16543_v6 = vunpack.c.l.b16 %v18455_v44  ;;  %v3473_v19 = vpack.c.bf16 %v3194_v41, %v3194_v41  ;;  %v3475_v58 = vpack.c.bf16 %v3202_v4, %v3202_v4  ;;  %v3476_v12 = vpack.c.bf16 %v3206_v48, %v3206_v48 }
 0x298   :  { %v3477_v32 = vpack.c.bf16 %v3210_v57, %v3210_v57  ;;  %v3478_v63 = vpack.c.bf16 %v3214_v18, %v3214_v18  ;;  %v16549_v30 = vunpack.c.l.b16 %v3463_v46  ;;  %v16551_v44 = vunpack.c.l.b16 %v3464_v60 }
 0x299   :  { %18456 = vst [vmem:[#allocation24_spill] sm:$0xff] %v16543_v6  ;;  %v16553_v35 = vunpack.c.l.b16 %v3465_v10  ;;  %v2895_v36 = vmax.f32 %v2723_v9, %v12336_v54  ;;  %v2896_v15 = vmax.f32 %v2724_v59, %v12337_v45  ;;  %v16555_v33 = vunpack.c.l.b16 %v3466_v51 }
 0x29a   :  { %18457 = vst [vmem:[#allocation40_spill] sm:$0xff] %v16551_v44  ;;  %v16557_v52 = vunpack.c.l.b16 %v3467_v1  ;;  %v16559_v34 = vunpack.c.l.b16 %v3469_v20  ;;  %v2897_v47 = vmax.f32 %v2725_v38, %v12338_v62  ;;  %v16561_v41 = vunpack.c.l.b16 %v3471_v39 }
 0x29b   :  { %18458 = vst [vmem:[#allocation25_spill] sm:$0xff] %v16553_v35  ;;  %18459 = vst [vmem:[#allocation41_spill] sm:$0xff] %v16555_v33  ;;  %v16563_v4 = vunpack.c.l.b16 %v3473_v19  ;;  %v16565_v18 = vunpack.c.l.b16 %v3475_v58  ;;  %v2898_v46 = vmax.f32 %v2726_v55, %v12339_v31  ;;  %v16567_v60 = vunpack.c.l.b16 %v3476_v12 }
 0x29c   :  { %18460 = vst [vmem:[#allocation27_spill] sm:$0xff] %v16557_v52  ;;  %18461 = vst [vmem:[#allocation42_spill] sm:$0xff] %v16559_v34  ;;  %v16569_v10 = vunpack.c.l.b16 %v3477_v32  ;;  %v16571_v9 = vunpack.c.l.b16 %v3478_v63  ;;  %v3218_v51 = vrot.slane %v2895_v36, %v15970_v56  ;;  %v3222_v1 = vrot.slane %v2895_v36, %v15973_v61 }
 0x29d   :  { %18462 = vst [vmem:[#allocation28_spill] sm:$0xff] %v16561_v41  ;;  %18463 = vst [vmem:[#allocation103_spill] sm:$0xff] %v16563_v4  ;;  %v3226_v20 = vrot.slane %v2895_v36, %v16013_v29  ;;  %v3230_v59 = vrot.slane %v2895_v36, %v16100_v16  ;;  %v3234_v38 = vrot.slane %v2896_v15, %v15970_v56 }
 0x29e   :  { %18464 = vst [vmem:[#allocation104_spill] sm:$0xff] %v16565_v18  ;;  %18465 = vst [vmem:[#allocation105_spill] sm:$0xff] %v16567_v60  ;;  %v3238_v57 = vrot.slane %v2896_v15, %v15973_v61  ;;  %v3242_v55 = vrot.slane %v2896_v15, %v16013_v29  ;;  %v3246_v12 = vrot.slane %v2896_v15, %v16100_v16 }
 0x29f   :  { %18466 = vst [vmem:[#allocation106_spill] sm:$0xff] %v16569_v10  ;;  %18467 = vst [vmem:[#allocation107_spill] sm:$0xff] %v16571_v9  ;;  %v3250_v32 = vrot.slane %v2897_v47, %v15970_v56  ;;  %v3254_v63 = vrot.slane %v2897_v47, %v15973_v61  ;;  %v3258_v54 = vrot.slane %v2897_v47, %v16013_v29 }
 0x2a0   :  { %v3262_v45 = vrot.slane %v2897_v47, %v16100_v16  ;;  %v3266_v62 = vrot.slane %v2898_v46, %v15970_v56  ;;  %v3270_v31 = vrot.slane %v2898_v46, %v15973_v61  ;;  %v3274_v48 = vrot.slane %v2898_v46, %v16013_v29 }
 0x2a1   :  { %v3278_v39 = vrot.slane %v2898_v46, %v16100_v16  ;;  %v3479_v19 = vpack.c.bf16 %v3218_v51, %v3218_v51  ;;  %v3480_v58 = vpack.c.bf16 %v3222_v1, %v3222_v1  ;;  %v3481_v36 = vpack.c.bf16 %v3226_v20, %v3226_v20 }
 0x2a2   :  { %v3482_v15 = vpack.c.bf16 %v3230_v59, %v3230_v59  ;;  %v3483_v49 = vpack.c.bf16 %v3234_v38, %v3234_v38  ;;  %v3484_v6 = vpack.c.bf16 %v3238_v57, %v3238_v57  ;;  %v3485_v10 = vpack.c.bf16 %v3242_v55, %v3242_v55 }
 0x2a3   :  { %v3486_v9 = vpack.c.bf16 %v3246_v12, %v3246_v12  ;;  %v3487_v4 = vpack.c.bf16 %v3250_v32, %v3250_v32  ;;  %v3488_v34 = vpack.c.bf16 %v3254_v63, %v3254_v63  ;;  %v3489_v35 = vpack.c.bf16 %v3258_v54, %v3258_v54 }
 0x2a4   :  { %v3490_v47 = vpack.c.bf16 %v3262_v45, %v3262_v45  ;;  %v3491_v33 = vpack.c.bf16 %v3266_v62, %v3266_v62  ;;  %v3492_v22 = vpack.c.bf16 %v3270_v31, %v3270_v31  ;;  %v3493_v18 = vpack.c.bf16 %v3274_v48, %v3274_v48  ;;  %v18483_v45 = vld [vmem:[#allocation29_spill] sm:$0xff]  ;;  %v18484_v62 = vld [vmem:[#allocation44_spill] sm:$0xff] }
 0x2a5   :  { %v3494_v60 = vpack.c.bf16 %v3278_v39, %v3278_v39  ;;  %v16589_v41 = vunpack.c.l.b16 %v3479_v19  ;;  %v16591_v52 = vunpack.c.l.b16 %v3480_v58  ;;  %v16593_v46 = vunpack.c.l.b16 %v3481_v36 }
 0x2a6   :  { %v16595_v51 = vunpack.c.l.b16 %v3482_v15  ;;  %v16597_v1 = vunpack.c.l.b16 %v3483_v49  ;;  %v16599_v20 = vunpack.c.l.b16 %v3484_v6  ;;  %v16601_v59 = vunpack.c.l.b16 %v3485_v10 }
 0x2a7   :  { %18468 = vst [vmem:[#allocation108_spill] sm:$0xff] %v16589_v41  ;;  %18469 = vst [vmem:[#allocation109_spill] sm:$0xff] %v16591_v52  ;;  %v16603_v38 = vunpack.c.l.b16 %v3486_v9  ;;  %v16605_v57 = vunpack.c.l.b16 %v3487_v4  ;;  %v16607_v55 = vunpack.c.l.b16 %v3488_v34  ;;  %v16609_v12 = vunpack.c.l.b16 %v3489_v35 }
 0x2a8   :  { %18470 = vst [vmem:[#allocation110_spill] sm:$0xff] %v16597_v1  ;;  %18471 = vst [vmem:[#allocation111_spill] sm:$0xff] %v16599_v20  ;;  %v16611_v32 = vunpack.c.l.b16 %v3490_v47  ;;  %v16613_v63 = vunpack.c.l.b16 %v3491_v33  ;;  %v16615_v54 = vunpack.c.l.b16 %v3492_v22  ;;  %v16617_v49 = vunpack.c.l.b16 %v3493_v18  ;;  %v18482_v33 = vld [vmem:[#allocation43_spill] sm:$0xff]  ;;  %v18485_v18 = vld [vmem:[#allocation30_spill] sm:$0xff] }
 0x2a9   :  { %18472 = vst [vmem:[#allocation112_spill] sm:$0xff] %v16601_v59  ;;  %18473 = vst [vmem:[#allocation113_spill] sm:$0xff] %v16605_v57  ;;  %v16619_v6 = vunpack.c.l.b16 %v3494_v60  ;;  %v18480_v4 = vmax.f32 %v18446_v13, %v18445_v0  ;;  %v18481_v35 = vmax.f32 %v18448_v50, %v18447_v24  ;;  %v2402_v22 = vmax.f32 %v18483_v45, %v18482_v33 }
 0x2aa   :  { %18474 = vst [vmem:[#allocation114_spill] sm:$0xff] %v16607_v55  ;;  %18475 = vst [vmem:[#allocation115_spill] sm:$0xff] %v16609_v12  ;;  %v2404_v31 = vmax.f32 %v18485_v18, %v18484_v62  ;;  %v3062_v0 = vrot.slane %v16325_v8, %v15973_v61  ;;  %v18486_v36 = vpack.c.bf16 %v16267_v11, %v16267_v11  ;;  %v4154_v18 = vrot.slane %v16162_v21, 6 }
 0x2ab   :  { %18476 = vst [vmem:[#allocation116_spill] sm:$0xff] %v16613_v63  ;;  %18477 = vst [vmem:[#allocation117_spill] sm:$0xff] %v16615_v54  ;;  %v2451_v34 = vadd.f32 %v15982_v5, %v18480_v4  ;;  %v2453_v9 = vadd.f32 %v15985_v43, %v18481_v35  ;;  %v3190_v5 = vrot.slane %v16515_v37, %v15973_v61  ;;  %v4216_v39 = vrot.slane %v16551_v44, 3  ;;  %v18499_v44 = vld [vmem:[#allocation68_spill] sm:$0xff] }
 0x2ac   :  { %18478 = vst [vmem:[#allocation118_spill] sm:$0xff] %v16617_v49  ;;  %18479 = vst [vmem:[#allocation119_spill] sm:$0xff] %v16619_v6  ;;  %v2452_v43 = vadd.f32 %v15988_v27, %v2402_v22  ;;  %v2454_v24 = vadd.f32 %v15991_v28, %v2404_v31  ;;  %v3440_v19 = vpack.c.bf16 %v3062_v0, %v3062_v0  ;;  %v16646_v15 = vunpack.c.l.b16 %v18486_v36 }
 0x2ad   :  { %v2479_v13 = vmax.f32 %v2451_v34, 0.0  ;;  %v2481_v50 = vmax.f32 %v2453_v9, 0.0  ;;  %v3472_v58 = vpack.c.bf16 %v3190_v5, %v3190_v5  ;;  %v18489_v27 = vpack.c.bf16 %v16524_v23, %v16524_v23 }
 0x2ae   :  { %18487 = vst [vmem:[#allocation43_spill] sm:$0xff] %v16646_v15  ;;  %v2480_v47 = vmax.f32 %v2452_v43, 0.0  ;;  %v2482_v4 = vmax.f32 %v2454_v24, 0.0  ;;  %v16648_v35 = vunpack.c.l.b16 %v3440_v19  ;;  %v18492_v22 = vrot.slane %v16150_v3, 7 }
 0x2af   :  { %v16653_v34 = vunpack.c.l.b16 %v18489_v27  ;;  %v16655_v11 = vunpack.c.l.b16 %v3472_v58  ;;  %v4156_v31 = vrot.slane %v16301_v7, 5  ;;  %v4158_v43 = vrot.slane %v16309_v40, 4 }
 0x2b0   :  { %18488 = vst [vmem:[#allocation29_spill] sm:$0xff] %v16648_v35  ;;  %v2727_v28 = vcombine.low %v2479_v13, %v2480_v47  ;;  %v2728_v9 = vcombine.high %v2479_v13, %v2480_v47  ;;  %v2729_v33 = vcombine.low %v2481_v50, %v2482_v4  ;;  %v2730_v45 = vcombine.high %v2481_v50, %v2482_v4 }
 0x2b1   :  { %18490 = vst [vmem:[#allocation44_spill] sm:$0xff] %v16653_v34  ;;  %18491 = vst [vmem:[#allocation30_spill] sm:$0xff] %v16655_v11  ;;  %v4153_v62 = vsel %vm4132_vm6, %v18492_v22, %v16156_v2  ;;  %v4160_v24 = vrot.slane %v16318_v26, 3  ;;  %v18494_v27 = vrot.slane %v16368_v17, 7 }
 0x2b2   :  { %v2737_v23 = vrot.slane %v2727_v28, %v15997_v14  ;;  %v2744_v0 = vrot.slane %v2728_v9, %v15997_v14  ;;  %v2751_v5 = vrot.slane %v2729_v33, %v15997_v14  ;;  %v2758_v13 = vrot.slane %v2730_v45, %v15997_v14 }
 0x2b3   :  { %v4155_v50 = vsel %vm4135_vm7, %v4154_v18, %v4153_v62  ;;  %v4209_v28 = vsel %vm4132_vm6, %v18494_v27, %v16385_v53  ;;  %v4210_v9 = vrot.slane %v16391_v25, 6  ;;  %v4212_v33 = vrot.slane %v16513_v42, 5  ;;  %v18497_v42 = vld [vmem:[#allocation48_spill] sm:$0xff] }
 0x2b4   :  { %v2759_v19 = vcombine.low %v2737_v23, %v2751_v5  ;;  %v2760_v58 = vcombine.high %v2737_v23, %v2751_v5  ;;  %v2761_v36 = vcombine.low %v2744_v0, %v2758_v13  ;;  %v16670_v47 = vcombine.high %v2744_v0, %v2758_v13  ;;  %v18495_v5 = vld [vmem:[#allocation37_spill] sm:$0xff] }
 0x2b5   :  { %v4157_v4 = vsel %vm4138_vm8, %v4156_v31, %v4155_v50  ;;  %v4162_v18 = vrot.slane %v16646_v15, 2  ;;  %v4164_v0 = vrot.slane %v16648_v35, 1  ;;  %v4211_v31 = vsel %vm4135_vm7, %v4210_v9, %v4209_v28 }
 0x2b6   :  { %18493 = vst [vmem:[#allocation120_spill] sm:$0xff] %v16670_v47  ;;  %v12340_v45 = vrot.slane %v2759_v19, 9  ;;  %v12341_v22 = vrot.slane %v2760_v58, 9  ;;  %v12342_v62 = vrot.slane %v2761_v36, 9  ;;  %v4159_v23 = vsel %vm4141_vm9, %v4158_v43, %v4157_v4 }
 0x2b7   :  { %v4214_v13 = vrot.slane %v18495_v5, 4  ;;  %v4161_v10 = vsel %vm4144_vm10, %v4160_v24, %v4159_v23  ;;  %v4213_v60 = vsel %vm4138_vm8, %v4212_v33, %v4211_v31  ;;  %v4218_v14 = vrot.slane %v16653_v34, 2 }
 0x2b8   :  { %v2899_v50 = vmax.f32 %v2759_v19, %v12340_v45  ;;  %v2900_v27 = vmax.f32 %v2760_v58, %v12341_v22  ;;  %v16684_v48 = vmax.f32 %v2761_v36, %v12342_v62  ;;  %v4220_v43 = vrot.slane %v16655_v11, 1 }
 0x2b9   :  { %v4163_v31 = vsel %vm4147_vm11, %v4162_v18, %v4161_v10  ;;  %v4215_v47 = vsel %vm4141_vm9, %v4214_v13, %v4213_v60  ;;  %v18498_v11 = vrot.slane %v18497_v42, 6  ;;  %v4140_v5 = vrot.slane %v18499_v44, 4  ;;  %v18504_v60 = vld [vmem:[#allocation64_spill] sm:$0xff] }
 0x2ba   :  { %v3282_v4 = vrot.slane %v2899_v50, %v15970_v56  ;;  %v3286_v28 = vrot.slane %v2899_v50, %v15973_v61  ;;  %v3290_v9 = vrot.slane %v2899_v50, %v16013_v29  ;;  %v3294_v19 = vrot.slane %v2899_v50, %v16100_v16  ;;  %v18496_v50 = vld [vmem:[#allocation50_spill] sm:$0xff] }
 0x2bb   :  { %v16696_v58 = vrot.slane %v2900_v27, %v15970_v56  ;;  %v3302_v36 = vrot.slane %v2900_v27, %v15973_v61  ;;  %v16700_v24 = vrot.slane %v2900_v27, %v16013_v29  ;;  %v16703_v33 = vrot.slane %v2900_v27, %v16100_v16 }
 0x2bc   :  { %v3495_v45 = vpack.c.bf16 %v3282_v4, %v3282_v4  ;;  %v3496_v22 = vpack.c.bf16 %v3286_v28, %v3286_v28  ;;  %v3497_v62 = vpack.c.bf16 %v3290_v9, %v3290_v9  ;;  %v3498_v23 = vpack.c.bf16 %v3294_v19, %v3294_v19  ;;  %v18506_v9 = vld [vmem:[#allocation72_spill] sm:$0xff] }
 0x2bd   :  { %v4136_v34 = vsel %vm4135_vm7, %v18498_v11, %v18496_v50  ;;  %v4165_v28 = vsel %vm4150_vm12, %v4164_v0, %v4163_v31  ;;  %v4217_v10 = vsel %vm4144_vm10, %v4216_v39, %v4215_v47  ;;  %v18505_v18 = vrot.slane %v18504_v60, 5  ;;  %v18509_v31 = vld [vmem:[#allocation95_spill] sm:$0xff]  ;;  %v18510_v39 = vld [vmem:[#allocation77_spill] sm:$0xff] }
 0x2be   :  { %v16712_v25 = vunpack.c.l.b16 %v3495_v45  ;;  %v16714_v17 = vunpack.c.l.b16 %v3496_v22  ;;  %v16716_v27 = vunpack.c.l.b16 %v3497_v62  ;;  %v16718_v4 = vunpack.c.l.b16 %v3498_v23  ;;  %v18507_v22 = vld [vmem:[#allocation76_spill] sm:$0xff] }
 0x2bf   :  { %v4139_v13 = vsel %vm4138_vm8, %v18505_v18, %v4136_v34  ;;  %v4143_v11 = vrot.slane %v18506_v9, 3  ;;  %v4219_v19 = vsel %vm4147_vm11, %v4218_v14, %v4217_v10  ;;  %v4146_v50 = vrot.slane %v18507_v22, 2  ;;  %v18508_v62 = vld [vmem:[#allocation88_spill] sm:$0xff] }
 0x2c0   :  { %18500 = vst [vmem:[#allocation50_spill] sm:$0xff] %v16712_v25  ;;  %18501 = vst [vmem:[#allocation48_spill] sm:$0xff] %v16714_v17  ;;  %v4142_v45 = vsel %vm4141_vm9, %v4140_v5, %v4139_v13  ;;  %v4149_v44 = vrot.slane %v18508_v62, 1  ;;  %v4221_v23 = vsel %vm4150_vm12, %v4220_v43, %v4219_v19  ;;  %v18511_v47 = vrot.slane %v18510_v39, 6  ;;  %v18513_v5 = vld [vmem:[#allocation36_spill] sm:$0xff]  ;;  %v18515_v62 = vld [vmem:[#allocation27_spill] sm:$0xff] }
 0x2c1   :  { %18502 = vst [vmem:[#allocation121_spill] sm:$0xff] %v16716_v27  ;;  %18503 = vst [vmem:[#allocation122_spill] sm:$0xff] %v16718_v4  ;;  %v4145_v0 = vsel %vm4144_vm10, %v4143_v11, %v4142_v45  ;;  %v4202_v34 = vrot.slane %v16549_v30, 3  ;;  %v16737_v18 = vpack.c.b16 %v4221_v23, %v4165_v28  ;;  %v18514_v10 = vrot.slane %v18513_v5, 5  ;;  %v18516_v11 = vld [vmem:[#allocation98_spill] sm:$0xff]  ;;  %v18518_v39 = vld [vmem:[#allocation28_spill] sm:$0xff] }
 0x2c2   :  { %v4197_v60 = vsel %vm4135_vm7, %v18511_v47, %v18509_v31  ;;  %v4148_v14 = vsel %vm4147_vm11, %v4146_v50, %v4145_v0  ;;  %v4204_v22 = vrot.slane %v18515_v62, 2  ;;  %v18517_v19 = vrot.slane %v18516_v11, 4  ;;  %v18519_v50 = vld [vmem:[#allocation105_spill] sm:$0xff] }
 0x2c3   :  { %18512 = vst [vmem:[#allocation72_spill] sm:$0xff] %v16737_v18  ;;  %v4199_v13 = vsel %vm4138_vm8, %v18514_v10, %v4197_v60  ;;  %v4151_v43 = vsel %vm4150_vm12, %v4149_v44, %v4148_v14  ;;  %v4206_v31 = vrot.slane %v18518_v39, 1  ;;  %v3500_v47 = vpack.c.bf16 %v3302_v36, %v3302_v36  ;;  %4866 = vmatprep.mubr.bf16.mxu0 %v16737_v18 }
 0x2c4   :  { %v4201_v45 = vsel %vm4141_vm9, %v18517_v19, %v4199_v13  ;;  %4968 = vmatprep.mubr.bf16.mxu1 %v16737_v18  ;;  %v3785_v60 = vrot.slane %v16684_v48, %v15973_v61  ;;  %v18520_v23 = vrot.slane %v16591_v52, 7  ;;  %v4266_v0 = vrot.slane %v16599_v20, 6  ;;  %v14248_v19 = vld [vmem:[#allocation7 + $0x780] ss:$12 sps:$4 sm:$0xff]   ;;  %v14255_v61 = vld [vmem:[#allocation7 + $0x79c] ss:$12 sps:$4 sm:$0xff]  }
 0x2c5   :  { %v4203_v28 = vsel %vm4144_vm10, %v4202_v34, %v4201_v45  ;;  %v16760_v10 = vunpack.c.l.b16 %v3500_v47  ;;  %v4268_v36 = vrot.slane %v16607_v55, 5  ;;  %v4270_v13 = vrot.slane %v16615_v54, 4  ;;  %v14252_v45 = vld [vmem:[#allocation7 + $0x788] ss:$12 sps:$4 sm:$0xff]   ;;  %v14256_v20 = vld [vmem:[#allocation7 + $0x860] ss:$12 sps:$4 sm:$0xff]  }
 0x2c6   :  { %v4265_v44 = vsel %vm4132_vm6, %v18520_v23, %v18519_v50  ;;  %v4205_v14 = vsel %vm4147_vm11, %v4204_v22, %v4203_v28  ;;  %v3807_v18 = vpack.c.bf16 %v3785_v60, %v3785_v60  ;;  %v4272_v39 = vrot.slane %v16714_v17, 3 }
 0x2c7   :  { %18521 = vst [vmem:[#allocation95_spill] sm:$0xff] %v16760_v10  ;;  %v4207_v34 = vsel %vm4150_vm12, %v4206_v31, %v4205_v14  ;;  %v4267_v5 = vsel %vm4135_vm7, %v4266_v0, %v4265_v44  ;;  %v4274_v47 = vrot.slane %v16760_v10, 2  ;;  %v3499_v28 = vpack.c.bf16 %v16696_v58, %v16696_v58  ;;  %v18524_v44 = vld [vmem:[#allocation104_spill] sm:$0xff] }
 0x2c8   :  { %v16767_v23 = vpack.c.b16 %v4207_v34, %v4151_v43  ;;  %v4269_v22 = vsel %vm4138_vm8, %v4268_v36, %v4267_v5  ;;  %v16773_v54 = vunpack.c.l.b16 %v3807_v18  ;;  %v3781_v60 = vrot.slane %v16684_v48, %v15970_v56  ;;  %v14253_v36 = vld [vmem:[#allocation7 + $0x798] ss:$12 sps:$4 sm:$0xff]  }
 0x2c9   :  { %v4271_v31 = vsel %vm4141_vm9, %v4270_v13, %v4269_v22  ;;  %v18525_v43 = vrot.slane %v16589_v41, 7  ;;  %v16785_v14 = vunpack.c.l.b16 %v3499_v28  ;;  %v4252_v58 = vrot.slane %v16597_v1, 6  ;;  %v14257_v13 = vld [vmem:[#allocation7 + $0x7a0] ss:$12 sps:$4 sm:$0xff]  }
 0x2ca   :  { %18522 = vst [vmem:[#allocation27_spill] sm:$0xff] %v16767_v23  ;;  %18523 = vst [vmem:[#allocation98_spill] sm:$0xff] %v16773_v54  ;;  %4867 = vmatmul.mubr.bf16.vlgmr.msra.gmra.mrb[32].mxu0 %v16767_v23  ;;  %4969 = vmatmul.mubr.bf16.vlgmr.msra.gmra.mrb[32].mxu1 %v16767_v23  ;;  %v4273_v5 = vsel %vm4144_vm10, %v4272_v39, %v4271_v31  ;;  %v4254_v18 = vrot.slane %v16605_v57, 5  ;;  %v4276_v22 = vrot.slane %v16773_v54, 1  ;;  %v4256_v56 = vrot.slane %v16613_v63, 4  ;;  %v18529_v54 = vld [vmem:[#allocation63_spill] sm:$0xff] }
 0x2cb   :  { %v4251_v0 = vsel %vm4132_vm6, %v18525_v43, %v18524_v44  ;;  %18526 = vst [vmem:[#allocation104_spill] sm:$0xff] %v16785_v14  ;;  %4886 = vmatpush1.bf16.msra.mxu0 %v14248_v19  ;;  %13268 = vmatpush3.bf16.msra.mxu1 %v14252_v45  ;;  %v4275_v34 = vsel %vm4147_vm11, %v4274_v47, %v4273_v5  ;;  %v14260_v39 = vld [vmem:[#allocation7 + $0x7b4] ss:$12 sps:$4 sm:$0xff]   ;;  %v4258_v31 = vrot.slane %v16712_v25, 3  ;;  %v4260_v23 = vrot.slane %v16785_v14, 2 }
 0x2cc   :  { %v3806_v43 = vpack.c.bf16 %v3781_v60, %v3781_v60  ;;  %4887 = vmatprep.subr.bf16.mxu0 %v14255_v61  ;;  %13269 = vmatprep.subr.bf16.mxu1 %v14256_v20  ;;  %v4253_v28 = vsel %vm4135_vm7, %v4252_v58, %v4251_v0  ;;  %v3070_v19 = vrot.slane %v16325_v8, %v16100_v16  ;;  %v14261_v47 = vld [vmem:[#allocation7 + $0x878] ss:$12 sps:$4 sm:$0xff]   ;;  %v14258_v8 = vld [vmem:[#allocation7 + $0x7b0] ss:$12 sps:$4 sm:$0xff]  }
 0x2cd   :  { %v4277_v45 = vsel %vm4150_vm12, %v4276_v22, %v4275_v34  ;;  %v4255_v60 = vsel %vm4138_vm8, %v4254_v18, %v4253_v28  ;;  %v3198_v61 = vrot.slane %v16515_v37, %v16100_v16  ;;  %v18530_v14 = vpack.c.bf16 %v18529_v54, %v18529_v54  ;;  %v14262_v22 = vld [vmem:[#allocation7 + $0x7b8] ss:$12 sps:$4 sm:$0xff]  }
 0x2ce   :  { %v16798_v5 = vunpack.c.l.b16 %v3806_v43  ;;  %v16803_v20 = vpack.c.b16 %v4277_v45, %v4277_v45  ;;  %v4257_v0 = vsel %vm4141_vm9, %v4256_v56, %v4255_v60  ;;  %v3442_v58 = vpack.c.bf16 %v3070_v19, %v3070_v19  ;;  %v18532_v37 = vld [vmem:[#allocation23_spill] sm:$0xff]  ;;  %v18539_v19 = vld [vmem:[#allocation60_spill] sm:$0xff] }
 0x2cf   :  { %v16809_v63 = vunpack.c.l.b16 %v18530_v14  ;;  %4888 = vmatpush1.bf16.msra.mxu0 %v14253_v36  ;;  %13270 = vmatpush3.bf16.msra.mxu1 %v14257_v13  ;;  %v4259_v34 = vsel %vm4144_vm10, %v4258_v31, %v4257_v0  ;;  %v3474_v43 = vpack.c.bf16 %v3198_v61, %v3198_v61  ;;  %v18533_v28 = vpack.c.bf16 %v18532_v37, %v18532_v37  ;;  %v18536_v14 = vld [vmem:[#allocation58_spill] sm:$0xff]  ;;  %v18537_v36 = vld [vmem:[#allocation57_spill] sm:$0xff]  ;;  %v18541_v37 = vld [vmem:[#allocation67_spill] sm:$0xff] }
 0x2d0   :  { %18527 = vst [vmem:[#allocation123_spill] sm:$0xff] %v16798_v5  ;;  %18528 = vst [vmem:[#allocation124_spill] sm:$0xff] %v16803_v20  ;;  %v4262_v18 = vrot.slane %v16798_v5, 1  ;;  %4876 = vmatprep.mubr.bf16.mxu0 %v16803_v20  ;;  %4889 = vmatprep.subr.bf16.mxu0 %v14260_v39  ;;  %v4261_v56 = vsel %vm4147_vm11, %v4260_v23, %v4259_v34  ;;  %v16820_v54 = vunpack.c.l.b16 %v3442_v58  ;;  %v18538_v13 = vrot.slane %v18537_v36, 7  ;;  %v14265_v58 = vld [vmem:[#allocation7 + $0x7cc] ss:$12 sps:$4 sm:$0xff]  }
 0x2d1   :  { %18531 = vst [vmem:[#allocation63_spill] sm:$0xff] %v16809_v63  ;;  %v16816_v45 = vunpack.c.l.b16 %v18533_v28  ;;  %v4182_v60 = vrot.slane %v18539_v19, 6  ;;  %4976 = vmatprep.mubr.bf16.mxu1 %v16803_v20  ;;  %13271 = vmatprep.subr.bf16.mxu1 %v14261_v47  ;;  %v16829_v0 = vunpack.c.l.b16 %v3474_v43  ;;  %v4184_v39 = vrot.slane %v18541_v37, 5  ;;  %v18542_v28 = vld [vmem:[#allocation71_spill] sm:$0xff]  ;;  %v14263_v20 = vld [vmem:[#allocation7 + $0x7c8] ss:$12 sps:$4 sm:$0xff]  }
 0x2d2   :  { %18535 = vst [vmem:[#allocation125_spill] sm:$0xff] %v16820_v54  ;;  %v4181_v31 = vsel %vm4132_vm6, %v18538_v13, %v18536_v14  ;;  %v4263_v61 = vsel %vm4150_vm12, %v4262_v18, %v4261_v56  ;;  %v4186_v23 = vrot.slane %v18542_v28, 4  ;;  %v14266_v34 = vld [vmem:[#allocation7 + $0x890] ss:$12 sps:$4 sm:$0xff]   ;;  %v4190_v1 = vrot.slane %v16809_v63, 2  ;;  %v18545_v43 = vld [vmem:[#allocation92_spill] sm:$0xff] }
 0x2d3   :  { %18534 = vst [vmem:[#allocation23_spill] sm:$0xff] %v16816_v45  ;;  %18540 = vst [vmem:[#allocation126_spill] sm:$0xff] %v16829_v0  ;;  %v16833_v5 = vpack.c.b16 %v4263_v61, %v4263_v61  ;;  %v4183_v25 = vsel %vm4135_vm7, %v4182_v60, %v4181_v31  ;;  %v18544_v13 = vld [vmem:[#allocation75_spill] sm:$0xff]  ;;  %4890 = vmatpush1.bf16.msra.mxu0 %v14258_v8  ;;  %13272 = vmatpush3.bf16.msra.mxu1 %v14262_v22  ;;  %v4192_v18 = vrot.slane %v16820_v54, 1  ;;  %v18546_v56 = vld [vmem:[#allocation86_spill] sm:$0xff] }
 0x2d4   :  { %v4188_v57 = vrot.slane %v18544_v13, 3  ;;  %v4185_v47 = vsel %vm4138_vm8, %v4184_v39, %v4183_v25  ;;  %v18547_v28 = vrot.slane %v18546_v56, 7  ;;  %v18548_v61 = vld [vmem:[#allocation94_spill] sm:$0xff]  ;;  %v18549_v22 = vld [vmem:[#allocation39_spill] sm:$0xff]  ;;  %v18551_v63 = vld [vmem:[#allocation41_spill] sm:$0xff]  ;;  %v4248_v19 = vrot.slane %v16829_v0, 1  ;;  %4891 = vmatprep.subr.bf16.mxu0 %v14265_v58  ;;  %13273 = vmatprep.subr.bf16.mxu1 %v14266_v34 }
 0x2d5   :  { %18543 = vst [vmem:[#allocation127_spill] sm:$0xff] %v16833_v5  ;;  %v4238_v17 = vrot.slane %v18548_v61, 6  ;;  %v14267_v37 = vld [vmem:[#allocation7 + $0x7d0] ss:$12 sps:$4 sm:$0xff]   ;;  %4877 = vmatmul.mubr.bf16.gmra.mrb[36].mxu0 %v16833_v5  ;;  %4977 = vmatmul.mubr.bf16.gmra.mrb[36].mxu1 %v16833_v5  ;;  %v4187_v8 = vsel %vm4141_vm9, %v4186_v23, %v4185_v47  ;;  %v4240_v60 = vrot.slane %v18549_v22, 5  ;;  %v4244_v54 = vrot.slane %v18551_v63, 3 }
 0x2d6   :  { %v4237_v10 = vsel %vm4132_vm6, %v18547_v28, %v18545_v43  ;;  %v14270_v31 = vld [vmem:[#allocation7 + $0x7e4] ss:$12 sps:$4 sm:$0xff]   ;;  %v14271_v13 = vld [vmem:[#allocation7 + $0x8a8] ss:$12 sps:$4 sm:$0xff]   ;;  %v4189_v56 = vsel %vm4144_vm10, %v4188_v57, %v4187_v8  ;;  %v4246_v61 = vrot.slane %v16816_v45, 2  ;;  %v18552_v47 = vld [vmem:[#allocation51_spill] sm:$0xff] }
 0x2d7   :  { %v18550_v25 = vld [vmem:[#allocation22_spill] sm:$0xff]  ;;  %v4239_v28 = vsel %vm4135_vm7, %v4238_v17, %v4237_v10  ;;  %v4191_v5 = vsel %vm4147_vm11, %v4190_v1, %v4189_v56  ;;  %v18553_v22 = vld [vmem:[#allocation49_spill] sm:$0xff]  ;;  %4892 = vmatpush1.bf16.msra.mxu0 %v14263_v20  ;;  %13274 = vmatpush3.bf16.msra.mxu1 %v14267_v37 }
 0x2d8   :  { %v4242_v39 = vrot.slane %v18550_v25, 4  ;;  %v4241_v23 = vsel %vm4138_vm8, %v4240_v60, %v4239_v28  ;;  %v18554_v25 = vrot.slane %v18553_v22, 6  ;;  %v18555_v36 = vld [vmem:[#allocation70_spill] sm:$0xff]  ;;  %v4193_v57 = vsel %vm4150_vm12, %v4192_v18, %v4191_v5  ;;  %v14268_v10 = vld [vmem:[#allocation7 + $0x7e0] ss:$12 sps:$4 sm:$0xff]   ;;  %4893 = vmatprep.subr.bf16.mxu0 %v14270_v31  ;;  %13275 = vmatprep.subr.bf16.mxu1 %v14271_v13 }
 0x2d9   :  { %v4172_v14 = vrot.slane %v18555_v36, 4  ;;  %v14272_v58 = vld [vmem:[#allocation7 + $0x7e8] ss:$12 sps:$4 sm:$0xff]  }
 0x2da   :  { %v4169_v63 = vsel %vm4135_vm7, %v18554_v25, %v18552_v47  ;;  %v4243_v17 = vsel %vm4141_vm9, %v4242_v39, %v4241_v23  ;;  %v18556_v34 = vld [vmem:[#allocation66_spill] sm:$0xff]  ;;  %v14275_v25 = vld [vmem:[#allocation7 + $0x7fc] ss:$12 sps:$4 sm:$0xff]   ;;  %v14276_v47 = vld [vmem:[#allocation7 + $0x8c0] ss:$12 sps:$4 sm:$0xff]  }
 0x2db   :  { %v18557_v8 = vrot.slane %v18556_v34, 5  ;;  %v18558_v56 = vld [vmem:[#allocation74_spill] sm:$0xff]  ;;  %v4245_v28 = vsel %vm4144_vm10, %v4244_v54, %v4243_v17  ;;  %v18559_v18 = vld [vmem:[#allocation85_spill] sm:$0xff]  ;;  %v18561_v36 = vld [vmem:[#allocation96_spill] sm:$0xff]  ;;  %4894 = vmatpush1.bf16.msra.mxu0 %v14268_v10  ;;  %13276 = vmatpush3.bf16.msra.mxu1 %v14272_v58  ;;  %v3793_v10 = vrot.slane %v16684_v48, %v16100_v16  ;;  %v4294_v58 = vrot.slane %v16603_v38, 6 }
 0x2dc   :  { %v4174_v60 = vrot.slane %v18558_v56, 3  ;;  %v4176_v39 = vrot.slane %v18559_v18, 2  ;;  %v18560_v20 = vld [vmem:[#allocation89_spill] sm:$0xff]  ;;  %v4247_v23 = vsel %vm4147_vm11, %v4246_v61, %v4245_v28  ;;  %v18567_v34 = vld [vmem:[#allocation42_spill] sm:$0xff]  ;;  %4895 = vmatprep.subr.bf16.mxu0 %v14275_v25  ;;  %13277 = vmatprep.subr.bf16.mxu1 %v14276_v47  ;;  %v18572_v25 = vld [vmem:[#allocation107_spill] sm:$0xff]  ;;  %v18573_v47 = vrot.slane %v16595_v51, 7 }
 0x2dd   :  { %v4171_v1 = vsel %vm4138_vm8, %v18557_v8, %v4169_v63  ;;  %v4178_v37 = vrot.slane %v18560_v20, 1  ;;  %v18562_v63 = vld [vmem:[#allocation78_spill] sm:$0xff]  ;;  %v18564_v54 = vld [vmem:[#allocation25_spill] sm:$0xff]  ;;  %v4249_v13 = vsel %vm4150_vm12, %v4248_v19, %v4247_v23  ;;  %v4232_v45 = vrot.slane %v18567_v34, 2  ;;  %v18571_v23 = vld [vmem:[#allocation103_spill] sm:$0xff] }
 0x2de   :  { %v4173_v5 = vsel %vm4141_vm9, %v4172_v14, %v4171_v1  ;;  %v18563_v8 = vrot.slane %v18562_v63, 6  ;;  %v4230_v31 = vrot.slane %v18564_v54, 3  ;;  %v18565_v14 = vld [vmem:[#allocation21_spill] sm:$0xff]  ;;  %v16885_v61 = vpack.c.b16 %v4249_v13, %v4193_v57 }
 0x2df   :  { %v4175_v0 = vsel %vm4144_vm10, %v4174_v60, %v4173_v5  ;;  %v18566_v1 = vrot.slane %v18565_v14, 5  ;;  %v14273_v60 = vld [vmem:[#allocation7 + $0x7f8] ss:$12 sps:$4 sm:$0xff]   ;;  %v14277_v28 = vld [vmem:[#allocation7 + $0x800] ss:$12 sps:$4 sm:$0xff]   ;;  %v3502_v57 = vpack.c.bf16 %v16703_v33, %v16703_v33  ;;  %v4298_v33 = vrot.slane %v16619_v6, 4 }
 0x2e0   :  { %v4225_v56 = vsel %vm4135_vm7, %v18563_v8, %v18561_v36  ;;  %v4177_v17 = vsel %vm4147_vm11, %v4176_v39, %v4175_v0  ;;  %18568 = vst [vmem:[#allocation51_spill] sm:$0xff] %v16885_v61  ;;  %v18569_v5 = vld [vmem:[#allocation101_spill] sm:$0xff]  ;;  %v4234_v0 = vrot.slane %v18571_v23, 1  ;;  %v14280_v39 = vld [vmem:[#allocation7 + $0x814] ss:$12 sps:$4 sm:$0xff]   ;;  %4917 = vmatprep.mubr.bf16.mxu0 %v16885_v61  ;;  %5016 = vmatprep.mubr.bf16.mxu1 %v16885_v61 }
 0x2e1   :  { %v4227_v18 = vsel %vm4138_vm8, %v18566_v1, %v4225_v56  ;;  %v4179_v36 = vsel %vm4150_vm12, %v4178_v37, %v4177_v17  ;;  %v18570_v8 = vrot.slane %v18569_v5, 4  ;;  %v14281_v56 = vld [vmem:[#allocation7 + $0x8d8] ss:$12 sps:$4 sm:$0xff]   ;;  %v4293_v37 = vsel %vm4132_vm6, %v18573_v47, %v18572_v25  ;;  %4896 = vmatpush1.bf16.msra.mxu0 %v14273_v60  ;;  %13278 = vmatpush3.bf16.msra.mxu1 %v14277_v28  ;;  %v14278_v16 = vld [vmem:[#allocation7 + $0x810] ss:$12 sps:$4 sm:$0xff]  }
 0x2e2   :  { %v3809_v17 = vpack.c.bf16 %v3793_v10, %v3793_v10  ;;  %v4300_v47 = vrot.slane %v16718_v4, 3  ;;  %v3501_v14 = vpack.c.bf16 %v16700_v24, %v16700_v24  ;;  %4897 = vmatprep.subr.bf16.mxu0 %v14280_v39  ;;  %13279 = vmatprep.subr.bf16.mxu1 %v14281_v56  ;;  %v18578_v24 = vrot.slane %v16593_v46, 7  ;;  %v14321_v6 = vld [vmem:[#allocation7 + $0x158] ss:$12 sps:$4 sm:$0xff]  }
 0x2e3   :  { %v4229_v19 = vsel %vm4141_vm9, %v18570_v8, %v4227_v18  ;;  %v16908_v8 = vunpack.c.l.b16 %v3502_v57  ;;  %v14286_v57 = vld [vmem:[#allocation7 + $0x8f0] ss:$12 sps:$4 sm:$0xff]   ;;  %v4280_v56 = vrot.slane %v16601_v59, 6 }
 0x2e4   :  { %v4231_v1 = vsel %vm4144_vm10, %v4230_v31, %v4229_v19  ;;  %v4296_v31 = vrot.slane %v16611_v32, 5  ;;  %v4295_v19 = vsel %vm4135_vm7, %v4294_v58, %v4293_v37  ;;  %v16917_v10 = vunpack.c.l.b16 %v3809_v17  ;;  %v18577_v37 = vld [vmem:[#allocation106_spill] sm:$0xff]  ;;  %v18635_v4 = vld [vmem:[#allocation47_spill] sm:$0xff] }
 0x2e5   :  { %v4233_v18 = vsel %vm4147_vm11, %v4232_v45, %v4231_v1  ;;  %18574 = vst [vmem:[#allocation49_spill] sm:$0xff] %v16908_v8  ;;  %v14282_v45 = vld [vmem:[#allocation7 + $0x818] ss:$12 sps:$4 sm:$0xff]   ;;  %v4302_v28 = vrot.slane %v16908_v8, 2  ;;  %v4279_v39 = vsel %vm4132_vm6, %v18578_v24, %v18577_v37  ;;  %v4282_v17 = vrot.slane %v16609_v12, 5  ;;  %4898 = vmatpush1.bf16.msra.mxu0 %v14278_v16 }
 0x2e6   :  { %v4235_v13 = vsel %vm4150_vm12, %v4234_v0, %v4233_v18  ;;  %v4297_v61 = vsel %vm4138_vm8, %v4296_v31, %v4295_v19  ;;  %v14285_v0 = vld [vmem:[#allocation7 + $0x82c] ss:$12 sps:$4 sm:$0xff]   ;;  %18575 = vst [vmem:[#allocation96_spill] sm:$0xff] %v16917_v10  ;;  %v16924_v18 = vunpack.c.l.b16 %v3501_v14  ;;  %v14283_v31 = vld [vmem:[#allocation7 + $0x828] ss:$12 sps:$4 sm:$0xff]   ;;  %13280 = vmatpush3.bf16.msra.mxu1 %v14282_v45  ;;  %v4281_v14 = vsel %vm4135_vm7, %v4280_v56, %v4279_v39 }
 0x2e7   :  { %v16911_v1 = vpack.c.b16 %v4235_v13, %v4179_v36  ;;  %v4299_v60 = vsel %vm4141_vm9, %v4298_v33, %v4297_v61  ;;  %v3789_v36 = vrot.slane %v16684_v48, %v16013_v29  ;;  %v4304_v61 = vrot.slane %v16917_v10, 1  ;;  %v14287_v48 = vld [vmem:[#allocation7 + $0x830] ss:$12 sps:$4 sm:$0xff]   ;;  %4899 = vmatprep.subr.bf16.mxu0 %v14285_v0  ;;  %13281 = vmatprep.subr.bf16.mxu1 %v14286_v57  ;;  %v18585_v56 = vld [vmem:[#allocation24_spill] sm:$0xff] }
 0x2e8   :  { %v4301_v58 = vsel %vm4144_vm10, %v4300_v47, %v4299_v60  ;;  %18576 = vst [vmem:[#allocation78_spill] sm:$0xff] %v16924_v18  ;;  %v4284_v19 = vrot.slane %v16617_v49, 4  ;;  %v4286_v47 = vrot.slane %v16716_v27, 3  ;;  %v4288_v60 = vrot.slane %v16924_v18, 2  ;;  %v14290_v24 = vld [vmem:[#allocation7 + $0x844] ss:$12 sps:$4 sm:$0xff]  }
 0x2e9   :  { %v4303_v13 = vsel %vm4147_vm11, %v4302_v28, %v4301_v58  ;;  %v3808_v33 = vpack.c.bf16 %v3789_v36, %v3789_v36  ;;  %v14291_v28 = vld [vmem:[#allocation7 + $0xc8] ss:$12 sps:$4 sm:$0xff]   ;;  %v4283_v16 = vsel %vm4138_vm8, %v4282_v17, %v4281_v14  ;;  %v18581_v10 = vrot.slane %v16156_v2, 7  ;;  %4900 = vmatpush1.bf16.msra.mxu0 %v14283_v31  ;;  %v14288_v2 = vld [vmem:[#allocation7 + $0x840] ss:$12 sps:$4 sm:$0xff]  }
 0x2ea   :  { %v4305_v58 = vsel %vm4150_vm12, %v4304_v61, %v4303_v13  ;;  %v18580_v45 = vld [vmem:[#allocation61_spill] sm:$0xff]  ;;  %v4285_v0 = vsel %vm4141_vm9, %v4284_v19, %v4283_v16  ;;  %v5064_v57 = vrot.slane %v16150_v3, 6  ;;  %v5066_v61 = vrot.slane %v16162_v21, 5  ;;  %13282 = vmatpush3.bf16.msra.mxu1 %v14287_v48  ;;  %4901 = vmatprep.subr.bf16.mxu0 %v14290_v24  ;;  %v18622_v27 = vld [vmem:[#allocation48_spill] sm:$0xff]  ;;  %v18623_v12 = vld [vmem:[#allocation95_spill] sm:$0xff] }
 0x2eb   :  { %v16939_v36 = vunpack.c.l.b16 %v3808_v33  ;;  %v5063_v39 = vsel %vm4132_vm6, %v18581_v10, %v18580_v45  ;;  %v16947_v49 = vpack.c.b16 %v4305_v58, %v4305_v58  ;;  %v4287_v18 = vsel %vm4144_vm10, %v4286_v47, %v4285_v0  ;;  %13295 = vmatprep.subr.bf16.mxu1 %v14291_v28  ;;  %v14292_v47 = vld [vmem:[#allocation7 + $0x8] ss:$12 sps:$4 sm:$0xff]  }
 0x2ec   :  { %v5068_v33 = vrot.slane %v16301_v7, 4  ;;  %v4289_v10 = vsel %vm4147_vm11, %v4288_v60, %v4287_v18  ;;  %v5065_v17 = vsel %vm4135_vm7, %v5064_v57, %v5063_v39  ;;  %v5070_v14 = vrot.slane %v16309_v40, 3  ;;  %v14295_v58 = vld [vmem:[#allocation7 + $0x85c] ss:$12 sps:$4 sm:$0xff]   ;;  %v14296_v39 = vld [vmem:[#allocation7 + $0xe0] ss:$12 sps:$4 sm:$0xff]  }
 0x2ed   :  { %18579 = vst [vmem:[#allocation25_spill] sm:$0xff] %v16939_v36  ;;  %v4290_v13 = vrot.slane %v16939_v36, 1  ;;  %v5072_v19 = vrot.slane %v16318_v26, 2  ;;  %v5067_v16 = vsel %vm4138_vm8, %v5066_v61, %v5065_v17  ;;  %v5074_v45 = vrot.slane %v16646_v15, 1  ;;  %v18583_v18 = vld [vmem:[#allocation84_spill] sm:$0xff]  ;;  %v18584_v24 = vld [vmem:[#allocation93_spill] sm:$0xff]  ;;  %5017 = vmatmul.mubr.bf16.vlgmr.msra.gmra.mrb[40].mxu1 %v16911_v1  ;;  %4902 = vmatpush1.bf16.msra.mxu0 %v14288_v2 }
 0x2ee   :  { %v18582_v31 = vrot.slane %v16385_v53, 7  ;;  %v5120_v60 = vrot.slane %v18583_v18, 6  ;;  %v5069_v57 = vsel %vm4141_vm9, %v5068_v33, %v5067_v16  ;;  %v5122_v28 = vrot.slane %v18584_v24, 5  ;;  %v18586_v53 = vld [vmem:[#allocation37_spill] sm:$0xff]  ;;  %5024 = vmatprep.mubr.bf16.mxu1 %v16947_v49  ;;  %v18588_v16 = vld [vmem:[#allocation44_spill] sm:$0xff]  ;;  %v18590_v40 = vld [vmem:[#allocation46_spill] sm:$0xff]  ;;  %13296 = vmatpush3.bf16.msra.mxu1 %v14292_v47 }
 0x2ef   :  { %v4291_v0 = vsel %vm4150_vm12, %v4290_v13, %v4289_v10  ;;  %v5124_v36 = vrot.slane %v18585_v56, 4  ;;  %v5071_v61 = vsel %vm4144_vm10, %v5070_v14, %v5069_v57  ;;  %v5126_v15 = vrot.slane %v18586_v53, 3  ;;  %v14293_v13 = vld [vmem:[#allocation7 + $0x858] ss:$12 sps:$4 sm:$0xff]   ;;  %4903 = vmatprep.subr.bf16.mxu0 %v14295_v58  ;;  %v14297_v53 = vld [vmem:[#allocation7 + $0x20] ss:$12 sps:$4 sm:$0xff]   ;;  %13297 = vmatprep.subr.bf16.mxu1 %v14296_v39 }
 0x2f0   :  { %v5119_v48 = vsel %vm4132_vm6, %v18582_v31, %v16648_v35  ;;  %v18587_v31 = vld [vmem:[#allocation40_spill] sm:$0xff]  ;;  %v5073_v33 = vsel %vm4147_vm11, %v5072_v19, %v5071_v61  ;;  %v5130_v56 = vrot.slane %v18588_v16, 1  ;;  %v18591_v3 = vrot.slane %v18590_v40, 6 }
 0x2f1   :  { %v5121_v17 = vsel %vm4135_vm7, %v5120_v60, %v5119_v48  ;;  %v5128_v35 = vrot.slane %v18587_v31, 2  ;;  %v18589_v26 = vld [vmem:[#allocation52_spill] sm:$0xff]  ;;  %v16983_v60 = vpack.c.b16 %v4291_v0, %v4291_v0  ;;  %v18592_v57 = vrot.slane %v18497_v42, 5  ;;  %v18596_v42 = vld [vmem:[#allocation79_spill] sm:$0xff]  ;;  %4904 = vmatpush1.bf16.msra.mxu0 %v14293_v13  ;;  %v18600_v13 = vld [vmem:[#allocation102_spill] sm:$0xff] }
 0x2f2   :  { %v5123_v10 = vsel %vm4138_vm8, %v5122_v28, %v5121_v17  ;;  %v5051_v14 = vsel %vm4135_vm7, %v18591_v3, %v18589_v26  ;;  %v14300_v48 = vld [vmem:[#allocation7 + $0x874] ss:$12 sps:$4 sm:$0xff]   ;;  %v14301_v17 = vld [vmem:[#allocation7 + $0xf8] ss:$12 sps:$4 sm:$0xff]   ;;  %v5075_v40 = vsel %vm4150_vm12, %v5074_v45, %v5073_v33  ;;  %v5058_v58 = vrot.slane %v18506_v9, 2  ;;  %v18598_v33 = vld [vmem:[#allocation77_spill] sm:$0xff]  ;;  %13298 = vmatpush3.bf16.msra.mxu1 %v14297_v53 }
 0x2f3   :  { %v5125_v2 = vsel %vm4141_vm9, %v5124_v36, %v5123_v10  ;;  %v5053_v19 = vsel %vm4138_vm8, %v18592_v57, %v5051_v14  ;;  %v18593_v28 = vld [vmem:[#allocation64_spill] sm:$0xff]  ;;  %v18595_v10 = vld [vmem:[#allocation97_spill] sm:$0xff]  ;;  %v18597_v16 = vrot.slane %v18596_v42, 6  ;;  %v5112_v39 = vrot.slane %v18516_v11, 3  ;;  %4905 = vmatprep.subr.bf16.mxu0 %v14300_v48  ;;  %13299 = vmatprep.subr.bf16.mxu1 %v14301_v17  ;;  %v18603_v53 = vld [vmem:[#allocation30_spill] sm:$0xff] }
 0x2f4   :  { %v5054_v61 = vrot.slane %v18593_v28, 4  ;;  %v5127_v3 = vsel %vm4144_vm10, %v5126_v15, %v5125_v2  ;;  %v18594_v26 = vld [vmem:[#allocation68_spill] sm:$0xff]  ;;  %v14298_v57 = vld [vmem:[#allocation7 + $0x870] ss:$12 sps:$4 sm:$0xff]   ;;  %v18599_v2 = vrot.slane %v18598_v33, 5  ;;  %v18604_v48 = vrot.slane %v18519_v50, 7 }
 0x2f5   :  { %v5056_v47 = vrot.slane %v18594_v26, 3  ;;  %v5129_v0 = vsel %vm4147_vm11, %v5128_v35, %v5127_v3  ;;  %v5107_v14 = vsel %vm4135_vm7, %v18597_v16, %v18595_v10  ;;  %v5114_v35 = vrot.slane %v16549_v30, 2  ;;  %v14305_v16 = vld [vmem:[#allocation7 + $0x88c] ss:$12 sps:$4 sm:$0xff]   ;;  %5025 = vmatmul.mubr.bf16.gmra.mrb[44].mxu1 %v16983_v60  ;;  %4906 = vmatpush1.bf16.msra.mxu0 %v14298_v57 }
 0x2f6   :  { %v5055_v36 = vsel %vm4141_vm9, %v5054_v61, %v5053_v19  ;;  %v5131_v45 = vsel %vm4150_vm12, %v5130_v56, %v5129_v0  ;;  %v5109_v31 = vsel %vm4138_vm8, %v18599_v2, %v5107_v14  ;;  %v14302_v19 = vld [vmem:[#allocation7 + $0x38] ss:$12 sps:$4 sm:$0xff]   ;;  %v18601_v3 = vrot.slane %v18600_v13, 4  ;;  %v14306_v0 = vld [vmem:[#allocation7 + $0x110] ss:$12 sps:$4 sm:$0xff]   ;;  %4907 = vmatprep.subr.bf16.mxu0 %v14305_v16 }
 0x2f7   :  { %v5057_v15 = vsel %vm4144_vm10, %v5056_v47, %v5055_v36  ;;  %v17007_v61 = vpack.c.b16 %v5131_v45, %v5075_v40  ;;  %v5116_v47 = vrot.slane %v18515_v62, 1  ;;  %v18602_v36 = vld [vmem:[#allocation76_spill] sm:$0xff]  ;;  %v5175_v40 = vsel %vm4132_vm6, %v18604_v48, %v18603_v53  ;;  %13300 = vmatpush3.bf16.msra.mxu1 %v14302_v19 }
 0x2f8   :  { %v5059_v11 = vsel %vm4147_vm11, %v5058_v58, %v5057_v15  ;;  %v5111_v56 = vsel %vm4141_vm9, %v18601_v3, %v5109_v31  ;;  %v5060_v10 = vrot.slane %v18602_v36, 1  ;;  %v5176_v14 = vrot.slane %v16591_v52, 6  ;;  %v18605_v58 = vld [vmem:[#allocation100_spill] sm:$0xff]  ;;  %v18606_v15 = vld [vmem:[#allocation99_spill] sm:$0xff]  ;;  %13301 = vmatprep.subr.bf16.mxu1 %v14306_v0 }
 0x2f9   :  { %v5113_v42 = vsel %vm4144_vm10, %v5112_v39, %v5111_v56  ;;  %v3458_v45 = vpack.c.bf16 %v18605_v58, %v18605_v58  ;;  %v18607_v31 = vpack.c.bf16 %v18606_v15, %v18606_v15  ;;  %v18608_v39 = vld [vmem:[#allocation111_spill] sm:$0xff]  ;;  %v5160_v13 = vrot.slane %v18524_v44, 7  ;;  %5878 = vmatprep.mubr.bf16.mxu1 %v17007_v61  ;;  %v14303_v3 = vld [vmem:[#allocation7 + $0x888] ss:$12 sps:$4 sm:$0xff]  }
 0x2fa   :  { %v5115_v17 = vsel %vm4147_vm11, %v5114_v35, %v5113_v42  ;;  %v5178_v2 = vrot.slane %v18608_v39, 5  ;;  %v5061_v56 = vsel %vm4150_vm12, %v5060_v10, %v5059_v11  ;;  %v5177_v58 = vsel %vm4135_vm7, %v5176_v14, %v5175_v40  ;;  %v18610_v52 = vld [vmem:[#allocation87_spill] sm:$0xff]  ;;  %v14310_v42 = vld [vmem:[#allocation7 + $0x8a4] ss:$12 sps:$4 sm:$0xff]   ;;  %v14311_v40 = vld [vmem:[#allocation7 + $0x128] ss:$12 sps:$4 sm:$0xff]   ;;  %4908 = vmatpush1.bf16.msra.mxu0 %v14303_v3 }
 0x2fb   :  { %v17026_v33 = vunpack.c.l.b16 %v18607_v31  ;;  %v5117_v48 = vsel %vm4150_vm12, %v5116_v47, %v5115_v17  ;;  %v18609_v31 = vld [vmem:[#allocation32_spill] sm:$0xff]  ;;  %v14307_v35 = vld [vmem:[#allocation7 + $0x50] ss:$12 sps:$4 sm:$0xff]   ;;  %v5146_v10 = vrot.slane %v18545_v43, 7  ;;  %v5180_v14 = vrot.slane %v16607_v55, 4  ;;  %4909 = vmatprep.subr.bf16.mxu0 %v14310_v42 }
 0x2fc   :  { %v17039_v50 = vrot.slane %v18610_v52, %v18609_v31  ;;  %v17041_v57 = vpack.c.b16 %v5117_v48, %v5061_v56  ;;  %v5179_v39 = vsel %vm4138_vm8, %v5178_v2, %v5177_v58  ;;  %v18611_v53 = vld [vmem:[#allocation80_spill] sm:$0xff]  ;;  %v18612_v17 = vld [vmem:[#allocation91_spill] sm:$0xff]  ;;  %v5047_v56 = vunpack.c.l.b16 %v3458_v45  ;;  %v18615_v43 = vld [vmem:[#allocation62_spill] sm:$0xff]  ;;  %13302 = vmatpush3.bf16.msra.mxu1 %v14307_v35 }
 0x2fd   :  { %v18613_v19 = vrot.slane %v18612_v17, 7  ;;  %v5162_v2 = vrot.slane %v16589_v41, 6  ;;  %v14308_v58 = vld [vmem:[#allocation7 + $0x8a0] ss:$12 sps:$4 sm:$0xff]   ;;  %v14312_v47 = vld [vmem:[#allocation7 + $0x68] ss:$12 sps:$4 sm:$0xff]   ;;  %v5181_v11 = vsel %vm4141_vm9, %v5180_v14, %v5179_v39  ;;  %13303 = vmatprep.subr.bf16.mxu1 %v14311_v40 }
 0x2fe   :  { %v18614_v0 = vld [vmem:[#allocation28_spill] sm:$0xff]  ;;  %v18616_v31 = vld [vmem:[#allocation58_spill] sm:$0xff]  ;;  %v18619_v48 = vld [vmem:[#allocation117_spill] sm:$0xff]  ;;  %4910 = vmatpush1.bf16.msra.mxu0 %v14308_v58 }
 0x2ff   :  { %v17052_v16 = vsel %vm4132_vm6, %v18613_v19, %v18560_v20  ;;  %v5161_v15 = vsel %vm4132_vm6, %v5160_v13, %v18614_v0  ;;  %v18617_v55 = vrot.slane %v18616_v31, 7  ;;  %v18618_v19 = vld [vmem:[#allocation57_spill] sm:$0xff]  ;;  %v5182_v41 = vrot.slane %v18619_v48, 3  ;;  %v18620_v17 = vld [vmem:[#allocation60_spill] sm:$0xff]  ;;  %v18621_v14 = vld [vmem:[#allocation67_spill] sm:$0xff] }
 0x300   :  { %v5092_v21 = vrot.slane %v18618_v19, 6  ;;  %v14315_v3 = vld [vmem:[#allocation7 + $0x8bc] ss:$12 sps:$4 sm:$0xff]   ;;  %v5094_v39 = vrot.slane %v18620_v17, 5  ;;  %v5096_v20 = vrot.slane %v18621_v14, 4  ;;  %v17077_v42 = vsel %vm4135_vm7, %v5162_v2, %v5161_v15  ;;  %13304 = vmatpush3.bf16.msra.mxu1 %v14312_v47 }
 0x301   :  { %v5091_v7 = vsel %vm4132_vm6, %v18617_v55, %v18615_v43  ;;  %v14316_v13 = vld [vmem:[#allocation7 + $0x140] ss:$12 sps:$4 sm:$0xff]   ;;  %v18624_v43 = vld [vmem:[#allocation110_spill] sm:$0xff]  ;;  %v17074_v35 = vsel %vm4144_vm10, %v5182_v41, %v5181_v11  ;;  %4911 = vmatprep.subr.bf16.mxu0 %v14315_v3 }
 0x302   :  { %v5093_v8 = vsel %vm4135_vm7, %v5092_v21, %v5091_v7  ;;  %v18625_v17 = vld [vmem:[#allocation71_spill] sm:$0xff]  ;;  %v18627_v19 = vld [vmem:[#allocation125_spill] sm:$0xff]  ;;  %v18628_v7 = vld [vmem:[#allocation86_spill] sm:$0xff]  ;;  %13305 = vmatprep.subr.bf16.mxu1 %v14316_v13 }
 0x303   :  { %v5095_v45 = vsel %vm4138_vm8, %v5094_v39, %v5093_v8  ;;  %v5098_v14 = vrot.slane %v18625_v17, 3  ;;  %v14313_v40 = vld [vmem:[#allocation7 + $0x8b8] ss:$12 sps:$4 sm:$0xff]   ;;  %v14317_v48 = vld [vmem:[#allocation7 + $0x80] ss:$12 sps:$4 sm:$0xff]   ;;  %v5147_v21 = vsel %vm4132_vm6, %v5146_v10, %v18627_v19  ;;  %v5148_v41 = vrot.slane %v18628_v7, 6 }
 0x304   :  { %v5097_v31 = vsel %vm4141_vm9, %v5096_v20, %v5095_v45  ;;  %v18626_v55 = vld [vmem:[#allocation75_spill] sm:$0xff]  ;;  %v18630_v39 = vld [vmem:[#allocation94_spill] sm:$0xff]  ;;  %v5152_v17 = vrot.slane %v5047_v56, 4  ;;  %v18632_v19 = vld [vmem:[#allocation41_spill] sm:$0xff]  ;;  %4912 = vmatpush1.bf16.msra.mxu0 %v14313_v40  ;;  %13306 = vmatpush3.bf16.msra.mxu1 %v14317_v48 }
 0x305   :  { %v5100_v59 = vrot.slane %v18626_v55, 2  ;;  %v14320_v15 = vld [vmem:[#allocation7 + $0x8d4] ss:$12 sps:$4 sm:$0xff]   ;;  %v5099_v11 = vsel %vm4144_vm10, %v5098_v14, %v5097_v31  ;;  %v5150_v58 = vrot.slane %v18630_v39, 5  ;;  %v5149_v45 = vsel %vm4135_vm7, %v5148_v41, %v5147_v21  ;;  %v14318_v13 = vld [vmem:[#allocation7 + $0x8d0] ss:$12 sps:$4 sm:$0xff]   ;;  %13307 = vmatprep.subr.bf16.mxu1 %v14321_v6 }
 0x306   :  { %v18629_v8 = vld [vmem:[#allocation63_spill] sm:$0xff]  ;;  %v18631_v55 = vld [vmem:[#allocation22_spill] sm:$0xff]  ;;  %v5156_v7 = vrot.slane %v18632_v19, 2  ;;  %v18636_v39 = vrot.slane %v18635_v4, 6  ;;  %v18637_v21 = vrot.slane %v18553_v22, 5  ;;  %4913 = vmatprep.subr.bf16.mxu0 %v14320_v15  ;;  %v18641_v40 = vld [vmem:[#allocation85_spill] sm:$0xff] }
 0x307   :  { %v5102_v2 = vrot.slane %v18629_v8, 1  ;;  %v5101_v20 = vsel %vm4147_vm11, %v5100_v59, %v5099_v11  ;;  %v5154_v10 = vrot.slane %v18631_v55, 3  ;;  %v5151_v3 = vsel %vm4138_vm8, %v5150_v58, %v5149_v45  ;;  %v18633_v14 = vld [vmem:[#allocation23_spill] sm:$0xff]  ;;  %v18634_v8 = vld [vmem:[#allocation53_spill] sm:$0xff]  ;;  %v18638_v41 = vld [vmem:[#allocation66_spill] sm:$0xff] }
 0x308   :  { %v5158_v31 = vrot.slane %v18633_v14, 1  ;;  %v5079_v56 = vsel %vm4135_vm7, %v18636_v39, %v18634_v8  ;;  %v5153_v59 = vsel %vm4141_vm9, %v5152_v17, %v5151_v3  ;;  %v5082_v11 = vrot.slane %v18638_v41, 4  ;;  %v14322_v58 = vld [vmem:[#allocation7 + $0x98] ss:$12 sps:$4 sm:$0xff]   ;;  %v14326_v3 = vld [vmem:[#allocation7 + $0x170] ss:$12 sps:$4 sm:$0xff]   ;;  %4914 = vmatpush1.bf16.msra.mxu0 %v14318_v13 }
 0x309   :  { %v5103_v47 = vsel %vm4150_vm12, %v5102_v2, %v5101_v20  ;;  %v5081_v55 = vsel %vm4138_vm8, %v18637_v21, %v5079_v56  ;;  %v18639_v2 = vld [vmem:[#allocation70_spill] sm:$0xff]  ;;  %v5155_v4 = vsel %vm4144_vm10, %v5154_v10, %v5153_v59  ;;  %v5088_v39 = vrot.slane %v18641_v40, 1  ;;  %13308 = vmatpush3.bf16.msra.mxu1 %v14322_v58 }
 0x30a   :  { %v5084_v20 = vrot.slane %v18639_v2, 3  ;;  %v14325_v45 = vld [vmem:[#allocation7 + $0x8ec] ss:$12 sps:$4 sm:$0xff]   ;;  %v18642_v17 = vrot.slane %v18611_v53, 6  ;;  %v5157_v56 = vsel %vm4147_vm11, %v5156_v7, %v5155_v4  ;;  %v5083_v48 = vsel %vm4141_vm9, %v5082_v11, %v5081_v55  ;;  %v14323_v7 = vld [vmem:[#allocation7 + $0x8e8] ss:$12 sps:$4 sm:$0xff]   ;;  %13309 = vmatprep.subr.bf16.mxu1 %v14326_v3 }
 0x30b   :  { %v18640_v14 = vld [vmem:[#allocation74_spill] sm:$0xff]  ;;  %v18643_v15 = vrot.slane %v18562_v63, 5  ;;  %v5140_v10 = vrot.slane %v18569_v5, 3  ;;  %v5159_v59 = vsel %vm4150_vm12, %v5158_v31, %v5157_v56  ;;  %v18644_v53 = vrot.slane %v17026_v33, 4  ;;  %4915 = vmatprep.subr.bf16.mxu0 %v14325_v45  ;;  %v18648_v45 = vld [vmem:[#allocation113_spill] sm:$0xff] }
 0x30c   :  { %v5086_v8 = vrot.slane %v18640_v14, 2  ;;  %v5135_v22 = vsel %vm4135_vm7, %v18642_v17, %v17052_v16  ;;  %v5085_v19 = vsel %vm4144_vm10, %v5084_v20, %v5083_v48  ;;  %v5142_v6 = vrot.slane %v18564_v54, 2  ;;  %v14327_v31 = vld [vmem:[#allocation7 + $0xb0] ss:$12 sps:$4 sm:$0xff]   ;;  %v14331_v58 = vld [vmem:[#allocation7 + $0x248] ss:$12 sps:$4 sm:$0xff]   ;;  %4916 = vmatpush1.bf16.msra.mxu0 %v14323_v7 }
 0x30d   :  { %v5137_v21 = vsel %vm4138_vm8, %v18643_v15, %v5135_v22  ;;  %v17125_v4 = vpack.c.b16 %v5159_v59, %v5103_v47  ;;  %v5144_v5 = vrot.slane %v18567_v34, 1  ;;  %v14330_v11 = vld [vmem:[#allocation7 + $0x4] ss:$12 sps:$4 sm:$0xff]   ;;  %v18645_v33 = vrot.slane %v18622_v27, 2  ;;  %13310 = vmatpush3.bf16.msra.mxu1 %v14327_v31 }
 0x30e   :  { %v5139_v16 = vsel %vm4141_vm9, %v18644_v53, %v5137_v21  ;;  %v5087_v63 = vsel %vm4147_vm11, %v5086_v8, %v5085_v19  ;;  %v18646_v13 = vrot.slane %v18624_v43, 5  ;;  %v18647_v8 = vld [vmem:[#allocation31_spill] sm:$0xff]  ;;  %v5166_v22 = vrot.slane %v18648_v45, 4  ;;  %v18651_v53 = vld [vmem:[#allocation50_spill] sm:$0xff]  ;;  %5744 = vmatprep.subr.bf16.mxu0 %v14330_v11  ;;  %13323 = vmatprep.subr.bf16.mxu1 %v14331_v58 }
 0x30f   :  { %v5141_v55 = vsel %vm4144_vm10, %v5140_v10, %v5139_v16  ;;  %v5185_v20 = vsel %vm4147_vm11, %v18645_v33, %v17074_v35  ;;  %v7496_v17 = vrot.slane %v18610_v52, %v18647_v8  ;;  %v5089_v56 = vsel %vm4150_vm12, %v5088_v39, %v5087_v63  ;;  %v14328_v39 = vld [vmem:[#allocation7] ss:$12 sps:$4 sm:$0xff]   ;;  %v14335_v33 = vld [vmem:[#allocation7 + $0x1c] ss:$12 sps:$4 sm:$0xff]   ;;  %4918 = vmatmul.mubr.bf16.vlgmr.msra.gmra.mrb[32].mxu0 %v16911_v1  ;;  %v14333_v58 = vld [vmem:[#allocation7 + $0x18] ss:$12 sps:$4 sm:$0xff]  }
 0x310   :  { %v5165_v47 = vsel %vm4138_vm8, %v18646_v13, %v17077_v42  ;;  %v5143_v19 = vsel %vm4147_vm11, %v5142_v6, %v5141_v55  ;;  %v7756_v35 = vrot.slane %v18584_v24, 7  ;;  %v18649_v42 = vpack.c.bf16 %v17039_v50, %v17039_v50  ;;  %v18652_v6 = vld [vmem:[#allocation116_spill] sm:$0xff]  ;;  %v18653_v55 = vld [vmem:[#allocation38_spill] sm:$0xff]  ;;  %5879 = vmatmul.mubr.bf16.vlgmr.msra.gmra.mrb[48].mxu1 %v17041_v57  ;;  %4927 = vmatprep.mubr.bf16.mxu0 %v16947_v49 }
 0x311   :  { %v5145_v48 = vsel %vm4150_vm12, %v5144_v5, %v5143_v19  ;;  %v18650_v10 = vrot.slane %v18623_v12, 1  ;;  %v5167_v59 = vsel %vm4141_vm9, %v5166_v22, %v5165_v47  ;;  %v5170_v16 = vrot.slane %v18651_v53, 2  ;;  %v14332_v50 = vld [vmem:[#allocation7 + $0x188] ss:$12 sps:$4 sm:$0xff]   ;;  %5745 = vmatpush1.bf16.msra.mxu0 %v14328_v39 }
 0x312   :  { %v17145_v15 = vpack.c.b16 %v5145_v48, %v5089_v56  ;;  %v7679_v21 = vunpack.c.l.b16 %v18649_v42  ;;  %v5168_v24 = vrot.slane %v18652_v6, 3  ;;  %v7533_v63 = vpack.c.bf16 %v7496_v17, %v7496_v17  ;;  %v18654_v47 = vld [vmem:[#allocation104_spill] sm:$0xff]  ;;  %13324 = vmatpush3.bf16.msra.mxu1 %v14332_v50  ;;  %5746 = vmatprep.subr.bf16.mxu0 %v14335_v33  ;;  %v14346_v50 = vld [vmem:[#allocation7 + $0x290] ss:$12 sps:$4 sm:$0xff]  }
 0x313   :  { %v5187_v3 = vsel %vm4150_vm12, %v18650_v10, %v5185_v20  ;;  %v7758_v5 = vrot.slane %v18653_v55, 6  ;;  %v14336_v20 = vld [vmem:[#allocation7 + $0x260] ss:$12 sps:$4 sm:$0xff]   ;;  %v5172_v19 = vrot.slane %v18654_v47, 1  ;;  %v7757_v17 = vsel %vm4132_vm6, %v7756_v35, %v18583_v18 }
 0x314   :  { %v17158_v7 = vpack.c.b16 %v5187_v3, %v5187_v3  ;;  %v5169_v13 = vsel %vm4144_vm10, %v5168_v24, %v5167_v59  ;;  %v7760_v31 = vrot.slane %v7679_v21, 5  ;;  %v7688_v22 = vrot.slane %v18593_v28, 6  ;;  %v14337_v48 = vld [vmem:[#allocation7 + $0x1a0] ss:$12 sps:$4 sm:$0xff]   ;;  %13325 = vmatprep.subr.bf16.mxu1 %v14336_v20  ;;  %v14341_v59 = vld [vmem:[#allocation7 + $0x278] ss:$12 sps:$4 sm:$0xff]  }
 0x315   :  { %v5171_v11 = vsel %vm4147_vm11, %v5170_v16, %v5169_v13  ;;  %v7678_v56 = vunpack.c.l.b16 %v7533_v63  ;;  %v14340_v42 = vld [vmem:[#allocation7 + $0x34] ss:$12 sps:$4 sm:$0xff]   ;;  %v7759_v21 = vsel %vm4135_vm7, %v7758_v5, %v7757_v17  ;;  %v7690_v10 = vrot.slane %v18594_v26, 5  ;;  %5747 = vmatpush1.bf16.msra.mxu0 %v14333_v58  ;;  %v14338_v28 = vld [vmem:[#allocation7 + $0x30] ss:$12 sps:$4 sm:$0xff]  }
 0x316   :  { %5886 = vmatprep.mubr.bf16.mxu1 %v17158_v7  ;;  %v5173_v3 = vsel %vm4150_vm12, %v5172_v19, %v5171_v11  ;;  %v18655_v18 = vld [vmem:[#allocation36_spill] sm:$0xff]  ;;  %v17174_v16 = vsel %vm4138_vm8, %v7760_v31, %v7759_v21  ;;  %13326 = vmatpush3.bf16.msra.mxu1 %v14337_v48  ;;  %v14345_v55 = vld [vmem:[#allocation7 + $0x4c] ss:$12 sps:$4 sm:$0xff]   ;;  %v7692_v20 = vrot.slane %v18506_v9, 4  ;;  %v5202_v13 = vrot.slane %v18572_v25, 7 }
 0x317   :  { %v7744_v35 = vrot.slane %v18655_v18, 6  ;;  %v7746_v39 = vrot.slane %v7678_v56, 5  ;;  %5748 = vmatprep.subr.bf16.mxu0 %v14340_v42  ;;  %v17176_v24 = vpack.c.b16 %v5173_v3, %v5173_v3  ;;  %v14342_v63 = vld [vmem:[#allocation7 + $0x1b8] ss:$12 sps:$4 sm:$0xff]   ;;  %4928 = vmatmul.mubr.bf16.gmra.mrb[36].mxu0 %v16983_v60  ;;  %v18657_v19 = vld [vmem:[#allocation81_spill] sm:$0xff]  ;;  %v7694_v48 = vrot.slane %v18602_v36, 3 }
 0x318   :  { %v18656_v5 = vld [vmem:[#allocation54_spill] sm:$0xff]  ;;  %13327 = vmatprep.subr.bf16.mxu1 %v14341_v59  ;;  %5776 = vmatprep.mubr.bf16.mxu0 %v17007_v61  ;;  %v18658_v58 = vld [vmem:[#allocation88_spill] sm:$0xff]  ;;  %v7748_v3 = vrot.slane %v16549_v30, 4  ;;  %v7750_v59 = vrot.slane %v18515_v62, 3  ;;  %v7504_v30 = vrot.slane %v18610_v52, %v16013_v29 }
 0x319   :  { %v7689_v26 = vsel %vm4135_vm7, %v7688_v22, %v18656_v5  ;;  %5887 = vmatmul.mubr.bf16.gmra.mrb[52].mxu1 %v17176_v24  ;;  %v7745_v31 = vsel %vm4135_vm7, %v7744_v35, %v18657_v19  ;;  %5749 = vmatpush1.bf16.msra.mxu0 %v14338_v28  ;;  %v14343_v11 = vld [vmem:[#allocation7 + $0x48] ss:$12 sps:$4 sm:$0xff]   ;;  %v7696_v22 = vrot.slane %v18658_v58, 2  ;;  %v14347_v9 = vld [vmem:[#allocation7 + $0x1d0] ss:$12 sps:$4 sm:$0xff]  }
 0x31a   :  { %v7691_v33 = vsel %vm4138_vm8, %v7690_v10, %v7689_v26  ;;  %5926 = vmatprep.mubr.bf16.mxu1 %v17125_v4  ;;  %13328 = vmatpush3.bf16.msra.mxu1 %v14342_v63  ;;  %v14350_v56 = vld [vmem:[#allocation7 + $0x64] ss:$12 sps:$4 sm:$0xff]   ;;  %v7747_v42 = vsel %vm4138_vm8, %v7746_v39, %v7745_v31  ;;  %v14351_v21 = vld [vmem:[#allocation7 + $0x2a8] ss:$12 sps:$4 sm:$0xff]   ;;  %v5204_v10 = vrot.slane %v16595_v51, 6  ;;  %v18660_v63 = vld [vmem:[#allocation83_spill] sm:$0xff] }
 0x31b   :  { %v7693_v17 = vsel %vm4141_vm9, %v7692_v20, %v7691_v33  ;;  %5750 = vmatprep.subr.bf16.mxu0 %v14345_v55  ;;  %13329 = vmatprep.subr.bf16.mxu1 %v14346_v50  ;;  %v18659_v18 = vld [vmem:[#allocation126_spill] sm:$0xff]  ;;  %v7698_v55 = vrot.slane %v18660_v63, 1  ;;  %v14348_v5 = vld [vmem:[#allocation7 + $0x60] ss:$12 sps:$4 sm:$0xff]   ;;  %v7749_v39 = vsel %vm4141_vm9, %v7748_v3, %v7747_v42  ;;  %v7752_v26 = vrot.slane %v18614_v0, 2 }
 0x31c   :  { %v5203_v35 = vsel %vm4132_vm6, %v5202_v13, %v18659_v18  ;;  %v7695_v28 = vsel %vm4144_vm10, %v7694_v48, %v7693_v17  ;;  %v14352_v62 = vld [vmem:[#allocation7 + $0x1e8] ss:$12 sps:$4 sm:$0xff]   ;;  %v5206_v33 = vrot.slane %v16603_v38, 5  ;;  %v7751_v20 = vsel %vm4144_vm10, %v7750_v59, %v7749_v39  ;;  %v14356_v19 = vld [vmem:[#allocation7 + $0x2c0] ss:$12 sps:$4 sm:$0xff]  }
 0x31d   :  { %5751 = vmatpush1.bf16.msra.mxu0 %v14343_v11  ;;  %v7697_v36 = vsel %vm4147_vm11, %v7696_v22, %v7695_v28  ;;  %v14355_v50 = vld [vmem:[#allocation7 + $0x7c] ss:$12 sps:$4 sm:$0xff]   ;;  %v7754_v13 = vrot.slane %v18524_v44, 1  ;;  %v5205_v31 = vsel %vm4135_vm7, %v5204_v10, %v5203_v35  ;;  %v7753_v11 = vsel %vm4147_vm11, %v7752_v26, %v7751_v20  ;;  %v14353_v22 = vld [vmem:[#allocation7 + $0x78] ss:$12 sps:$4 sm:$0xff]  }
 0x31e   :  { %13330 = vmatpush3.bf16.msra.mxu1 %v14347_v9  ;;  %5752 = vmatprep.subr.bf16.mxu0 %v14350_v56  ;;  %v5188_v0 = vrot.slane %v18577_v37, 7  ;;  %v7699_v17 = vsel %vm4150_vm12, %v7698_v55, %v7697_v36  ;;  %v7535_v56 = vpack.c.bf16 %v7504_v30, %v7504_v30  ;;  %v14357_v44 = vld [vmem:[#allocation7 + $0x200] ss:$12 sps:$4 sm:$0xff]   ;;  %v5207_v42 = vsel %vm4138_vm8, %v5206_v33, %v5205_v31  ;;  %v14358_v28 = vld [vmem:[#allocation7 + $0x90] ss:$12 sps:$4 sm:$0xff]  }
 0x31f   :  { %13331 = vmatprep.subr.bf16.mxu1 %v14351_v21  ;;  %v7755_v58 = vsel %vm4150_vm12, %v7754_v13, %v7753_v11  ;;  %v14360_v48 = vld [vmem:[#allocation7 + $0x94] ss:$12 sps:$4 sm:$0xff]   ;;  %v14361_v21 = vld [vmem:[#allocation7 + $0x2d8] ss:$12 sps:$4 sm:$0xff]   ;;  %v5208_v10 = vrot.slane %v16611_v32, 4  ;;  %v5190_v3 = vrot.slane %v16593_v46, 6 }
 0x320   :  { %v17213_v9 = vpack.c.b16 %v7755_v58, %v7699_v17  ;;  %v7716_v59 = vrot.slane %v18638_v41, 6  ;;  %v5189_v35 = vsel %vm4132_vm6, %v5188_v0, %v18571_v23  ;;  %v18661_v55 = vld [vmem:[#allocation122_spill] sm:$0xff]  ;;  %v7680_v36 = vunpack.c.l.b16 %v7535_v56  ;;  %v18662_v30 = vld [vmem:[#allocation119_spill] sm:$0xff]  ;;  %v18665_v0 = vld [vmem:[#allocation49_spill] sm:$0xff] }
 0x321   :  { %5753 = vmatpush1.bf16.msra.mxu0 %v14348_v5  ;;  %v5209_v63 = vsel %vm4141_vm9, %v5208_v10, %v5207_v42  ;;  %v5212_v5 = vrot.slane %v18661_v55, 2  ;;  %v14362_v39 = vld [vmem:[#allocation7 + $0x218] ss:$12 sps:$4 sm:$0xff]   ;;  %v7718_v41 = vrot.slane %v18639_v2, 5  ;;  %v14366_v20 = vld [vmem:[#allocation7 + $0x2f0] ss:$12 sps:$4 sm:$0xff]   ;;  %v5191_v13 = vsel %vm4135_vm7, %v5190_v3, %v5189_v35 }
 0x322   :  { %13332 = vmatpush3.bf16.msra.mxu1 %v14352_v62  ;;  %5754 = vmatprep.subr.bf16.mxu0 %v14355_v50  ;;  %v14365_v26 = vld [vmem:[#allocation7 + $0xac] ss:$12 sps:$4 sm:$0xff]   ;;  %v5210_v62 = vrot.slane %v18662_v30, 3  ;;  %v18663_v50 = vld [vmem:[#allocation112_spill] sm:$0xff]  ;;  %v5214_v17 = vrot.slane %v18665_v0, 1 }
 0x323   :  { %13333 = vmatprep.subr.bf16.mxu1 %v14356_v19  ;;  %v5192_v33 = vrot.slane %v18663_v50, 5  ;;  %v18664_v19 = vld [vmem:[#allocation21_spill] sm:$0xff]  ;;  %v18666_v58 = vld [vmem:[#allocation55_spill] sm:$0xff] }
 0x324   :  { %v7772_v31 = vrot.slane %v18664_v19, 6  ;;  %v5211_v11 = vsel %vm4144_vm10, %v5210_v62, %v5209_v63  ;;  %v14363_v56 = vld [vmem:[#allocation7 + $0xa8] ss:$12 sps:$4 sm:$0xff]   ;;  %v14367_v2 = vld [vmem:[#allocation7 + $0x230] ss:$12 sps:$4 sm:$0xff]   ;;  %v7720_v62 = vrot.slane %v18640_v14, 4 }
 0x325   :  { %5755 = vmatpush1.bf16.msra.mxu0 %v14353_v22  ;;  %v7717_v22 = vsel %vm4135_vm7, %v7716_v59, %v18666_v58  ;;  %v14370_v42 = vld [vmem:[#allocation7 + $0xc4] ss:$12 sps:$4 sm:$0xff]   ;;  %v18667_v3 = vld [vmem:[#allocation115_spill] sm:$0xff] }
 0x326   :  { %13334 = vmatpush3.bf16.msra.mxu1 %v14357_v44  ;;  %5756 = vmatprep.subr.bf16.mxu0 %v14360_v48  ;;  %v5213_v44 = vsel %vm4147_vm11, %v5212_v5, %v5211_v11  ;;  %v7774_v48 = vrot.slane %v7680_v36, 5  ;;  %v14373_v10 = vld [vmem:[#allocation7 + $0x904] ss:$12 sps:$4 sm:$0xff]   ;;  %v5194_v35 = vrot.slane %v18667_v3, 4  ;;  %v7719_v63 = vsel %vm4138_vm8, %v7718_v41, %v7717_v22  ;;  %v14371_v14 = vld [vmem:[#allocation7 + $0x900] ss:$12 sps:$4 sm:$0xff]  }
 0x327   :  { %13335 = vmatprep.subr.bf16.mxu1 %v14361_v21  ;;  %v5193_v21 = vsel %vm4138_vm8, %v5192_v33, %v5191_v13  ;;  %v5215_v59 = vsel %vm4150_vm12, %v5214_v17, %v5213_v44  ;;  %v18669_v5 = vld [vmem:[#allocation82_spill] sm:$0xff]  ;;  %v7721_v33 = vsel %vm4141_vm9, %v7720_v62, %v7719_v63  ;;  %v18670_v13 = vld [vmem:[#allocation89_spill] sm:$0xff]  ;;  %v18673_v63 = vld [vmem:[#allocation91_spill] sm:$0xff] }
 0x328   :  { %v7773_v36 = vsel %vm4135_vm7, %v7772_v31, %v18669_v5  ;;  %v7724_v11 = vrot.slane %v18670_v13, 2  ;;  %v18671_v41 = vld [vmem:[#allocation118_spill] sm:$0xff]  ;;  %v7776_v31 = vrot.slane %v18564_v54, 4  ;;  %v7726_v62 = vrot.slane %v18673_v63, 1 }
 0x329   :  { %5757 = vmatpush1.bf16.msra.mxu0 %v14358_v28  ;;  %v18668_v28 = vld [vmem:[#allocation121_spill] sm:$0xff]  ;;  %v5196_v17 = vrot.slane %v18671_v41, 3  ;;  %v18672_v58 = vld [vmem:[#allocation78_spill] sm:$0xff]  ;;  %v7775_v44 = vsel %vm4138_vm8, %v7774_v48, %v7773_v36  ;;  %v7780_v48 = vrot.slane %v18571_v23, 2  ;;  %v7782_v36 = vrot.slane %v18577_v37, 1 }
 0x32a   :  { %13336 = vmatpush3.bf16.msra.mxu1 %v14362_v39  ;;  %5758 = vmatprep.subr.bf16.mxu0 %v14365_v26  ;;  %v5198_v19 = vrot.slane %v18668_v28, 2  ;;  %v14368_v39 = vld [vmem:[#allocation7 + $0xc0] ss:$12 sps:$4 sm:$0xff]   ;;  %v5195_v26 = vsel %vm4141_vm9, %v5194_v35, %v5193_v21  ;;  %v5200_v22 = vrot.slane %v18672_v58, 1  ;;  %v14376_v21 = vld [vmem:[#allocation7 + $0xdc] ss:$12 sps:$4 sm:$0xff]   ;;  %v7777_v13 = vsel %vm4141_vm9, %v7776_v31, %v7775_v44 }
 0x32b   :  { %13337 = vmatprep.subr.bf16.mxu1 %v14366_v20  ;;  %v7722_v20 = vrot.slane %v18641_v40, 3  ;;  %v14379_v35 = vld [vmem:[#allocation7 + $0x91c] ss:$12 sps:$4 sm:$0xff]   ;;  %v14374_v54 = vld [vmem:[#allocation7 + $0xd8] ss:$12 sps:$4 sm:$0xff]  }
 0x32c   :  { %v14385_v23 = vld [vmem:[#allocation7 + $0x934] ss:$12 sps:$4 sm:$0xff]   ;;  %v14380_v37 = vld [vmem:[#allocation7 + $0xf0] ss:$12 sps:$4 sm:$0xff]   ;;  %v14388_v44 = vld [vmem:[#allocation7 + $0x10c] ss:$12 sps:$4 sm:$0xff]  }
 0x32d   :  { %5759 = vmatpush1.bf16.msra.mxu0 %v14363_v56  ;;  %v17249_v56 = vpack.c.b16 %v5215_v59, %v5215_v59  ;;  %v7723_v40 = vsel %vm4144_vm10, %v7722_v20, %v7721_v33  ;;  %v14391_v31 = vld [vmem:[#allocation7 + $0x94c] ss:$12 sps:$4 sm:$0xff]   ;;  %v14397_v63 = vld [vmem:[#allocation7 + $0x964] ss:$12 sps:$4 sm:$0xff]  }
 0x32e   :  { %13338 = vmatpush3.bf16.msra.mxu1 %v14367_v2  ;;  %5760 = vmatprep.subr.bf16.mxu0 %v14370_v42  ;;  %v7778_v2 = vrot.slane %v18567_v34, 3  ;;  %v5197_v42 = vsel %vm4144_vm10, %v5196_v17, %v5195_v26  ;;  %v7725_v5 = vsel %vm4147_vm11, %v7724_v11, %v7723_v40  ;;  %v14377_v34 = vld [vmem:[#allocation7 + $0x918] ss:$12 sps:$4 sm:$0xff]   ;;  %v14382_v26 = vld [vmem:[#allocation7 + $0xf4] ss:$12 sps:$4 sm:$0xff]  }
 0x32f   :  { %6583 = vmatprep.subr.bf16.mxu1 %v14373_v10  ;;  %v5199_v10 = vsel %vm4147_vm11, %v5198_v19, %v5197_v42  ;;  %v7727_v20 = vsel %vm4150_vm12, %v7726_v62, %v7725_v5  ;;  %v14394_v40 = vld [vmem:[#allocation7 + $0x124] ss:$12 sps:$4 sm:$0xff]   ;;  %v14392_v62 = vld [vmem:[#allocation7 + $0x120] ss:$12 sps:$4 sm:$0xff]   ;;  %v14400_v42 = vld [vmem:[#allocation7 + $0x13c] ss:$12 sps:$4 sm:$0xff]  }
 0x330   :  { %v7779_v59 = vsel %vm4144_vm10, %v7778_v2, %v7777_v13  ;;  %v5201_v19 = vsel %vm4150_vm12, %v5200_v22, %v5199_v10  ;;  %v14389_v22 = vld [vmem:[#allocation7 + $0x948] ss:$12 sps:$4 sm:$0xff]   ;;  %v14395_v2 = vld [vmem:[#allocation7 + $0x960] ss:$12 sps:$4 sm:$0xff]   ;;  %v14398_v13 = vld [vmem:[#allocation7 + $0x138] ss:$12 sps:$4 sm:$0xff]  }
 0x331   :  { %5927 = vmatmul.mubr.bf16.vlgmr.msra.gmra.mrb[56].mxu1 %v17145_v15  ;;  %5761 = vmatpush1.bf16.msra.mxu0 %v14368_v39  ;;  %v7781_v33 = vsel %vm4147_vm11, %v7780_v48, %v7779_v59  ;;  %v17269_v17 = vpack.c.b16 %v5201_v19, %v5201_v19  ;;  %v14403_v5 = vld [vmem:[#allocation7 + $0x97c] ss:$12 sps:$4 sm:$0xff]   ;;  %v14401_v48 = vld [vmem:[#allocation7 + $0x978] ss:$12 sps:$4 sm:$0xff]   ;;  %v14409_v10 = vld [vmem:[#allocation7 + $0x994] ss:$12 sps:$4 sm:$0xff]  }
 0x332   :  { %5934 = vmatprep.mubr.bf16.mxu1 %v17249_v56  ;;  %6584 = vmatpush1.bf16.msra.mxu1 %v14371_v14  ;;  %v7783_v39 = vsel %vm4150_vm12, %v7782_v36, %v7781_v33  ;;  %v14383_v14 = vld [vmem:[#allocation7 + $0x930] ss:$12 sps:$4 sm:$0xff]   ;;  %v14410_v33 = vld [vmem:[#allocation7 + $0x168] ss:$12 sps:$4 sm:$0xff]   ;;  %v14416_v19 = vld [vmem:[#allocation7 + $0x180] ss:$12 sps:$4 sm:$0xff]  }
 0x333   :  { %5762 = vmatprep.subr.bf16.mxu0 %v14376_v21  ;;  %6585 = vmatprep.subr.bf16.mxu1 %v14379_v35  ;;  %v17267_v11 = vpack.c.b16 %v7783_v39, %v7727_v20  ;;  %v14386_v21 = vld [vmem:[#allocation7 + $0x108] ss:$12 sps:$4 sm:$0xff]   ;;  %v14404_v59 = vld [vmem:[#allocation7 + $0x150] ss:$12 sps:$4 sm:$0xff]  }
 0x334   :  { %v18674_v35 = vld [vmem:[#allocation72_spill] sm:$0xff]  ;;  %v14407_v36 = vld [vmem:[#allocation7 + $0x990] ss:$12 sps:$4 sm:$0xff]  }
 0x335   :  { %5763 = vmatpush1.bf16.msra.mxu0 %v14374_v54  ;;  %v14406_v54 = vld [vmem:[#allocation7 + $0x154] ss:$12 sps:$4 sm:$0xff]   ;;  %v14418_v20 = vld [vmem:[#allocation7 + $0x184] ss:$12 sps:$4 sm:$0xff]  }
 0x336   :  { %6586 = vmatpush1.bf16.msra.mxu1 %v14377_v34  ;;  %5764 = vmatprep.subr.bf16.mxu0 %v14382_v26  ;;  %v14412_v34 = vld [vmem:[#allocation7 + $0x16c] ss:$12 sps:$4 sm:$0xff]   ;;  %v14421_v39 = vld [vmem:[#allocation7 + $0x9c4] ss:$12 sps:$4 sm:$0xff]  }
 0x337   :  { %6587 = vmatprep.subr.bf16.mxu1 %v14385_v23  ;;  %v14415_v26 = vld [vmem:[#allocation7 + $0x9ac] ss:$12 sps:$4 sm:$0xff]   ;;  %v14413_v23 = vld [vmem:[#allocation7 + $0x9a8] ss:$12 sps:$4 sm:$0xff]  }
 0x339   :  { %5935 = vmatmul.mubr.bf16.gmra.mrb[60].mxu1 %v17269_v17  ;;  %5765 = vmatpush1.bf16.msra.mxu0 %v14380_v37  ;;  %v14419_v37 = vld [vmem:[#allocation7 + $0x9c0] ss:$12 sps:$4 sm:$0xff]  }
 0x33a   :  { %6588 = vmatpush1.bf16.msra.mxu1 %v14383_v14  ;;  %6615 = vmatprep.mubr.bf16.mxu1 %v18674_v35  ;;  %v14424_v14 = vld [vmem:[#allocation7 + $0x19c] ss:$12 sps:$4 sm:$0xff]  }
 0x33b   :  { %5766 = vmatprep.subr.bf16.mxu0 %v14388_v44  ;;  %6589 = vmatprep.subr.bf16.mxu1 %v14391_v31  ;;  %v14427_v44 = vld [vmem:[#allocation7 + $0x9dc] ss:$12 sps:$4 sm:$0xff]   ;;  %v14422_v31 = vld [vmem:[#allocation7 + $0x198] ss:$12 sps:$4 sm:$0xff]  }
 0x33d   :  { %5767 = vmatpush1.bf16.msra.mxu0 %v14386_v21  ;;  %v14425_v21 = vld [vmem:[#allocation7 + $0x9d8] ss:$12 sps:$4 sm:$0xff]  }
 0x33e   :  { %6590 = vmatpush1.bf16.msra.mxu1 %v14389_v22  ;;  %5768 = vmatprep.subr.bf16.mxu0 %v14394_v40  ;;  %v14430_v22 = vld [vmem:[#allocation7 + $0x1b4] ss:$12 sps:$4 sm:$0xff]  }
 0x33f   :  { %6591 = vmatprep.subr.bf16.mxu1 %v14397_v63  ;;  %v14433_v40 = vld [vmem:[#allocation7 + $0x9f4] ss:$12 sps:$4 sm:$0xff]   ;;  %v14428_v63 = vld [vmem:[#allocation7 + $0x1b0] ss:$12 sps:$4 sm:$0xff]  }
 0x341   :  { %5769 = vmatpush1.bf16.msra.mxu0 %v14392_v62  ;;  %v14431_v62 = vld [vmem:[#allocation7 + $0x9f0] ss:$12 sps:$4 sm:$0xff]  }
 0x342   :  { %6592 = vmatpush1.bf16.msra.mxu1 %v14395_v2  ;;  %5770 = vmatprep.subr.bf16.mxu0 %v14400_v42  ;;  %v14436_v2 = vld [vmem:[#allocation7 + $0x1cc] ss:$12 sps:$4 sm:$0xff]  }
 0x343   :  { %6593 = vmatprep.subr.bf16.mxu1 %v14403_v5  ;;  %v14439_v42 = vld [vmem:[#allocation7 + $0xa0c] ss:$12 sps:$4 sm:$0xff]   ;;  %v14434_v5 = vld [vmem:[#allocation7 + $0x1c8] ss:$12 sps:$4 sm:$0xff]  }
 0x345   :  { %5771 = vmatpush1.bf16.msra.mxu0 %v14398_v13  ;;  %v14437_v13 = vld [vmem:[#allocation7 + $0xa08] ss:$12 sps:$4 sm:$0xff]  }
 0x346   :  { %6594 = vmatpush1.bf16.msra.mxu1 %v14401_v48  ;;  %5772 = vmatprep.subr.bf16.mxu0 %v14406_v54  ;;  %v14442_v48 = vld [vmem:[#allocation7 + $0x1e4] ss:$12 sps:$4 sm:$0xff]  }
 0x347   :  { %6595 = vmatprep.subr.bf16.mxu1 %v14409_v10  ;;  %v14445_v54 = vld [vmem:[#allocation7 + $0xa24] ss:$12 sps:$4 sm:$0xff]   ;;  %v14440_v10 = vld [vmem:[#allocation7 + $0x1e0] ss:$12 sps:$4 sm:$0xff]  }
 0x349   :  { %5773 = vmatpush1.bf16.msra.mxu0 %v14404_v59  ;;  %v14443_v59 = vld [vmem:[#allocation7 + $0xa20] ss:$12 sps:$4 sm:$0xff]  }
 0x34a   :  { %6596 = vmatpush1.bf16.msra.mxu1 %v14407_v36  ;;  %5774 = vmatprep.subr.bf16.mxu0 %v14412_v34  ;;  %v14448_v36 = vld [vmem:[#allocation7 + $0x1fc] ss:$12 sps:$4 sm:$0xff]  }
 0x34b   :  { %6597 = vmatprep.subr.bf16.mxu1 %v14415_v26  ;;  %v14451_v34 = vld [vmem:[#allocation7 + $0xa3c] ss:$12 sps:$4 sm:$0xff]   ;;  %v14446_v26 = vld [vmem:[#allocation7 + $0x1f8] ss:$12 sps:$4 sm:$0xff]  }
 0x34d   :  { %5775 = vmatpush1.bf16.msra.mxu0 %v14410_v33  ;;  %v14449_v33 = vld [vmem:[#allocation7 + $0xa38] ss:$12 sps:$4 sm:$0xff]  }
 0x34e   :  { %6598 = vmatpush1.bf16.msra.mxu1 %v14413_v23  ;;  %5795 = vmatprep.subr.bf16.mxu0 %v14418_v20  ;;  %v14454_v23 = vld [vmem:[#allocation7 + $0x214] ss:$12 sps:$4 sm:$0xff]  }
 0x34f   :  { %6599 = vmatprep.subr.bf16.mxu1 %v14421_v39  ;;  %v14457_v20 = vld [vmem:[#allocation7 + $0xa54] ss:$12 sps:$4 sm:$0xff]   ;;  %v14452_v39 = vld [vmem:[#allocation7 + $0x210] ss:$12 sps:$4 sm:$0xff]  }
 0x350   :  { %5777 = vmatmul.mubr.bf16.vlgmr.msra.gmra.mrb[32].mxu0 %v17041_v57 }
 0x351   :  { %5786 = vmatprep.mubr.bf16.mxu0 %v17158_v7  ;;  %5796 = vmatpush1.bf16.msra.mxu0 %v14416_v19  ;;  %v14455_v19 = vld [vmem:[#allocation7 + $0xa50] ss:$12 sps:$4 sm:$0xff]  }
 0x352   :  { %6600 = vmatpush1.bf16.msra.mxu1 %v14419_v37  ;;  %5797 = vmatprep.subr.bf16.mxu0 %v14424_v14  ;;  %v14460_v37 = vld [vmem:[#allocation7 + $0x22c] ss:$12 sps:$4 sm:$0xff]  }
 0x353   :  { %6601 = vmatprep.subr.bf16.mxu1 %v14427_v44  ;;  %v14463_v14 = vld [vmem:[#allocation7 + $0xa6c] ss:$12 sps:$4 sm:$0xff]   ;;  %v14458_v44 = vld [vmem:[#allocation7 + $0x228] ss:$12 sps:$4 sm:$0xff]  }
 0x355   :  { %5798 = vmatpush1.bf16.msra.mxu0 %v14422_v31  ;;  %v14461_v31 = vld [vmem:[#allocation7 + $0xa68] ss:$12 sps:$4 sm:$0xff]  }
 0x356   :  { %6602 = vmatpush1.bf16.msra.mxu1 %v14425_v21  ;;  %5799 = vmatprep.subr.bf16.mxu0 %v14430_v22  ;;  %v14466_v21 = vld [vmem:[#allocation7 + $0x244] ss:$12 sps:$4 sm:$0xff]  }
 0x357   :  { %6603 = vmatprep.subr.bf16.mxu1 %v14433_v40  ;;  %v14469_v22 = vld [vmem:[#allocation7 + $0xa84] ss:$12 sps:$4 sm:$0xff]   ;;  %v14464_v40 = vld [vmem:[#allocation7 + $0x240] ss:$12 sps:$4 sm:$0xff]  }
 0x358   :  { %5787 = vmatmul.mubr.bf16.gmra.mrb[36].mxu0 %v17176_v24 }
 0x359   :  { %5800 = vmatpush1.bf16.msra.mxu0 %v14428_v63  ;;  %5827 = vmatprep.mubr.bf16.mxu0 %v17125_v4  ;;  %v14467_v63 = vld [vmem:[#allocation7 + $0xa80] ss:$12 sps:$4 sm:$0xff]  }
 0x35a   :  { %6604 = vmatpush1.bf16.msra.mxu1 %v14431_v62  ;;  %5801 = vmatprep.subr.bf16.mxu0 %v14436_v2  ;;  %v14472_v62 = vld [vmem:[#allocation7 + $0x25c] ss:$12 sps:$4 sm:$0xff]  }
 0x35b   :  { %6605 = vmatprep.subr.bf16.mxu1 %v14439_v42  ;;  %v14475_v2 = vld [vmem:[#allocation7 + $0xa9c] ss:$12 sps:$4 sm:$0xff]  }
 0x35c   :  { %v18675_v42 = vld [vmem:[#allocation27_spill] sm:$0xff] }
 0x35d   :  { %5802 = vmatpush1.bf16.msra.mxu0 %v14434_v5  ;;  %v14470_v5 = vld [vmem:[#allocation7 + $0x258] ss:$12 sps:$4 sm:$0xff]  }
 0x35e   :  { %6606 = vmatpush1.bf16.msra.mxu1 %v14437_v13  ;;  %5803 = vmatprep.subr.bf16.mxu0 %v14442_v48  ;;  %v18676_v13 = vld [vmem:[#allocation124_spill] sm:$0xff] }
 0x35f   :  { %6607 = vmatprep.subr.bf16.mxu1 %v14445_v54  ;;  %v14473_v48 = vld [vmem:[#allocation7 + $0xa98] ss:$12 sps:$4 sm:$0xff]   ;;  %v14478_v54 = vld [vmem:[#allocation7 + $0x274] ss:$12 sps:$4 sm:$0xff]  }
 0x361   :  { %5804 = vmatpush1.bf16.msra.mxu0 %v14440_v10  ;;  %v14481_v10 = vld [vmem:[#allocation7 + $0xab4] ss:$12 sps:$4 sm:$0xff]  }
 0x362   :  { %6608 = vmatpush1.bf16.msra.mxu1 %v14443_v59  ;;  %5805 = vmatprep.subr.bf16.mxu0 %v14448_v36  ;;  %v14476_v59 = vld [vmem:[#allocation7 + $0x270] ss:$12 sps:$4 sm:$0xff]  }
 0x363   :  { %6609 = vmatprep.subr.bf16.mxu1 %v14451_v34  ;;  %v14479_v36 = vld [vmem:[#allocation7 + $0xab0] ss:$12 sps:$4 sm:$0xff]   ;;  %v14484_v34 = vld [vmem:[#allocation7 + $0x28c] ss:$12 sps:$4 sm:$0xff]  }
 0x365   :  { %5806 = vmatpush1.bf16.msra.mxu0 %v14446_v26  ;;  %v14487_v26 = vld [vmem:[#allocation7 + $0xacc] ss:$12 sps:$4 sm:$0xff]  }
 0x366   :  { %6610 = vmatpush1.bf16.msra.mxu1 %v14449_v33  ;;  %5807 = vmatprep.subr.bf16.mxu0 %v14454_v23  ;;  %v18677_v33 = vld [vmem:[#allocation127_spill] sm:$0xff]  ;;  %v14482_v23 = vld [vmem:[#allocation7 + $0x288] ss:$12 sps:$4 sm:$0xff]  }
 0x367   :  { %6611 = vmatprep.subr.bf16.mxu1 %v14457_v20  ;;  %v18678_v20 = vld [vmem:[#allocation51_spill] sm:$0xff] }
 0x369   :  { %5808 = vmatpush1.bf16.msra.mxu0 %v14452_v39  ;;  %v14485_v39 = vld [vmem:[#allocation7 + $0xac8] ss:$12 sps:$4 sm:$0xff]  }
 0x36a   :  { %6612 = vmatpush1.bf16.msra.mxu1 %v14455_v19  ;;  %5809 = vmatprep.subr.bf16.mxu0 %v14460_v37  ;;  %v14490_v19 = vld [vmem:[#allocation7 + $0x2a4] ss:$12 sps:$4 sm:$0xff]  }
 0x36b   :  { %6613 = vmatprep.subr.bf16.mxu1 %v14463_v14  ;;  %v14493_v37 = vld [vmem:[#allocation7 + $0xae4] ss:$12 sps:$4 sm:$0xff]   ;;  %v14488_v14 = vld [vmem:[#allocation7 + $0x2a0] ss:$12 sps:$4 sm:$0xff]  }
 0x36d   :  { %5810 = vmatpush1.bf16.msra.mxu0 %v14458_v44  ;;  %v14491_v44 = vld [vmem:[#allocation7 + $0xae0] ss:$12 sps:$4 sm:$0xff]  }
 0x36e   :  { %6614 = vmatpush1.bf16.msra.mxu1 %v14461_v31  ;;  %5811 = vmatprep.subr.bf16.mxu0 %v14466_v21  ;;  %v14496_v31 = vld [vmem:[#allocation7 + $0x2bc] ss:$12 sps:$4 sm:$0xff]  }
 0x36f   :  { %6634 = vmatprep.subr.bf16.mxu1 %v14469_v22  ;;  %v14499_v21 = vld [vmem:[#allocation7 + $0xafc] ss:$12 sps:$4 sm:$0xff]   ;;  %v14494_v22 = vld [vmem:[#allocation7 + $0x2b8] ss:$12 sps:$4 sm:$0xff]  }
 0x371   :  { %6616 = vmatmul.mubr.bf16.vlgmr.msra.gmra.mrb[64].mxu1 %v18675_v42  ;;  %5812 = vmatpush1.bf16.msra.mxu0 %v14464_v40  ;;  %v14497_v40 = vld [vmem:[#allocation7 + $0xaf8] ss:$12 sps:$4 sm:$0xff]  }
 0x372   :  { %6625 = vmatprep.mubr.bf16.mxu1 %v18676_v13  ;;  %6635 = vmatpush1.bf16.msra.mxu1 %v14467_v63  ;;  %v14502_v63 = vld [vmem:[#allocation7 + $0x2d4] ss:$12 sps:$4 sm:$0xff]  }
 0x373   :  { %5813 = vmatprep.subr.bf16.mxu0 %v14472_v62  ;;  %6636 = vmatprep.subr.bf16.mxu1 %v14475_v2  ;;  %v14505_v62 = vld [vmem:[#allocation7 + $0xb14] ss:$12 sps:$4 sm:$0xff]   ;;  %v14500_v2 = vld [vmem:[#allocation7 + $0x2d0] ss:$12 sps:$4 sm:$0xff]  }
 0x375   :  { %5814 = vmatpush1.bf16.msra.mxu0 %v14470_v5  ;;  %v14503_v5 = vld [vmem:[#allocation7 + $0xb10] ss:$12 sps:$4 sm:$0xff]  }
 0x376   :  { %6637 = vmatpush1.bf16.msra.mxu1 %v14473_v48  ;;  %5815 = vmatprep.subr.bf16.mxu0 %v14478_v54  ;;  %v14508_v48 = vld [vmem:[#allocation7 + $0x2ec] ss:$12 sps:$4 sm:$0xff]  }
 0x377   :  { %6638 = vmatprep.subr.bf16.mxu1 %v14481_v10  ;;  %v14511_v54 = vld [vmem:[#allocation7 + $0xb2c] ss:$12 sps:$4 sm:$0xff]   ;;  %v14506_v10 = vld [vmem:[#allocation7 + $0x2e8] ss:$12 sps:$4 sm:$0xff]  }
 0x379   :  { %6626 = vmatmul.mubr.bf16.gmra.mrb[68].mxu1 %v18677_v33  ;;  %5816 = vmatpush1.bf16.msra.mxu0 %v14476_v59  ;;  %v14509_v59 = vld [vmem:[#allocation7 + $0xb28] ss:$12 sps:$4 sm:$0xff]  }
 0x37a   :  { %6639 = vmatpush1.bf16.msra.mxu1 %v14479_v36  ;;  %6666 = vmatprep.mubr.bf16.mxu1 %v18678_v20  ;;  %v14515_v36 = vld [vmem:[#allocation7 + $0x9c8] ss:$12 sps:$4 sm:$0xff]  }
 0x37b   :  { %5817 = vmatprep.subr.bf16.mxu0 %v14484_v34  ;;  %6640 = vmatprep.subr.bf16.mxu1 %v14487_v26  ;;  %v14514_v34 = vld [vmem:[#allocation7 + $0xb44] ss:$12 sps:$4 sm:$0xff]   ;;  %v14516_v26 = vld [vmem:[#allocation7 + $0x908] ss:$12 sps:$4 sm:$0xff]  }
 0x37d   :  { %5818 = vmatpush1.bf16.msra.mxu0 %v14482_v23  ;;  %v14512_v23 = vld [vmem:[#allocation7 + $0xb40] ss:$12 sps:$4 sm:$0xff]  }
 0x37e   :  { %6641 = vmatpush1.bf16.msra.mxu1 %v14485_v39  ;;  %5819 = vmatprep.subr.bf16.mxu0 %v14490_v19  ;;  %v14520_v39 = vld [vmem:[#allocation7 + $0x9e0] ss:$12 sps:$4 sm:$0xff]   ;;  %v14519_v19 = vld [vmem:[#allocation7 + $0xb5c] ss:$12 sps:$4 sm:$0xff]  }
 0x37f   :  { %6642 = vmatprep.subr.bf16.mxu1 %v14493_v37  ;;  %v14521_v37 = vld [vmem:[#allocation7 + $0x920] ss:$12 sps:$4 sm:$0xff]  }
 0x381   :  { %5820 = vmatpush1.bf16.msra.mxu0 %v14488_v14  ;;  %v14517_v14 = vld [vmem:[#allocation7 + $0xb58] ss:$12 sps:$4 sm:$0xff]  }
 0x382   :  { %6643 = vmatpush1.bf16.msra.mxu1 %v14491_v44  ;;  %5821 = vmatprep.subr.bf16.mxu0 %v14496_v31  ;;  %v14525_v44 = vld [vmem:[#allocation7 + $0x9f8] ss:$12 sps:$4 sm:$0xff]   ;;  %v14524_v31 = vld [vmem:[#allocation7 + $0xb74] ss:$12 sps:$4 sm:$0xff]  }
 0x383   :  { %6644 = vmatprep.subr.bf16.mxu1 %v14499_v21  ;;  %v14526_v21 = vld [vmem:[#allocation7 + $0x938] ss:$12 sps:$4 sm:$0xff]  }
 0x385   :  { %5822 = vmatpush1.bf16.msra.mxu0 %v14494_v22  ;;  %v14522_v22 = vld [vmem:[#allocation7 + $0xb70] ss:$12 sps:$4 sm:$0xff]  }
 0x386   :  { %6645 = vmatpush1.bf16.msra.mxu1 %v14497_v40  ;;  %5823 = vmatprep.subr.bf16.mxu0 %v14502_v63  ;;  %v14530_v40 = vld [vmem:[#allocation7 + $0xa10] ss:$12 sps:$4 sm:$0xff]   ;;  %v14529_v63 = vld [vmem:[#allocation7 + $0xb8c] ss:$12 sps:$4 sm:$0xff]  }
 0x387   :  { %6646 = vmatprep.subr.bf16.mxu1 %v14505_v62  ;;  %v14531_v62 = vld [vmem:[#allocation7 + $0x950] ss:$12 sps:$4 sm:$0xff]  }
 0x389   :  { %5824 = vmatpush1.bf16.msra.mxu0 %v14500_v2  ;;  %v14527_v2 = vld [vmem:[#allocation7 + $0xb88] ss:$12 sps:$4 sm:$0xff]  }
 0x38a   :  { %6647 = vmatpush1.bf16.msra.mxu1 %v14503_v5  ;;  %5825 = vmatprep.subr.bf16.mxu0 %v14508_v48  ;;  %v14535_v5 = vld [vmem:[#allocation7 + $0xa28] ss:$12 sps:$4 sm:$0xff]   ;;  %v14534_v48 = vld [vmem:[#allocation7 + $0xba4] ss:$12 sps:$4 sm:$0xff]  }
 0x38b   :  { %6648 = vmatprep.subr.bf16.mxu1 %v14511_v54  ;;  %v14536_v54 = vld [vmem:[#allocation7 + $0x968] ss:$12 sps:$4 sm:$0xff]  }
 0x38d   :  { %5826 = vmatpush1.bf16.msra.mxu0 %v14506_v10  ;;  %v14532_v10 = vld [vmem:[#allocation7 + $0xba0] ss:$12 sps:$4 sm:$0xff]  }
 0x38e   :  { %6649 = vmatpush1.bf16.msra.mxu1 %v14509_v59  ;;  %13351 = vmatprep.subr.bf16.mxu0 %v14515_v36  ;;  %v14540_v59 = vld [vmem:[#allocation7 + $0xa40] ss:$12 sps:$4 sm:$0xff]   ;;  %v14539_v36 = vld [vmem:[#allocation7 + $0xbbc] ss:$12 sps:$4 sm:$0xff]  }
 0x38f   :  { %6650 = vmatprep.subr.bf16.mxu1 %v14514_v34  ;;  %v14541_v34 = vld [vmem:[#allocation7 + $0x980] ss:$12 sps:$4 sm:$0xff]  }
 0x390   :  { %5828 = vmatmul.mubr.bf16.vlgmr.msra.gmra.mrb[32].mxu0 %v17145_v15 }
 0x391   :  { %5837 = vmatprep.mubr.bf16.mxu0 %v17249_v56  ;;  %13352 = vmatpush3.bf16.msra.mxu0 %v14516_v26 }
 0x392   :  { %6651 = vmatpush1.bf16.msra.mxu1 %v14512_v23  ;;  %13353 = vmatprep.subr.bf16.mxu0 %v14520_v39  ;;  %v14545_v23 = vld [vmem:[#allocation7 + $0xa58] ss:$12 sps:$4 sm:$0xff]  }
 0x393   :  { %6652 = vmatprep.subr.bf16.mxu1 %v14519_v19  ;;  %v14544_v19 = vld [vmem:[#allocation7 + $0xbd4] ss:$12 sps:$4 sm:$0xff]  }
 0x395   :  { %13354 = vmatpush3.bf16.msra.mxu0 %v14521_v37 }
 0x396   :  { %6653 = vmatpush1.bf16.msra.mxu1 %v14517_v14  ;;  %13355 = vmatprep.subr.bf16.mxu0 %v14525_v44 }
 0x397   :  { %6654 = vmatprep.subr.bf16.mxu1 %v14524_v31  ;;  %v14546_v31 = vld [vmem:[#allocation7 + $0x998] ss:$12 sps:$4 sm:$0xff]  }
 0x398   :  { %5838 = vmatmul.mubr.bf16.gmra.mrb[36].mxu0 %v17269_v17 }
 0x399   :  { %13356 = vmatpush3.bf16.msra.mxu0 %v14526_v21  ;;  %6717 = vmatprep.mubr.bf16.mxu0 %v18674_v35  ;;  %v14537_v35 = vld [vmem:[#allocation7 + $0xbb8] ss:$12 sps:$4 sm:$0xff]  }
 0x39a   :  { %6655 = vmatpush1.bf16.msra.mxu1 %v14522_v22  ;;  %13357 = vmatprep.subr.bf16.mxu0 %v14530_v40  ;;  %v14542_v22 = vld [vmem:[#allocation7 + $0xbd0] ss:$12 sps:$4 sm:$0xff]  }
 0x39b   :  { %6656 = vmatprep.subr.bf16.mxu1 %v14529_v63  ;;  %v14550_v40 = vld [vmem:[#allocation7 + $0xa70] ss:$12 sps:$4 sm:$0xff]   ;;  %v14549_v63 = vld [vmem:[#allocation7 + $0xbec] ss:$12 sps:$4 sm:$0xff]  }
 0x39d   :  { %13358 = vmatpush3.bf16.msra.mxu0 %v14531_v62  ;;  %v13255_v26 = vpop.f32.mrb[32].mxu1  ;;  %v14551_v62 = vld [vmem:[#allocation7 + $0x9b0] ss:$12 sps:$4 sm:$0xff]  }
 0x39e   :  { %6657 = vmatpush1.bf16.msra.mxu1 %v14527_v2  ;;  %13359 = vmatprep.subr.bf16.mxu0 %v14535_v5  ;;  %v13256_v39 = vpop.f32.mrb[33].mxu1  ;;  %v14547_v2 = vld [vmem:[#allocation7 + $0xbe8] ss:$12 sps:$4 sm:$0xff]  }
 0x39f   :  { %6658 = vmatprep.subr.bf16.mxu1 %v14534_v48  ;;  %v17285_v37 = vadd.f32 %v13256_v39, %v13255_v26  ;;  %v13258_v14 = vpop.f32.mrb[34].mxu1  ;;  %v14553_v5 = vld [vmem:[#allocation7 + $0x3c8] ss:$12 sps:$4 sm:$0xff]   ;;  %v14557_v39 = vld [vmem:[#allocation7 + $0x3e0] ss:$12 sps:$4 sm:$0xff]  }
 0x3a0   :  { %v13259_v44 = vpop.f32.mrb[35].mxu1  ;;  %v14552_v48 = vld [vmem:[#allocation7 + $0xb48] ss:$12 sps:$4 sm:$0xff]  }
 0x3a1   :  { %13360 = vmatpush3.bf16.msra.mxu0 %v14536_v54  ;;  %v17287_v21 = vadd.f32 %v13259_v44, %v13258_v14  ;;  %v14559_v14 = vld [vmem:[#allocation7 + $0x320] ss:$12 sps:$4 sm:$0xff]   ;;  %v14560_v44 = vld [vmem:[#allocation7 + $0xb78] ss:$12 sps:$4 sm:$0xff]  }
 0x3a2   :  { %6659 = vmatpush1.bf16.msra.mxu1 %v14532_v10  ;;  %13361 = vmatprep.subr.bf16.mxu0 %v14540_v59 }
 0x3a3   :  { %6660 = vmatprep.subr.bf16.mxu1 %v14539_v36 }
 0x3a5   :  { %13362 = vmatpush3.bf16.msra.mxu0 %v14541_v34  ;;  %v14554_v34 = vld [vmem:[#allocation7 + $0xa88] ss:$12 sps:$4 sm:$0xff]  }
 0x3a6   :  { %6661 = vmatpush1.bf16.msra.mxu1 %v14537_v35  ;;  %13363 = vmatprep.subr.bf16.mxu0 %v14545_v23  ;;  %v14555_v35 = vld [vmem:[#allocation7 + $0x308] ss:$12 sps:$4 sm:$0xff]   ;;  %v14556_v23 = vld [vmem:[#allocation7 + $0xb60] ss:$12 sps:$4 sm:$0xff]  }
 0x3a7   :  { %6662 = vmatprep.subr.bf16.mxu1 %v14544_v19  ;;  %v14558_v19 = vld [vmem:[#allocation7 + $0xaa0] ss:$12 sps:$4 sm:$0xff]  }
 0x3a8   :  { %v13261_v54 = vpop.f32.mrb[36].mxu1 }
 0x3a9   :  { %13364 = vmatpush3.bf16.msra.mxu0 %v14546_v31  ;;  %v13262_v10 = vpop.f32.mrb[37].mxu1  ;;  %v14561_v31 = vld [vmem:[#allocation7 + $0x3f8] ss:$12 sps:$4 sm:$0xff]  }
 0x3aa   :  { %6663 = vmatpush1.bf16.msra.mxu1 %v14542_v22  ;;  %13365 = vmatprep.subr.bf16.mxu0 %v14550_v40  ;;  %v17289_v59 = vadd.f32 %v13262_v10, %v13261_v54  ;;  %v13264_v36 = vpop.f32.mrb[38].mxu1  ;;  %v14562_v22 = vld [vmem:[#allocation7 + $0xab8] ss:$12 sps:$4 sm:$0xff]   ;;  %v14564_v40 = vld [vmem:[#allocation7 + $0xb90] ss:$12 sps:$4 sm:$0xff]  }
 0x3ab   :  { %6664 = vmatprep.subr.bf16.mxu1 %v14549_v63  ;;  %v13265_v26 = vpop.f32.mrb[39].mxu1  ;;  %v14566_v63 = vld [vmem:[#allocation7 + $0xad0] ss:$12 sps:$4 sm:$0xff]   ;;  %v14572_v54 = vld [vmem:[#allocation7 + $0xbc0] ss:$12 sps:$4 sm:$0xff]  }
 0x3ac   :  { %v14573_v10 = vld [vmem:[#allocation7 + $0x440] ss:$12 sps:$4 sm:$0xff]  }
 0x3ad   :  { %13366 = vmatpush3.bf16.msra.mxu0 %v14551_v62  ;;  %v14567_v62 = vld [vmem:[#allocation7 + $0x350] ss:$12 sps:$4 sm:$0xff]   ;;  %v14575_v26 = vld [vmem:[#allocation7 + $0x380] ss:$12 sps:$4 sm:$0xff]  }
 0x3ae   :  { %6665 = vmatpush1.bf16.msra.mxu1 %v14547_v2  ;;  %13407 = vmatprep.subr.bf16.mxu0 %v14553_v5  ;;  %v14568_v2 = vld [vmem:[#allocation7 + $0xba8] ss:$12 sps:$4 sm:$0xff]  }
 0x3af   :  { %13379 = vmatprep.subr.bf16.mxu1 %v14552_v48  ;;  %v14569_v5 = vld [vmem:[#allocation7 + $0x428] ss:$12 sps:$4 sm:$0xff]  }
 0x3b0   :  { %6718 = vmatmul.mubr.bf16.vlgmr.msra.gmra.mrb[40].mxu0 %v18675_v42  ;;  %v14563_v42 = vld [vmem:[#allocation7 + $0x338] ss:$12 sps:$4 sm:$0xff]   ;;  %v14570_v48 = vld [vmem:[#allocation7 + $0xae8] ss:$12 sps:$4 sm:$0xff]  }
 0x3b1   :  { %6667 = vmatmul.mubr.bf16.vlgmr.msra.gmra.mrb[64].mxu1 %v16911_v1  ;;  %6725 = vmatprep.mubr.bf16.mxu0 %v18676_v13  ;;  %v14565_v13 = vld [vmem:[#allocation7 + $0x410] ss:$12 sps:$4 sm:$0xff]  }
 0x3b2   :  { %6676 = vmatprep.mubr.bf16.mxu1 %v16947_v49  ;;  %13380 = vmatpush3.bf16.msra.mxu1 %v14554_v34  ;;  %v14574_v34 = vld [vmem:[#allocation7 + $0xb00] ss:$12 sps:$4 sm:$0xff]  }
 0x3b3   :  { %13408 = vmatpush3.bf16.msra.mxu0 %v14555_v35  ;;  %13381 = vmatprep.subr.bf16.mxu1 %v14556_v23  ;;  %v14576_v35 = vld [vmem:[#allocation7 + $0xbd8] ss:$12 sps:$4 sm:$0xff]  }
 0x3b4   :  { %13409 = vmatprep.subr.bf16.mxu0 %v14557_v39 }
 0x3b6   :  { %13382 = vmatpush3.bf16.msra.mxu1 %v14558_v19  ;;  %v14577_v19 = vld [vmem:[#allocation7 + $0x458] ss:$12 sps:$4 sm:$0xff]  }
 0x3b7   :  { %13410 = vmatpush3.bf16.msra.mxu0 %v14559_v14  ;;  %13383 = vmatprep.subr.bf16.mxu1 %v14560_v44 }
 0x3b8   :  { %6726 = vmatmul.mubr.bf16.gmra.mrb[44].mxu0 %v18677_v33  ;;  %13411 = vmatprep.subr.bf16.mxu0 %v14561_v31  ;;  %v14571_v33 = vld [vmem:[#allocation7 + $0x368] ss:$12 sps:$4 sm:$0xff]  }
 0x3b9   :  { %6677 = vmatmul.mubr.bf16.gmra.mrb[68].mxu1 %v16983_v60  ;;  %7427 = vmatprep.mubr.bf16.mxu0 %v17007_v61 }
 0x3ba   :  { %13384 = vmatpush3.bf16.msra.mxu1 %v14562_v22  ;;  %6765 = vmatprep.mubr.bf16.mxu1 %v18678_v20  ;;  %v14578_v22 = vld [vmem:[#allocation7 + $0xb18] ss:$12 sps:$4 sm:$0xff]  }
 0x3bb   :  { %13412 = vmatpush3.bf16.msra.mxu0 %v14563_v42  ;;  %13385 = vmatprep.subr.bf16.mxu1 %v14564_v40  ;;  %v14579_v42 = vld [vmem:[#allocation7 + $0x398] ss:$12 sps:$4 sm:$0xff]   ;;  %v14580_v40 = vld [vmem:[#allocation7 + $0xbf0] ss:$12 sps:$4 sm:$0xff]  }
 0x3bc   :  { %13413 = vmatprep.subr.bf16.mxu0 %v14565_v13 }
 0x3be   :  { %13386 = vmatpush3.bf16.msra.mxu1 %v14566_v63  ;;  %v14581_v63 = vld [vmem:[#allocation7 + $0x470] ss:$12 sps:$4 sm:$0xff]  }
 0x3bf   :  { %13414 = vmatpush3.bf16.msra.mxu0 %v14567_v62  ;;  %13387 = vmatprep.subr.bf16.mxu1 %v14568_v2  ;;  %v14582_v2 = vld [vmem:[#allocation7 + $0xb30] ss:$12 sps:$4 sm:$0xff]  }
 0x3c0   :  { %13415 = vmatprep.subr.bf16.mxu0 %v14569_v5  ;;  %v13283_v36 = vpop.f32.mrb[40].mxu1 }
 0x3c1   :  { %v13284_v20 = vpop.f32.mrb[41].mxu1 }
 0x3c2   :  { %13388 = vmatpush3.bf16.msra.mxu1 %v14570_v48  ;;  %v13285_v23 = vadd.f32 %v13284_v20, %v13283_v36  ;;  %v13286_v39 = vpop.f32.mrb[42].mxu1  ;;  %v14586_v48 = vld [vmem:[#allocation7 + $0x304] ss:$12 sps:$4 sm:$0xff]   ;;  %v14588_v20 = vld [vmem:[#allocation7 + $0x488] ss:$12 sps:$4 sm:$0xff]  }
 0x3c3   :  { %13416 = vmatpush3.bf16.msra.mxu0 %v14571_v33  ;;  %13389 = vmatprep.subr.bf16.mxu1 %v14572_v54  ;;  %v13287_v14 = vpop.f32.mrb[43].mxu1 }
 0x3c4   :  { %13417 = vmatprep.subr.bf16.mxu0 %v14573_v10  ;;  %v17300_v44 = vadd.f32 %v13285_v23, %v17285_v37  ;;  %v13288_v31 = vadd.f32 %v13287_v14, %v13286_v39  ;;  %v14583_v37 = vld [vmem:[#allocation7 + $0x3b0] ss:$12 sps:$4 sm:$0xff]   ;;  %v14587_v10 = vld [vmem:[#allocation7 + $0x548] ss:$12 sps:$4 sm:$0xff]   ;;  %v14589_v23 = vld [vmem:[#allocation7 + $0x318] ss:$12 sps:$4 sm:$0xff]  }
 0x3c5   :  { %v14596_v39 = vld [vmem:[#allocation7 + $0x334] ss:$12 sps:$4 sm:$0xff]   ;;  %v14594_v14 = vld [vmem:[#allocation7 + $0x330] ss:$12 sps:$4 sm:$0xff]  }
 0x3c6   :  { %13390 = vmatpush3.bf16.msra.mxu1 %v14574_v34  ;;  %v17303_v13 = vadd.f32 %v13288_v31, %v17287_v21  ;;  %v14584_v21 = vld [vmem:[#allocation7 + $0x300] ss:$12 sps:$4 sm:$0xff]  }
 0x3c7   :  { %13418 = vmatpush3.bf16.msra.mxu0 %v14575_v26  ;;  %13391 = vmatprep.subr.bf16.mxu1 %v14576_v35  ;;  %v14591_v26 = vld [vmem:[#allocation7 + $0x31c] ss:$12 sps:$4 sm:$0xff]   ;;  %v14592_v35 = vld [vmem:[#allocation7 + $0x560] ss:$12 sps:$4 sm:$0xff]  }
 0x3c8   :  { %13419 = vmatprep.subr.bf16.mxu0 %v14577_v19  ;;  %v13289_v62 = vpop.f32.mrb[44].mxu1  ;;  %v14597_v19 = vld [vmem:[#allocation7 + $0x578] ss:$12 sps:$4 sm:$0xff]  }
 0x3c9   :  { %v13290_v5 = vpop.f32.mrb[45].mxu1  ;;  %v14601_v31 = vld [vmem:[#allocation7 + $0x34c] ss:$12 sps:$4 sm:$0xff]  }
 0x3ca   :  { %13392 = vmatpush3.bf16.msra.mxu1 %v14578_v22  ;;  %v13291_v33 = vadd.f32 %v13290_v5, %v13289_v62  ;;  %v13292_v54 = vpop.f32.mrb[46].mxu1  ;;  %v14599_v22 = vld [vmem:[#allocation7 + $0x348] ss:$12 sps:$4 sm:$0xff]   ;;  %v14604_v62 = vld [vmem:[#allocation7 + $0x360] ss:$12 sps:$4 sm:$0xff]  }
 0x3cb   :  { %13420 = vmatpush3.bf16.msra.mxu0 %v14579_v42  ;;  %13393 = vmatprep.subr.bf16.mxu1 %v14580_v40  ;;  %v13293_v36 = vpop.f32.mrb[47].mxu1  ;;  %v14603_v42 = vld [vmem:[#allocation7 + $0x4d0] ss:$12 sps:$4 sm:$0xff]   ;;  %v14612_v5 = vld [vmem:[#allocation7 + $0x5c0] ss:$12 sps:$4 sm:$0xff]  }
 0x3cc   :  { %13421 = vmatprep.subr.bf16.mxu0 %v14581_v63  ;;  %v17306_v34 = vadd.f32 %v13291_v33, %v17289_v59  ;;  %v14593_v59 = vld [vmem:[#allocation7 + $0x4a0] ss:$12 sps:$4 sm:$0xff]   ;;  %v14606_v40 = vld [vmem:[#allocation7 + $0x364] ss:$12 sps:$4 sm:$0xff]   ;;  %v14607_v63 = vld [vmem:[#allocation7 + $0x5a8] ss:$12 sps:$4 sm:$0xff]  }
 0x3cd   :  { %v14613_v33 = vld [vmem:[#allocation7 + $0x500] ss:$12 sps:$4 sm:$0xff]  }
 0x3ce   :  { %13394 = vmatpush3.bf16.msra.mxu1 %v14582_v2  ;;  %v14611_v2 = vld [vmem:[#allocation7 + $0x37c] ss:$12 sps:$4 sm:$0xff]   ;;  %v14616_v54 = vld [vmem:[#allocation7 + $0x394] ss:$12 sps:$4 sm:$0xff]  }
 0x3cf   :  { %13422 = vmatpush3.bf16.msra.mxu0 %v14583_v37  ;;  %7293 = vmatprep.subr.bf16.mxu1 %v14586_v48  ;;  %v14609_v37 = vld [vmem:[#allocation7 + $0x378] ss:$12 sps:$4 sm:$0xff]  }
 0x3d0   :  { %13435 = vmatprep.subr.bf16.mxu0 %v14587_v10  ;;  %v18679_v10 = vld [vmem:[#allocation59_spill] sm:$0xff] }
 0x3d1   :  { %6766 = vmatmul.mubr.bf16.vlgmr.msra.gmra.mrb[72].mxu1 %v16911_v1  ;;  %v14598_v1 = vld [vmem:[#allocation7 + $0x4b8] ss:$12 sps:$4 sm:$0xff]   ;;  %v7700_v36 = vrot.slane %v18679_v10, 7 }
 0x3d2   :  { %7428 = vmatmul.mubr.bf16.vlgmr.msra.gmra.mrb[48].mxu0 %v17041_v57  ;;  %6773 = vmatprep.mubr.bf16.mxu1 %v16947_v49  ;;  %v14602_v49 = vld [vmem:[#allocation7 + $0x590] ss:$12 sps:$4 sm:$0xff]  }
 0x3d3   :  { %7294 = vmatpush1.bf16.msra.mxu1 %v14584_v21  ;;  %7435 = vmatprep.mubr.bf16.mxu0 %v17158_v7  ;;  %v14629_v10 = vld [vmem:[#allocation7 + $0xc04] ss:$12 sps:$4 sm:$0xff]  }
 0x3d4   :  { %13436 = vmatpush3.bf16.msra.mxu0 %v14588_v20  ;;  %7295 = vmatprep.subr.bf16.mxu1 %v14591_v26  ;;  %v14617_v26 = vld [vmem:[#allocation7 + $0x5d8] ss:$12 sps:$4 sm:$0xff]  }
 0x3d5   :  { %13437 = vmatprep.subr.bf16.mxu0 %v14592_v35 }
 0x3d7   :  { %7296 = vmatpush1.bf16.msra.mxu1 %v14589_v23 }
 0x3d8   :  { %13438 = vmatpush3.bf16.msra.mxu0 %v14593_v59  ;;  %7297 = vmatprep.subr.bf16.mxu1 %v14596_v39  ;;  %v14614_v39 = vld [vmem:[#allocation7 + $0x390] ss:$12 sps:$4 sm:$0xff]  }
 0x3d9   :  { %6774 = vmatmul.mubr.bf16.gmra.mrb[76].mxu1 %v16983_v60  ;;  %13439 = vmatprep.subr.bf16.mxu0 %v14597_v19  ;;  %v14608_v60 = vld [vmem:[#allocation7 + $0x4e8] ss:$12 sps:$4 sm:$0xff]   ;;  %v14618_v19 = vld [vmem:[#allocation7 + $0x518] ss:$12 sps:$4 sm:$0xff]  }
 0x3da   :  { %7436 = vmatmul.mubr.bf16.gmra.mrb[52].mxu0 %v17176_v24  ;;  %7325 = vmatprep.mubr.bf16.mxu1 %v17007_v61 }
 0x3db   :  { %7298 = vmatpush1.bf16.msra.mxu1 %v14594_v14  ;;  %7475 = vmatprep.mubr.bf16.mxu0 %v17125_v4  ;;  %v14621_v14 = vld [vmem:[#allocation7 + $0x3ac] ss:$12 sps:$4 sm:$0xff]  }
 0x3dc   :  { %13440 = vmatpush3.bf16.msra.mxu0 %v14598_v1  ;;  %7299 = vmatprep.subr.bf16.mxu1 %v14601_v31  ;;  %v18680_v1 = vld [vmem:[#allocation65_spill] sm:$0xff] }
 0x3dd   :  { %13441 = vmatprep.subr.bf16.mxu0 %v14602_v49  ;;  %v7702_v31 = vrot.slane %v18680_v1, 6 }
 0x3df   :  { %7300 = vmatpush1.bf16.msra.mxu1 %v14599_v22  ;;  %v14622_v22 = vld [vmem:[#allocation7 + $0x5f0] ss:$12 sps:$4 sm:$0xff]  }
 0x3e0   :  { %13442 = vmatpush3.bf16.msra.mxu0 %v14603_v42  ;;  %7301 = vmatprep.subr.bf16.mxu1 %v14606_v40  ;;  %v18681_v42 = vld [vmem:[#allocation56_spill] sm:$0xff] }
 0x3e1   :  { %13443 = vmatprep.subr.bf16.mxu0 %v14607_v63  ;;  %v7701_v40 = vsel %vm4132_vm6, %v7700_v36, %v18681_v42  ;;  %v18682_v63 = vld [vmem:[#allocation40_spill] sm:$0xff] }
 0x3e3   :  { %7302 = vmatpush1.bf16.msra.mxu1 %v14604_v62  ;;  %v13311_v61 = vpop.f32.mrb[48].mxu1 }
 0x3e4   :  { %13444 = vmatpush3.bf16.msra.mxu0 %v14608_v60  ;;  %v13312_v48 = vpop.f32.mrb[49].mxu1  ;;  %7303 = vmatprep.subr.bf16.mxu1 %v14611_v2  ;;  %v14619_v60 = vld [vmem:[#allocation7 + $0x3a8] ss:$12 sps:$4 sm:$0xff]  }
 0x3e5   :  { %v13313_v21 = vadd.f32 %v13312_v48, %v13311_v61  ;;  %13445 = vmatprep.subr.bf16.mxu0 %v14612_v5  ;;  %v13314_v20 = vpop.f32.mrb[50].mxu1  ;;  %v18683_v2 = vld [vmem:[#allocation69_spill] sm:$0xff] }
 0x3e6   :  { %v13315_v35 = vpop.f32.mrb[51].mxu1  ;;  %v7704_v5 = vrot.slane %v18683_v2, 5  ;;  %v14626_v48 = vld [vmem:[#allocation7 + $0x3c4] ss:$12 sps:$4 sm:$0xff]  }
 0x3e7   :  { %v17318_v23 = vadd.f32 %v13313_v21, %v17300_v44  ;;  %7304 = vmatpush1.bf16.msra.mxu1 %v14609_v37  ;;  %v13316_v59 = vadd.f32 %v13315_v35, %v13314_v20  ;;  %v7762_v44 = vrot.slane %v18682_v63, 4  ;;  %v14623_v37 = vld [vmem:[#allocation7 + $0x530] ss:$12 sps:$4 sm:$0xff]   ;;  %v18684_v21 = vld [vmem:[#allocation44_spill] sm:$0xff] }
 0x3e8   :  { %13446 = vmatpush3.bf16.msra.mxu0 %v14613_v33  ;;  %7305 = vmatprep.subr.bf16.mxu1 %v14616_v54  ;;  %v7764_v36 = vrot.slane %v18684_v21, 3 }
 0x3e9   :  { %v17322_v49 = vadd.f32 %v13316_v59, %v17303_v13  ;;  %13447 = vmatprep.subr.bf16.mxu0 %v14617_v26  ;;  %v7703_v13 = vsel %vm4135_vm7, %v7702_v31, %v7701_v40  ;;  %v7763_v26 = vsel %vm4141_vm9, %v7762_v44, %v17174_v16  ;;  %v14624_v59 = vld [vmem:[#allocation7 + $0x3c0] ss:$12 sps:$4 sm:$0xff]   ;;  %v14632_v31 = vld [vmem:[#allocation7 + $0x3dc] ss:$12 sps:$4 sm:$0xff]  }
 0x3ea   :  { %v7765_v42 = vsel %vm4144_vm10, %v7764_v36, %v7763_v26  ;;  %v18686_v16 = vld [vmem:[#allocation29_spill] sm:$0xff] }
 0x3eb   :  { %7306 = vmatpush1.bf16.msra.mxu1 %v14614_v39  ;;  %v7705_v39 = vsel %vm4138_vm8, %v7704_v5, %v7703_v13  ;;  %v7710_v63 = vrot.slane %v18686_v16, 2  ;;  %v14633_v5 = vld [vmem:[#allocation7 + $0xc18] ss:$12 sps:$4 sm:$0xff]   ;;  %v14648_v16 = vld [vmem:[#allocation7 + $0x420] ss:$12 sps:$4 sm:$0xff]  }
 0x3ec   :  { %v13317_v62 = vpop.f32.mrb[52].mxu1  ;;  %13448 = vmatpush3.bf16.msra.mxu0 %v14618_v19  ;;  %7307 = vmatprep.subr.bf16.mxu1 %v14621_v14  ;;  %v14627_v19 = vld [vmem:[#allocation7 + $0xc00] ss:$12 sps:$4 sm:$0xff]  }
 0x3ed   :  { %v13318_v61 = vpop.f32.mrb[53].mxu1  ;;  %13449 = vmatprep.subr.bf16.mxu0 %v14622_v22  ;;  %v18685_v14 = vld [vmem:[#allocation73_spill] sm:$0xff] }
 0x3ee   :  { %v13319_v33 = vadd.f32 %v13318_v61, %v13317_v62  ;;  %v13320_v54 = vpop.f32.mrb[54].mxu1  ;;  %v7706_v1 = vrot.slane %v18685_v14, 4  ;;  %v14635_v22 = vld [vmem:[#allocation7 + $0xc1c] ss:$12 sps:$4 sm:$0xff]   ;;  %v14630_v62 = vld [vmem:[#allocation7 + $0x3d8] ss:$12 sps:$4 sm:$0xff]  }
 0x3ef   :  { %v13321_v20 = vpop.f32.mrb[55].mxu1  ;;  %7308 = vmatpush1.bf16.msra.mxu1 %v14619_v60  ;;  %v18688_v60 = vld [vmem:[#allocation43_spill] sm:$0xff] }
 0x3f0   :  { %v17333_v35 = vadd.f32 %v13319_v33, %v17306_v34  ;;  %13450 = vmatpush3.bf16.msra.mxu0 %v14623_v37  ;;  %7309 = vmatprep.subr.bf16.mxu1 %v14626_v48  ;;  %v7707_v40 = vsel %vm4141_vm9, %v7706_v1, %v7705_v39  ;;  %v18687_v34 = vld [vmem:[#allocation30_spill] sm:$0xff]  ;;  %v7708_v2 = vrot.slane %v18688_v60, 3 }
 0x3f1   :  { %8382 = vmatprep.subr.bf16.mxu0 %v14629_v10  ;;  %v7766_v44 = vrot.slane %v18687_v34, 2  ;;  %v14638_v61 = vld [vmem:[#allocation7 + $0x3f4] ss:$12 sps:$4 sm:$0xff]   ;;  %v18690_v10 = vld [vmem:[#allocation105_spill] sm:$0xff] }
 0x3f2   :  { %v14641_v48 = vld [vmem:[#allocation7 + $0xc34] ss:$12 sps:$4 sm:$0xff]   ;;  %v7709_v13 = vsel %vm4144_vm10, %v7708_v2, %v7707_v40  ;;  %v7768_v21 = vrot.slane %v18690_v10, 1  ;;  %v14636_v20 = vld [vmem:[#allocation7 + $0x3f0] ss:$12 sps:$4 sm:$0xff]  }
 0x3f3   :  { %7476 = vmatmul.mubr.bf16.vlgmr.msra.gmra.mrb[56].mxu0 %v17145_v15  ;;  %7310 = vmatpush1.bf16.msra.mxu1 %v14624_v59  ;;  %v7767_v37 = vsel %vm4147_vm11, %v7766_v44, %v7765_v42  ;;  %v18689_v33 = vld [vmem:[#allocation90_spill] sm:$0xff]  ;;  %v7711_v36 = vsel %vm4147_vm11, %v7710_v63, %v7709_v13  ;;  %v14651_v63 = vld [vmem:[#allocation7 + $0xc60] ss:$12 sps:$4 sm:$0xff]   ;;  %v14656_v34 = vld [vmem:[#allocation7 + $0x43c] ss:$12 sps:$4 sm:$0xff]  }
 0x3f4   :  { %7483 = vmatprep.mubr.bf16.mxu0 %v17249_v56  ;;  %8383 = vmatpush1.bf16.msra.mxu0 %v14627_v19  ;;  %v7712_v54 = vrot.slane %v18689_v33, 1  ;;  %v7769_v26 = vsel %vm4150_vm12, %v7768_v21, %v7767_v37  ;;  %v14639_v59 = vld [vmem:[#allocation7 + $0xc30] ss:$12 sps:$4 sm:$0xff]   ;;  %v14644_v19 = vld [vmem:[#allocation7 + $0x40c] ss:$12 sps:$4 sm:$0xff]  }
 0x3f5   :  { %7311 = vmatprep.subr.bf16.mxu1 %v14632_v31  ;;  %8384 = vmatprep.subr.bf16.mxu0 %v14635_v22  ;;  %v14647_v14 = vld [vmem:[#allocation7 + $0xc4c] ss:$12 sps:$4 sm:$0xff]   ;;  %v14642_v31 = vld [vmem:[#allocation7 + $0x408] ss:$12 sps:$4 sm:$0xff]   ;;  %v14650_v42 = vld [vmem:[#allocation7 + $0x424] ss:$12 sps:$4 sm:$0xff]  }
 0x3f6   :  { %v7713_v39 = vsel %vm4150_vm12, %v7712_v54, %v7711_v36  ;;  %v14645_v22 = vld [vmem:[#allocation7 + $0xc48] ss:$12 sps:$4 sm:$0xff]   ;;  %v14653_v40 = vld [vmem:[#allocation7 + $0xc64] ss:$12 sps:$4 sm:$0xff]  }
 0x3f7   :  { %7312 = vmatpush1.bf16.msra.mxu1 %v14630_v62  ;;  %v17351_v1 = vpack.c.b16 %v7769_v26, %v7713_v39  ;;  %v14659_v44 = vld [vmem:[#allocation7 + $0xc7c] ss:$12 sps:$4 sm:$0xff]   ;;  %v14654_v62 = vld [vmem:[#allocation7 + $0x438] ss:$12 sps:$4 sm:$0xff]   ;;  %v14665_v37 = vld [vmem:[#allocation7 + $0xc94] ss:$12 sps:$4 sm:$0xff]  }
 0x3f8   :  { %8385 = vmatpush1.bf16.msra.mxu0 %v14633_v5  ;;  %7313 = vmatprep.subr.bf16.mxu1 %v14638_v61  ;;  %v14657_v2 = vld [vmem:[#allocation7 + $0xc78] ss:$12 sps:$4 sm:$0xff]   ;;  %v14662_v5 = vld [vmem:[#allocation7 + $0x454] ss:$12 sps:$4 sm:$0xff]   ;;  %v14660_v54 = vld [vmem:[#allocation7 + $0x450] ss:$12 sps:$4 sm:$0xff]  }
 0x3f9   :  { %8386 = vmatprep.subr.bf16.mxu0 %v14641_v48  ;;  %v14663_v36 = vld [vmem:[#allocation7 + $0xc90] ss:$12 sps:$4 sm:$0xff]   ;;  %v14671_v26 = vld [vmem:[#allocation7 + $0xcac] ss:$12 sps:$4 sm:$0xff]   ;;  %v14666_v39 = vld [vmem:[#allocation7 + $0x468] ss:$12 sps:$4 sm:$0xff]  }
 0x3fb   :  { %7484 = vmatmul.mubr.bf16.gmra.mrb[60].mxu0 %v17269_v17  ;;  %7314 = vmatpush1.bf16.msra.mxu1 %v14636_v20  ;;  %v14668_v20 = vld [vmem:[#allocation7 + $0x46c] ss:$12 sps:$4 sm:$0xff]  }
 0x3fc   :  { %8387 = vmatpush1.bf16.msra.mxu0 %v14639_v59  ;;  %8414 = vmatprep.mubr.bf16.mxu0 %v17351_v1 }
 0x3fd   :  { %7315 = vmatprep.subr.bf16.mxu1 %v14644_v19  ;;  %8388 = vmatprep.subr.bf16.mxu0 %v14647_v14  ;;  %v14669_v14 = vld [vmem:[#allocation7 + $0xca8] ss:$12 sps:$4 sm:$0xff]  }
 0x3ff   :  { %7316 = vmatpush1.bf16.msra.mxu1 %v14642_v31  ;;  %v14674_v31 = vld [vmem:[#allocation7 + $0x484] ss:$12 sps:$4 sm:$0xff]  }
 0x400   :  { %8389 = vmatpush1.bf16.msra.mxu0 %v14645_v22  ;;  %7317 = vmatprep.subr.bf16.mxu1 %v14650_v42 }
 0x401   :  { %8390 = vmatprep.subr.bf16.mxu0 %v14653_v40 }
 0x403   :  { %7318 = vmatpush1.bf16.msra.mxu1 %v14648_v16 }
 0x404   :  { %8391 = vmatpush1.bf16.msra.mxu0 %v14651_v63  ;;  %v13339_v60 = vpop.f32.mrb[56].mxu1  ;;  %7319 = vmatprep.subr.bf16.mxu1 %v14656_v34  ;;  %v14672_v63 = vld [vmem:[#allocation7 + $0x480] ss:$12 sps:$4 sm:$0xff]  }
 0x405   :  { %v13340_v61 = vpop.f32.mrb[57].mxu1  ;;  %8392 = vmatprep.subr.bf16.mxu0 %v14659_v44  ;;  %v14680_v44 = vld [vmem:[#allocation7 + $0x49c] ss:$12 sps:$4 sm:$0xff]  }
 0x406   :  { %v13341_v48 = vadd.f32 %v13340_v61, %v13339_v60  ;;  %v13342_v13 = vpop.f32.mrb[58].mxu1  ;;  %v14678_v60 = vld [vmem:[#allocation7 + $0x498] ss:$12 sps:$4 sm:$0xff]   ;;  %v14689_v61 = vld [vmem:[#allocation7 + $0xcf4] ss:$12 sps:$4 sm:$0xff]  }
 0x407   :  { %7320 = vmatpush1.bf16.msra.mxu1 %v14654_v62  ;;  %v13343_v33 = vpop.f32.mrb[59].mxu1  ;;  %v14683_v62 = vld [vmem:[#allocation7 + $0xcdc] ss:$12 sps:$4 sm:$0xff]  }
 0x408   :  { %v17356_v10 = vadd.f32 %v13341_v48, %v17318_v23  ;;  %8393 = vmatpush1.bf16.msra.mxu0 %v14657_v2  ;;  %v13344_v21 = vadd.f32 %v13343_v33, %v13342_v13  ;;  %7321 = vmatprep.subr.bf16.mxu1 %v14662_v5  ;;  %v14677_v23 = vld [vmem:[#allocation7 + $0xcc4] ss:$12 sps:$4 sm:$0xff]   ;;  %v14686_v5 = vld [vmem:[#allocation7 + $0x4b4] ss:$12 sps:$4 sm:$0xff]   ;;  %v14692_v33 = vld [vmem:[#allocation7 + $0x4cc] ss:$12 sps:$4 sm:$0xff]  }
 0x409   :  { %8394 = vmatprep.subr.bf16.mxu0 %v14665_v37  ;;  %v14681_v2 = vld [vmem:[#allocation7 + $0xcd8] ss:$12 sps:$4 sm:$0xff]   ;;  %v14687_v13 = vld [vmem:[#allocation7 + $0xcf0] ss:$12 sps:$4 sm:$0xff]  }
 0x40a   :  { %v17359_v59 = vadd.f32 %v13344_v21, %v17322_v49  ;;  %v14675_v49 = vld [vmem:[#allocation7 + $0xcc0] ss:$12 sps:$4 sm:$0xff]   ;;  %v14690_v21 = vld [vmem:[#allocation7 + $0x4c8] ss:$12 sps:$4 sm:$0xff]  }
 0x40b   :  { %7322 = vmatpush1.bf16.msra.mxu1 %v14660_v54  ;;  %v18691_v37 = vld [vmem:[#allocation120_spill] sm:$0xff] }
 0x40c   :  { %8395 = vmatpush1.bf16.msra.mxu0 %v14663_v36  ;;  %v13345_v19 = vpop.f32.mrb[60].mxu1  ;;  %7323 = vmatprep.subr.bf16.mxu1 %v14668_v20  ;;  %v12343_v48 = vrot.slane %v18691_v37, 9  ;;  %v18693_v36 = vld [vmem:[#allocation45_spill] sm:$0xff] }
 0x40d   :  { %v13346_v22 = vpop.f32.mrb[61].mxu1  ;;  %8396 = vmatprep.subr.bf16.mxu0 %v14671_v26  ;;  %v7508_v20 = vrot.slane %v18610_v52, %v18693_v36  ;;  %v14699_v52 = vld [vmem:[#allocation7 + $0xd20] ss:$12 sps:$4 sm:$0xff]  }
 0x40e   :  { %v13347_v42 = vadd.f32 %v13346_v22, %v13345_v19  ;;  %v13348_v40 = vpop.f32.mrb[62].mxu1  ;;  %v17373_v26 = vmax.f32 %v18691_v37, %v12343_v48  ;;  %v14698_v19 = vld [vmem:[#allocation7 + $0x4e4] ss:$12 sps:$4 sm:$0xff]   ;;  %v14696_v22 = vld [vmem:[#allocation7 + $0x4e0] ss:$12 sps:$4 sm:$0xff]  }
 0x40f   :  { %7324 = vmatpush1.bf16.msra.mxu1 %v14666_v39  ;;  %v13349_v16 = vpop.f32.mrb[63].mxu1  ;;  %v14693_v39 = vld [vmem:[#allocation7 + $0xd08] ss:$12 sps:$4 sm:$0xff]  }
 0x410   :  { %v17362_v34 = vadd.f32 %v13347_v42, %v17333_v35  ;;  %8397 = vmatpush1.bf16.msra.mxu0 %v14669_v14  ;;  %7344 = vmatprep.subr.bf16.mxu1 %v14674_v31  ;;  %v14684_v35 = vld [vmem:[#allocation7 + $0x4b0] ss:$12 sps:$4 sm:$0xff]   ;;  %v7536_v42 = vpack.c.bf16 %v7508_v20, %v7508_v20  ;;  %v18696_v16 = vld [vmem:[#allocation32_spill] sm:$0xff]  ;;  %v7800_v20 = vrot.slane %v18648_v45, 6  ;;  %v14716_v45 = vld [vmem:[#allocation7 + $0x52c] ss:$12 sps:$4 sm:$0xff]  }
 0x411   :  { %8398 = vmatprep.subr.bf16.mxu0 %v14677_v23  ;;  %v14701_v14 = vld [vmem:[#allocation7 + $0xd24] ss:$12 sps:$4 sm:$0xff]   ;;  %v14704_v40 = vld [vmem:[#allocation7 + $0x4fc] ss:$12 sps:$4 sm:$0xff]  }
 0x412   :  { %7326 = vmatmul.mubr.bf16.vlgmr.msra.gmra.mrb[64].mxu1 %v17041_v57  ;;  %v14695_v57 = vld [vmem:[#allocation7 + $0xd0c] ss:$12 sps:$4 sm:$0xff]   ;;  %v7681_v48 = vunpack.c.l.b16 %v7536_v42 }
 0x413   :  { %7335 = vmatprep.mubr.bf16.mxu1 %v17158_v7  ;;  %7345 = vmatpush1.bf16.msra.mxu1 %v14672_v63  ;;  %v18692_v7 = vld [vmem:[#allocation111_spill] sm:$0xff]  ;;  %v18694_v31 = vld [vmem:[#allocation114_spill] sm:$0xff]  ;;  %v18695_v23 = vld [vmem:[#allocation109_spill] sm:$0xff]  ;;  %v7516_v63 = vrot.slane %v17373_v26, %v18696_v16 }
 0x414   :  { %8399 = vmatpush1.bf16.msra.mxu0 %v14675_v49  ;;  %7346 = vmatprep.subr.bf16.mxu1 %v14680_v44  ;;  %v7812_v54 = vrot.slane %v18692_v7, 7  ;;  %v14707_v49 = vld [vmem:[#allocation7 + $0xd3c] ss:$12 sps:$4 sm:$0xff]   ;;  %v7798_v44 = vrot.slane %v18624_v43, 7  ;;  %v14713_v43 = vld [vmem:[#allocation7 + $0xd54] ss:$12 sps:$4 sm:$0xff]  }
 0x415   :  { %8400 = vmatprep.subr.bf16.mxu0 %v14683_v62  ;;  %v18699_v7 = vld [vmem:[#allocation60_spill] sm:$0xff] }
 0x417   :  { %7347 = vmatpush1.bf16.msra.mxu1 %v14678_v60  ;;  %v7818_v60 = vrot.slane %v18622_v27, 4  ;;  %v7820_v27 = vrot.slane %v18623_v12, 3  ;;  %v14711_v12 = vld [vmem:[#allocation7 + $0xd50] ss:$12 sps:$4 sm:$0xff]  }
 0x418   :  { %8401 = vmatpush1.bf16.msra.mxu0 %v14681_v2  ;;  %7348 = vmatprep.subr.bf16.mxu1 %v14686_v5  ;;  %v18697_v2 = vld [vmem:[#allocation94_spill] sm:$0xff] }
 0x419   :  { %8402 = vmatprep.subr.bf16.mxu0 %v14689_v61  ;;  %v7784_v5 = vrot.slane %v18697_v2, 7  ;;  %v14702_v61 = vld [vmem:[#allocation7 + $0x4f8] ss:$12 sps:$4 sm:$0xff]   ;;  %v7804_v2 = vrot.slane %v18651_v53, 4 }
 0x41a   :  { %7336 = vmatmul.mubr.bf16.gmra.mrb[68].mxu1 %v17176_v24  ;;  %v7814_v24 = vrot.slane %v18694_v31, 6  ;;  %v18701_v31 = vld [vmem:[#allocation108_spill] sm:$0xff] }
 0x41b   :  { %7349 = vmatpush1.bf16.msra.mxu1 %v14684_v35  ;;  %7376 = vmatprep.mubr.bf16.mxu1 %v17125_v4  ;;  %v7813_v4 = vsel %vm4132_vm6, %v7812_v54, %v18695_v23  ;;  %v18698_v35 = vld [vmem:[#allocation117_spill] sm:$0xff]  ;;  %v7728_v54 = vrot.slane %v18699_v7, 7  ;;  %v7512_v23 = vrot.slane %v17373_v26, %v18647_v8 }
 0x41c   :  { %8403 = vmatpush1.bf16.msra.mxu0 %v14687_v13  ;;  %7350 = vmatprep.subr.bf16.mxu1 %v14692_v33  ;;  %v7815_v62 = vsel %vm4135_vm7, %v7814_v24, %v7813_v4  ;;  %v7816_v37 = vrot.slane %v18698_v35, 5  ;;  %v14705_v13 = vld [vmem:[#allocation7 + $0xd38] ss:$12 sps:$4 sm:$0xff]   ;;  %v14710_v33 = vld [vmem:[#allocation7 + $0x514] ss:$12 sps:$4 sm:$0xff]   ;;  %v7799_v24 = vsel %vm4132_vm6, %v7798_v44, %v18701_v31 }
 0x41d   :  { %8404 = vmatprep.subr.bf16.mxu0 %v14695_v57  ;;  %v7538_v57 = vpack.c.bf16 %v7516_v63, %v7516_v63  ;;  %v18702_v4 = vld [vmem:[#allocation86_spill] sm:$0xff]  ;;  %v18703_v63 = vld [vmem:[#allocation67_spill] sm:$0xff] }
 0x41e   :  { %v7785_v42 = vsel %vm4132_vm6, %v7784_v5, %v18702_v4  ;;  %v18705_v5 = vld [vmem:[#allocation98_spill] sm:$0xff] }
 0x41f   :  { %7351 = vmatpush1.bf16.msra.mxu1 %v14690_v21  ;;  %v7817_v21 = vsel %vm4138_vm8, %v7816_v37, %v7815_v62  ;;  %v14719_v62 = vld [vmem:[#allocation7 + $0xd6c] ss:$12 sps:$4 sm:$0xff]   ;;  %v7822_v37 = vrot.slane %v18705_v5, 2  ;;  %v14714_v7 = vld [vmem:[#allocation7 + $0x528] ss:$12 sps:$4 sm:$0xff]  }
 0x420   :  { %8405 = vmatpush1.bf16.msra.mxu0 %v14693_v39  ;;  %7352 = vmatprep.subr.bf16.mxu1 %v14698_v19  ;;  %v18700_v39 = vld [vmem:[#allocation39_spill] sm:$0xff]  ;;  %v14722_v53 = vld [vmem:[#allocation7 + $0x544] ss:$12 sps:$4 sm:$0xff]  }
 0x421   :  { %8406 = vmatprep.subr.bf16.mxu0 %v14701_v14  ;;  %v7786_v19 = vrot.slane %v18700_v39, 6  ;;  %v7819_v14 = vsel %vm4141_vm9, %v7818_v60, %v7817_v21  ;;  %v7801_v60 = vsel %vm4135_vm7, %v7800_v20, %v7799_v24  ;;  %v18707_v21 = vld [vmem:[#allocation71_spill] sm:$0xff]  ;;  %v14717_v20 = vld [vmem:[#allocation7 + $0xd68] ss:$12 sps:$4 sm:$0xff]  }
 0x422   :  { %v7821_v44 = vsel %vm4144_vm10, %v7820_v27, %v7819_v14  ;;  %v7732_v27 = vrot.slane %v18707_v21, 5  ;;  %v7806_v14 = vrot.slane %v18654_v47, 3  ;;  %v14723_v47 = vld [vmem:[#allocation7 + $0xd80] ss:$12 sps:$4 sm:$0xff]  }
 0x423   :  { %7353 = vmatpush1.bf16.msra.mxu1 %v14696_v22  ;;  %v14708_v22 = vld [vmem:[#allocation7 + $0x510] ss:$12 sps:$4 sm:$0xff]   ;;  %v7823_v39 = vsel %vm4147_vm11, %v7822_v37, %v7821_v44 }
 0x424   :  { %8407 = vmatpush1.bf16.msra.mxu0 %v14699_v52  ;;  %7354 = vmatprep.subr.bf16.mxu1 %v14704_v40  ;;  %v7788_v52 = vrot.slane %v7681_v48, 5  ;;  %v7683_v40 = vunpack.c.l.b16 %v7538_v57  ;;  %v7802_v48 = vrot.slane %v18652_v6, 5 }
 0x425   :  { %8408 = vmatprep.subr.bf16.mxu0 %v14707_v49  ;;  %v7730_v49 = vrot.slane %v18703_v63, 6 }
 0x426   :  { %v7824_v31 = vrot.slane %v7683_v40, 1 }
 0x427   :  { %7355 = vmatpush1.bf16.msra.mxu1 %v14702_v61  ;;  %v18704_v61 = vld [vmem:[#allocation57_spill] sm:$0xff] }
 0x428   :  { %8409 = vmatpush1.bf16.msra.mxu0 %v14705_v13  ;;  %7356 = vmatprep.subr.bf16.mxu1 %v14710_v33  ;;  %v7729_v35 = vsel %vm4132_vm6, %v7728_v54, %v18704_v61  ;;  %v7787_v13 = vsel %vm4135_vm7, %v7786_v19, %v7785_v42  ;;  %v18706_v33 = vld [vmem:[#allocation41_spill] sm:$0xff]  ;;  %v7803_v54 = vsel %vm4138_vm8, %v7802_v48, %v7801_v60 }
 0x429   :  { %8410 = vmatprep.subr.bf16.mxu0 %v14713_v43  ;;  %v7790_v57 = vrot.slane %v18706_v33, 4  ;;  %v7537_v43 = vpack.c.bf16 %v7512_v23, %v7512_v23  ;;  %v7731_v6 = vsel %vm4135_vm7, %v7730_v49, %v7729_v35  ;;  %v14725_v19 = vld [vmem:[#allocation7 + $0xd84] ss:$12 sps:$4 sm:$0xff]   ;;  %v7805_v24 = vsel %vm4141_vm9, %v7804_v2, %v7803_v54  ;;  %v18708_v23 = vld [vmem:[#allocation23_spill] sm:$0xff] }
 0x42a   :  { %v7792_v4 = vrot.slane %v18708_v23, 3  ;;  %v7733_v63 = vsel %vm4138_vm8, %v7732_v27, %v7731_v6  ;;  %v7807_v40 = vsel %vm4144_vm10, %v7806_v14, %v7805_v24  ;;  %v14731_v60 = vld [vmem:[#allocation7 + $0xd9c] ss:$12 sps:$4 sm:$0xff]   ;;  %v7794_v33 = vrot.slane %v18659_v18, 2  ;;  %v14729_v27 = vld [vmem:[#allocation7 + $0xd98] ss:$12 sps:$4 sm:$0xff]  }
 0x42b   :  { %7357 = vmatpush1.bf16.msra.mxu1 %v14708_v22  ;;  %v7789_v22 = vsel %vm4138_vm8, %v7788_v52, %v7787_v13  ;;  %v7682_v49 = vunpack.c.l.b16 %v7537_v43  ;;  %v14728_v52 = vld [vmem:[#allocation7 + $0x55c] ss:$12 sps:$4 sm:$0xff]   ;;  %v14737_v54 = vld [vmem:[#allocation7 + $0xdb4] ss:$12 sps:$4 sm:$0xff]  }
 0x42c   :  { %8411 = vmatpush1.bf16.msra.mxu0 %v14711_v12  ;;  %7358 = vmatprep.subr.bf16.mxu1 %v14716_v45  ;;  %v7791_v42 = vsel %vm4141_vm9, %v7790_v57, %v7789_v22  ;;  %v14720_v12 = vld [vmem:[#allocation7 + $0x540] ss:$12 sps:$4 sm:$0xff]   ;;  %v7825_v45 = vsel %vm4150_vm12, %v7824_v31, %v7823_v39  ;;  %v14726_v57 = vld [vmem:[#allocation7 + $0x558] ss:$12 sps:$4 sm:$0xff]   ;;  %v14732_v22 = vld [vmem:[#allocation7 + $0x570] ss:$12 sps:$4 sm:$0xff]  }
 0x42d   :  { %8412 = vmatprep.subr.bf16.mxu0 %v14719_v62  ;;  %v18709_v62 = vld [vmem:[#allocation75_spill] sm:$0xff]  ;;  %v7793_v35 = vsel %vm4144_vm10, %v7792_v4, %v7791_v42  ;;  %v17422_v5 = vpack.c.b16 %v7825_v45, %v7825_v45  ;;  %v18711_v48 = vld [vmem:[#allocation125_spill] sm:$0xff]  ;;  %v18713_v14 = vld [vmem:[#allocation92_spill] sm:$0xff] }
 0x42e   :  { %v7734_v44 = vrot.slane %v18709_v62, 4  ;;  %v18710_v2 = vld [vmem:[#allocation123_spill] sm:$0xff]  ;;  %v7738_v13 = vrot.slane %v18711_v48, 2  ;;  %v7795_v39 = vsel %vm4147_vm11, %v7794_v33, %v7793_v35  ;;  %v7740_v6 = vrot.slane %v18713_v14, 1  ;;  %v14749_v62 = vld [vmem:[#allocation7 + $0xde4] ss:$12 sps:$4 sm:$0xff]  }
 0x42f   :  { %7359 = vmatpush1.bf16.msra.mxu1 %v14714_v7  ;;  %v7808_v61 = vrot.slane %v18710_v2, 2  ;;  %v18712_v43 = vld [vmem:[#allocation63_spill] sm:$0xff] }
 0x430   :  { %8413 = vmatpush1.bf16.msra.mxu0 %v14717_v20  ;;  %7360 = vmatprep.subr.bf16.mxu1 %v14722_v53  ;;  %v7735_v37 = vsel %vm4141_vm9, %v7734_v44, %v7733_v63  ;;  %v7736_v21 = vrot.slane %v18712_v43, 3  ;;  %v14734_v20 = vld [vmem:[#allocation7 + $0x574] ss:$12 sps:$4 sm:$0xff]   ;;  %v7810_v53 = vrot.slane %v7682_v49, 1  ;;  %v14735_v4 = vld [vmem:[#allocation7 + $0xdb0] ss:$12 sps:$4 sm:$0xff]  }
 0x431   :  { %8433 = vmatprep.subr.bf16.mxu0 %v14725_v19  ;;  %v7809_v7 = vsel %vm4147_vm11, %v7808_v61, %v7807_v40  ;;  %v7796_v19 = vrot.slane %v18572_v25, 1  ;;  %v14740_v45 = vld [vmem:[#allocation7 + $0x58c] ss:$12 sps:$4 sm:$0xff]   ;;  %v14738_v25 = vld [vmem:[#allocation7 + $0x588] ss:$12 sps:$4 sm:$0xff]  }
 0x432   :  { %v7737_v18 = vsel %vm4144_vm10, %v7736_v21, %v7735_v37  ;;  %v7811_v31 = vsel %vm4150_vm12, %v7810_v53, %v7809_v7  ;;  %v14743_v63 = vld [vmem:[#allocation7 + $0xdcc] ss:$12 sps:$4 sm:$0xff]   ;;  %v14741_v49 = vld [vmem:[#allocation7 + $0xdc8] ss:$12 sps:$4 sm:$0xff]   ;;  %v14746_v40 = vld [vmem:[#allocation7 + $0x5a4] ss:$12 sps:$4 sm:$0xff]  }
 0x433   :  { %8415 = vmatmul.mubr.bf16.vlgmr.msra.gmra.mrb[32].mxu0 %v17213_v9  ;;  %7361 = vmatpush1.bf16.msra.mxu1 %v14720_v12  ;;  %v7739_v24 = vsel %vm4147_vm11, %v7738_v13, %v7737_v18  ;;  %v7797_v23 = vsel %vm4150_vm12, %v7796_v19, %v7795_v39  ;;  %v17438_v42 = vpack.c.b16 %v7811_v31, %v7811_v31  ;;  %v14744_v44 = vld [vmem:[#allocation7 + $0x5a0] ss:$12 sps:$4 sm:$0xff]   ;;  %v14755_v2 = vld [vmem:[#allocation7 + $0xdfc] ss:$12 sps:$4 sm:$0xff]   ;;  %v14750_v61 = vld [vmem:[#allocation7 + $0x5b8] ss:$12 sps:$4 sm:$0xff]  }
 0x434   :  { %8424 = vmatprep.mubr.bf16.mxu0 %v17422_v5  ;;  %8434 = vmatpush1.bf16.msra.mxu0 %v14723_v47  ;;  %v7741_v12 = vsel %vm4150_vm12, %v7740_v6, %v7739_v24  ;;  %v14753_v35 = vld [vmem:[#allocation7 + $0xdf8] ss:$12 sps:$4 sm:$0xff]   ;;  %v14758_v37 = vld [vmem:[#allocation7 + $0x5d4] ss:$12 sps:$4 sm:$0xff]   ;;  %v14756_v13 = vld [vmem:[#allocation7 + $0x5d0] ss:$12 sps:$4 sm:$0xff]  }
 0x435   :  { %7362 = vmatprep.subr.bf16.mxu1 %v14728_v52  ;;  %8435 = vmatprep.subr.bf16.mxu0 %v14731_v60  ;;  %v17441_v47 = vpack.c.b16 %v7797_v23, %v7741_v12  ;;  %v14747_v52 = vld [vmem:[#allocation7 + $0xde0] ss:$12 sps:$4 sm:$0xff]   ;;  %v14752_v60 = vld [vmem:[#allocation7 + $0x5bc] ss:$12 sps:$4 sm:$0xff]   ;;  %v14773_v6 = vld [vmem:[#allocation7 + $0xe58] ss:$12 sps:$4 sm:$0xff]  }
 0x436   :  { %v14761_v48 = vld [vmem:[#allocation7 + $0xe14] ss:$12 sps:$4 sm:$0xff]   ;;  %v14759_v33 = vld [vmem:[#allocation7 + $0xe10] ss:$12 sps:$4 sm:$0xff]   ;;  %v14767_v7 = vld [vmem:[#allocation7 + $0xe2c] ss:$12 sps:$4 sm:$0xff]  }
 0x437   :  { %7363 = vmatpush1.bf16.msra.mxu1 %v14726_v57  ;;  %v14764_v57 = vld [vmem:[#allocation7 + $0x5ec] ss:$12 sps:$4 sm:$0xff]   ;;  %v14762_v43 = vld [vmem:[#allocation7 + $0x5e8] ss:$12 sps:$4 sm:$0xff]   ;;  %v14786_v23 = vld [vmem:[#allocation7 + $0xd10] ss:$12 sps:$4 sm:$0xff]  }
 0x438   :  { %8436 = vmatpush1.bf16.msra.mxu0 %v14729_v27  ;;  %7364 = vmatprep.subr.bf16.mxu1 %v14734_v20  ;;  %v14765_v21 = vld [vmem:[#allocation7 + $0xe28] ss:$12 sps:$4 sm:$0xff]   ;;  %v14770_v20 = vld [vmem:[#allocation7 + $0xe44] ss:$12 sps:$4 sm:$0xff]   ;;  %v14768_v39 = vld [vmem:[#allocation7 + $0xe40] ss:$12 sps:$4 sm:$0xff]  }
 0x439   :  { %8437 = vmatprep.subr.bf16.mxu0 %v14737_v54  ;;  %v14771_v27 = vld [vmem:[#allocation7 + $0xcc8] ss:$12 sps:$4 sm:$0xff]   ;;  %v14776_v54 = vld [vmem:[#allocation7 + $0xce0] ss:$12 sps:$4 sm:$0xff]   ;;  %v14781_v19 = vld [vmem:[#allocation7 + $0xcf8] ss:$12 sps:$4 sm:$0xff]  }
 0x43a   :  { %v14772_v53 = vld [vmem:[#allocation7 + $0xc08] ss:$12 sps:$4 sm:$0xff]   ;;  %v14777_v14 = vld [vmem:[#allocation7 + $0xc20] ss:$12 sps:$4 sm:$0xff]   ;;  %v14782_v24 = vld [vmem:[#allocation7 + $0xc38] ss:$12 sps:$4 sm:$0xff]  }
 0x43b   :  { %8425 = vmatmul.mubr.bf16.gmra.mrb[36].mxu0 %v17438_v42  ;;  %7365 = vmatpush1.bf16.msra.mxu1 %v14732_v22  ;;  %v14775_v18 = vld [vmem:[#allocation7 + $0xe5c] ss:$12 sps:$4 sm:$0xff]   ;;  %v14780_v31 = vld [vmem:[#allocation7 + $0xe74] ss:$12 sps:$4 sm:$0xff]  }
 0x43c   :  { %8438 = vmatpush1.bf16.msra.mxu0 %v14735_v4  ;;  %8465 = vmatprep.mubr.bf16.mxu0 %v17441_v47  ;;  %v14778_v22 = vld [vmem:[#allocation7 + $0xe70] ss:$12 sps:$4 sm:$0xff]   ;;  %v14785_v4 = vld [vmem:[#allocation7 + $0xe8c] ss:$12 sps:$4 sm:$0xff]   ;;  %v14783_v12 = vld [vmem:[#allocation7 + $0xe88] ss:$12 sps:$4 sm:$0xff]  }
 0x43d   :  { %7366 = vmatprep.subr.bf16.mxu1 %v14740_v45  ;;  %8439 = vmatprep.subr.bf16.mxu0 %v14743_v63  ;;  %v14791_v45 = vld [vmem:[#allocation7 + $0xd28] ss:$12 sps:$4 sm:$0xff]   ;;  %v14790_v63 = vld [vmem:[#allocation7 + $0xea4] ss:$12 sps:$4 sm:$0xff]  }
 0x43f   :  { %7367 = vmatpush1.bf16.msra.mxu1 %v14738_v25  ;;  %v7842_v25 = vrot.slane %v16611_v32, 6  ;;  %v7846_v32 = vrot.slane %v18661_v55, 4 }
 0x440   :  { %8440 = vmatpush1.bf16.msra.mxu0 %v14741_v49  ;;  %7368 = vmatprep.subr.bf16.mxu1 %v14746_v40  ;;  %v14792_v49 = vld [vmem:[#allocation7 + $0xc68] ss:$12 sps:$4 sm:$0xff]  }
 0x441   :  { %8441 = vmatprep.subr.bf16.mxu0 %v14749_v62  ;;  %v14795_v62 = vld [vmem:[#allocation7 + $0xebc] ss:$12 sps:$4 sm:$0xff]  }
 0x443   :  { %7369 = vmatpush1.bf16.msra.mxu1 %v14744_v44  ;;  %v7524_v44 = vrot.slane %v17373_v26, %v18693_v36 }
 0x444   :  { %8442 = vmatpush1.bf16.msra.mxu0 %v14747_v52  ;;  %7370 = vmatprep.subr.bf16.mxu1 %v14752_v60  ;;  %v7826_v52 = vrot.slane %v18663_v50, 7  ;;  %v7828_v50 = vrot.slane %v18667_v3, 6 }
 0x445   :  { %8443 = vmatprep.subr.bf16.mxu0 %v14755_v2  ;;  %v14797_v2 = vld [vmem:[#allocation7 + $0xc80] ss:$12 sps:$4 sm:$0xff]  }
 0x446   :  { %v7827_v55 = vsel %vm4132_vm6, %v7826_v52, %v16593_v46 }
 0x447   :  { %7371 = vmatpush1.bf16.msra.mxu1 %v14750_v61  ;;  %v7844_v61 = vrot.slane %v18662_v30, 5  ;;  %v14802_v30 = vld [vmem:[#allocation7 + $0xc98] ss:$12 sps:$4 sm:$0xff]   ;;  %v7829_v3 = vsel %vm4135_vm7, %v7828_v50, %v7827_v55  ;;  %v14826_v50 = vld [vmem:[#allocation7 + $0xde8] ss:$12 sps:$4 sm:$0xff]  }
 0x448   :  { %8444 = vmatpush1.bf16.msra.mxu0 %v14753_v35  ;;  %7372 = vmatprep.subr.bf16.mxu1 %v14758_v37  ;;  %v14801_v35 = vld [vmem:[#allocation7 + $0xd58] ss:$12 sps:$4 sm:$0xff]   ;;  %v14800_v37 = vld [vmem:[#allocation7 + $0xed4] ss:$12 sps:$4 sm:$0xff]  }
 0x449   :  { %8445 = vmatprep.subr.bf16.mxu0 %v14761_v48  ;;  %v7540_v48 = vpack.c.bf16 %v7524_v44, %v7524_v44  ;;  %v14816_v44 = vld [vmem:[#allocation7 + $0xe78] ss:$12 sps:$4 sm:$0xff]   ;;  %v14828_v55 = vld [vmem:[#allocation7 + $0xec0] ss:$12 sps:$4 sm:$0xff]  }
 0x44b   :  { %7373 = vmatpush1.bf16.msra.mxu1 %v14756_v13 }
 0x44c   :  { %8446 = vmatpush1.bf16.msra.mxu0 %v14759_v33  ;;  %7374 = vmatprep.subr.bf16.mxu1 %v14764_v57  ;;  %v7848_v33 = vrot.slane %v18665_v0, 3 }
 0x44d   :  { %8447 = vmatprep.subr.bf16.mxu0 %v14767_v7  ;;  %v14798_v7 = vld [vmem:[#allocation7 + $0xed0] ss:$12 sps:$4 sm:$0xff]  }
 0x44f   :  { %7375 = vmatpush1.bf16.msra.mxu1 %v14762_v43  ;;  %v14806_v43 = vld [vmem:[#allocation7 + $0xd70] ss:$12 sps:$4 sm:$0xff]  }
 0x450   :  { %8448 = vmatpush1.bf16.msra.mxu0 %v14765_v21  ;;  %13463 = vmatprep.subr.bf16.mxu1 %v14771_v27  ;;  %v7520_v21 = vrot.slane %v17373_v26, %v16013_v29  ;;  %v14805_v27 = vld [vmem:[#allocation7 + $0xeec] ss:$12 sps:$4 sm:$0xff]  }
 0x451   :  { %8449 = vmatprep.subr.bf16.mxu0 %v14770_v20  ;;  %v7685_v20 = vunpack.c.l.b16 %v7540_v48  ;;  %v14823_v48 = vld [vmem:[#allocation7 + $0xf50] ss:$12 sps:$4 sm:$0xff]  }
 0x452   :  { %7377 = vmatmul.mubr.bf16.vlgmr.msra.gmra.mrb[64].mxu1 %v17145_v15  ;;  %v7840_v15 = vrot.slane %v16603_v38, 7  ;;  %v14796_v38 = vld [vmem:[#allocation7 + $0xd40] ss:$12 sps:$4 sm:$0xff]  }
 0x453   :  { %7386 = vmatprep.mubr.bf16.mxu1 %v17249_v56  ;;  %13464 = vmatpush3.bf16.msra.mxu1 %v14772_v53  ;;  %v14787_v56 = vld [vmem:[#allocation7 + $0xc50] ss:$12 sps:$4 sm:$0xff]   ;;  %v7832_v53 = vrot.slane %v18668_v28, 4  ;;  %v7852_v28 = vrot.slane %v7685_v20, 1 }
 0x454   :  { %8450 = vmatpush1.bf16.msra.mxu0 %v14768_v39  ;;  %13465 = vmatprep.subr.bf16.mxu1 %v14776_v54  ;;  %v7841_v40 = vsel %vm4132_vm6, %v7840_v15, %v16595_v51  ;;  %v14793_v51 = vld [vmem:[#allocation7 + $0xeb8] ss:$12 sps:$4 sm:$0xff]   ;;  %v7830_v54 = vrot.slane %v18671_v41, 5 }
 0x455   :  { %8451 = vmatprep.subr.bf16.mxu0 %v14775_v18  ;;  %v7843_v60 = vsel %vm4135_vm7, %v7842_v25, %v7841_v40  ;;  %v18714_v39 = vld [vmem:[#allocation96_spill] sm:$0xff]  ;;  %v14807_v18 = vld [vmem:[#allocation7 + $0xcb0] ss:$12 sps:$4 sm:$0xff]  }
 0x456   :  { %v7845_v13 = vsel %vm4138_vm8, %v7844_v61, %v7843_v60  ;;  %v7850_v46 = vrot.slane %v18714_v39, 2  ;;  %v14817_v60 = vld [vmem:[#allocation7 + $0xff8] ss:$12 sps:$4 sm:$0xff]  }
 0x457   :  { %13466 = vmatpush3.bf16.msra.mxu1 %v14777_v14  ;;  %v7847_v57 = vsel %vm4141_vm9, %v7846_v32, %v7845_v13  ;;  %v14803_v14 = vld [vmem:[#allocation7 + $0xee8] ss:$12 sps:$4 sm:$0xff]   ;;  %v14818_v32 = vld [vmem:[#allocation7 + $0xdb8] ss:$12 sps:$4 sm:$0xff]  }
 0x458   :  { %8452 = vmatpush1.bf16.msra.mxu0 %v14773_v6  ;;  %13467 = vmatprep.subr.bf16.mxu1 %v14781_v19  ;;  %v7849_v0 = vsel %vm4144_vm10, %v7848_v33, %v7847_v57  ;;  %v14808_v6 = vld [vmem:[#allocation7 + $0xe48] ss:$12 sps:$4 sm:$0xff]   ;;  %v7539_v19 = vpack.c.bf16 %v7520_v21, %v7520_v21  ;;  %v14819_v61 = vld [vmem:[#allocation7 + $0xf38] ss:$12 sps:$4 sm:$0xff]   ;;  %v14830_v21 = vld [vmem:[#allocation7 + $0xe00] ss:$12 sps:$4 sm:$0xff]  }
 0x459   :  { %8453 = vmatprep.subr.bf16.mxu0 %v14780_v31  ;;  %v7851_v26 = vsel %vm4147_vm11, %v7850_v46, %v7849_v0  ;;  %v7831_v31 = vsel %vm4138_vm8, %v7830_v54, %v7829_v3  ;;  %v14824_v13 = vld [vmem:[#allocation7 + $0xea8] ss:$12 sps:$4 sm:$0xff]   ;;  %v14831_v0 = vld [vmem:[#allocation7 + $0xf80] ss:$12 sps:$4 sm:$0xff]   ;;  %v14832_v3 = vld [vmem:[#allocation7 + $0xed8] ss:$12 sps:$4 sm:$0xff]  }
 0x45a   :  { %7387 = vmatmul.mubr.bf16.gmra.mrb[68].mxu1 %v17269_v17  ;;  %v14788_v17 = vld [vmem:[#allocation7 + $0xea0] ss:$12 sps:$4 sm:$0xff]   ;;  %v7853_v41 = vsel %vm4150_vm12, %v7852_v28, %v7851_v26  ;;  %v7684_v15 = vunpack.c.l.b16 %v7539_v19  ;;  %v14825_v33 = vld [vmem:[#allocation7 + $0x1028] ss:$12 sps:$4 sm:$0xff]   ;;  %v14833_v39 = vld [vmem:[#allocation7 + $0x1058] ss:$12 sps:$4 sm:$0xff]  }
 0x45b   :  { %13468 = vmatpush3.bf16.msra.mxu1 %v14782_v24  ;;  %8516 = vmatprep.mubr.bf16.mxu1 %v17351_v1  ;;  %v7834_v24 = vrot.slane %v18672_v58, 3  ;;  %v17480_v58 = vpack.c.b16 %v7853_v41, %v7853_v41  ;;  %v14827_v57 = vld [vmem:[#allocation7 + $0xf68] ss:$12 sps:$4 sm:$0xff]   ;;  %v14834_v54 = vld [vmem:[#allocation7 + $0xe18] ss:$12 sps:$4 sm:$0xff]  }
 0x45c   :  { %8454 = vmatpush1.bf16.msra.mxu0 %v14778_v22  ;;  %13469 = vmatprep.subr.bf16.mxu1 %v14786_v23  ;;  %v14809_v22 = vld [vmem:[#allocation7 + $0xfc8] ss:$12 sps:$4 sm:$0xff]   ;;  %v7833_v23 = vsel %vm4141_vm9, %v7832_v53, %v7831_v31  ;;  %v14838_v31 = vld [vmem:[#allocation7 + $0xe30] ss:$12 sps:$4 sm:$0xff]  }
 0x45d   :  { %8455 = vmatprep.subr.bf16.mxu0 %v14785_v4  ;;  %v14810_v4 = vld [vmem:[#allocation7 + $0xd88] ss:$12 sps:$4 sm:$0xff]   ;;  %v14839_v28 = vld [vmem:[#allocation7 + $0xfb0] ss:$12 sps:$4 sm:$0xff]  }
 0x45f   :  { %13470 = vmatpush3.bf16.msra.mxu1 %v14787_v56  ;;  %v7835_v56 = vsel %vm4144_vm10, %v7834_v24, %v7833_v23  ;;  %v14842_v23 = vld [vmem:[#allocation7 + $0xf04] ss:$12 sps:$4 sm:$0xff]  }
 0x460   :  { %8456 = vmatpush1.bf16.msra.mxu0 %v14783_v12  ;;  %13471 = vmatprep.subr.bf16.mxu1 %v14791_v45  ;;  %v14811_v12 = vld [vmem:[#allocation7 + $0xf08] ss:$12 sps:$4 sm:$0xff]   ;;  %v14812_v45 = vld [vmem:[#allocation7 + $0xe60] ss:$12 sps:$4 sm:$0xff]  }
 0x461   :  { %8457 = vmatprep.subr.bf16.mxu0 %v14790_v63  ;;  %v18715_v63 = vld [vmem:[#allocation25_spill] sm:$0xff] }
 0x462   :  { %v7836_v25 = vrot.slane %v18715_v63, 2  ;;  %v14845_v63 = vld [vmem:[#allocation7 + $0xf18] ss:$12 sps:$4 sm:$0xff]  }
 0x463   :  { %13472 = vmatpush3.bf16.msra.mxu1 %v14792_v49  ;;  %v14813_v49 = vld [vmem:[#allocation7 + $0xfe0] ss:$12 sps:$4 sm:$0xff]  }
 0x464   :  { %8458 = vmatpush1.bf16.msra.mxu0 %v14788_v17  ;;  %13473 = vmatprep.subr.bf16.mxu1 %v14796_v38  ;;  %v7837_v40 = vsel %vm4147_vm11, %v7836_v25, %v7835_v56  ;;  %v14814_v17 = vld [vmem:[#allocation7 + $0xda0] ss:$12 sps:$4 sm:$0xff]   ;;  %v7838_v38 = vrot.slane %v7684_v15, 1  ;;  %v14844_v56 = vld [vmem:[#allocation7 + $0x1088] ss:$12 sps:$4 sm:$0xff]  }
 0x465   :  { %8459 = vmatprep.subr.bf16.mxu0 %v14795_v62  ;;  %v14815_v62 = vld [vmem:[#allocation7 + $0xf20] ss:$12 sps:$4 sm:$0xff]  }
 0x466   :  { %v7839_v52 = vsel %vm4150_vm12, %v7838_v38, %v7837_v40  ;;  %v14840_v15 = vld [vmem:[#allocation7 + $0xf00] ss:$12 sps:$4 sm:$0xff]   ;;  %v14853_v40 = vld [vmem:[#allocation7 + $0x1178] ss:$12 sps:$4 sm:$0xff]  }
 0x467   :  { %13474 = vmatpush3.bf16.msra.mxu1 %v14797_v2  ;;  %v17487_v2 = vpack.c.b16 %v7839_v52, %v7839_v52  ;;  %v14849_v25 = vld [vmem:[#allocation7 + $0x10a0] ss:$12 sps:$4 sm:$0xff]   ;;  %v14854_v38 = vld [vmem:[#allocation7 + $0x10b8] ss:$12 sps:$4 sm:$0xff]   ;;  %v14855_v52 = vld [vmem:[#allocation7 + $0xf48] ss:$12 sps:$4 sm:$0xff]  }
 0x468   :  { %8460 = vmatpush1.bf16.msra.mxu0 %v14793_v51  ;;  %13475 = vmatprep.subr.bf16.mxu1 %v14801_v35  ;;  %v14820_v51 = vld [vmem:[#allocation7 + $0xe90] ss:$12 sps:$4 sm:$0xff]  }
 0x469   :  { %8461 = vmatprep.subr.bf16.mxu0 %v14800_v37  ;;  %v14821_v35 = vld [vmem:[#allocation7 + $0x1010] ss:$12 sps:$4 sm:$0xff]  }
 0x46a   :  { %v14822_v37 = vld [vmem:[#allocation7 + $0xdd0] ss:$12 sps:$4 sm:$0xff]  }
 0x46b   :  { %13476 = vmatpush3.bf16.msra.mxu1 %v14802_v30  ;;  %v14829_v30 = vld [vmem:[#allocation7 + $0x1040] ss:$12 sps:$4 sm:$0xff]  }
 0x46c   :  { %8462 = vmatpush1.bf16.msra.mxu0 %v14798_v7  ;;  %13477 = vmatprep.subr.bf16.mxu1 %v14806_v43 }
 0x46d   :  { %8463 = vmatprep.subr.bf16.mxu0 %v14805_v27 }
 0x46f   :  { %13478 = vmatpush3.bf16.msra.mxu1 %v14807_v18  ;;  %v14835_v18 = vld [vmem:[#allocation7 + $0xf98] ss:$12 sps:$4 sm:$0xff]  }
 0x470   :  { %8464 = vmatpush1.bf16.msra.mxu0 %v14803_v14  ;;  %13491 = vmatprep.subr.bf16.mxu1 %v14808_v6  ;;  %v14836_v14 = vld [vmem:[#allocation7 + $0xef0] ss:$12 sps:$4 sm:$0xff]  }
 0x471   :  { %13519 = vmatprep.subr.bf16.mxu0 %v14809_v22  ;;  %v14837_v6 = vld [vmem:[#allocation7 + $0x1070] ss:$12 sps:$4 sm:$0xff]  }
 0x472   :  { %8517 = vmatmul.mubr.bf16.vlgmr.msra.gmra.mrb[80].mxu1 %v17213_v9 }
 0x473   :  { %8466 = vmatmul.mubr.bf16.vlgmr.msra.gmra.mrb[32].mxu0 %v17267_v11  ;;  %8524 = vmatprep.mubr.bf16.mxu1 %v17422_v5 }
 0x474   :  { %8475 = vmatprep.mubr.bf16.mxu0 %v17480_v58  ;;  %13492 = vmatpush3.bf16.msra.mxu1 %v14810_v4  ;;  %v14843_v4 = vld [vmem:[#allocation7 + $0x1148] ss:$12 sps:$4 sm:$0xff]  }
 0x475   :  { %13520 = vmatpush3.bf16.msra.mxu0 %v14811_v12  ;;  %13493 = vmatprep.subr.bf16.mxu1 %v14812_v45  ;;  %v14847_v12 = vld [vmem:[#allocation7 + $0xf1c] ss:$12 sps:$4 sm:$0xff]   ;;  %v14848_v45 = vld [vmem:[#allocation7 + $0x1160] ss:$12 sps:$4 sm:$0xff]  }
 0x476   :  { %13521 = vmatprep.subr.bf16.mxu0 %v14813_v49  ;;  %v14852_v49 = vld [vmem:[#allocation7 + $0xf34] ss:$12 sps:$4 sm:$0xff]  }
 0x478   :  { %13494 = vmatpush3.bf16.msra.mxu1 %v14814_v17  ;;  %v14850_v17 = vld [vmem:[#allocation7 + $0xf30] ss:$12 sps:$4 sm:$0xff]  }
 0x479   :  { %13522 = vmatpush3.bf16.msra.mxu0 %v14815_v62  ;;  %13495 = vmatprep.subr.bf16.mxu1 %v14816_v44  ;;  %v14857_v62 = vld [vmem:[#allocation7 + $0xf4c] ss:$12 sps:$4 sm:$0xff]   ;;  %v14858_v44 = vld [vmem:[#allocation7 + $0x1190] ss:$12 sps:$4 sm:$0xff]  }
 0x47a   :  { %8525 = vmatmul.mubr.bf16.gmra.mrb[84].mxu1 %v17438_v42  ;;  %13523 = vmatprep.subr.bf16.mxu0 %v14817_v60  ;;  %v14859_v60 = vld [vmem:[#allocation7 + $0x10d0] ss:$12 sps:$4 sm:$0xff]  }
 0x47b   :  { %8476 = vmatmul.mubr.bf16.gmra.mrb[36].mxu0 %v17487_v2  ;;  %8564 = vmatprep.mubr.bf16.mxu1 %v17441_v47 }
 0x47c   :  { %13496 = vmatpush3.bf16.msra.mxu1 %v14818_v32  ;;  %9364 = vmatprep.mubr.bf16.mxu0 %v17351_v1  ;;  %v14862_v32 = vld [vmem:[#allocation7 + $0xf64] ss:$12 sps:$4 sm:$0xff]  }
 0x47d   :  { %13524 = vmatpush3.bf16.msra.mxu0 %v14819_v61  ;;  %13497 = vmatprep.subr.bf16.mxu1 %v14820_v51  ;;  %v14863_v61 = vld [vmem:[#allocation7 + $0x11a8] ss:$12 sps:$4 sm:$0xff]   ;;  %v14860_v51 = vld [vmem:[#allocation7 + $0xf60] ss:$12 sps:$4 sm:$0xff]  }
 0x47e   :  { %13525 = vmatprep.subr.bf16.mxu0 %v14821_v35  ;;  %v14864_v35 = vld [vmem:[#allocation7 + $0x10e8] ss:$12 sps:$4 sm:$0xff]  }
 0x480   :  { %13498 = vmatpush3.bf16.msra.mxu1 %v14822_v37  ;;  %v14867_v37 = vld [vmem:[#allocation7 + $0xf7c] ss:$12 sps:$4 sm:$0xff]  }
 0x481   :  { %13526 = vmatpush3.bf16.msra.mxu0 %v14823_v48  ;;  %13499 = vmatprep.subr.bf16.mxu1 %v14824_v13  ;;  %v14868_v48 = vld [vmem:[#allocation7 + $0x11c0] ss:$12 sps:$4 sm:$0xff]  }
 0x482   :  { %13527 = vmatprep.subr.bf16.mxu0 %v14825_v33 }
 0x483   :  { %v13367_v7 = vpop.f32.mrb[40].mxu0 }
 0x484   :  { %13500 = vmatpush3.bf16.msra.mxu1 %v14826_v50  ;;  %v13368_v43 = vpop.f32.mrb[41].mxu0  ;;  %v14865_v50 = vld [vmem:[#allocation7 + $0xf78] ss:$12 sps:$4 sm:$0xff]  }
 0x485   :  { %13528 = vmatpush3.bf16.msra.mxu0 %v14827_v57  ;;  %v17493_v27 = vadd.f32 %v13368_v43, %v13367_v7  ;;  %13501 = vmatprep.subr.bf16.mxu1 %v14828_v55  ;;  %v13370_v20 = vpop.f32.mrb[42].mxu0  ;;  %v14869_v7 = vld [vmem:[#allocation7 + $0x1100] ss:$12 sps:$4 sm:$0xff]  }
 0x486   :  { %13529 = vmatprep.subr.bf16.mxu0 %v14829_v30  ;;  %v13371_v53 = vpop.f32.mrb[43].mxu0  ;;  %v14872_v43 = vld [vmem:[#allocation7 + $0xf94] ss:$12 sps:$4 sm:$0xff]  }
 0x487   :  { %v17495_v46 = vadd.f32 %v13371_v53, %v13370_v20 }
 0x488   :  { %13502 = vmatpush3.bf16.msra.mxu1 %v14830_v21 }
 0x489   :  { %13530 = vmatpush3.bf16.msra.mxu0 %v14831_v0  ;;  %13503 = vmatprep.subr.bf16.mxu1 %v14832_v3  ;;  %v14873_v3 = vld [vmem:[#allocation7 + $0x11d8] ss:$12 sps:$4 sm:$0xff]  }
 0x48a   :  { %13531 = vmatprep.subr.bf16.mxu0 %v14833_v39 }
 0x48b   :  { %v13373_v26 = vpop.f32.mrb[44].mxu0 }
 0x48c   :  { %13504 = vmatpush3.bf16.msra.mxu1 %v14834_v54  ;;  %v13374_v19 = vpop.f32.mrb[45].mxu0 }
 0x48d   :  { %13532 = vmatpush3.bf16.msra.mxu0 %v14835_v18  ;;  %v17497_v24 = vadd.f32 %v13374_v19, %v13373_v26  ;;  %13505 = vmatprep.subr.bf16.mxu1 %v14836_v14  ;;  %v13376_v22 = vpop.f32.mrb[46].mxu0  ;;  %v14870_v14 = vld [vmem:[#allocation7 + $0xf90] ss:$12 sps:$4 sm:$0xff]   ;;  %v14874_v19 = vld [vmem:[#allocation7 + $0x1118] ss:$12 sps:$4 sm:$0xff]  }
 0x48e   :  { %13533 = vmatprep.subr.bf16.mxu0 %v14837_v6  ;;  %v13377_v41 = vpop.f32.mrb[47].mxu0  ;;  %v14878_v22 = vld [vmem:[#allocation7 + $0x11f0] ss:$12 sps:$4 sm:$0xff]  }
 0x490   :  { %13506 = vmatpush3.bf16.msra.mxu1 %v14838_v31  ;;  %v14877_v31 = vld [vmem:[#allocation7 + $0xfac] ss:$12 sps:$4 sm:$0xff]  }
 0x491   :  { %13534 = vmatpush3.bf16.msra.mxu0 %v14839_v28  ;;  %9230 = vmatprep.subr.bf16.mxu1 %v14842_v23 }
 0x492   :  { %13547 = vmatprep.subr.bf16.mxu0 %v14843_v4  ;;  %v14875_v4 = vld [vmem:[#allocation7 + $0xfa8] ss:$12 sps:$4 sm:$0xff]  }
 0x493   :  { %8565 = vmatmul.mubr.bf16.vlgmr.msra.gmra.mrb[88].mxu1 %v17267_v11 }
 0x494   :  { %9365 = vmatmul.mubr.bf16.vlgmr.msra.gmra.mrb[64].mxu0 %v17213_v9  ;;  %8572 = vmatprep.mubr.bf16.mxu1 %v17480_v58 }
 0x495   :  { %9231 = vmatpush1.bf16.msra.mxu1 %v14840_v15  ;;  %9372 = vmatprep.mubr.bf16.mxu0 %v17422_v5 }
 0x496   :  { %13548 = vmatpush3.bf16.msra.mxu0 %v14844_v56  ;;  %9232 = vmatprep.subr.bf16.mxu1 %v14847_v12 }
 0x497   :  { %13549 = vmatprep.subr.bf16.mxu0 %v14848_v45  ;;  %v14879_v45 = vld [vmem:[#allocation7 + $0x1130] ss:$12 sps:$4 sm:$0xff]  }
 0x499   :  { %9233 = vmatpush1.bf16.msra.mxu1 %v14845_v63  ;;  %v14882_v63 = vld [vmem:[#allocation7 + $0xfc4] ss:$12 sps:$4 sm:$0xff]  }
 0x49a   :  { %13550 = vmatpush3.bf16.msra.mxu0 %v14849_v25  ;;  %9234 = vmatprep.subr.bf16.mxu1 %v14852_v49 }
 0x49b   :  { %8573 = vmatmul.mubr.bf16.gmra.mrb[92].mxu1 %v17487_v2  ;;  %13551 = vmatprep.subr.bf16.mxu0 %v14853_v40 }
 0x49c   :  { %9373 = vmatmul.mubr.bf16.gmra.mrb[68].mxu0 %v17438_v42  ;;  %9262 = vmatprep.mubr.bf16.mxu1 %v17351_v1 }
 0x49d   :  { %9235 = vmatpush1.bf16.msra.mxu1 %v14850_v17  ;;  %9412 = vmatprep.mubr.bf16.mxu0 %v17441_v47 }
 0x49e   :  { %13552 = vmatpush3.bf16.msra.mxu0 %v14854_v38  ;;  %9236 = vmatprep.subr.bf16.mxu1 %v14857_v62  ;;  %v14880_v38 = vld [vmem:[#allocation7 + $0xfc0] ss:$12 sps:$4 sm:$0xff]  }
 0x49f   :  { %13553 = vmatprep.subr.bf16.mxu0 %v14858_v44  ;;  %v14885_v44 = vld [vmem:[#allocation7 + $0xfdc] ss:$12 sps:$4 sm:$0xff]  }
 0x4a1   :  { %9237 = vmatpush1.bf16.msra.mxu1 %v14855_v52  ;;  %v14883_v52 = vld [vmem:[#allocation7 + $0xfd8] ss:$12 sps:$4 sm:$0xff]  }
 0x4a2   :  { %13554 = vmatpush3.bf16.msra.mxu0 %v14859_v60  ;;  %9238 = vmatprep.subr.bf16.mxu1 %v14862_v32  ;;  %v14888_v60 = vld [vmem:[#allocation7 + $0xff4] ss:$12 sps:$4 sm:$0xff]   ;;  %v14886_v32 = vld [vmem:[#allocation7 + $0xff0] ss:$12 sps:$4 sm:$0xff]  }
 0x4a3   :  { %13555 = vmatprep.subr.bf16.mxu0 %v14863_v61  ;;  %v14891_v61 = vld [vmem:[#allocation7 + $0x100c] ss:$12 sps:$4 sm:$0xff]  }
 0x4a4   :  { %v13395_v13 = vpop.f32.mrb[72].mxu1 }
 0x4a5   :  { %9239 = vmatpush1.bf16.msra.mxu1 %v14860_v51  ;;  %v13423_v1 = vpop.f32.mrb[48].mxu0  ;;  %v13396_v33 = vpop.f32.mrb[73].mxu1  ;;  %v14894_v51 = vld [vmem:[#allocation7 + $0x1024] ss:$12 sps:$4 sm:$0xff]  }
 0x4a6   :  { %13556 = vmatpush3.bf16.msra.mxu0 %v14864_v35  ;;  %v13397_v57 = vadd.f32 %v13396_v33, %v13395_v13  ;;  %v13424_v55 = vpop.f32.mrb[49].mxu0  ;;  %9240 = vmatprep.subr.bf16.mxu1 %v14867_v37  ;;  %v13398_v30 = vpop.f32.mrb[74].mxu1  ;;  %v14892_v35 = vld [vmem:[#allocation7 + $0x1020] ss:$12 sps:$4 sm:$0xff]   ;;  %v14897_v37 = vld [vmem:[#allocation7 + $0x103c] ss:$12 sps:$4 sm:$0xff]  }
 0x4a7   :  { %v13425_v21 = vadd.f32 %v13424_v55, %v13423_v1  ;;  %13557 = vmatprep.subr.bf16.mxu0 %v14868_v48  ;;  %v13426_v20 = vpop.f32.mrb[50].mxu0  ;;  %v13399_v0 = vpop.f32.mrb[75].mxu1  ;;  %v14895_v48 = vld [vmem:[#allocation7 + $0x1038] ss:$12 sps:$4 sm:$0xff]   ;;  %v14900_v1 = vld [vmem:[#allocation7 + $0x1054] ss:$12 sps:$4 sm:$0xff]  }
 0x4a8   :  { %v6768_v53 = vadd.f32 %v13397_v57, %v17493_v27  ;;  %v13400_v39 = vadd.f32 %v13399_v0, %v13398_v30  ;;  %v13427_v54 = vpop.f32.mrb[51].mxu0  ;;  %v14898_v30 = vld [vmem:[#allocation7 + $0x1050] ss:$12 sps:$4 sm:$0xff]   ;;  %v14901_v0 = vld [vmem:[#allocation7 + $0x1068] ss:$12 sps:$4 sm:$0xff]  }
 0x4a9   :  { %9241 = vmatpush1.bf16.msra.mxu1 %v14865_v50  ;;  %v13428_v18 = vadd.f32 %v13427_v54, %v13426_v20 }
 0x4aa   :  { %v17508_v6 = vadd.f32 %v13425_v21, %v6768_v53  ;;  %13558 = vmatpush3.bf16.msra.mxu0 %v14869_v7  ;;  %v6771_v26 = vadd.f32 %v13400_v39, %v17495_v46  ;;  %9242 = vmatprep.subr.bf16.mxu1 %v14872_v43  ;;  %v14903_v21 = vld [vmem:[#allocation7 + $0x106c] ss:$12 sps:$4 sm:$0xff]   ;;  %v14906_v53 = vld [vmem:[#allocation7 + $0x1084] ss:$12 sps:$4 sm:$0xff]  }
 0x4ab   :  { %13559 = vmatprep.subr.bf16.mxu0 %v14873_v3 }
 0x4ac   :  { %v7433_v28 = vadd.f32 %v13428_v18, %v6771_v26  ;;  %v13401_v23 = vpop.f32.mrb[76].mxu1  ;;  %v14904_v26 = vld [vmem:[#allocation7 + $0x1080] ss:$12 sps:$4 sm:$0xff]  }
 0x4ad   :  { %9243 = vmatpush1.bf16.msra.mxu1 %v14870_v14  ;;  %v13429_v41 = vpop.f32.mrb[52].mxu0  ;;  %v13402_v27 = vpop.f32.mrb[77].mxu1 }
 0x4ae   :  { %13560 = vmatpush3.bf16.msra.mxu0 %v14874_v19  ;;  %v13403_v15 = vadd.f32 %v13402_v27, %v13401_v23  ;;  %v13430_v56 = vpop.f32.mrb[53].mxu0  ;;  %9244 = vmatprep.subr.bf16.mxu1 %v14877_v31  ;;  %v13404_v12 = vpop.f32.mrb[78].mxu1  ;;  %v14907_v31 = vld [vmem:[#allocation7 + $0x1098] ss:$12 sps:$4 sm:$0xff]  }
 0x4af   :  { %v13431_v25 = vadd.f32 %v13430_v56, %v13429_v41  ;;  %13561 = vmatprep.subr.bf16.mxu0 %v14878_v22  ;;  %v13432_v46 = vpop.f32.mrb[54].mxu0  ;;  %v13405_v49 = vpop.f32.mrb[79].mxu1  ;;  %v14912_v22 = vld [vmem:[#allocation7 + $0x10b4] ss:$12 sps:$4 sm:$0xff]   ;;  %v14915_v23 = vld [vmem:[#allocation7 + $0x10cc] ss:$12 sps:$4 sm:$0xff]  }
 0x4b0   :  { %v6776_v40 = vadd.f32 %v13403_v15, %v17497_v24  ;;  %v13433_v17 = vpop.f32.mrb[55].mxu0  ;;  %v14889_v24 = vld [vmem:[#allocation7 + $0x1008] ss:$12 sps:$4 sm:$0xff]   ;;  %v14918_v27 = vld [vmem:[#allocation7 + $0x10e4] ss:$12 sps:$4 sm:$0xff]  }
 0x4b1   :  { %9245 = vmatpush1.bf16.msra.mxu1 %v14875_v4  ;;  %v14913_v41 = vld [vmem:[#allocation7 + $0x10c8] ss:$12 sps:$4 sm:$0xff]   ;;  %v14919_v4 = vld [vmem:[#allocation7 + $0x10f8] ss:$12 sps:$4 sm:$0xff]   ;;  %v14922_v56 = vld [vmem:[#allocation7 + $0x1110] ss:$12 sps:$4 sm:$0xff]  }
 0x4b2   :  { %v7438_v62 = vadd.f32 %v13431_v25, %v6776_v40  ;;  %13562 = vmatpush3.bf16.msra.mxu0 %v14879_v45  ;;  %9246 = vmatprep.subr.bf16.mxu1 %v14882_v63  ;;  %v14924_v15 = vld [vmem:[#allocation7 + $0x1114] ss:$12 sps:$4 sm:$0xff]   ;;  %v14927_v12 = vld [vmem:[#allocation7 + $0x112c] ss:$12 sps:$4 sm:$0xff]   ;;  %v14930_v45 = vld [vmem:[#allocation7 + $0x1144] ss:$12 sps:$4 sm:$0xff]  }
 0x4b3   :  { %v14933_v63 = vld [vmem:[#allocation7 + $0x115c] ss:$12 sps:$4 sm:$0xff]   ;;  %v14931_v25 = vld [vmem:[#allocation7 + $0x1158] ss:$12 sps:$4 sm:$0xff]   ;;  %v14936_v46 = vld [vmem:[#allocation7 + $0x1174] ss:$12 sps:$4 sm:$0xff]  }
 0x4b4   :  { %v14934_v49 = vld [vmem:[#allocation7 + $0x1170] ss:$12 sps:$4 sm:$0xff]   ;;  %v14939_v40 = vld [vmem:[#allocation7 + $0x118c] ss:$12 sps:$4 sm:$0xff]   ;;  %v14937_v17 = vld [vmem:[#allocation7 + $0x1188] ss:$12 sps:$4 sm:$0xff]  }
 0x4b5   :  { %9413 = vmatmul.mubr.bf16.vlgmr.msra.gmra.mrb[72].mxu0 %v17267_v11  ;;  %9247 = vmatpush1.bf16.msra.mxu1 %v14880_v38  ;;  %v14942_v38 = vld [vmem:[#allocation7 + $0x11a4] ss:$12 sps:$4 sm:$0xff]  }
 0x4b6   :  { %9420 = vmatprep.mubr.bf16.mxu0 %v17480_v58  ;;  %9248 = vmatprep.subr.bf16.mxu1 %v14885_v44  ;;  %v14945_v44 = vld [vmem:[#allocation7 + $0x11bc] ss:$12 sps:$4 sm:$0xff]  }
 0x4b9   :  { %9249 = vmatpush1.bf16.msra.mxu1 %v14883_v52  ;;  %v14943_v52 = vld [vmem:[#allocation7 + $0x11b8] ss:$12 sps:$4 sm:$0xff]  }
 0x4ba   :  { %9250 = vmatprep.subr.bf16.mxu1 %v14888_v60  ;;  %v14948_v60 = vld [vmem:[#allocation7 + $0x11d4] ss:$12 sps:$4 sm:$0xff]  }
 0x4bd   :  { %9421 = vmatmul.mubr.bf16.gmra.mrb[76].mxu0 %v17487_v2  ;;  %9251 = vmatpush1.bf16.msra.mxu1 %v14886_v32  ;;  %v14946_v32 = vld [vmem:[#allocation7 + $0x11d0] ss:$12 sps:$4 sm:$0xff]  }
 0x4be   :  { %9252 = vmatprep.subr.bf16.mxu1 %v14891_v61  ;;  %v14951_v61 = vld [vmem:[#allocation7 + $0x11ec] ss:$12 sps:$4 sm:$0xff]  }
 0x4c1   :  { %9253 = vmatpush1.bf16.msra.mxu1 %v14889_v24  ;;  %v14949_v24 = vld [vmem:[#allocation7 + $0x11e8] ss:$12 sps:$4 sm:$0xff]  }
 0x4c2   :  { %9254 = vmatprep.subr.bf16.mxu1 %v14894_v51  ;;  %v14952_v51 = vld [vmem:[#allocation10] ss:$8 sps:$4 sm:$0xff]  }
 0x4c5   :  { %9255 = vmatpush1.bf16.msra.mxu1 %v14892_v35  ;;  %v14954_v35 = vld [vmem:[#allocation10 + $0x4] ss:$8 sps:$4 sm:$0xff]  }
 0x4c6   :  { %v13451_v13 = vpop.f32.mrb[56].mxu0  ;;  %9256 = vmatprep.subr.bf16.mxu1 %v14897_v37  ;;  %v14955_v37 = vld [vmem:[#allocation10 + $0x180] ss:$8 sps:$4 sm:$0xff]  }
 0x4c7   :  { %v13452_v33 = vpop.f32.mrb[57].mxu0 }
 0x4c8   :  { %v13453_v50 = vadd.f32 %v13452_v33, %v13451_v13  ;;  %v13454_v57 = vpop.f32.mrb[58].mxu0  ;;  %v14960_v13 = vld [vmem:[#allocation10 + $0x14] ss:$8 sps:$4 sm:$0xff]   ;;  %v14958_v33 = vld [vmem:[#allocation10 + $0x10] ss:$8 sps:$4 sm:$0xff]  }
 0x4c9   :  { %9257 = vmatpush1.bf16.msra.mxu1 %v14895_v48  ;;  %v13455_v55 = vpop.f32.mrb[59].mxu0  ;;  %v14957_v48 = vld [vmem:[#allocation10 + $0x184] ss:$8 sps:$4 sm:$0xff]  }
 0x4ca   :  { %v17516_v7 = vadd.f32 %v13453_v50, %v17508_v6  ;;  %v13456_v43 = vadd.f32 %v13455_v55, %v13454_v57  ;;  %9258 = vmatprep.subr.bf16.mxu1 %v14900_v1  ;;  %v14909_v6 = vld [vmem:[#allocation7 + $0x109c] ss:$12 sps:$4 sm:$0xff]   ;;  %v14963_v1 = vld [vmem:[#allocation10 + $0x194] ss:$8 sps:$4 sm:$0xff]   ;;  %10278 = vmatprep.subr.bf16.mxu0 %v14957_v48 }
 0x4cb   :  { %10279 = vmatpush1.bf16.msra.mxu0 %v14955_v37  ;;  %v14961_v50 = vld [vmem:[#allocation10 + $0x190] ss:$8 sps:$4 sm:$0xff]   ;;  %v14966_v57 = vld [vmem:[#allocation10 + $0x24] ss:$8 sps:$4 sm:$0xff]   ;;  %v14972_v55 = vld [vmem:[#allocation10 + $0x34] ss:$8 sps:$4 sm:$0xff]  }
 0x4cc   :  { %v17518_v20 = vadd.f32 %v13456_v43, %v7433_v28  ;;  %v14910_v28 = vld [vmem:[#allocation7 + $0x10b0] ss:$12 sps:$4 sm:$0xff]   ;;  %10280 = vmatprep.subr.bf16.mxu0 %v14963_v1 }
 0x4cd   :  { %9259 = vmatpush1.bf16.msra.mxu1 %v14898_v30  ;;  %v14975_v30 = vld [vmem:[#allocation10 + $0x1b4] ss:$8 sps:$4 sm:$0xff]   ;;  %v14970_v43 = vld [vmem:[#allocation10 + $0x30] ss:$8 sps:$4 sm:$0xff]  }
 0x4ce   :  { %v13457_v3 = vpop.f32.mrb[60].mxu0  ;;  %9260 = vmatprep.subr.bf16.mxu1 %v14903_v21  ;;  %v14973_v21 = vld [vmem:[#allocation10 + $0x1b0] ss:$8 sps:$4 sm:$0xff]  }
 0x4cf   :  { %v13458_v39 = vpop.f32.mrb[61].mxu0  ;;  %10281 = vmatpush1.bf16.msra.mxu0 %v14961_v50 }
 0x4d0   :  { %v13459_v54 = vadd.f32 %v13458_v39, %v13457_v3  ;;  %v13460_v18 = vpop.f32.mrb[62].mxu0  ;;  %v14981_v3 = vld [vmem:[#allocation10 + $0x1c4] ss:$8 sps:$4 sm:$0xff]   ;;  %v14979_v39 = vld [vmem:[#allocation10 + $0x1c0] ss:$8 sps:$4 sm:$0xff]  }
 0x4d1   :  { %9261 = vmatpush1.bf16.msra.mxu1 %v14901_v0  ;;  %v13461_v14 = vpop.f32.mrb[63].mxu0  ;;  %v14978_v0 = vld [vmem:[#allocation10 + $0x44] ss:$8 sps:$4 sm:$0xff]   ;;  %v14987_v18 = vld [vmem:[#allocation10 + $0x1d4] ss:$8 sps:$4 sm:$0xff]  }
 0x4d2   :  { %v17520_v19 = vadd.f32 %v13459_v54, %v7438_v62  ;;  %9281 = vmatprep.subr.bf16.mxu1 %v14906_v53  ;;  %v14940_v62 = vld [vmem:[#allocation7 + $0x11a0] ss:$12 sps:$4 sm:$0xff]   ;;  %v14982_v14 = vld [vmem:[#allocation10 + $0x50] ss:$8 sps:$4 sm:$0xff]  }
 0x4d3   :  { %v14976_v53 = vld [vmem:[#allocation10 + $0x40] ss:$8 sps:$4 sm:$0xff]   ;;  %v14984_v54 = vld [vmem:[#allocation10 + $0x54] ss:$8 sps:$4 sm:$0xff]  }
 0x4d4   :  { %9263 = vmatmul.mubr.bf16.vlgmr.msra.gmra.mrb[64].mxu1 %v17213_v9  ;;  %v14916_v9 = vld [vmem:[#allocation7 + $0x10e0] ss:$12 sps:$4 sm:$0xff]  }
 0x4d5   :  { %9272 = vmatprep.mubr.bf16.mxu1 %v17422_v5  ;;  %9282 = vmatpush1.bf16.msra.mxu1 %v14904_v26  ;;  %v14921_v5 = vld [vmem:[#allocation7 + $0x10fc] ss:$12 sps:$4 sm:$0xff]  }
 0x4d6   :  { %9283 = vmatprep.subr.bf16.mxu1 %v14909_v6  ;;  %v14985_v26 = vld [vmem:[#allocation10 + $0x1d0] ss:$8 sps:$4 sm:$0xff]   ;;  %v14990_v6 = vld [vmem:[#allocation10 + $0x64] ss:$8 sps:$4 sm:$0xff]  }
 0x4d9   :  { %9284 = vmatpush1.bf16.msra.mxu1 %v14907_v31  ;;  %v14993_v31 = vld [vmem:[#allocation10 + $0x1e4] ss:$8 sps:$4 sm:$0xff]  }
 0x4da   :  { %9285 = vmatprep.subr.bf16.mxu1 %v14912_v22  ;;  %v14988_v22 = vld [vmem:[#allocation10 + $0x60] ss:$8 sps:$4 sm:$0xff]  }
 0x4dc   :  { %9273 = vmatmul.mubr.bf16.gmra.mrb[68].mxu1 %v17438_v42  ;;  %v14925_v42 = vld [vmem:[#allocation7 + $0x1128] ss:$12 sps:$4 sm:$0xff]  }
 0x4dd   :  { %9286 = vmatpush1.bf16.msra.mxu1 %v14910_v28  ;;  %9313 = vmatprep.mubr.bf16.mxu1 %v17441_v47  ;;  %v14928_v47 = vld [vmem:[#allocation7 + $0x1140] ss:$12 sps:$4 sm:$0xff]  }
 0x4de   :  { %9287 = vmatprep.subr.bf16.mxu1 %v14915_v23  ;;  %v14991_v28 = vld [vmem:[#allocation10 + $0x1e0] ss:$8 sps:$4 sm:$0xff]  }
 0x4e1   :  { %9288 = vmatpush1.bf16.msra.mxu1 %v14913_v41 }
 0x4e2   :  { %9289 = vmatprep.subr.bf16.mxu1 %v14918_v27 }
 0x4e5   :  { %9290 = vmatpush1.bf16.msra.mxu1 %v14916_v9 }
 0x4e6   :  { %9291 = vmatprep.subr.bf16.mxu1 %v14921_v5 }
 0x4e9   :  { %9292 = vmatpush1.bf16.msra.mxu1 %v14919_v4 }
 0x4ea   :  { %9293 = vmatprep.subr.bf16.mxu1 %v14924_v15 }
 0x4ed   :  { %9294 = vmatpush1.bf16.msra.mxu1 %v14922_v56 }
 0x4ee   :  { %9295 = vmatprep.subr.bf16.mxu1 %v14927_v12 }
 0x4f1   :  { %9296 = vmatpush1.bf16.msra.mxu1 %v14925_v42 }
 0x4f2   :  { %9297 = vmatprep.subr.bf16.mxu1 %v14930_v45 }
 0x4f5   :  { %9298 = vmatpush1.bf16.msra.mxu1 %v14928_v47 }
 0x4f6   :  { %9299 = vmatprep.subr.bf16.mxu1 %v14933_v63 }
 0x4f9   :  { %9300 = vmatpush1.bf16.msra.mxu1 %v14931_v25 }
 0x4fa   :  { %9301 = vmatprep.subr.bf16.mxu1 %v14936_v46 }
 0x4fd   :  { %9302 = vmatpush1.bf16.msra.mxu1 %v14934_v49 }
 0x4fe   :  { %9303 = vmatprep.subr.bf16.mxu1 %v14939_v40 }
 0x501   :  { %9304 = vmatpush1.bf16.msra.mxu1 %v14937_v17 }
 0x502   :  { %9305 = vmatprep.subr.bf16.mxu1 %v14942_v38 }
 0x505   :  { %9306 = vmatpush1.bf16.msra.mxu1 %v14940_v62 }
 0x506   :  { %9307 = vmatprep.subr.bf16.mxu1 %v14945_v44 }
 0x509   :  { %9308 = vmatpush1.bf16.msra.mxu1 %v14943_v52 }
 0x50a   :  { %9309 = vmatprep.subr.bf16.mxu1 %v14948_v60 }
 0x50d   :  { %9310 = vmatpush1.bf16.msra.mxu1 %v14946_v32 }
 0x50e   :  { %9311 = vmatprep.subr.bf16.mxu1 %v14951_v61 }
 0x511   :  { %9312 = vmatpush1.bf16.msra.mxu1 %v14949_v24 }
 0x512   :  { %10660 = vmatprep.subr.bf16.mxu1 %v14954_v35 }
 0x514   :  { %9314 = vmatmul.mubr.bf16.vlgmr.msra.gmra.mrb[64].mxu1 %v17267_v11  ;;  %v14969_v11 = vld [vmem:[#allocation10 + $0x1a4] ss:$8 sps:$4 sm:$0xff]  }
 0x515   :  { %9323 = vmatprep.mubr.bf16.mxu1 %v17480_v58  ;;  %10661 = vmatpush1.bf16.msra.mxu1 %v14952_v51  ;;  %v14964_v58 = vld [vmem:[#allocation10 + $0x20] ss:$8 sps:$4 sm:$0xff]  }
 0x516   :  { %10662 = vmatprep.subr.bf16.mxu1 %v14960_v13  ;;  %10282 = vmatprep.subr.bf16.mxu0 %v14969_v11 }
 0x519   :  { %10663 = vmatpush1.bf16.msra.mxu1 %v14958_v33 }
 0x51a   :  { %10664 = vmatprep.subr.bf16.mxu1 %v14966_v57 }
 0x51c   :  { %9324 = vmatmul.mubr.bf16.gmra.mrb[68].mxu1 %v17487_v2  ;;  %v14967_v2 = vld [vmem:[#allocation10 + $0x1a0] ss:$8 sps:$4 sm:$0xff]  }
 0x51d   :  { %10665 = vmatpush1.bf16.msra.mxu1 %v14964_v58  ;;  %10283 = vmatpush1.bf16.msra.mxu0 %v14967_v2 }
 0x51e   :  { %10666 = vmatprep.subr.bf16.mxu1 %v14972_v55  ;;  %10284 = vmatprep.subr.bf16.mxu0 %v14975_v30 }
 0x521   :  { %10667 = vmatpush1.bf16.msra.mxu1 %v14970_v43  ;;  %10285 = vmatpush1.bf16.msra.mxu0 %v14973_v21 }
 0x522   :  { %10668 = vmatprep.subr.bf16.mxu1 %v14978_v0  ;;  %10286 = vmatprep.subr.bf16.mxu0 %v14981_v3 }
 0x525   :  { %10669 = vmatpush1.bf16.msra.mxu1 %v14976_v53  ;;  %10287 = vmatpush1.bf16.msra.mxu0 %v14979_v39 }
 0x526   :  { %10670 = vmatprep.subr.bf16.mxu1 %v14984_v54  ;;  %10288 = vmatprep.subr.bf16.mxu0 %v14987_v18  ;;  %v14994_v18 = vld [vmem:[#allocation10 + $0x70] ss:$8 sps:$4 sm:$0xff]  }
 0x529   :  { %10671 = vmatpush1.bf16.msra.mxu1 %v14982_v14  ;;  %10289 = vmatpush1.bf16.msra.mxu0 %v14985_v26  ;;  %v14996_v14 = vld [vmem:[#allocation10 + $0x74] ss:$8 sps:$4 sm:$0xff]  }
 0x52a   :  { %10672 = vmatprep.subr.bf16.mxu1 %v14990_v6  ;;  %10290 = vmatprep.subr.bf16.mxu0 %v14993_v31 }
 0x52d   :  { %10673 = vmatpush1.bf16.msra.mxu1 %v14988_v22  ;;  %10291 = vmatpush1.bf16.msra.mxu0 %v14991_v28 }
 0x52e   :  { %10674 = vmatprep.subr.bf16.mxu1 %v14996_v14  ;;  %v15047_v14 = vld [vmem:[#allocation10 + $0x274] ss:$8 sps:$4 sm:$0xff]  }
 0x531   :  { %10675 = vmatpush1.bf16.msra.mxu1 %v14994_v18  ;;  %v15044_v18 = vld [vmem:[#allocation10 + $0xf4] ss:$8 sps:$4 sm:$0xff]  }
 0x545   :  { %v13479_v23 = vpop.f32.mrb[80].mxu1 }
 0x546   :  { %v17529_v41 = vpop.f32.mrb[32].mxu0  ;;  %v13480_v27 = vpop.f32.mrb[81].mxu1 }
 0x547   :  { %v17531_v9 = vpop.f32.mrb[33].mxu0  ;;  %v13481_v5 = vadd.f32 %v13480_v27, %v13479_v23  ;;  %v13482_v4 = vpop.f32.mrb[82].mxu1 }
 0x548   :  { %v17533_v15 = vpop.f32.mrb[34].mxu0  ;;  %v13483_v56 = vpop.f32.mrb[83].mxu1 }
 0x549   :  { %v17535_v12 = vpop.f32.mrb[35].mxu0  ;;  %v13484_v42 = vadd.f32 %v13483_v56, %v13482_v4 }
 0x54d   :  { %v13485_v45 = vpop.f32.mrb[84].mxu1 }
 0x54e   :  { %v17537_v47 = vpop.f32.mrb[36].mxu0  ;;  %v13486_v63 = vpop.f32.mrb[85].mxu1 }
 0x54f   :  { %v17539_v25 = vpop.f32.mrb[37].mxu0  ;;  %v13487_v46 = vadd.f32 %v13486_v63, %v13485_v45  ;;  %v13488_v49 = vpop.f32.mrb[86].mxu1 }
 0x550   :  { %v8481_v40 = vpop.f32.mrb[38].mxu0  ;;  %v13489_v17 = vpop.f32.mrb[87].mxu1 }
 0x551   :  { %v8482_v38 = vpop.f32.mrb[39].mxu0  ;;  %v14999_v17 = vld [vmem:[#allocation10 + $0x1f4] ss:$8 sps:$4 sm:$0xff]  }
 0x552   :  { %v15000_v38 = vld [vmem:[#allocation10 + $0x80] ss:$8 sps:$4 sm:$0xff]   ;;  %10292 = vmatprep.subr.bf16.mxu0 %v14999_v17 }
 0x566   :  { %v13507_v62 = vpop.f32.mrb[88].mxu1 }
 0x567   :  { %v13535_v44 = vpop.f32.mrb[64].mxu0  ;;  %v13508_v52 = vpop.f32.mrb[89].mxu1 }
 0x568   :  { %v13509_v60 = vadd.f32 %v13508_v52, %v13507_v62  ;;  %v13536_v32 = vpop.f32.mrb[65].mxu0  ;;  %v13510_v61 = vpop.f32.mrb[90].mxu1  ;;  %v15003_v52 = vld [vmem:[#allocation10 + $0x200] ss:$8 sps:$4 sm:$0xff]  }
 0x569   :  { %v13537_v24 = vadd.f32 %v13536_v32, %v13535_v44  ;;  %v13538_v51 = vpop.f32.mrb[66].mxu0  ;;  %v13511_v35 = vpop.f32.mrb[91].mxu1  ;;  %v15005_v44 = vld [vmem:[#allocation10 + $0x204] ss:$8 sps:$4 sm:$0xff]   ;;  %v15008_v32 = vld [vmem:[#allocation10 + $0x94] ss:$8 sps:$4 sm:$0xff]  }
 0x56a   :  { %v8567_v37 = vadd.f32 %v13509_v60, %v13481_v5  ;;  %v13512_v48 = vadd.f32 %v13511_v35, %v13510_v61  ;;  %v13539_v13 = vpop.f32.mrb[67].mxu0  ;;  %v15006_v60 = vld [vmem:[#allocation10 + $0x90] ss:$8 sps:$4 sm:$0xff]   ;;  %v15012_v35 = vld [vmem:[#allocation10 + $0xa0] ss:$8 sps:$4 sm:$0xff]  }
 0x56b   :  { %v13540_v1 = vadd.f32 %v13539_v13, %v13538_v51  ;;  %v15009_v61 = vld [vmem:[#allocation10 + $0x210] ss:$8 sps:$4 sm:$0xff]   ;;  %v15017_v51 = vld [vmem:[#allocation10 + $0x224] ss:$8 sps:$4 sm:$0xff]   ;;  %v15023_v13 = vld [vmem:[#allocation10 + $0x234] ss:$8 sps:$4 sm:$0xff]  }
 0x56c   :  { %v17542_v33 = vadd.f32 %v8567_v37, %v17356_v10  ;;  %v8570_v50 = vadd.f32 %v13512_v48, %v13484_v42  ;;  %v15015_v37 = vld [vmem:[#allocation10 + $0x220] ss:$8 sps:$4 sm:$0xff]   ;;  %v15020_v48 = vld [vmem:[#allocation10 + $0xb4] ss:$8 sps:$4 sm:$0xff]  }
 0x56e   :  { %v17545_v57 = vadd.f32 %v8570_v50, %v17359_v59  ;;  %v13513_v11 = vpop.f32.mrb[92].mxu1  ;;  %v15021_v50 = vld [vmem:[#allocation10 + $0x230] ss:$8 sps:$4 sm:$0xff]  }
 0x56f   :  { %v13541_v58 = vpop.f32.mrb[68].mxu0  ;;  %v13514_v2 = vpop.f32.mrb[93].mxu1 }
 0x570   :  { %v13515_v55 = vadd.f32 %v13514_v2, %v13513_v11  ;;  %v13542_v30 = vpop.f32.mrb[69].mxu0  ;;  %v13516_v43 = vpop.f32.mrb[94].mxu1  ;;  %v15026_v11 = vld [vmem:[#allocation10 + $0xc4] ss:$8 sps:$4 sm:$0xff]   ;;  %v15024_v2 = vld [vmem:[#allocation10 + $0xc0] ss:$8 sps:$4 sm:$0xff]  }
 0x571   :  { %v13543_v21 = vadd.f32 %v13542_v30, %v13541_v58  ;;  %v13544_v0 = vpop.f32.mrb[70].mxu0  ;;  %v13517_v3 = vpop.f32.mrb[95].mxu1  ;;  %v15029_v58 = vld [vmem:[#allocation10 + $0x244] ss:$8 sps:$4 sm:$0xff]   ;;  %v15032_v30 = vld [vmem:[#allocation10 + $0xd4] ss:$8 sps:$4 sm:$0xff]  }
 0x572   :  { %v8575_v53 = vadd.f32 %v13515_v55, %v13487_v46  ;;  %v13545_v39 = vpop.f32.mrb[71].mxu0  ;;  %v15027_v55 = vld [vmem:[#allocation10 + $0x240] ss:$8 sps:$4 sm:$0xff]   ;;  %v15035_v43 = vld [vmem:[#allocation10 + $0x254] ss:$8 sps:$4 sm:$0xff]  }
 0x573   :  { %v15033_v0 = vld [vmem:[#allocation10 + $0x250] ss:$8 sps:$4 sm:$0xff]   ;;  %v15038_v3 = vld [vmem:[#allocation10 + $0xe4] ss:$8 sps:$4 sm:$0xff]   ;;  %v15036_v39 = vld [vmem:[#allocation10 + $0xe0] ss:$8 sps:$4 sm:$0xff]  }
 0x574   :  { %v17548_v54 = vadd.f32 %v8575_v53, %v17362_v34  ;;  %v15041_v53 = vld [vmem:[#allocation10 + $0x264] ss:$8 sps:$4 sm:$0xff]  }
 0x588   :  { %v13563_v10 = vpop.f32.mrb[72].mxu0 }
 0x589   :  { %v13564_v26 = vpop.f32.mrb[73].mxu0 }
 0x58a   :  { %v13565_v59 = vadd.f32 %v13564_v26, %v13563_v10  ;;  %v13566_v6 = vpop.f32.mrb[74].mxu0  ;;  %v15039_v10 = vld [vmem:[#allocation10 + $0x260] ss:$8 sps:$4 sm:$0xff]   ;;  %v15042_v26 = vld [vmem:[#allocation10 + $0xf0] ss:$8 sps:$4 sm:$0xff]  }
 0x58b   :  { %v13567_v31 = vpop.f32.mrb[75].mxu0 }
 0x58c   :  { %v9415_v22 = vadd.f32 %v13565_v59, %v13537_v24  ;;  %v13568_v28 = vadd.f32 %v13567_v31, %v13566_v6  ;;  %v15014_v24 = vld [vmem:[#allocation10 + $0xa4] ss:$8 sps:$4 sm:$0xff]   ;;  %v15045_v59 = vld [vmem:[#allocation10 + $0x270] ss:$8 sps:$4 sm:$0xff]  }
 0x58d   :  { %v15050_v6 = vld [vmem:[#allocation10 + $0x404] ss:$8 sps:$4 sm:$0xff]  }
 0x58e   :  { %v17551_v23 = vadd.f32 %v9415_v22, %v17516_v7  ;;  %v9418_v27 = vadd.f32 %v13568_v28, %v13540_v1  ;;  %v14997_v7 = vld [vmem:[#allocation10 + $0x1f0] ss:$8 sps:$4 sm:$0xff]   ;;  %v15053_v31 = vld [vmem:[#allocation10 + $0x284] ss:$8 sps:$4 sm:$0xff]   ;;  %v9446_v22 = vld [vmem:[#allocation8] sm:$0x7] }
 0x58f   :  { %10293 = vmatpush1.bf16.msra.mxu0 %v14997_v7  ;;  %v15018_v1 = vld [vmem:[#allocation10 + $0xb0] ss:$8 sps:$4 sm:$0xff]   ;;  %v9459_v28 = vrot.slane %v9446_v22, %v18696_v16 }
 0x590   :  { %v9439_v5 = vmax.f32 %v17542_v33, %v17551_v23  ;;  %v17556_v34 = vadd.f32 %v9418_v27, %v17518_v20  ;;  %v13569_v4 = vpop.f32.mrb[76].mxu0  ;;  %v15002_v20 = vld [vmem:[#allocation10 + $0x84] ss:$8 sps:$4 sm:$0xff]   ;;  %10294 = vmatprep.subr.bf16.mxu0 %v15005_v44 }
 0x591   :  { %v13570_v56 = vpop.f32.mrb[77].mxu0  ;;  %10676 = vmatprep.subr.bf16.mxu1 %v15002_v20 }
 0x592   :  { %v9442_v42 = vmax.f32 %v17545_v57, %v17556_v34  ;;  %v13571_v45 = vadd.f32 %v13570_v56, %v13569_v4  ;;  %v13572_v63 = vpop.f32.mrb[78].mxu0  ;;  %10677 = vmatpush1.bf16.msra.mxu1 %v15000_v38  ;;  %v9465_v27 = vadd.f32 %v9459_v28, %v9439_v5  ;;  %v9451_v56 = vrot.slane %v9446_v22, %v18647_v8 }
 0x593   :  { %v13573_v46 = vpop.f32.mrb[79].mxu0  ;;  %10295 = vmatpush1.bf16.msra.mxu0 %v15003_v52  ;;  %10678 = vmatprep.subr.bf16.mxu1 %v15008_v32  ;;  %v18716_v63 = vld [vmem:[#allocation33_spill] sm:$0xff] }
 0x594   :  { %v9423_v49 = vadd.f32 %v13571_v45, %v13543_v21  ;;  %v15030_v21 = vld [vmem:[#allocation10 + $0xd0] ss:$8 sps:$4 sm:$0xff]   ;;  %v9468_v4 = vadd.f32 %v9459_v28, %v9442_v42  ;;  %v17574_v46 = vrot.slane %v9446_v22, %v18716_v63 }
 0x596   :  { %v17561_v40 = vadd.f32 %v9423_v49, %v17520_v19  ;;  %v15011_v19 = vld [vmem:[#allocation10 + $0x214] ss:$8 sps:$4 sm:$0xff]   ;;  %10679 = vmatpush1.bf16.msra.mxu1 %v15006_v60  ;;  %v9474_v49 = vmax.f32 %v9465_v27, 0.0  ;;  %v9477_v5 = vmax.f32 %v9468_v4, 0.0 }
 0x597   :  { %10296 = vmatprep.subr.bf16.mxu0 %v15011_v19  ;;  %10680 = vmatprep.subr.bf16.mxu1 %v15014_v24  ;;  %v18717_v24 = vld [vmem:[#allocation35_spill] sm:$0xff] }
 0x598   :  { %v9445_v62 = vmax.f32 %v17548_v54, %v17561_v40  ;;  %10297 = vmatpush1.bf16.msra.mxu0 %v15009_v61  ;;  %v9492_v52 = vcombine.high %v9474_v49, %v9474_v49 }
 0x599   :  { %10298 = vmatprep.subr.bf16.mxu0 %v15017_v51  ;;  %v9513_v51 = vrot.slane %v9474_v49, %v18717_v24 }
 0x59a   :  { %10681 = vmatpush1.bf16.msra.mxu1 %v15012_v35  ;;  %v9471_v7 = vadd.f32 %v9459_v28, %v9445_v62  ;;  %v9527_v62 = vcombine.high %v9477_v5, %v9477_v5 }
 0x59b   :  { %10682 = vmatprep.subr.bf16.mxu1 %v15020_v48  ;;  %v9520_v48 = vrot.slane %v9492_v52, %v18717_v24 }
 0x59c   :  { %10299 = vmatpush1.bf16.msra.mxu0 %v15015_v37  ;;  %v9480_v60 = vmax.f32 %v9471_v7, 0.0 }
 0x59d   :  { %10300 = vmatprep.subr.bf16.mxu0 %v15023_v13 }
 0x59e   :  { %10683 = vmatpush1.bf16.msra.mxu1 %v15018_v1  ;;  %v9562_v37 = vcombine.high %v9480_v60, %v9480_v60 }
 0x59f   :  { %10684 = vmatprep.subr.bf16.mxu1 %v15026_v11 }
 0x5a0   :  { %10301 = vmatpush1.bf16.msra.mxu0 %v15021_v50 }
 0x5a1   :  { %10302 = vmatprep.subr.bf16.mxu0 %v15029_v58 }
 0x5a2   :  { %10685 = vmatpush1.bf16.msra.mxu1 %v15024_v2 }
 0x5a3   :  { %10686 = vmatprep.subr.bf16.mxu1 %v15032_v30  ;;  %v9555_v30 = vrot.slane %v9527_v62, %v18717_v24 }
 0x5a4   :  { %10303 = vmatpush1.bf16.msra.mxu0 %v15027_v55 }
 0x5a5   :  { %10304 = vmatprep.subr.bf16.mxu0 %v15035_v43 }
 0x5a6   :  { %10687 = vmatpush1.bf16.msra.mxu1 %v15030_v21 }
 0x5a7   :  { %10688 = vmatprep.subr.bf16.mxu1 %v15038_v3 }
 0x5a8   :  { %10305 = vmatpush1.bf16.msra.mxu0 %v15033_v0  ;;  %v17596_v0 = vrot.slane %v9480_v60, %v18717_v24 }
 0x5a9   :  { %10306 = vmatprep.subr.bf16.mxu0 %v15041_v53 }
 0x5aa   :  { %10689 = vmatpush1.bf16.msra.mxu1 %v15036_v39 }
 0x5ab   :  { %10690 = vmatprep.subr.bf16.mxu1 %v15044_v18 }
 0x5ac   :  { %10307 = vmatpush1.bf16.msra.mxu0 %v15039_v10 }
 0x5ad   :  { %10308 = vmatprep.subr.bf16.mxu0 %v15047_v14 }
 0x5ae   :  { %10691 = vmatpush1.bf16.msra.mxu1 %v15042_v26 }
 0x5af   :  { %11170 = vmatprep.subr.bf16.mxu1 %v15050_v6 }
 0x5b0   :  { %10309 = vmatpush1.bf16.msra.mxu0 %v15045_v59  ;;  %v17602_v59 = vrot.slane %v9562_v37, %v18717_v24 }
 0x5b1   :  { %10319 = vmatprep.subr.bf16.mxu0 %v15053_v31 }
 0x5e7   :  { %v9315_v45 = vpop.f32.mrb[64].mxu1 }
 0x5e8   :  { %v9437_v17 = vmax.f32 %v17529_v41, %v9315_v45  ;;  %v9317_v38 = vpop.f32.mrb[65].mxu1 }
 0x5e9   :  { %v9438_v33 = vmax.f32 %v17531_v9, %v9317_v38  ;;  %v9319_v23 = vpop.f32.mrb[66].mxu1 }
 0x5ea   :  { %v9463_v57 = vadd.f32 %v9451_v56, %v9437_v17  ;;  %v9440_v34 = vmax.f32 %v17533_v15, %v9319_v23  ;;  %v9321_v42 = vpop.f32.mrb[67].mxu1 }
 0x5eb   :  { %v9464_v20 = vadd.f32 %v17574_v46, %v9438_v33  ;;  %v9441_v44 = vmax.f32 %v17535_v12, %v9321_v42  ;;  %v9548_v12 = vrot.slane %v9477_v5, %v18717_v24 }
 0x5ec   :  { %v9472_v32 = vmax.f32 %v9463_v57, 0.0  ;;  %v9466_v54 = vadd.f32 %v9451_v56, %v9440_v34 }
 0x5ed   :  { %v9473_v40 = vmax.f32 %v9464_v20, 0.0  ;;  %v9467_v41 = vadd.f32 %v17574_v46, %v9441_v44 }
 0x5ee   :  { %v9475_v61 = vmax.f32 %v9466_v54, 0.0 }
 0x5ef   :  { %v9490_v9 = vcombine.low %v9472_v32, %v9473_v40  ;;  %v9491_v19 = vcombine.high %v9472_v32, %v9473_v40  ;;  %v9476_v35 = vmax.f32 %v9467_v41, 0.0  ;;  %v9325_v15 = vpop.f32.mrb[68].mxu1 }
 0x5f0   :  { %v9443_v13 = vmax.f32 %v17537_v47, %v9325_v15  ;;  %v9327_v1 = vpop.f32.mrb[69].mxu1 }
 0x5f1   :  { %v9499_v50 = vrot.slane %v9490_v9, %v18717_v24  ;;  %v9506_v11 = vrot.slane %v9491_v19, %v18717_v24  ;;  %v9525_v58 = vcombine.low %v9475_v61, %v9476_v35  ;;  %v9526_v2 = vcombine.high %v9475_v61, %v9476_v35  ;;  %v9329_v55 = vpop.f32.mrb[70].mxu1 }
 0x5f2   :  { %v17592_v43 = vadd.f32 %v9451_v56, %v9443_v13  ;;  %v9444_v21 = vmax.f32 %v17539_v25, %v9327_v1  ;;  %v9330_v3 = vpop.f32.mrb[71].mxu1 }
 0x5f3   :  { %v9521_v53 = vcombine.low %v9499_v50, %v9513_v51  ;;  %v9522_v47 = vcombine.high %v9499_v50, %v9513_v51  ;;  %v9523_v39 = vcombine.low %v9506_v11, %v9520_v48  ;;  %v9524_v10 = vcombine.high %v9506_v11, %v9520_v48 }
 0x5f4   :  { %v9534_v18 = vrot.slane %v9525_v58, %v18717_v24  ;;  %v9541_v14 = vrot.slane %v9526_v2, %v18717_v24  ;;  %v9478_v26 = vmax.f32 %v17592_v43, 0.0  ;;  %v17616_v5 = vadd.f32 %v17574_v46, %v9444_v21 }
 0x5f5   :  { %v12920_v6 = vrot.slane %v9521_v53, 9  ;;  %v12921_v31 = vrot.slane %v9522_v47, 9  ;;  %v12922_v25 = vrot.slane %v9523_v39, 9  ;;  %v12923_v22 = vrot.slane %v9524_v10, 9 }
 0x5f6   :  { %v17604_v28 = vcombine.low %v9534_v18, %v9548_v12  ;;  %v17606_v27 = vcombine.high %v9534_v18, %v9548_v12  ;;  %v17608_v4 = vcombine.low %v9541_v14, %v9555_v30  ;;  %v17610_v56 = vcombine.high %v9541_v14, %v9555_v30 }
 0x5f7   :  { %v9643_v45 = vmax.f32 %v9521_v53, %v12920_v6  ;;  %v9644_v49 = vmax.f32 %v9522_v47, %v12921_v31  ;;  %v9645_v7 = vmax.f32 %v9523_v39, %v12922_v25  ;;  %v9646_v17 = vmax.f32 %v9524_v10, %v12923_v22 }
 0x5f8   :  { %v12924_v38 = vrot.slane %v17604_v28, 9  ;;  %v12925_v33 = vrot.slane %v17606_v27, 9  ;;  %v12926_v23 = vrot.slane %v17608_v4, 9  ;;  %v12927_v19 = vrot.slane %v17610_v56, 9 }
 0x5f9   :  { %v9666_v57 = vrot.slane %v9643_v45, %v18647_v8  ;;  %v9670_v34 = vrot.slane %v9643_v45, %v18696_v16  ;;  %v9674_v42 = vrot.slane %v9643_v45, %v16013_v29  ;;  %v9678_v20 = vrot.slane %v9644_v49, %v18647_v8 }
 0x5fa   :  { %v9682_v44 = vrot.slane %v9644_v49, %v18696_v16  ;;  %v9686_v52 = vrot.slane %v9644_v49, %v16013_v29  ;;  %v9690_v60 = vrot.slane %v9645_v7, %v18647_v8  ;;  %v9694_v32 = vrot.slane %v9645_v7, %v18696_v16 }
 0x5fb   :  { %v9698_v54 = vrot.slane %v9645_v7, %v16013_v29  ;;  %v9702_v46 = vrot.slane %v9646_v17, %v18647_v8  ;;  %v9706_v40 = vrot.slane %v9646_v17, %v18696_v16  ;;  %v9710_v41 = vrot.slane %v9646_v17, %v16013_v29 }
 0x5fc   :  { %v9783_v62 = vpack.c.bf16 %v9666_v57, %v9666_v57  ;;  %v9784_v61 = vpack.c.bf16 %v9670_v34, %v9670_v34  ;;  %v9786_v9 = vpack.c.bf16 %v9678_v20, %v9678_v20  ;;  %v9787_v51 = vpack.c.bf16 %v9682_v44, %v9682_v44 }
 0x5fd   :  { %v9788_v35 = vpack.c.bf16 %v9686_v52, %v9686_v52  ;;  %v9789_v15 = vpack.c.bf16 %v9690_v60, %v9690_v60  ;;  %v9790_v37 = vpack.c.bf16 %v9694_v32, %v9694_v32  ;;  %v9791_v48 = vpack.c.bf16 %v9698_v54, %v9698_v54 }
 0x5fe   :  { %v9792_v12 = vpack.c.bf16 %v9702_v46, %v9702_v46  ;;  %v9793_v13 = vpack.c.bf16 %v9706_v40, %v9706_v40  ;;  %v9794_v1 = vpack.c.bf16 %v9710_v41, %v9710_v41  ;;  %v9785_v50 = vpack.c.bf16 %v9674_v42, %v9674_v42 }
 0x5ff   :  { %v9966_v11 = vunpack.c.l.b16 %v9786_v9  ;;  %v17631_v58 = vunpack.c.l.b16 %v9787_v51  ;;  %v9969_v2 = vunpack.c.l.b16 %v9789_v15  ;;  %v9968_v55 = vunpack.c.l.b16 %v9788_v35 }
 0x600   :  { %v17633_v30 = vunpack.c.l.b16 %v9790_v37  ;;  %v17635_v21 = vunpack.c.l.b16 %v9791_v48  ;;  %v17637_v3 = vunpack.c.l.b16 %v9792_v12  ;;  %v17639_v53 = vunpack.c.l.b16 %v9793_v13 }
 0x601   :  { %v17641_v47 = vunpack.c.l.b16 %v9794_v1  ;;  %v9990_v39 = vrot.slane %v9969_v2, 7  ;;  %v10366_v10 = vunpack.c.l.b16 %v9783_v62  ;;  %v17646_v31 = vunpack.c.l.b16 %v9784_v61 }
 0x602   :  { %v9992_v18 = vrot.slane %v17637_v3, 6  ;;  %v10004_v14 = vrot.slane %v17633_v30, 7  ;;  %v10018_v6 = vrot.slane %v17635_v21, 7  ;;  %v10368_v22 = vunpack.c.l.b16 %v9785_v50 }
 0x603   :  { %v9991_v25 = vsel %vm4132_vm6, %v9990_v39, %v9966_v11  ;;  %v10372_v45 = vrot.slane %v9966_v11, 7  ;;  %v10374_v49 = vrot.slane %v9969_v2, 6  ;;  %v10020_v57 = vrot.slane %v17641_v47, 6 }
 0x604   :  { %v17650_v7 = vsel %vm4135_vm7, %v9992_v18, %v9991_v25  ;;  %v17653_v17 = vsel %vm4132_vm6, %v10018_v6, %v9968_v55  ;;  %v10376_v34 = vrot.slane %v17637_v3, 5  ;;  %v10386_v20 = vrot.slane %v17631_v58, 7 }
 0x605   :  { %v10373_v42 = vsel %vm4132_vm6, %v10372_v45, %v10366_v10  ;;  %v10400_v44 = vrot.slane %v9968_v55, 7  ;;  %v10841_v54 = vrot.slane %v17637_v3, 7  ;;  %v10869_v46 = vrot.slane %v17641_v47, 7 }
 0x606   :  { %v17661_v60 = vsel %vm4135_vm7, %v10374_v49, %v10373_v42  ;;  %v9647_v62 = vmax.f32 %v17604_v28, %v12924_v38  ;;  %v9649_v61 = vmax.f32 %v17608_v4, %v12926_v23  ;;  %v9648_v35 = vmax.f32 %v17606_v27, %v12925_v33 }
 0x607   :  { %v17667_v40 = vsel %vm4132_vm6, %v10400_v44, %v10368_v22  ;;  %v17673_v9 = vsel %vm4132_vm6, %v10841_v54, %v9969_v2  ;;  %v17677_v51 = vsel %vm4132_vm6, %v10869_v46, %v17635_v21  ;;  %v9650_v15 = vmax.f32 %v17610_v56, %v12927_v19 }
 0x608   :  { %v9714_v37 = vrot.slane %v9649_v61, %v18647_v8  ;;  %v9722_v48 = vrot.slane %v9649_v61, %v16013_v29  ;;  %v9860_v28 = vrot.slane %v9647_v62, %v18647_v8  ;;  %v9479_v4 = vmax.f32 %v17616_v5, 0.0 }
 0x609   :  { %v9718_v38 = vrot.slane %v9649_v61, %v18696_v16  ;;  %v9726_v23 = vrot.slane %v9650_v15, %v18647_v8  ;;  %v9734_v12 = vrot.slane %v9650_v15, %v16013_v29  ;;  %v9864_v13 = vrot.slane %v9647_v62, %v18696_v16 }
 0x60a   :  { %v9730_v27 = vrot.slane %v9650_v15, %v18696_v16  ;;  %v9795_v33 = vpack.c.bf16 %v9714_v37, %v9714_v37  ;;  %v9797_v56 = vpack.c.bf16 %v9722_v48, %v9722_v48  ;;  %v9868_v19 = vrot.slane %v9647_v62, %v16013_v29 }
 0x60b   :  { %v9798_v1 = vpack.c.bf16 %v9726_v23, %v9726_v23  ;;  %v9800_v50 = vpack.c.bf16 %v9734_v12, %v9734_v12  ;;  %v9887_v11 = vpack.c.bf16 %v9860_v28, %v9860_v28  ;;  %v9888_v2 = vpack.c.bf16 %v9864_v13, %v9864_v13 }
 0x60c   :  { %v9889_v55 = vpack.c.bf16 %v9868_v19, %v9868_v19  ;;  %v17693_v5 = vunpack.c.l.b16 %v9795_v33  ;;  %v17695_v39 = vunpack.c.l.b16 %v9797_v56  ;;  %v10747_v10 = vrot.slane %v9648_v35, %v18647_v8 }
 0x60d   :  { %v17698_v18 = vunpack.c.l.b16 %v9887_v11  ;;  %v17700_v6 = vunpack.c.l.b16 %v9888_v2  ;;  %v17702_v25 = vunpack.c.l.b16 %v9798_v1  ;;  %v17704_v22 = vunpack.c.l.b16 %v9800_v50 }
 0x60e   :  { %v9796_v45 = vpack.c.bf16 %v9718_v38, %v9718_v38  ;;  %v17706_v49 = vunpack.c.l.b16 %v9889_v55  ;;  %v10378_v42 = vrot.slane %v17693_v5, 4  ;;  %v10751_v44 = vrot.slane %v9648_v35, %v18696_v16 }
 0x60f   :  { %v9994_v54 = vrot.slane %v17698_v18, 5  ;;  %v9996_v46 = vrot.slane %v17702_v25, 4  ;;  %v10380_v15 = vrot.slane %v17702_v25, 3  ;;  %v10755_v37 = vrot.slane %v9648_v35, %v16013_v29 }
 0x610   :  { %v10774_v48 = vpack.c.bf16 %v10747_v10, %v10747_v10  ;;  %v10775_v28 = vpack.c.bf16 %v10751_v44, %v10751_v44  ;;  %v10022_v38 = vrot.slane %v17706_v49, 5  ;;  %v9560_v13 = vcombine.low %v9478_v26, %v9479_v4 }
 0x611   :  { %v10776_v33 = vpack.c.bf16 %v10755_v37, %v10755_v37  ;;  %v10871_v19 = vrot.slane %v17706_v49, 6  ;;  %v9561_v1 = vcombine.high %v9478_v26, %v9479_v4  ;;  %v9799_v50 = vpack.c.bf16 %v9730_v27, %v9730_v27 }
 0x612   :  { %v17721_v56 = vunpack.c.l.b16 %v10775_v28  ;;  %v9569_v35 = vrot.slane %v9560_v13, %v18717_v24  ;;  %v10370_v11 = vunpack.c.l.b16 %v9796_v45  ;;  %v10387_v2 = vsel %vm4132_vm6, %v10386_v20, %v17646_v31 }
 0x613   :  { %v17731_v55 = vunpack.c.l.b16 %v10774_v48  ;;  %v17733_v10 = vunpack.c.l.b16 %v10776_v33  ;;  %v9576_v37 = vrot.slane %v9561_v1, %v18717_v24  ;;  %v9979_v4 = vunpack.c.l.b16 %v9799_v50 }
 0x614   :  { %v9591_v43 = vcombine.low %v9569_v35, %v17596_v0  ;;  %v9592_v26 = vcombine.high %v9569_v35, %v17596_v0  ;;  %v10388_v27 = vrot.slane %v17633_v30, 6  ;;  %v10390_v20 = vrot.slane %v17639_v53, 5 }
 0x615   :  { %v10873_v45 = vrot.slane %v17733_v10, 5  ;;  %v9593_v28 = vcombine.low %v9576_v37, %v17602_v59  ;;  %v9594_v31 = vcombine.high %v9576_v37, %v17602_v59  ;;  %v10392_v24 = vrot.slane %v10370_v11, 4  ;;  %v15062_v10 = vld [vmem:[#allocation10 + $0x424] ss:$8 sps:$4 sm:$0xff]  }
 0x616   :  { %v12928_v48 = vrot.slane %v9591_v43, 9  ;;  %v12929_v13 = vrot.slane %v9592_v26, 9  ;;  %v10389_v33 = vsel %vm4135_vm7, %v10388_v27, %v10387_v2  ;;  %v10394_v35 = vrot.slane %v9979_v4, 3 }
 0x617   :  { %v12930_v1 = vrot.slane %v9593_v28, 9  ;;  %v12931_v23 = vrot.slane %v9594_v31, 9  ;;  %v10391_v0 = vsel %vm4138_vm8, %v10390_v20, %v10389_v33  ;;  %v10005_v59 = vsel %vm4132_vm6, %v10004_v14, %v17631_v58 }
 0x618   :  { %v9651_v50 = vmax.f32 %v9591_v43, %v12928_v48  ;;  %v9652_v44 = vmax.f32 %v9592_v26, %v12929_v13  ;;  %v10393_v12 = vsel %vm4141_vm9, %v10392_v24, %v10391_v0  ;;  %v10006_v11 = vrot.slane %v17639_v53, 6 }
 0x619   :  { %v9653_v37 = vmax.f32 %v9593_v28, %v12930_v1  ;;  %v17751_v41 = vmax.f32 %v9594_v31, %v12931_v23  ;;  %v10395_v2 = vsel %vm4144_vm10, %v10394_v35, %v10393_v12  ;;  %v9995_v5 = vsel %vm4138_vm8, %v9994_v54, %v17650_v7 }
 0x61a   :  { %v9738_v27 = vrot.slane %v9651_v50, %v18647_v8  ;;  %v9742_v20 = vrot.slane %v9651_v50, %v18696_v16  ;;  %v9746_v43 = vrot.slane %v9651_v50, %v16013_v29  ;;  %v9750_v26 = vrot.slane %v9652_v44, %v18647_v8 }
 0x61b   :  { %v9758_v48 = vrot.slane %v9652_v44, %v16013_v29  ;;  %v9872_v13 = vrot.slane %v9653_v37, %v18647_v8  ;;  %v9880_v58 = vrot.slane %v9653_v37, %v16013_v29  ;;  %v9754_v14 = vrot.slane %v9652_v44, %v18696_v16 }
 0x61c   :  { %v9801_v23 = vpack.c.bf16 %v9738_v27, %v9738_v27  ;;  %v9803_v12 = vpack.c.bf16 %v9746_v43, %v9746_v43  ;;  %v9804_v28 = vpack.c.bf16 %v9750_v26, %v9750_v26  ;;  %v9802_v31 = vpack.c.bf16 %v9742_v20, %v9742_v20 }
 0x61d   :  { %v9806_v33 = vpack.c.bf16 %v9758_v48, %v9758_v48  ;;  %v9890_v24 = vpack.c.bf16 %v9872_v13, %v9872_v13  ;;  %v9892_v1 = vpack.c.bf16 %v9880_v58, %v9880_v58  ;;  %v9805_v0 = vpack.c.bf16 %v9754_v14, %v9754_v14 }
 0x61e   :  { %v17763_v35 = vunpack.c.l.b16 %v9801_v23  ;;  %v17765_v50 = vunpack.c.l.b16 %v9803_v12  ;;  %v17767_v61 = vunpack.c.l.b16 %v9804_v28  ;;  %v17769_v32 = vunpack.c.l.b16 %v9802_v31 }
 0x61f   :  { %v17771_v52 = vunpack.c.l.b16 %v9806_v33  ;;  %v17773_v62 = vunpack.c.l.b16 %v9890_v24  ;;  %v17775_v44 = vunpack.c.l.b16 %v9805_v0  ;;  %v9876_v27 = vrot.slane %v9653_v37, %v18696_v16 }
 0x620   :  { %v9998_v20 = vrot.slane %v17763_v35, 3  ;;  %v10396_v43 = vrot.slane %v17769_v32, 2  ;;  %v10007_v26 = vsel %vm4135_vm7, %v10006_v11, %v10005_v59  ;;  %v10008_v48 = vrot.slane %v17700_v6, 5 }
 0x621   :  { %v10398_v13 = vrot.slane %v17775_v44, 1  ;;  %v9891_v58 = vpack.c.bf16 %v9876_v27, %v9876_v27  ;;  %v10010_v14 = vrot.slane %v9979_v4, 4  ;;  %v10012_v23 = vrot.slane %v17769_v32, 3 }
 0x622   :  { %v10397_v12 = vsel %vm4147_vm11, %v10396_v43, %v10395_v2  ;;  %v10009_v28 = vsel %vm4138_vm8, %v10008_v48, %v10007_v26  ;;  %v10014_v37 = vrot.slane %v17775_v44, 2  ;;  %v10377_v31 = vsel %vm4138_vm8, %v10376_v34, %v17661_v60  ;;  %v15048_v48 = vld [vmem:[#allocation10 + $0x400] ss:$8 sps:$4 sm:$0xff]  }
 0x623   :  { %v10399_v59 = vsel %vm4150_vm12, %v10398_v13, %v10397_v12  ;;  %v17792_v11 = vunpack.c.l.b16 %v9891_v58  ;;  %v10011_v33 = vsel %vm4141_vm9, %v10010_v14, %v10009_v28  ;;  %v10379_v4 = vsel %vm4141_vm9, %v10378_v42, %v10377_v31  ;;  %v15056_v28 = vld [vmem:[#allocation10 + $0x414] ss:$8 sps:$4 sm:$0xff]  }
 0x624   :  { %v10415_v2 = vpack.c.b16 %v10399_v59, %v10399_v59  ;;  %v10013_v24 = vsel %vm4144_vm10, %v10012_v23, %v10011_v33  ;;  %v10381_v0 = vsel %vm4144_vm10, %v10380_v15, %v10379_v4  ;;  %v10382_v3 = vrot.slane %v17763_v35, 2  ;;  %v15059_v33 = vld [vmem:[#allocation10 + $0x294] ss:$8 sps:$4 sm:$0xff]  }
 0x625   :  { %v10015_v34 = vsel %vm4147_vm11, %v10014_v37, %v10013_v24  ;;  %v10016_v60 = vrot.slane %v17792_v11, 1  ;;  %v10384_v27 = vrot.slane %v17767_v61, 1  ;;  %v9997_v15 = vsel %vm4141_vm9, %v9996_v46, %v9995_v5  ;;  %v15051_v46 = vld [vmem:[#allocation10 + $0x280] ss:$8 sps:$4 sm:$0xff]  }
 0x626   :  { %10692 = vmatprep.mubr.bf16.mxu1 %v10415_v2  ;;  %v10383_v42 = vsel %vm4147_vm11, %v10382_v3, %v10381_v0  ;;  %v10000_v43 = vrot.slane %v17767_v61, 2  ;;  %v10002_v26 = vrot.slane %v17773_v62, 1  ;;  %v9999_v14 = vsel %vm4144_vm10, %v9998_v20, %v9997_v15  ;;  %v15054_v0 = vld [vmem:[#allocation10 + $0x410] ss:$8 sps:$4 sm:$0xff]  }
 0x627   :  { %v10017_v13 = vsel %vm4150_vm12, %v10016_v60, %v10015_v34  ;;  %v10385_v58 = vsel %vm4150_vm12, %v10384_v27, %v10383_v42  ;;  %v9989_v23 = vunpack.c.l.b16 %v9892_v1  ;;  %v10767_v25 = vrot.slane %v17751_v41, %v16013_v29  ;;  %v15057_v15 = vld [vmem:[#allocation10 + $0x290] ss:$8 sps:$4 sm:$0xff]  }
 0x628   :  { %v10033_v7 = vpack.c.b16 %v10017_v13, %v10017_v13  ;;  %v10414_v54 = vpack.c.b16 %v10385_v58, %v10385_v58  ;;  %v10001_v12 = vsel %vm4147_vm11, %v10000_v43, %v9999_v14  ;;  %v10872_v31 = vsel %vm4135_vm7, %v10871_v19, %v17677_v51 }
 0x629   :  { %v10003_v37 = vsel %vm4150_vm12, %v10002_v26, %v10001_v12  ;;  %v10875_v59 = vrot.slane %v17765_v50, 4  ;;  %v10877_v1 = vrot.slane %v17771_v52, 3  ;;  %v10779_v4 = vpack.c.bf16 %v10767_v25, %v10767_v25  ;;  %v15068_v25 = vld [vmem:[#allocation10 + $0x434] ss:$8 sps:$4 sm:$0xff]  }
 0x62a   :  { %10310 = vmatprep.mubr.bf16.mxu0 %v10033_v7  ;;  %10693 = vmatmul.mubr.bf16.vlgmr.msra.gmra.mrb[96].mxu1 %v10414_v54  ;;  %v10032_v20 = vpack.c.b16 %v10003_v37, %v10003_v37  ;;  %v10874_v2 = vsel %vm4138_vm8, %v10873_v45, %v10872_v31  ;;  %v10879_v24 = vrot.slane %v9989_v23, 2  ;;  %v18718_v3 = vmov 0   ;;  %v15060_v54 = vld [vmem:[#allocation10 + $0x420] ss:$8 sps:$4 sm:$0xff]  }
 0x62b   :  { %11171 = vmatpush1.bf16.msra.mxu1 %v15048_v48  ;;  %11202 = vmatprep.mubr.bf16.mxu1 %v18718_v3  ;;  %v10876_v51 = vsel %vm4141_vm9, %v10875_v59, %v10874_v2  ;;  %v10021_v19 = vsel %vm4135_vm7, %v10020_v57, %v17653_v17  ;;  %v10026_v34 = vrot.slane %v17765_v50, 3  ;;  %v10028_v60 = vrot.slane %v17771_v52, 2  ;;  %v15063_v31 = vld [vmem:[#allocation10 + $0x2a0] ss:$8 sps:$4 sm:$0xff]  }
 0x62c   :  { %10311 = vmatmul.mubr.bf16.vlgmr.msra.gmra.mrb[80].mxu0 %v10032_v20  ;;  %11172 = vmatprep.subr.bf16.mxu1 %v15056_v28  ;;  %v10840_v45 = vunpack.c.l.b16 %v10779_v4  ;;  %v10878_v27 = vsel %vm4144_vm10, %v10877_v1, %v10876_v51  ;;  %v10023_v5 = vsel %vm4138_vm8, %v10022_v38, %v10021_v19  ;;  %v10030_v42 = vrot.slane %v9989_v23, 1  ;;  %v15065_v38 = vld [vmem:[#allocation10 + $0x2a4] ss:$8 sps:$4 sm:$0xff]   ;;  %v15071_v20 = vld [vmem:[#allocation10 + $0x2b4] ss:$8 sps:$4 sm:$0xff]  }
 0x62d   :  { %10320 = vmatpush1.bf16.msra.mxu0 %v15051_v46  ;;  %10351 = vmatprep.mubr.bf16.mxu0 %v18718_v3  ;;  %v10880_v17 = vsel %vm4147_vm11, %v10879_v24, %v10878_v27  ;;  %v18719_v57 = vrot.slane %v17704_v22, 4  ;;  %v18720_v26 = vrot.slane %v17635_v21, 6  ;;  %v10408_v49 = vrot.slane %v17704_v22, 3 }
 0x62e   :  { %10321 = vmatprep.subr.bf16.mxu0 %v15059_v33  ;;  %v10881_v13 = vrot.slane %v10840_v45, 1  ;;  %v18721_v14 = vrot.slane %v17641_v47, 5  ;;  %v10410_v7 = vrot.slane %v17765_v50, 2  ;;  %v18722_v21 = vrot.slane %v17695_v39, 4 }
 0x62f   :  { %v10025_v43 = vsel %vm4141_vm9, %v18719_v57, %v10023_v5  ;;  %v10403_v48 = vsel %vm4135_vm7, %v18720_v26, %v17667_v40  ;;  %11173 = vmatpush1.bf16.msra.mxu1 %v15054_v0  ;;  %v10412_v22 = vrot.slane %v17771_v52, 1  ;;  %v10763_v28 = vrot.slane %v17751_v41, %v18696_v16 }
 0x630   :  { %v10027_v58 = vsel %vm4144_vm10, %v10026_v34, %v10025_v43  ;;  %v10405_v23 = vsel %vm4138_vm8, %v18721_v14, %v10403_v48  ;;  %11174 = vmatprep.subr.bf16.mxu1 %v15062_v10  ;;  %v17867_v47 = vsel %vm4150_vm12, %v10881_v13, %v10880_v17  ;;  %v18723_v39 = vrot.slane %v17639_v53, 7  ;;  %v15074_v34 = vld [vmem:[#allocation10 + $0x444] ss:$8 sps:$4 sm:$0xff]   ;;  %v15080_v43 = vld [vmem:[#allocation10 + $0x454] ss:$8 sps:$4 sm:$0xff]  }
 0x631   :  { %v10029_v12 = vsel %vm4147_vm11, %v10028_v60, %v10027_v58  ;;  %v10407_v40 = vsel %vm4141_vm9, %v18722_v21, %v10405_v23  ;;  %v10845_v52 = vrot.slane %v17731_v55, 5  ;;  %10322 = vmatpush1.bf16.msra.mxu0 %v15057_v15  ;;  %v10778_v1 = vpack.c.bf16 %v10763_v28, %v10763_v28  ;;  %v15066_v55 = vld [vmem:[#allocation10 + $0x430] ss:$8 sps:$4 sm:$0xff]   ;;  %v15075_v48 = vld [vmem:[#allocation10 + $0x2c0] ss:$8 sps:$4 sm:$0xff]  }
 0x632   :  { %v17870_v50 = vsel %vm4150_vm12, %v10030_v42, %v10029_v12  ;;  %v10409_v46 = vsel %vm4144_vm10, %v10408_v49, %v10407_v40  ;;  %v10856_v37 = vsel %vm4132_vm6, %v18723_v39, %v17633_v30  ;;  %10323 = vmatprep.subr.bf16.mxu0 %v15065_v38  ;;  %v18724_v4 = vrot.slane %v17700_v6, 6  ;;  %v15077_v42 = vld [vmem:[#allocation10 + $0x2c4] ss:$8 sps:$4 sm:$0xff]   ;;  %v15083_v49 = vld [vmem:[#allocation10 + $0x2d4] ss:$8 sps:$4 sm:$0xff]  }
 0x633   :  { %v10411_v59 = vsel %vm4147_vm11, %v10410_v7, %v10409_v46  ;;  %v10861_v53 = vrot.slane %v17769_v32, 4  ;;  %v10863_v30 = vrot.slane %v17775_v44, 3  ;;  %11175 = vmatpush1.bf16.msra.mxu1 %v15060_v54  ;;  %v10839_v24 = vunpack.c.l.b16 %v10778_v1  ;;  %v15078_v13 = vld [vmem:[#allocation10 + $0x450] ss:$8 sps:$4 sm:$0xff]   ;;  %v15089_v23 = vld [vmem:[#allocation10 + $0x2e4] ss:$8 sps:$4 sm:$0xff]  }
 0x634   :  { %v17880_v33 = vsel %vm4150_vm12, %v10412_v22, %v10411_v59  ;;  %v10858_v2 = vsel %vm4135_vm7, %v18724_v4, %v10856_v37  ;;  %v18725_v0 = vrot.slane %v17721_v56, 5  ;;  %v10865_v19 = vrot.slane %v17792_v11, 2  ;;  %11176 = vmatprep.subr.bf16.mxu1 %v15068_v25  ;;  %v15069_v56 = vld [vmem:[#allocation10 + $0x2b0] ss:$8 sps:$4 sm:$0xff]   ;;  %v15084_v7 = vld [vmem:[#allocation10 + $0x460] ss:$8 sps:$4 sm:$0xff]  }
 0x635   :  { %v10759_v6 = vrot.slane %v17751_v41, %v18647_v8  ;;  %v18726_v32 = vrot.slane %v17698_v18, 6  ;;  %v10847_v10 = vrot.slane %v17763_v35, 4  ;;  %10324 = vmatpush1.bf16.msra.mxu0 %v15063_v31  ;;  %v10867_v27 = vrot.slane %v10839_v24, 1  ;;  %v15072_v35 = vld [vmem:[#allocation10 + $0x440] ss:$8 sps:$4 sm:$0xff]  }
 0x636   :  { %v10860_v51 = vsel %vm4138_vm8, %v18725_v0, %v10858_v2  ;;  %v10849_v5 = vrot.slane %v17767_v61, 3  ;;  %10325 = vmatprep.subr.bf16.mxu0 %v15071_v20  ;;  %v15081_v14 = vld [vmem:[#allocation10 + $0x2d0] ss:$8 sps:$4 sm:$0xff]   ;;  %v15092_v54 = vld [vmem:[#allocation10 + $0x474] ss:$8 sps:$4 sm:$0xff]   ;;  %v10885_v25 = vpack.c.b16 %v17867_v47, %v17867_v47  ;;  %v10034_v39 = vpack.c.b16 %v17870_v50, %v17870_v50 }
 0x637   :  { %v10862_v60 = vsel %vm4141_vm9, %v10861_v53, %v10860_v51  ;;  %v10844_v44 = vsel %vm4135_vm7, %v18726_v32, %v17673_v9  ;;  %v10777_v15 = vpack.c.bf16 %v10759_v6, %v10759_v6  ;;  %v10851_v9 = vrot.slane %v17773_v62, 2  ;;  %11177 = vmatpush1.bf16.msra.mxu1 %v15066_v55  ;;  %v15086_v62 = vld [vmem:[#allocation10 + $0x464] ss:$8 sps:$4 sm:$0xff]   ;;  %v15087_v12 = vld [vmem:[#allocation10 + $0x2e0] ss:$8 sps:$4 sm:$0xff]  }
 0x638   :  { %v10864_v45 = vsel %vm4144_vm10, %v10863_v30, %v10862_v60  ;;  %v10846_v11 = vsel %vm4138_vm8, %v10845_v52, %v10844_v44  ;;  %11178 = vmatprep.subr.bf16.mxu1 %v15074_v34  ;;  %v15095_v21 = vld [vmem:[#allocation10 + $0x2f4] ss:$8 sps:$4 sm:$0xff]   ;;  %v15090_v40 = vld [vmem:[#allocation10 + $0x470] ss:$8 sps:$4 sm:$0xff]   ;;  %v15098_v28 = vld [vmem:[#allocation10 + $0x104] ss:$8 sps:$4 sm:$0xff]   ;;  %v10416_v51 = vpack.c.b16 %v17880_v33, %v17880_v33 }
 0x639   :  { %v10866_v41 = vsel %vm4147_vm11, %v10865_v19, %v10864_v45  ;;  %v10848_v18 = vsel %vm4141_vm9, %v10847_v10, %v10846_v11  ;;  %v10838_v26 = vunpack.c.l.b16 %v10777_v15  ;;  %10326 = vmatpush1.bf16.msra.mxu0 %v15069_v56  ;;  %v15093_v22 = vld [vmem:[#allocation10 + $0x2f0] ss:$8 sps:$4 sm:$0xff]   ;;  %v15096_v46 = vld [vmem:[#allocation10 + $0x100] ss:$8 sps:$4 sm:$0xff]   ;;  %v15101_v37 = vld [vmem:[#allocation10 + $0x114] ss:$8 sps:$4 sm:$0xff]  }
 0x63a   :  { %v17906_v17 = vsel %vm4150_vm12, %v10867_v27, %v10866_v41  ;;  %v10850_v57 = vsel %vm4144_vm10, %v10849_v5, %v10848_v18  ;;  %10327 = vmatprep.subr.bf16.mxu0 %v15077_v42  ;;  %v15099_v52 = vld [vmem:[#allocation10 + $0x110] ss:$8 sps:$4 sm:$0xff]   ;;  %v15104_v31 = vld [vmem:[#allocation10 + $0x124] ss:$8 sps:$4 sm:$0xff]   ;;  %v15102_v59 = vld [vmem:[#allocation10 + $0x120] ss:$8 sps:$4 sm:$0xff]  }
 0x63b   :  { %v10852_v61 = vsel %vm4147_vm11, %v10851_v9, %v10850_v57  ;;  %v10853_v38 = vrot.slane %v10838_v26, 1  ;;  %11179 = vmatpush1.bf16.msra.mxu1 %v15072_v35  ;;  %v15107_v1 = vld [vmem:[#allocation10 + $0x134] ss:$8 sps:$4 sm:$0xff]   ;;  %v15105_v47 = vld [vmem:[#allocation10 + $0x130] ss:$8 sps:$4 sm:$0xff]   ;;  %v10884_v34 = vpack.c.b16 %v17906_v17, %v17906_v17 }
 0x63c   :  { %11180 = vmatprep.subr.bf16.mxu1 %v15080_v43  ;;  %v15110_v20 = vld [vmem:[#allocation10 + $0x144] ss:$8 sps:$4 sm:$0xff]   ;;  %v15108_v4 = vld [vmem:[#allocation10 + $0x140] ss:$8 sps:$4 sm:$0xff]   ;;  %v15113_v50 = vld [vmem:[#allocation10 + $0x154] ss:$8 sps:$4 sm:$0xff]  }
 0x63d   :  { %v17911_v58 = vsel %vm4150_vm12, %v10853_v38, %v10852_v61  ;;  %10328 = vmatpush1.bf16.msra.mxu0 %v15075_v48  ;;  %v15111_v2 = vld [vmem:[#allocation10 + $0x150] ss:$8 sps:$4 sm:$0xff]   ;;  %v15116_v53 = vld [vmem:[#allocation10 + $0x164] ss:$8 sps:$4 sm:$0xff]   ;;  %v15119_v30 = vld [vmem:[#allocation10 + $0x174] ss:$8 sps:$4 sm:$0xff]  }
 0x63e   :  { %10329 = vmatprep.subr.bf16.mxu0 %v15083_v49  ;;  %v15117_v55 = vld [vmem:[#allocation10 + $0x170] ss:$8 sps:$4 sm:$0xff]   ;;  %v15122_v24 = vld [vmem:[#allocation10 + $0x304] ss:$8 sps:$4 sm:$0xff]   ;;  %v15120_v0 = vld [vmem:[#allocation10 + $0x300] ss:$8 sps:$4 sm:$0xff]  }
 0x63f   :  { %11181 = vmatpush1.bf16.msra.mxu1 %v15078_v13  ;;  %v15125_v19 = vld [vmem:[#allocation10 + $0x314] ss:$8 sps:$4 sm:$0xff]   ;;  %v15123_v60 = vld [vmem:[#allocation10 + $0x310] ss:$8 sps:$4 sm:$0xff]   ;;  %v15128_v6 = vld [vmem:[#allocation10 + $0x324] ss:$8 sps:$4 sm:$0xff]  }
 0x640   :  { %11182 = vmatprep.subr.bf16.mxu1 %v15086_v62  ;;  %v15126_v32 = vld [vmem:[#allocation10 + $0x320] ss:$8 sps:$4 sm:$0xff]   ;;  %v15131_v44 = vld [vmem:[#allocation10 + $0x334] ss:$8 sps:$4 sm:$0xff]   ;;  %v15129_v10 = vld [vmem:[#allocation10 + $0x330] ss:$8 sps:$4 sm:$0xff]  }
 0x641   :  { %10330 = vmatpush1.bf16.msra.mxu0 %v15081_v14  ;;  %v15134_v56 = vld [vmem:[#allocation10 + $0x344] ss:$8 sps:$4 sm:$0xff]   ;;  %v15132_v33 = vld [vmem:[#allocation10 + $0x340] ss:$8 sps:$4 sm:$0xff]   ;;  %v15137_v45 = vld [vmem:[#allocation10 + $0x354] ss:$8 sps:$4 sm:$0xff]  }
 0x642   :  { %10331 = vmatprep.subr.bf16.mxu0 %v15089_v23  ;;  %v15135_v27 = vld [vmem:[#allocation10 + $0x350] ss:$8 sps:$4 sm:$0xff]   ;;  %v15140_v11 = vld [vmem:[#allocation10 + $0x364] ss:$8 sps:$4 sm:$0xff]   ;;  %v15138_v5 = vld [vmem:[#allocation10 + $0x360] ss:$8 sps:$4 sm:$0xff]  }
 0x643   :  { %11183 = vmatpush1.bf16.msra.mxu1 %v15084_v7  ;;  %v15143_v42 = vld [vmem:[#allocation10 + $0x374] ss:$8 sps:$4 sm:$0xff]   ;;  %v15141_v41 = vld [vmem:[#allocation10 + $0x370] ss:$8 sps:$4 sm:$0xff]   ;;  %v15146_v15 = vld [vmem:[#allocation10 + $0x384] ss:$8 sps:$4 sm:$0xff]   ;;  %v10883_v7 = vpack.c.b16 %v17911_v58, %v17911_v58 }
 0x644   :  { %11184 = vmatprep.subr.bf16.mxu1 %v15092_v54  ;;  %v15144_v18 = vld [vmem:[#allocation10 + $0x380] ss:$8 sps:$4 sm:$0xff]   ;;  %v15149_v9 = vld [vmem:[#allocation10 + $0x394] ss:$8 sps:$4 sm:$0xff]   ;;  %v15147_v35 = vld [vmem:[#allocation10 + $0x390] ss:$8 sps:$4 sm:$0xff]  }
 0x645   :  { %10332 = vmatpush1.bf16.msra.mxu0 %v15087_v12  ;;  %v15152_v17 = vld [vmem:[#allocation10 + $0x3a4] ss:$8 sps:$4 sm:$0xff]   ;;  %v15150_v57 = vld [vmem:[#allocation10 + $0x3a0] ss:$8 sps:$4 sm:$0xff]   ;;  %v15155_v43 = vld [vmem:[#allocation10 + $0x3b4] ss:$8 sps:$4 sm:$0xff]  }
 0x646   :  { %10333 = vmatprep.subr.bf16.mxu0 %v15095_v21  ;;  %v15153_v26 = vld [vmem:[#allocation10 + $0x3b0] ss:$8 sps:$4 sm:$0xff]   ;;  %v15158_v61 = vld [vmem:[#allocation10 + $0x3c4] ss:$8 sps:$4 sm:$0xff]   ;;  %v15156_v48 = vld [vmem:[#allocation10 + $0x3c0] ss:$8 sps:$4 sm:$0xff]  }
 0x647   :  { %11185 = vmatpush1.bf16.msra.mxu1 %v15090_v40  ;;  %v15161_v49 = vld [vmem:[#allocation10 + $0x3d4] ss:$8 sps:$4 sm:$0xff]   ;;  %v15159_v38 = vld [vmem:[#allocation10 + $0x3d0] ss:$8 sps:$4 sm:$0xff]   ;;  %v15164_v13 = vld [vmem:[#allocation10 + $0x3e4] ss:$8 sps:$4 sm:$0xff]  }
 0x648   :  { %v15162_v62 = vld [vmem:[#allocation10 + $0x3e0] ss:$8 sps:$4 sm:$0xff]   ;;  %v15167_v14 = vld [vmem:[#allocation10 + $0x3f4] ss:$8 sps:$4 sm:$0xff]   ;;  %v15165_v23 = vld [vmem:[#allocation10 + $0x3f0] ss:$8 sps:$4 sm:$0xff]  }
 0x649   :  { %10334 = vmatpush1.bf16.msra.mxu0 %v15093_v22  ;;  %v15168_v54 = vld [vmem:[%s18166_s7 + $0xc0] sm:$0xff]   ;;  %v15172_v58 = vld [vmem:[%s18166_s7 + $0xc8] sm:$0xff]  }
 0x64a   :  { %11203 = vmatmul.mubr.bf16.vlgmr.msra.gmra.mrb[100].mxu1 %v10885_v25  ;;  %10701 = vmatprep.subr.bf16.mxu0 %v15098_v28  ;;  %v15169_v12 = vld [vmem:[%s18166_s7 + $0x40] sm:$0xff]   ;;  %v15173_v22 = vld [vmem:[%s18166_s7 + $0x48] sm:$0xff]  }
 0x64b   :  { %v15170_v21 = vld [vmem:[%s18166_s7 + $0x80] sm:$0xff]   ;;  %13575 = vmatprep.subr.bf16.mxu1 %v15168_v54  ;;  %v15174_v28 = vld [vmem:[%s18166_s7 + $0x88] sm:$0xff]  }
 0x64c   :  { %10352 = vmatmul.mubr.bf16.vlgmr.msra.gmra.mrb[84].mxu0 %v10034_v39  ;;  %v15171_v40 = vld [vmem:[%s18166_s7] sm:$0xff]   ;;  %13576 = vmatpush3.bf16.msra.mxu1 %v15170_v21  ;;  %v15175_v25 = vld [vmem:[%s18166_s7 + $0x8] sm:$0xff]   ;;  %v15177_v39 = vld [vmem:[%s18166_s7 + $0x50] sm:$0xff]  }
 0x64d   :  { %10702 = vmatpush1.bf16.msra.mxu0 %v15096_v46  ;;  %10733 = vmatprep.mubr.bf16.mxu0 %v18718_v3  ;;  %v15114_v3 = vld [vmem:[#allocation10 + $0x160] ss:$8 sps:$4 sm:$0xff]  }
 0x64e   :  { %10703 = vmatprep.subr.bf16.mxu0 %v15101_v37  ;;  %13577 = vmatprep.subr.bf16.mxu1 %v15172_v58  ;;  %v15176_v46 = vld [vmem:[%s18166_s7 + $0xd0] sm:$0xff]  }
 0x650   :  { %13578 = vmatpush3.bf16.msra.mxu1 %v15174_v28 }
 0x651   :  { %10704 = vmatpush1.bf16.msra.mxu0 %v15099_v52  ;;  %13579 = vmatprep.subr.bf16.mxu1 %v15176_v46 }
 0x652   :  { %10705 = vmatprep.subr.bf16.mxu0 %v15104_v31 }
 0x655   :  { %10706 = vmatpush1.bf16.msra.mxu0 %v15102_v59 }
 0x656   :  { %10707 = vmatprep.subr.bf16.mxu0 %v15107_v1 }
 0x659   :  { %10708 = vmatpush1.bf16.msra.mxu0 %v15105_v47 }
 0x65a   :  { %10709 = vmatprep.subr.bf16.mxu0 %v15110_v20 }
 0x65d   :  { %10710 = vmatpush1.bf16.msra.mxu0 %v15108_v4 }
 0x65e   :  { %10711 = vmatprep.subr.bf16.mxu0 %v15113_v50  ;;  %v15178_v50 = vld [vmem:[%s18166_s7 + $0x90] sm:$0xff]  }
 0x65f   :  { %13580 = vmatpush3.bf16.msra.mxu1 %v15178_v50 }
 0x661   :  { %10712 = vmatpush1.bf16.msra.mxu0 %v15111_v2  ;;  %v15179_v2 = vld [vmem:[%s18166_s7 + $0x10] sm:$0xff]  }
 0x662   :  { %10713 = vmatprep.subr.bf16.mxu0 %v15116_v53  ;;  %v15180_v53 = vld [vmem:[%s18166_s7 + $0xd8] sm:$0xff]  }
 0x663   :  { %13581 = vmatprep.subr.bf16.mxu1 %v15180_v53 }
 0x665   :  { %10714 = vmatpush1.bf16.msra.mxu0 %v15114_v3  ;;  %v15181_v3 = vld [vmem:[%s18166_s7 + $0x58] sm:$0xff]  }
 0x666   :  { %10715 = vmatprep.subr.bf16.mxu0 %v15119_v30  ;;  %v15182_v30 = vld [vmem:[%s18166_s7 + $0x98] sm:$0xff]  }
 0x667   :  { %13582 = vmatpush3.bf16.msra.mxu1 %v15182_v30 }
 0x669   :  { %10716 = vmatpush1.bf16.msra.mxu0 %v15117_v55  ;;  %v15183_v55 = vld [vmem:[%s18166_s7 + $0x18] sm:$0xff]  }
 0x66a   :  { %11129 = vmatprep.subr.bf16.mxu0 %v15122_v24  ;;  %v15184_v24 = vld [vmem:[%s18166_s7 + $0xe0] sm:$0xff]  }
 0x66b   :  { %13583 = vmatprep.subr.bf16.mxu1 %v15184_v24 }
 0x66c   :  { %10734 = vmatmul.mubr.bf16.vlgmr.msra.gmra.mrb[88].mxu0 %v10416_v51  ;;  %v15186_v51 = vld [vmem:[%s18166_s7 + $0xa0] sm:$0xff]  }
 0x66d   :  { %11130 = vmatpush1.bf16.msra.mxu0 %v15120_v0  ;;  %11161 = vmatprep.mubr.bf16.mxu0 %v10884_v34  ;;  %v15185_v0 = vld [vmem:[%s18166_s7 + $0x60] sm:$0xff]   ;;  %v15188_v34 = vld [vmem:[%s18166_s7 + $0xe8] sm:$0xff]  }
 0x66e   :  { %11131 = vmatprep.subr.bf16.mxu0 %v15125_v19  ;;  %v15187_v19 = vld [vmem:[%s18166_s7 + $0x20] sm:$0xff]   ;;  %13584 = vmatpush3.bf16.msra.mxu1 %v15186_v51 }
 0x66f   :  { %13585 = vmatprep.subr.bf16.mxu1 %v15188_v34 }
 0x671   :  { %11132 = vmatpush1.bf16.msra.mxu0 %v15123_v60  ;;  %v15189_v60 = vld [vmem:[%s18166_s7 + $0x68] sm:$0xff]  }
 0x672   :  { %11133 = vmatprep.subr.bf16.mxu0 %v15128_v6  ;;  %v15190_v6 = vld [vmem:[%s18166_s7 + $0xa8] sm:$0xff]  }
 0x673   :  { %13586 = vmatpush3.bf16.msra.mxu1 %v15190_v6 }
 0x675   :  { %11134 = vmatpush1.bf16.msra.mxu0 %v15126_v32  ;;  %v15191_v32 = vld [vmem:[%s18166_s7 + $0x28] sm:$0xff]  }
 0x676   :  { %11135 = vmatprep.subr.bf16.mxu0 %v15131_v44  ;;  %v15192_v44 = vld [vmem:[%s18166_s7 + $0xf0] sm:$0xff]  }
 0x677   :  { %13587 = vmatprep.subr.bf16.mxu1 %v15192_v44 }
 0x679   :  { %11136 = vmatpush1.bf16.msra.mxu0 %v15129_v10  ;;  %v15193_v10 = vld [vmem:[%s18166_s7 + $0x70] sm:$0xff]  }
 0x67a   :  { %11137 = vmatprep.subr.bf16.mxu0 %v15134_v56  ;;  %v15194_v56 = vld [vmem:[%s18166_s7 + $0xb0] sm:$0xff]  }
 0x67b   :  { %13588 = vmatpush3.bf16.msra.mxu1 %v15194_v56 }
 0x67d   :  { %11138 = vmatpush1.bf16.msra.mxu0 %v15132_v33  ;;  %v15195_v33 = vld [vmem:[%s18166_s7 + $0x30] sm:$0xff]  }
 0x67e   :  { %11139 = vmatprep.subr.bf16.mxu0 %v15137_v45  ;;  %v15196_v45 = vld [vmem:[%s18166_s7 + $0xf8] sm:$0xff]  }
 0x67f   :  { %13589 = vmatprep.subr.bf16.mxu1 %v15196_v45 }
 0x681   :  { %11140 = vmatpush1.bf16.msra.mxu0 %v15135_v27  ;;  %v15197_v27 = vld [vmem:[%s18166_s7 + $0x78] sm:$0xff]  }
 0x682   :  { %11141 = vmatprep.subr.bf16.mxu0 %v15140_v11  ;;  %v15198_v11 = vld [vmem:[%s18166_s7 + $0xb8] sm:$0xff]  }
 0x683   :  { %13590 = vmatpush3.bf16.msra.mxu1 %v15198_v11 }
 0x685   :  { %11142 = vmatpush1.bf16.msra.mxu0 %v15138_v5  ;;  %v15199_v5 = vld [vmem:[%s18166_s7 + $0x38] sm:$0xff]  }
 0x686   :  { %11143 = vmatprep.subr.bf16.mxu0 %v15143_v42  ;;  %v15200_v42 = vld [vmem:[%s18166_s7 + $0x140] sm:$0xff]  }
 0x687   :  { %13619 = vmatprep.subr.bf16.mxu1 %v15200_v42 }
 0x689   :  { %11144 = vmatpush1.bf16.msra.mxu0 %v15141_v41  ;;  %v15201_v41 = vld [vmem:[%s18166_s7 + $0x1c0] sm:$0xff]  }
 0x68a   :  { %11145 = vmatprep.subr.bf16.mxu0 %v15146_v15 }
 0x68d   :  { %11146 = vmatpush1.bf16.msra.mxu0 %v15144_v18 }
 0x68e   :  { %11147 = vmatprep.subr.bf16.mxu0 %v15149_v9 }
 0x691   :  { %11148 = vmatpush1.bf16.msra.mxu0 %v15147_v35 }
 0x692   :  { %11149 = vmatprep.subr.bf16.mxu0 %v15152_v17 }
 0x695   :  { %11150 = vmatpush1.bf16.msra.mxu0 %v15150_v57 }
 0x696   :  { %11151 = vmatprep.subr.bf16.mxu0 %v15155_v43 }
 0x699   :  { %11152 = vmatpush1.bf16.msra.mxu0 %v15153_v26 }
 0x69a   :  { %11153 = vmatprep.subr.bf16.mxu0 %v15158_v61 }
 0x69d   :  { %11154 = vmatpush1.bf16.msra.mxu0 %v15156_v48 }
 0x69e   :  { %11155 = vmatprep.subr.bf16.mxu0 %v15161_v49 }
 0x6a1   :  { %11156 = vmatpush1.bf16.msra.mxu0 %v15159_v38 }
 0x6a2   :  { %11157 = vmatprep.subr.bf16.mxu0 %v15164_v13 }
 0x6a5   :  { %11158 = vmatpush1.bf16.msra.mxu0 %v15162_v62 }
 0x6a6   :  { %11159 = vmatprep.subr.bf16.mxu0 %v15167_v14 }
 0x6a9   :  { %11160 = vmatpush1.bf16.msra.mxu0 %v15165_v23 }
 0x6aa   :  { %13597 = vmatprep.subr.bf16.mxu0 %v15169_v12  ;;  %v11213_v12 = vld [vmem:[#allocation11] sm:$0x3] }
 0x6ab   :  { %v11218_v58 = vrot.slane %v11213_v12, %v18647_v8 }
 0x6ac   :  { %11162 = vmatmul.mubr.bf16.vlgmr.msra.gmra.mrb[92].mxu0 %v10883_v7 }
 0x6ad   :  { %13598 = vmatpush3.bf16.msra.mxu0 %v15171_v40 }
 0x6ae   :  { %13599 = vmatprep.subr.bf16.mxu0 %v15173_v22 }
 0x6b1   :  { %13600 = vmatpush3.bf16.msra.mxu0 %v15175_v25  ;;  %v11222_v25 = vrot.slane %v11213_v12, %v18716_v63 }
 0x6b2   :  { %13601 = vmatprep.subr.bf16.mxu0 %v15177_v39 }
 0x6b5   :  { %13602 = vmatpush3.bf16.msra.mxu0 %v15179_v2 }
 0x6b6   :  { %13603 = vmatprep.subr.bf16.mxu0 %v15181_v3 }
 0x6b9   :  { %13604 = vmatpush3.bf16.msra.mxu0 %v15183_v55 }
 0x6ba   :  { %13605 = vmatprep.subr.bf16.mxu0 %v15185_v0 }
 0x6bd   :  { %13606 = vmatpush3.bf16.msra.mxu0 %v15187_v19 }
 0x6be   :  { %13607 = vmatprep.subr.bf16.mxu0 %v15189_v60 }
 0x6c1   :  { %13608 = vmatpush3.bf16.msra.mxu0 %v15191_v32 }
 0x6c2   :  { %13609 = vmatprep.subr.bf16.mxu0 %v15193_v10 }
 0x6c5   :  { %13610 = vmatpush3.bf16.msra.mxu0 %v15195_v33 }
 0x6c6   :  { %13611 = vmatprep.subr.bf16.mxu0 %v15197_v27 }
 0x6c9   :  { %13612 = vmatpush3.bf16.msra.mxu0 %v15199_v5 }
 0x6ca   :  { %13641 = vmatprep.subr.bf16.mxu0 %v15201_v41 }
 0x6fd   :  { %v17954_v37 = vpop.f32.mrb[96].mxu1 }
 0x6fe   :  { %v17956_v52 = vpop.f32.mrb[97].mxu1 }
 0x6ff   :  { %v10312_v31 = vpop.f32.mrb[80].mxu0  ;;  %v10698_v59 = vpop.f32.mrb[98].mxu1 }
 0x700   :  { %v10314_v1 = vpop.f32.mrb[81].mxu0  ;;  %v10699_v47 = vpop.f32.mrb[99].mxu1 }
 0x701   :  { %v10316_v20 = vpop.f32.mrb[82].mxu0 }
 0x702   :  { %v10317_v4 = vpop.f32.mrb[83].mxu0  ;;  %v18727_v20 = vld [vmem:[#allocation26_spill] sm:$0xff] }
 0x703   :  { %v11295_v4 = vsub.s32 5, %v18727_v20  ;;  %v11868_v53 = vsub.s32 7, %v18727_v20  ;;  %v15206_v20 = vld [vmem:[%s18166_s7 + $0x108] sm:$0xff]  }
 0x71d   :  { %v11204_v15 = vpop.f32.mrb[100].mxu1 }
 0x71e   :  { %v11206_v18 = vpop.f32.mrb[101].mxu1 }
 0x71f   :  { %v10353_v9 = vpop.f32.mrb[84].mxu0  ;;  %v11208_v35 = vpop.f32.mrb[102].mxu1 }
 0x720   :  { %v10354_v17 = vadd.f32 %v10353_v9, %v10312_v31  ;;  %v10355_v57 = vpop.f32.mrb[85].mxu0  ;;  %v11209_v43 = vpop.f32.mrb[103].mxu1 }
 0x721   :  { %v10356_v26 = vadd.f32 %v10355_v57, %v10314_v1  ;;  %v10357_v61 = vpop.f32.mrb[86].mxu0 }
 0x722   :  { %v10358_v48 = vpop.f32.mrb[87].mxu0  ;;  %v10695_v49 = vadd.f32 %v17954_v37, %v10354_v17 }
 0x723   :  { %v10697_v38 = vadd.f32 %v17956_v52, %v10356_v26 }
 0x73f   :  { %v10735_v13 = vpop.f32.mrb[88].mxu0 }
 0x740   :  { %v10736_v62 = vadd.f32 %v10735_v13, %v10695_v49  ;;  %v10737_v14 = vpop.f32.mrb[89].mxu0 }
 0x741   :  { %v10738_v23 = vadd.f32 %v10737_v14, %v10697_v38  ;;  %v10739_v7 = vpop.f32.mrb[90].mxu0 }
 0x742   :  { %v10740_v54 = vpop.f32.mrb[91].mxu0  ;;  %v15203_v7 = vld [vmem:[%s18166_s7 + $0x180] sm:$0xff]  }
 0x77f   :  { %v11163_v21 = vpop.f32.mrb[92].mxu0 }
 0x780   :  { %v11205_v40 = vadd.f32 %v11204_v15, %v11163_v21  ;;  %v11165_v22 = vpop.f32.mrb[93].mxu0 }
 0x781   :  { %v11207_v28 = vadd.f32 %v11206_v18, %v11165_v22  ;;  %v11167_v46 = vpop.f32.mrb[94].mxu0  ;;  %v15205_v22 = vld [vmem:[%s18166_s7 + $0x1c8] sm:$0xff]  }
 0x782   :  { %v11211_v39 = vadd.f32 %v11205_v40, %v10736_v62  ;;  %v11168_v37 = vpop.f32.mrb[95].mxu0 }
 0x783   :  { %v11212_v31 = vadd.f32 %v11207_v28, %v10738_v23 }
 0x784   :  { %v11225_v52 = vadd.f32 %v11218_v58, %v11211_v39  ;;  %v15204_v58 = vld [vmem:[%s18166_s7 + $0x148] sm:$0xff]  }
 0x785   :  { %v11226_v59 = vadd.f32 %v11222_v25, %v11212_v31 }
 0x786   :  { %v11227_v1 = vmax.f32 %v11225_v52, 0.0  ;;  %v18728_v52 = vld [vmem:[#allocation34_spill] sm:$0xff] }
 0x787   :  { %v11228_v47 = vmax.f32 %v11226_v59, 0.0 }
 0x789   :  { %v11231_v50 = vcombine.low %v11227_v1, %v11228_v47  ;;  %v18035_v2 = vcombine.high %v11227_v1, %v11228_v47 }
 0x78b   :  { %v11296_v3 = vrot.slane %v11231_v50, %v11295_v4  ;;  %v11304_v30 = vrot.slane %v18035_v2, %v11295_v4  ;;  %v11240_v55 = vrot.slane %v11231_v50, %v16013_v29  ;;  %v11248_v24 = vrot.slane %v18035_v2, %v16013_v29 }
 0x78c   :  { %v11292_v0 = vrot.slane %v11231_v50, %v18716_v63  ;;  %v11300_v51 = vrot.slane %v18035_v2, %v18716_v63  ;;  %v11236_v19 = vrot.slane %v11231_v50, %v18647_v8  ;;  %v11244_v34 = vrot.slane %v18035_v2, %v18647_v8 }
 0x78d   :  { %v11310_v60 = vpack.c.bf16 %v11296_v3, %v11296_v3  ;;  %v11312_v6 = vpack.c.bf16 %v11304_v30, %v11304_v30  ;;  %v11254_v32 = vpack.c.bf16 %v11240_v55, %v11240_v55  ;;  %v11256_v44 = vpack.c.bf16 %v11248_v24, %v11248_v24 }
 0x78e   :  { %v11309_v10 = vpack.c.bf16 %v11292_v0, %v11292_v0  ;;  %v11311_v56 = vpack.c.bf16 %v11300_v51, %v11300_v51  ;;  %v11253_v33 = vpack.c.bf16 %v11236_v19, %v11236_v19  ;;  %v11255_v45 = vpack.c.bf16 %v11244_v34, %v11244_v34 }
 0x78f   :  { %v11351_v27 = vunpack.c.l.b16 %v11310_v60  ;;  %v11353_v29 = vunpack.c.l.b16 %v11312_v6  ;;  %v11503_v11 = vunpack.c.l.b16 %v11254_v32  ;;  %v11505_v5 = vunpack.c.l.b16 %v11256_v44  ;;  %v15210_v44 = vld [vmem:[%s18166_s7 + $0x110] sm:$0xff]  }
 0x790   :  { %v11350_v42 = vunpack.c.l.b16 %v11309_v10  ;;  %v11352_v41 = vunpack.c.l.b16 %v11311_v56  ;;  %v11502_v63 = vunpack.c.l.b16 %v11253_v33  ;;  %v11504_v15 = vunpack.c.l.b16 %v11255_v45  ;;  %v15211_v33 = vld [vmem:[%s18166_s7 + $0x190] sm:$0xff]   ;;  %v15212_v45 = vld [vmem:[%s18166_s7 + $0x158] sm:$0xff]  }
 0x791   :  { %v11356_v18 = vrot.slane %v11351_v27, 1  ;;  %v11508_v9 = vrot.slane %v11505_v5, 7  ;;  %v11657_v8 = vrot.slane %v11231_v50, %v18693_v36  ;;  %v11665_v35 = vrot.slane %v18035_v2, %v18693_v36  ;;  %v15202_v36 = vld [vmem:[%s18166_s7 + $0x100] sm:$0xff]   ;;  %v15213_v5 = vld [vmem:[%s18166_s7 + $0x1d8] sm:$0xff]  }
 0x792   :  { %v11354_v17 = vrot.slane %v11350_v42, 1  ;;  %v11506_v57 = vrot.slane %v11504_v15, 7  ;;  %v11869_v43 = vrot.slane %v11231_v50, %v11868_v53  ;;  %v11877_v26 = vrot.slane %v18035_v2, %v11868_v53  ;;  %v15215_v15 = vld [vmem:[%s18166_s7 + $0x198] sm:$0xff]  }
 0x793   :  { %v11357_v61 = vsel %vm4132_vm6, %v11353_v29, %v11356_v18  ;;  %v11509_v48 = vsel %vm4132_vm6, %v11508_v9, %v11503_v11  ;;  %v11671_v49 = vpack.c.bf16 %v11657_v8, %v11657_v8  ;;  %v11673_v38 = vpack.c.bf16 %v11665_v35, %v11665_v35  ;;  %v15216_v18 = vld [vmem:[%s18166_s7 + $0x160] sm:$0xff]  }
 0x794   :  { %v11359_v13 = vpack.c.b16 %v11357_v61, %v11357_v61  ;;  %v11511_v62 = vpack.c.b16 %v11509_v48, %v11509_v48  ;;  %v11355_v14 = vsel %vm4132_vm6, %v11352_v41, %v11354_v17  ;;  %v11507_v23 = vsel %vm4132_vm6, %v11506_v57, %v11502_v63  ;;  %v15214_v63 = vld [vmem:[%s18166_s7 + $0x118] sm:$0xff]   ;;  %v15217_v8 = vld [vmem:[%s18166_s7 + $0x1e0] sm:$0xff]   ;;  %v15220_v57 = vld [vmem:[%s18166_s7 + $0x168] sm:$0xff]  }
 0x795   :  { %v11358_v54 = vpack.c.b16 %v11355_v14, %v11355_v14  ;;  %v11510_v12 = vpack.c.b16 %v11507_v23, %v11507_v23  ;;  %v11712_v21 = vunpack.c.l.b16 %v11671_v49  ;;  %v11714_v40 = vunpack.c.l.b16 %v11673_v38  ;;  %v15218_v35 = vld [vmem:[%s18166_s7 + $0x120] sm:$0xff]   ;;  %v15223_v61 = vld [vmem:[%s18166_s7 + $0x1a8] sm:$0xff]   ;;  %v15224_v48 = vld [vmem:[%s18166_s7 + $0x170] sm:$0xff]  }
 0x796   :  { %11490 = vmatprep.mubr.bf16.mxu1 %v11359_v13  ;;  %11642 = vmatprep.mubr.bf16.mxu0 %v11511_v62  ;;  %v11883_v28 = vpack.c.bf16 %v11869_v43, %v11869_v43  ;;  %v11885_v25 = vpack.c.bf16 %v11877_v26, %v11877_v26  ;;  %v11653_v46 = vrot.slane %v11231_v50, %v18696_v16  ;;  %v15219_v17 = vld [vmem:[%s18166_s7 + $0x1a0] sm:$0xff]   ;;  %v15221_v43 = vld [vmem:[%s18166_s7 + $0x1e8] sm:$0xff]   ;;  %v15225_v49 = vld [vmem:[%s18166_s7 + $0x1f0] sm:$0xff]  }
 0x797   :  { %11491 = vmatmul.mubr.bf16.vlgmr.msra.gmra.mrb[104].mxu1 %v11358_v54  ;;  %11643 = vmatmul.mubr.bf16.vlgmr.msra.gmra.mrb[96].mxu0 %v11510_v12  ;;  %v11718_v39 = vrot.slane %v11712_v21, 2  ;;  %v11719_v37 = vrot.slane %v11714_v40, 1  ;;  %v11661_v31 = vrot.slane %v18035_v2, %v18696_v16  ;;  %v11865_v59 = vrot.slane %v11231_v50, %v18728_v52  ;;  %v15207_v16 = vld [vmem:[%s18166_s7 + $0x188] sm:$0xff]   ;;  %v15208_v50 = vld [vmem:[%s18166_s7 + $0x150] sm:$0xff]   ;;  %v15228_v62 = vld [vmem:[%s18166_s7 + $0x178] sm:$0xff]  }
 0x798   :  { %13620 = vmatpush3.bf16.msra.mxu1 %v15202_v36  ;;  %13642 = vmatpush3.bf16.msra.mxu0 %v15203_v7  ;;  %v11924_v1 = vunpack.c.l.b16 %v11883_v28  ;;  %v11926_v47 = vunpack.c.l.b16 %v11885_v25  ;;  %v11670_v4 = vpack.c.bf16 %v11653_v46, %v11653_v46  ;;  %v11873_v53 = vrot.slane %v18035_v2, %v18728_v52  ;;  %v15209_v2 = vld [vmem:[%s18166_s7 + $0x1d0] sm:$0xff]   ;;  %v15222_v26 = vld [vmem:[%s18166_s7 + $0x128] sm:$0xff]   ;;  %v15229_v14 = vld [vmem:[%s18166_s7 + $0x1f8] sm:$0xff]  }
 0x799   :  { %v11720_v3 = vsel %vm4132_vm6, %v11719_v37, %v11718_v39  ;;  %13621 = vmatprep.subr.bf16.mxu1 %v15204_v58  ;;  %13643 = vmatprep.subr.bf16.mxu0 %v15205_v22  ;;  %v11672_v30 = vpack.c.bf16 %v11661_v31, %v11661_v31  ;;  %v11882_v55 = vpack.c.bf16 %v11865_v59, %v11865_v59  ;;  %v15226_v38 = vld [vmem:[%s18166_s7 + $0x130] sm:$0xff]   ;;  %v15230_v23 = vld [vmem:[%s18166_s7 + $0x138] sm:$0xff]  }
 0x79a   :  { %v11722_v24 = vpack.c.b16 %v11720_v3, %v11720_v3  ;;  %v11930_v0 = vrot.slane %v11924_v1, 3  ;;  %v11931_v51 = vrot.slane %v11926_v47, 2  ;;  %v11711_v19 = vunpack.c.l.b16 %v11670_v4  ;;  %v15227_v13 = vld [vmem:[%s18166_s7 + $0x1b0] sm:$0xff]   ;;  %v15231_v36 = vld [vmem:[%s18166_s7 + $0x1b8] sm:$0xff]  }
 0x79b   :  { %v11713_v34 = vunpack.c.l.b16 %v11672_v30  ;;  %v11884_v60 = vpack.c.bf16 %v11873_v53, %v11873_v53  ;;  %v11923_v6 = vunpack.c.l.b16 %v11882_v55  ;;  %v13236_v55 = vld [vmem:[#allocation13] ss:$0 sm:$0xff] }
 0x79c   :  { %11853 = vmatprep.mubr.bf16.mxu1 %v11722_v24  ;;  %v11932_v32 = vsel %vm4132_vm6, %v11931_v51, %v11930_v0  ;;  %13622 = vmatpush3.bf16.msra.mxu1 %v15206_v20  ;;  %v11715_v10 = vrot.slane %v11711_v19, 2  ;;  %v13237_v51 = vld [vmem:[#allocation14] ss:$0 sm:$0xff] }
 0x79d   :  { %v11934_v56 = vpack.c.b16 %v11932_v32, %v11932_v32  ;;  %13644 = vmatpush3.bf16.msra.mxu0 %v15207_v16  ;;  %13623 = vmatprep.subr.bf16.mxu1 %v15208_v50  ;;  %v11716_v27 = vrot.slane %v11713_v34, 1  ;;  %v11925_v29 = vunpack.c.l.b16 %v11884_v60  ;;  %v11927_v11 = vrot.slane %v11923_v6, 3  ;;  %v13238_v60 = vld [vmem:[#allocation2] ss:$0 sm:$0xff] }
 0x79e   :  { %13645 = vmatprep.subr.bf16.mxu0 %v15209_v2 }
 0x79f   :  { %12065 = vmatprep.mubr.bf16.mxu0 %v11934_v56  ;;  %v11717_v42 = vsel %vm4132_vm6, %v11716_v27, %v11715_v10  ;;  %v11928_v41 = vrot.slane %v11925_v29, 2 }
 0x7a0   :  { %13624 = vmatpush3.bf16.msra.mxu1 %v15210_v44  ;;  %v11721_v7 = vpack.c.b16 %v11717_v42, %v11717_v42 }
 0x7a1   :  { %13646 = vmatpush3.bf16.msra.mxu0 %v15211_v33  ;;  %13625 = vmatprep.subr.bf16.mxu1 %v15212_v45  ;;  %v11929_v9 = vsel %vm4132_vm6, %v11928_v41, %v11927_v11 }
 0x7a2   :  { %13647 = vmatprep.subr.bf16.mxu0 %v15213_v5  ;;  %v11933_v54 = vpack.c.b16 %v11929_v9, %v11929_v9 }
 0x7a4   :  { %13626 = vmatpush3.bf16.msra.mxu1 %v15214_v63 }
 0x7a5   :  { %13648 = vmatpush3.bf16.msra.mxu0 %v15215_v15  ;;  %13627 = vmatprep.subr.bf16.mxu1 %v15216_v18 }
 0x7a6   :  { %13649 = vmatprep.subr.bf16.mxu0 %v15217_v8 }
 0x7a8   :  { %13628 = vmatpush3.bf16.msra.mxu1 %v15218_v35 }
 0x7a9   :  { %13650 = vmatpush3.bf16.msra.mxu0 %v15219_v17  ;;  %13629 = vmatprep.subr.bf16.mxu1 %v15220_v57 }
 0x7aa   :  { %13651 = vmatprep.subr.bf16.mxu0 %v15221_v43 }
 0x7ac   :  { %13630 = vmatpush3.bf16.msra.mxu1 %v15222_v26 }
 0x7ad   :  { %13652 = vmatpush3.bf16.msra.mxu0 %v15223_v61  ;;  %13631 = vmatprep.subr.bf16.mxu1 %v15224_v48 }
 0x7ae   :  { %13653 = vmatprep.subr.bf16.mxu0 %v15225_v49 }
 0x7b0   :  { %13632 = vmatpush3.bf16.msra.mxu1 %v15226_v38 }
 0x7b1   :  { %13654 = vmatpush3.bf16.msra.mxu0 %v15227_v13  ;;  %13633 = vmatprep.subr.bf16.mxu1 %v15228_v62 }
 0x7b2   :  { %13655 = vmatprep.subr.bf16.mxu0 %v15229_v14 }
 0x7b4   :  { %13634 = vmatpush3.bf16.msra.mxu1 %v15230_v23 }
 0x7b5   :  { %13656 = vmatpush3.bf16.msra.mxu0 %v15231_v36 }
 0x7b7   :  { %11854 = vmatmul.mubr.bf16.vlgmr.msra.gmra.mrb[108].mxu1 %v11721_v7 }
 0x7b8   :  { %12066 = vmatmul.mubr.bf16.vlgmr.msra.gmra.mrb[100].mxu0 %v11933_v54 }
 0x86a   :  { %v13591_v12 = vpop.f32.mrb[104].mxu1  ;;  %v13613_v21 = vpop.f32.mrb[96].mxu0 }
 0x86b   :  { %v13592_v40 = vpop.f32.mrb[105].mxu1  ;;  %v13614_v58 = vpop.f32.mrb[97].mxu0 }
 0x86c   :  { %v13593_v22 = vadd.f32 %v13592_v40, %v13591_v12  ;;  %v13615_v28 = vadd.f32 %v13614_v58, %v13613_v21  ;;  %v13594_v25 = vpop.f32.mrb[106].mxu1  ;;  %v13616_v46 = vpop.f32.mrb[98].mxu0 }
 0x86d   :  { %v13595_v39 = vpop.f32.mrb[107].mxu1  ;;  %v13617_v37 = vpop.f32.mrb[99].mxu0 }
 0x86e   :  { %v11645_v31 = vadd.f32 %v13615_v28, %v13593_v22 }
 0x88a   :  { %v13635_v52 = vpop.f32.mrb[108].mxu1 }
 0x88b   :  { %v13657_v59 = vpop.f32.mrb[100].mxu0  ;;  %v13636_v1 = vpop.f32.mrb[109].mxu1 }
 0x88c   :  { %v13637_v47 = vadd.f32 %v13636_v1, %v13635_v52  ;;  %v13658_v20 = vpop.f32.mrb[101].mxu0  ;;  %v13638_v4 = vpop.f32.mrb[110].mxu1 }
 0x88d   :  { %v13659_v53 = vadd.f32 %v13658_v20, %v13657_v59  ;;  %v13660_v3 = vpop.f32.mrb[102].mxu0  ;;  %v13639_v16 = vpop.f32.mrb[111].mxu1 }
 0x88e   :  { %v11861_v50 = vadd.f32 %v13637_v47, %v11645_v31  ;;  %v13661_v30 = vpop.f32.mrb[103].mxu0 }
 0x890   :  { %v12073_v24 = vadd.f32 %v13659_v53, %v11861_v50 }
 0x892   :  { %v12081_v0 = vadd.f32 %v13236_v55, %v12073_v24 }
 0x894   :  { %v12082_v2 = vmax.f32 %v12081_v0, 0.0 }
 0x896   :  { %v12090_v19 = vmul.f32 %v13237_v51, %v12082_v2 }
 0x898   :  { %v12092_v34 = vsel %vm12091_vm13, %v12090_v19, 0.0 }
 0x899   :  { %12093 = vadd.xlane.f32.xlu0 %v12092_v34 }
 0x926   :  { %v12094_v6 = vpop.xlane.xlu0 %12093 }
 0x927   :  { %v12102_v32 = vadd.f32 %v13238_v60, %v12094_v6 }
 0x929   :  { %v12103_v44 = vsub.f32 0.0, %v12102_v32 }
 0x92b   :  { %v12104_v10 = vmul.f32 1.442695, %v12103_v44 }
 0x92d   :  { %15232 = vpow2.f32 %v12104_v10 }
 0x937   :  { %v15233_v56 = vpop.eup %15232 }
 0x938   :  { %v12106_v33 = vadd.f32 1.0, %v15233_v56 }
 0x93a   :  { %15234 = vrcp.f32 %v12106_v33 }
 0x944   :  { %v15235_v45 = vpop.eup %15234 }
 0x945   :  { %12110 = vst.msk [vmem:[%s18170_s11] sm:$0x3] %vm12109_vm14, %v15235_v45 }
 0x946   :  { %12115 = vsyncpa [#allocation4], 1 }
 0x947   :  { %12116 = vsyncpa [#allocation6], 1 }
 0x948   :  { %12117 = vsyncpa [#allocation9], 1 }
 0x949   :  { %12118 = vsyncpa [#allocation12], 1 }
 0x94a   :  { %12119 = vsyncpa [#allocation15], 1 }

</bundles_post_ra>
